<compile_context>
chip_gen: v7x
topology: tpu7x:2x2x1
jax: 0.10.0
libtpu: 0.0.40
codegen_flags: <defaults>
</compile_context>

<pallas_src>
import jax
import jax.numpy as jnp
from jax.experimental import pallas as pl
from jax.experimental.pallas import tpu as pltpu


def _basic_block_kernel(x_ref, w1_ref, w2_ref, shift_ref, o_ref, pad_ref):
    """One batch element of BasicBlockNaive (full-precision, identity shortcut).

    x_ref     : (H, W, Cp)       input activations (batch dim squeezed), f32
    w1_ref    : (9*Cp, Cp)       conv1 weights, bn1 scale folded, im2col rows, bf16
    w2_ref    : (9*Cp, Cp)       conv2 weights, bn2 scale folded, bf16
    shift_ref : (2, Cp)          row 0 = bn1 shift, row 1 = bn2 shift, f32
    o_ref     : (H, W, Cp)       output activations
    pad_ref   : (H+2, W+2, Cp)   bf16 VMEM scratch: zero-padded conv input
    """
    H, W, C = x_ref.shape

    def conv3x3(w_ref):
        # im2col: concatenate the 9 shifted (H*W, Cp) views along the contraction
        # axis and issue a single MXU matmul with K = 9*Cp (bf16 x bf16 -> f32).
        taps = [pad_ref[dy:dy + H, dx:dx + W, :].reshape(H * W, C)
                for dy in range(3) for dx in range(3)]
        patches = jnp.concatenate(taps, axis=-1)               # (H*W, 9*Cp) bf16
        return jnp.dot(patches, w_ref[...],
                       preferred_element_type=jnp.float32)     # (H*W, Cp) f32

    # Zero the padded scratch once per grid step: the 1-pixel halo stays zero
    # across both convs and the interior is fully overwritten before each matmul.
    pad_ref[...] = jnp.zeros(pad_ref.shape, pad_ref.dtype)

    # x = relu(x); kept in f32 for the residual add, stored as bf16 for the MXU.
    xr = jnp.maximum(x_ref[...].astype(jnp.float32), 0.0)      # (H, W, Cp)
    pad_ref[1:H + 1, 1:W + 1, :] = xr.astype(pad_ref.dtype)

    b1 = shift_ref[0:1, :]                                     # (1, Cp) f32
    b2 = shift_ref[1:2, :]

    # out = relu(bn1(conv1(relu(x))))   (bn1 scale pre-folded into w1)
    h = jnp.maximum(conv3x3(w1_ref) + b1, 0.0)                 # (H*W, Cp) f32
    # conv2's input goes straight into the scratch interior (no extra relayout).
    pad_ref[1:H + 1, 1:W + 1, :] = h.reshape(H, W, C).astype(pad_ref.dtype)

    # out = bn2(conv2(.)) + identity-shortcut(relu(x))
    out = conv3x3(w2_ref) + b2 + xr.reshape(H * W, C)
    o_ref[...] = out.reshape(H, W, C).astype(o_ref.dtype)


def basic_block_naive_pallas(x_nhwc, w1, bn1, w2, bn2, eps=1e-5):
    """Runs the fused block. x_nhwc: (N, H, W, C); w*: (3,3,C,C) HWIO;
    bn* = (gamma, beta, running_mean, running_var), each (C,)."""
    N, H, W, C = x_nhwc.shape
    Cout = w1.shape[-1]
    assert Cout == C, "identity-shortcut configuration requires in_planes == planes"

    # Lane-dense channel padding: pad C up to (at least) 128 so activations,
    # weights and output blocks use full 128-lane vregs / unmasked stores.
    Cp = max(128, -(-C // 128) * 128)

    def fold(w, bn):
        # Fold inference-mode BN scale into the conv weights; keep the shift.
        g, b, m, v = bn
        s = g / jnp.sqrt(v + eps)
        shift = b - m * s
        w_s = (w * s[None, None, None, :]).astype(jnp.float32)        # (3,3,C,C)
        w_p = jnp.zeros((3, 3, Cp, Cp), jnp.float32).at[:, :, :C, :C].set(w_s)
        # HWIO -> im2col (9*Cp, Cp); row index = (dy*3 + dx)*Cp + cin, matching
        # the tap/channel concatenation order used inside the kernel.
        w_mat = w_p.reshape(9 * Cp, Cp).astype(jnp.bfloat16)
        shift_p = jnp.zeros((Cp,), jnp.float32).at[:C].set(shift.astype(jnp.float32))
        return w_mat, shift_p

    w1m, b1 = fold(w1, bn1)
    w2m, b2 = fold(w2, bn2)
    shifts = jnp.stack([b1, b2], axis=0)                               # (2, Cp)

    x_p = jnp.zeros((N, H, W, Cp), x_nhwc.dtype).at[..., :C].set(x_nhwc)

    act_spec = pl.BlockSpec((pl.Squeezed(), H, W, Cp), lambda n: (n, 0, 0, 0))
    w_spec = pl.BlockSpec((9 * Cp, Cp), lambda n: (0, 0))
    s_spec = pl.BlockSpec((2, Cp), lambda n: (0, 0))

    out_p = pl.pallas_call(
        _basic_block_kernel,
        out_shape=jax.ShapeDtypeStruct((N, H, W, Cp), x_nhwc.dtype),
        grid_spec=pltpu.PrefetchScalarGridSpec(
            num_scalar_prefetch=0,
            grid=(N,),
            in_specs=[act_spec, w_spec, w_spec, s_spec],
            out_specs=act_spec,
            scratch_shapes=[pltpu.VMEM((H + 2, W + 2, Cp), jnp.bfloat16)],
        ),
        compiler_params=pltpu.CompilerParams(
            dimension_semantics=("parallel",)),
    )(x_p, w1m, w2m, shifts)

    return out_p[..., :C]


def basic_block_naive_forward(inp, params):
    """Mirrors BasicBlockNaive.forward's list-in / list-out contract
    (full-precision weights, identity shortcut, inference-mode BN)."""
    x, i_layer, feature_layers_to_extract, features, cut_network = inp
    w1, bn1, w2, bn2 = params
    if cut_network and i_layer > cut_network:
        return inp
    # TODO(synk): cut_network == i_layer + 1 mid-block early return would need
    # the intermediate activation as an extra kernel output.
    out = basic_block_naive_pallas(x, w1, bn1, w2, bn2)
    i_layer += 2
    if feature_layers_to_extract and i_layer in feature_layers_to_extract:
        features[i_layer] = out
    return [out, i_layer, feature_layers_to_extract, features, cut_network]


def _reference(x, w1, bn1, w2, bn2, eps=1e-5):
    def bn(y, p):
        g, b, m, v = p
        return (y - m) / jnp.sqrt(v + eps) * g + b

    dn = ("NHWC", "HWIO", "NHWC")
    xr = jnp.maximum(x, 0.0)
    out = bn(jax.lax.conv_general_dilated(xr, w1, (1, 1), "SAME",
                                          dimension_numbers=dn), bn1)
    out = jnp.maximum(out, 0.0)
    out = bn(jax.lax.conv_general_dilated(out, w2, (1, 1), "SAME",
                                          dimension_numbers=dn), bn2)
    return out + xr


if __name__ == "__main__":
    # Small shapes consistent with the module: batch=2, planes=4, 16x16 spatial.
    N, C, H, W = 2, 4, 16, 16
    key = jax.random.PRNGKey(0)
    ks = jax.random.split(key, 9)

    # PyTorch-layout input (NCHW) -> kernel layout (NHWC).
    x_nchw = jax.random.normal(ks[0], (N, C, H, W), jnp.float32)
    x = jnp.transpose(x_nchw, (0, 2, 3, 1))

    # Deterministic synthetic parameters (OIHW conv weights -> HWIO).
    w1_oihw = 0.1 * jax.random.normal(ks[1], (C, C, 3, 3), jnp.float32)
    w2_oihw = 0.1 * jax.random.normal(ks[2], (C, C, 3, 3), jnp.float32)
    w1 = jnp.transpose(w1_oihw, (2, 3, 1, 0))
    w2 = jnp.transpose(w2_oihw, (2, 3, 1, 0))

    bn1 = (1.0 + 0.1 * jax.random.normal(ks[3], (C,), jnp.float32),  # gamma
           0.1 * jax.random.normal(ks[4], (C,), jnp.float32),        # beta
           0.1 * jax.random.normal(ks[5], (C,), jnp.float32),        # running_mean
           0.5 + jax.random.uniform(ks[6], (C,), jnp.float32))       # running_var
    bn2 = (1.0 + 0.1 * jax.random.normal(ks[7], (C,), jnp.float32),
           0.1 * jax.random.normal(ks[8], (C,), jnp.float32),
           jnp.zeros((C,), jnp.float32),
           jnp.ones((C,), jnp.float32))

    inp = [x, 0, None, {}, None]
    out_list = basic_block_naive_forward(inp, (w1, bn1, w2, bn2))
    out = jax.block_until_ready(out_list[0])

    ref = _reference(x, w1, bn1, w2, bn2)
    assert out.shape == (N, H, W, C)
    assert out_list[1] == 2
    # Tolerance loosened vs. a pure-f32 check: the MXU operands are bf16
    # (accumulation and BN/residual math stay in f32).
    assert jnp.allclose(out, ref, atol=3e-2, rtol=3e-2), "mismatch vs reference"

    print("KERNEL_OK")
</pallas_src>

<mosaic_0001>
module attributes {stable_mosaic.version = 11 : i64} {
  func.func @_basic_block_kernel(%arg0: i32, %arg1: memref<1x16x16x128xf32, #tpu.memory_space<vmem>>, %arg2: memref<1152x128xbf16, #tpu.memory_space<vmem>>, %arg3: memref<1152x128xbf16, #tpu.memory_space<vmem>>, %arg4: memref<2x128xf32, #tpu.memory_space<vmem>>, %arg5: memref<1x16x16x128xf32, #tpu.memory_space<vmem>>, %arg6: memref<18x18x128xbf16, #tpu.memory_space<vmem>>) attributes {dimension_semantics = [#tpu.dimension_semantics<parallel>], iteration_bounds = array<i64: 2>, scalar_prefetch = 0 : i64, scratch_operands = 1 : i64, tpu.core_type = #tpu.core_type<tc>, window_params = [{transform_indices = @transform_0, window_bounds = array<i64: 1, 16, 16, 128>}, {pipeline_mode = #tpu.pipeline_mode<synchronous>, transform_indices = @transform_1, window_bounds = array<i64: 1152, 128>}, {pipeline_mode = #tpu.pipeline_mode<synchronous>, transform_indices = @transform_2, window_bounds = array<i64: 1152, 128>}, {pipeline_mode = #tpu.pipeline_mode<synchronous>, transform_indices = @transform_3, window_bounds = array<i64: 2, 128>}, {transform_indices = @transform_4, window_bounds = array<i64: 1, 16, 16, 128>}]} {
    %cst = arith.constant 0.000000e+00 : bf16
    %0 = vector.broadcast %cst : bf16 to vector<18x18x128xbf16>
    %c0 = arith.constant 0 : index
    %c0_0 = arith.constant 0 : index
    %c0_1 = arith.constant 0 : index
    %1 = vector.load %arg6[%c0, %c0_0, %c0_1] : memref<18x18x128xbf16, #tpu.memory_space<vmem>>, vector<18x18x128xbf16>
    tpu.vector_store %arg6[%c0, %c0_0, %c0_1], %0 {strides = array<i32>} : memref<18x18x128xbf16, #tpu.memory_space<vmem>>, vector<18x18x128xbf16>,
    %c0_2 = arith.constant 0 : index
    %c0_3 = arith.constant 0 : index
    %c0_4 = arith.constant 0 : index
    %c0_5 = arith.constant 0 : index
    %2 = vector.load %arg1[%c0_2, %c0_3, %c0_4, %c0_5] : memref<1x16x16x128xf32, #tpu.memory_space<vmem>>, vector<1x16x16x128xf32>
    %3 = vector.shape_cast %2 : vector<1x16x16x128xf32> to vector<16x16x128xf32>
    %cst_6 = arith.constant 0.000000e+00 : f32
    %4 = vector.broadcast %cst_6 : f32 to vector<16x16x128xf32>
    %5 = arith.maximumf %3, %4 : vector<16x16x128xf32>
    %6 = arith.truncf %5 : vector<16x16x128xf32> to vector<16x16x128xbf16>
    %c1 = arith.constant 1 : index
    %c1_7 = arith.constant 1 : index
    %c0_8 = arith.constant 0 : index
    %7 = vector.load %arg6[%c1, %c1_7, %c0_8] : memref<18x18x128xbf16, #tpu.memory_space<vmem>>, vector<16x16x128xbf16>
    tpu.vector_store %arg6[%c1, %c1_7, %c0_8], %6 {strides = array<i32>} : memref<18x18x128xbf16, #tpu.memory_space<vmem>>, vector<16x16x128xbf16>,
    %c0_9 = arith.constant 0 : index
    %c0_10 = arith.constant 0 : index
    %8 = vector.load %arg4[%c0_9, %c0_10] : memref<2x128xf32, #tpu.memory_space<vmem>>, vector<1x128xf32>
    %c1_11 = arith.constant 1 : index
    %c0_12 = arith.constant 0 : index
    %9 = vector.load %arg4[%c1_11, %c0_12] : memref<2x128xf32, #tpu.memory_space<vmem>>, vector<1x128xf32>
    %c0_13 = arith.constant 0 : index
    %c0_14 = arith.constant 0 : index
    %c0_15 = arith.constant 0 : index
    %10 = vector.load %arg6[%c0_13, %c0_14, %c0_15] : memref<18x18x128xbf16, #tpu.memory_space<vmem>>, vector<16x16x128xbf16>
    %11 = vector.shape_cast %10 : vector<16x16x128xbf16> to vector<256x128xbf16>
    %c0_16 = arith.constant 0 : index
    %c1_17 = arith.constant 1 : index
    %c0_18 = arith.constant 0 : index
    %12 = vector.load %arg6[%c0_16, %c1_17, %c0_18] : memref<18x18x128xbf16, #tpu.memory_space<vmem>>, vector<16x16x128xbf16>
    %13 = vector.shape_cast %12 : vector<16x16x128xbf16> to vector<256x128xbf16>
    %c0_19 = arith.constant 0 : index
    %c2 = arith.constant 2 : index
    %c0_20 = arith.constant 0 : index
    %14 = vector.load %arg6[%c0_19, %c2, %c0_20] : memref<18x18x128xbf16, #tpu.memory_space<vmem>>, vector<16x16x128xbf16>
    %15 = vector.shape_cast %14 : vector<16x16x128xbf16> to vector<256x128xbf16>
    %c1_21 = arith.constant 1 : index
    %c0_22 = arith.constant 0 : index
    %c0_23 = arith.constant 0 : index
    %16 = vector.load %arg6[%c1_21, %c0_22, %c0_23] : memref<18x18x128xbf16, #tpu.memory_space<vmem>>, vector<16x16x128xbf16>
    %17 = vector.shape_cast %16 : vector<16x16x128xbf16> to vector<256x128xbf16>
    %c1_24 = arith.constant 1 : index
    %c1_25 = arith.constant 1 : index
    %c0_26 = arith.constant 0 : index
    %18 = vector.load %arg6[%c1_24, %c1_25, %c0_26] : memref<18x18x128xbf16, #tpu.memory_space<vmem>>, vector<16x16x128xbf16>
    %19 = vector.shape_cast %18 : vector<16x16x128xbf16> to vector<256x128xbf16>
    %c1_27 = arith.constant 1 : index
    %c2_28 = arith.constant 2 : index
    %c0_29 = arith.constant 0 : index
    %20 = vector.load %arg6[%c1_27, %c2_28, %c0_29] : memref<18x18x128xbf16, #tpu.memory_space<vmem>>, vector<16x16x128xbf16>
    %21 = vector.shape_cast %20 : vector<16x16x128xbf16> to vector<256x128xbf16>
    %c2_30 = arith.constant 2 : index
    %c0_31 = arith.constant 0 : index
    %c0_32 = arith.constant 0 : index
    %22 = vector.load %arg6[%c2_30, %c0_31, %c0_32] : memref<18x18x128xbf16, #tpu.memory_space<vmem>>, vector<16x16x128xbf16>
    %23 = vector.shape_cast %22 : vector<16x16x128xbf16> to vector<256x128xbf16>
    %c2_33 = arith.constant 2 : index
    %c1_34 = arith.constant 1 : index
    %c0_35 = arith.constant 0 : index
    %24 = vector.load %arg6[%c2_33, %c1_34, %c0_35] : memref<18x18x128xbf16, #tpu.memory_space<vmem>>, vector<16x16x128xbf16>
    %25 = vector.shape_cast %24 : vector<16x16x128xbf16> to vector<256x128xbf16>
    %c2_36 = arith.constant 2 : index
    %c2_37 = arith.constant 2 : index
    %c0_38 = arith.constant 0 : index
    %26 = vector.load %arg6[%c2_36, %c2_37, %c0_38] : memref<18x18x128xbf16, #tpu.memory_space<vmem>>, vector<16x16x128xbf16>
    %27 = vector.shape_cast %26 : vector<16x16x128xbf16> to vector<256x128xbf16>
    %28 = tpu.concatenate %11, %13, %15, %17, %19, %21, %23, %25, %27 in 1 : vector<256x128xbf16>, vector<256x128xbf16>, vector<256x128xbf16>, vector<256x128xbf16>, vector<256x128xbf16>, vector<256x128xbf16>, vector<256x128xbf16>, vector<256x128xbf16>, vector<256x128xbf16> -> vector<256x1152xbf16>
    %c0_39 = arith.constant 0 : index
    %c0_40 = arith.constant 0 : index
    %29 = vector.load %arg2[%c0_39, %c0_40] : memref<1152x128xbf16, #tpu.memory_space<vmem>>, vector<1152x128xbf16>
    %cst_41 = arith.constant dense<0.000000e+00> : vector<256x128xf32>
    %30 = tpu.matmul %28, %29, %cst_41 {dimension_numbers = #tpu.dot_dimension_numbers<[1], [0], [0], [1], [0, 0, 1, 1], [], []>} : vector<256x1152xbf16>, vector<1152x128xbf16>, vector<256x128xf32> -> vector<256x128xf32>
    %31 = vector.broadcast %8 : vector<1x128xf32> to vector<256x128xf32>
    %32 = arith.addf %30, %31 : vector<256x128xf32>
    %cst_42 = arith.constant 0.000000e+00 : f32
    %33 = vector.broadcast %cst_42 : f32 to vector<256x128xf32>
    %34 = arith.maximumf %32, %33 : vector<256x128xf32>
    %35 = vector.shape_cast %34 : vector<256x128xf32> to vector<16x16x128xf32>
    %36 = arith.truncf %35 : vector<16x16x128xf32> to vector<16x16x128xbf16>
    %c1_43 = arith.constant 1 : index
    %c1_44 = arith.constant 1 : index
    %c0_45 = arith.constant 0 : index
    %37 = vector.load %arg6[%c1_43, %c1_44, %c0_45] : memref<18x18x128xbf16, #tpu.memory_space<vmem>>, vector<16x16x128xbf16>
    tpu.vector_store %arg6[%c1_43, %c1_44, %c0_45], %36 {strides = array<i32>} : memref<18x18x128xbf16, #tpu.memory_space<vmem>>, vector<16x16x128xbf16>,
    %c0_46 = arith.constant 0 : index
    %c0_47 = arith.constant 0 : index
    %c0_48 = arith.constant 0 : index
    %38 = vector.load %arg6[%c0_46, %c0_47, %c0_48] : memref<18x18x128xbf16, #tpu.memory_space<vmem>>, vector<16x16x128xbf16>
    %39 = vector.shape_cast %38 : vector<16x16x128xbf16> to vector<256x128xbf16>
    %c0_49 = arith.constant 0 : index
    %c1_50 = arith.constant 1 : index
    %c0_51 = arith.constant 0 : index
    %40 = vector.load %arg6[%c0_49, %c1_50, %c0_51] : memref<18x18x128xbf16, #tpu.memory_space<vmem>>, vector<16x16x128xbf16>
    %41 = vector.shape_cast %40 : vector<16x16x128xbf16> to vector<256x128xbf16>
    %c0_52 = arith.constant 0 : index
    %c2_53 = arith.constant 2 : index
    %c0_54 = arith.constant 0 : index
    %42 = vector.load %arg6[%c0_52, %c2_53, %c0_54] : memref<18x18x128xbf16, #tpu.memory_space<vmem>>, vector<16x16x128xbf16>
    %43 = vector.shape_cast %42 : vector<16x16x128xbf16> to vector<256x128xbf16>
    %c1_55 = arith.constant 1 : index
    %c0_56 = arith.constant 0 : index
    %c0_57 = arith.constant 0 : index
    %44 = vector.load %arg6[%c1_55, %c0_56, %c0_57] : memref<18x18x128xbf16, #tpu.memory_space<vmem>>, vector<16x16x128xbf16>
    %45 = vector.shape_cast %44 : vector<16x16x128xbf16> to vector<256x128xbf16>
    %c1_58 = arith.constant 1 : index
    %c1_59 = arith.constant 1 : index
    %c0_60 = arith.constant 0 : index
    %46 = vector.load %arg6[%c1_58, %c1_59, %c0_60] : memref<18x18x128xbf16, #tpu.memory_space<vmem>>, vector<16x16x128xbf16>
    %47 = vector.shape_cast %46 : vector<16x16x128xbf16> to vector<256x128xbf16>
    %c1_61 = arith.constant 1 : index
    %c2_62 = arith.constant 2 : index
    %c0_63 = arith.constant 0 : index
    %48 = vector.load %arg6[%c1_61, %c2_62, %c0_63] : memref<18x18x128xbf16, #tpu.memory_space<vmem>>, vector<16x16x128xbf16>
    %49 = vector.shape_cast %48 : vector<16x16x128xbf16> to vector<256x128xbf16>
    %c2_64 = arith.constant 2 : index
    %c0_65 = arith.constant 0 : index
    %c0_66 = arith.constant 0 : index
    %50 = vector.load %arg6[%c2_64, %c0_65, %c0_66] : memref<18x18x128xbf16, #tpu.memory_space<vmem>>, vector<16x16x128xbf16>
    %51 = vector.shape_cast %50 : vector<16x16x128xbf16> to vector<256x128xbf16>
    %c2_67 = arith.constant 2 : index
    %c1_68 = arith.constant 1 : index
    %c0_69 = arith.constant 0 : index
    %52 = vector.load %arg6[%c2_67, %c1_68, %c0_69] : memref<18x18x128xbf16, #tpu.memory_space<vmem>>, vector<16x16x128xbf16>
    %53 = vector.shape_cast %52 : vector<16x16x128xbf16> to vector<256x128xbf16>
    %c2_70 = arith.constant 2 : index
    %c2_71 = arith.constant 2 : index
    %c0_72 = arith.constant 0 : index
    %54 = vector.load %arg6[%c2_70, %c2_71, %c0_72] : memref<18x18x128xbf16, #tpu.memory_space<vmem>>, vector<16x16x128xbf16>
    %55 = vector.shape_cast %54 : vector<16x16x128xbf16> to vector<256x128xbf16>
    %56 = tpu.concatenate %39, %41, %43, %45, %47, %49, %51, %53, %55 in 1 : vector<256x128xbf16>, vector<256x128xbf16>, vector<256x128xbf16>, vector<256x128xbf16>, vector<256x128xbf16>, vector<256x128xbf16>, vector<256x128xbf16>, vector<256x128xbf16>, vector<256x128xbf16> -> vector<256x1152xbf16>
    %c0_73 = arith.constant 0 : index
    %c0_74 = arith.constant 0 : index
    %57 = vector.load %arg3[%c0_73, %c0_74] : memref<1152x128xbf16, #tpu.memory_space<vmem>>, vector<1152x128xbf16>
    %cst_75 = arith.constant dense<0.000000e+00> : vector<256x128xf32>
    %58 = tpu.matmul %56, %57, %cst_75 {dimension_numbers = #tpu.dot_dimension_numbers<[1], [0], [0], [1], [0, 0, 1, 1], [], []>} : vector<256x1152xbf16>, vector<1152x128xbf16>, vector<256x128xf32> -> vector<256x128xf32>
    %59 = vector.broadcast %9 : vector<1x128xf32> to vector<256x128xf32>
    %60 = arith.addf %58, %59 : vector<256x128xf32>
    %61 = vector.shape_cast %5 : vector<16x16x128xf32> to vector<256x128xf32>
    %62 = arith.addf %60, %61 : vector<256x128xf32>
    %63 = vector.shape_cast %62 : vector<256x128xf32> to vector<16x16x128xf32>
    %c0_76 = arith.constant 0 : index
    %c0_77 = arith.constant 0 : index
    %c0_78 = arith.constant 0 : index
    %c0_79 = arith.constant 0 : index
    %64 = vector.load %arg5[%c0_76, %c0_77, %c0_78, %c0_79] : memref<1x16x16x128xf32, #tpu.memory_space<vmem>>, vector<1x16x16x128xf32>
    %65 = vector.shape_cast %64 : vector<1x16x16x128xf32> to vector<16x16x128xf32>
    %66 = vector.shape_cast %63 : vector<16x16x128xf32> to vector<1x16x16x128xf32>
    tpu.vector_store %arg5[%c0_76, %c0_77, %c0_78, %c0_79], %66 {strides = array<i32>} : memref<1x16x16x128xf32, #tpu.memory_space<vmem>>, vector<1x16x16x128xf32>,
    return
  }
  func.func @transform_0(%arg0: i32) -> (i32, i32, i32, i32) {
    %c0_i32 = arith.constant 0 : i32
    %c0_i32_0 = arith.constant 0 : i32
    %c0_i32_1 = arith.constant 0 : i32
    %c0_i32_2 = arith.constant 0 : i32
    return %arg0, %c0_i32, %c0_i32_0, %c0_i32_1 : i32, i32, i32, i32
  }
  func.func @transform_1(%arg0: i32) -> (i32, i32) {
    %c0_i32 = arith.constant 0 : i32
    %c0_i32_0 = arith.constant 0 : i32
    %c0_i32_1 = arith.constant 0 : i32
    return %c0_i32, %c0_i32_0 : i32, i32
  }
  func.func @transform_2(%arg0: i32) -> (i32, i32) {
    %c0_i32 = arith.constant 0 : i32
    %c0_i32_0 = arith.constant 0 : i32
    %c0_i32_1 = arith.constant 0 : i32
    return %c0_i32, %c0_i32_0 : i32, i32
  }
  func.func @transform_3(%arg0: i32) -> (i32, i32) {
    %c0_i32 = arith.constant 0 : i32
    %c0_i32_0 = arith.constant 0 : i32
    %c0_i32_1 = arith.constant 0 : i32
    return %c0_i32, %c0_i32_0 : i32, i32
  }
  func.func @transform_4(%arg0: i32) -> (i32, i32, i32, i32) {
    %c0_i32 = arith.constant 0 : i32
    %c0_i32_0 = arith.constant 0 : i32
    %c0_i32_1 = arith.constant 0 : i32
    %c0_i32_2 = arith.constant 0 : i32
    return %arg0, %c0_i32, %c0_i32_0, %c0_i32_1 : i32, i32, i32, i32
  }
}

</mosaic_0001>

<bundles_post_ra>
// kernel: tpu_custom_call.1
= control target key start
LH: loop header
LB: loop body
LE: loop exit
PB: predicated region body
PF: predicated region fallthrough
CT: control target
= control target key end

     0   :  { %9 = vsyncpa [#allocation4], 0  ;;  %s15887_s0 = inlined_call_operand.hbm [shape: f32[2,16,16,128], index: 0, kind: input, shape index: {}]   ;;  %s15888_s1 = inlined_call_operand.hbm [shape: bf16[1152,128], index: 1, kind: input, shape index: {}]   ;;  %s15889_s2 = inlined_call_operand.hbm [shape: bf16[1152,128], index: 2, kind: input, shape index: {}]   ;;  %s15890_s3 = inlined_call_operand.vmem [shape: f32[2,128], index: 3, kind: input, shape index: {}]   ;;  %s15891_s4 = inlined_call_operand.hbm [shape: f32[2,16,16,128], index: 4, kind: output, shape index: {}]  }
   0x1   :  { %11 = vsyncpa [#allocation4 + $0x1], 0 }
   0x2   :  { %12 = vsyncpa [#allocation7], 0 }
   0x3   :  { %13 = vsyncpa [#allocation5], 0 }
   0x4   :  { %15 = vsyncpa [#allocation5 + $0x1], 0  ;;  %s11606_s15 = smov 0   ;;  %s11608_s16 = smov 0  }
   0x5   :  { %s11610_s17 = smov 0   ;;  %s11612_s18 = smov 0  }
   0x6 LB: > { %s11627_s19 = sadd.s32 4294967295, %s11568_s18   ;;  %s9305_s20 = sadd.s32 4294967294, %s11568_s18   ;;  %s11568_s18 = sphi %s11612_s18, %s16361_s18   ;;  %s11564_s17 = sphi %s11610_s17, %s16360_s17   ;;  %s11560_s16 = sphi %s11608_s16, %s16359_s16   ;;  %s11556_s15 = sphi %s11606_s15, %s16358_s15  }
   0x7   : > { %p41_p0 = scmp.ne.s32.totalorder %s11560_s16, %s11556_s15  ;;  %p15892_p1 = scmp.eq.s32.totalorder %s11627_s19, 0 }
   0x8   : > { %p134_p3 = scmp.eq.s32.totalorder %s9305_s20, 1  ;;  %p9306_p5 = scmp.ge.s32.totalorder %s11568_s18, 1 }
   0x9   : > { %p11636_p4 = por %p15892_p1, %p41_p0  ;;  %p141_p7 = scmp.lt.s32.totalorder %s11568_s18, 3 }
   0xa   : > { %p11641_p6 = por %p134_p3, %p41_p0  ;;  %s11570_s24 = smov [#allocation6]  }
   0xb   : > { %s15970_s21 = scalar_select %p11636_p4, 1, 0 }
   0xc   : > { %s15971_s22 = scalar_select %p11641_p6, 1, 0 }
   0xd   : > { %p11646_p8 = pnand %p9306_p5, %p141_p7  ;;  %s153_s25 = sshll.u32 %s11570_s24, 4  ;;  %s11650_s25 = int_to_ptr.vmem [resolvable:$true] %s153_s25 }
   0xe   : > { %s11571_s27 = smov [#allocation8]   ;;  %s11412_s5 = scalar_lea.hbm %s15888_s1, 9216 }
   0xf   : > { %p11035_p9 = pneg %p11646_p8  ;;  %s166_s28 = sshll.u32 %s11571_s27, 4  ;;  %s11661_s28 = int_to_ptr.vmem [resolvable:$true] %s166_s28 }
  0x10   : > { %p11413_p12 = scmp.ne.s32.totalorder %s15888_s1, %s11412_s5  ;;  %p11419_p5 = scmp.lt.u32.totalorder %s11412_s5, %s15888_s1 }
  0x11   : > { %p11657_p11 = pnand %p11035_p9, %p15892_p1 }
  0x13   : > { %p11414_p13 = pneg %p11657_p11 }
  0x15   : > { %p11415_p0 = pnand %p11414_p13, %p11413_p12 }
  0x17   : > { %p11416_p3 = pneg %p11415_p0 }
  0x19   : > { %p11421_p7 = pnand %p11419_p5, %p11416_p3 }
  0x1b   : > { %11424 = shalt.err (!%p11421_p7)
}
  0x1c   : > { %s11425_s10 = scalar_lea.vmem %s11650_s25, 9216  ;;  %p11433_p2 = scmp.lt.s32.totalorder %s11650_s25, %s11650_s25 }
  0x1d   : > { %p11426_p9 = scmp.ne.s32.totalorder %s11650_s25, %s11425_s10  ;;  %p11434_p12 = scmp.lt.s32.totalorder %s11425_s10, %s11425_s10 }
  0x1f   : > { %p11428_p10 = pnand %p11426_p9, %p11414_p13  ;;  %p11435_p0 = por %p11434_p12, %p11433_p2 }
  0x21   : > { %p11429_p1 = pneg %p11428_p10 }
  0x23   : > { %p11436_p6 = pnand %p11435_p0, %p11429_p1 }
  0x25   : > { %11439 = shalt.err (!%p11436_p6)
}
  0x26   : > { %s11572_s11 = smov 64   ;;  %s11573_s12 = smov 4  }
  0x27   : > { %11038 = dma.hbm_to_vmem [thread:$0]  (!%p11657_p11), %s15888_s1, 9216, %s11650_s25, [#allocation7], %s11572_s11, %s11572_s11, %s11573_s12  }
  0x28   : > { %s11440_s27 = scalar_lea.hbm %s15889_s2, 9216 }
  0x29   : > { %p11441_p2 = scmp.ne.s32.totalorder %s15889_s2, %s11440_s27  ;;  %p11447_p10 = scmp.lt.u32.totalorder %s11440_s27, %s15889_s2 }
  0x2b   : > { %p11443_p1 = pnand %p11441_p2, %p11414_p13 }
  0x2d   : > { %p11444_p6 = pneg %p11443_p1 }
  0x2f   : > { %p11449_p3 = pnand %p11447_p10, %p11444_p6 }
  0x31   : > { %11452 = shalt.err (!%p11449_p3)
}
  0x32   : > { %s11453_s25 = scalar_lea.vmem %s11661_s28, 9216  ;;  %p11461_p12 = scmp.lt.s32.totalorder %s11661_s28, %s11661_s28 }
  0x33   : > { %p11454_p5 = scmp.ne.s32.totalorder %s11661_s28, %s11453_s25  ;;  %p11462_p0 = scmp.lt.s32.totalorder %s11453_s25, %s11453_s25 }
  0x35   : > { %p11456_p7 = pnand %p11454_p5, %p11414_p13  ;;  %p11463_p2 = por %p11462_p0, %p11461_p12 }
  0x37   : > { %p11457_p9 = pneg %p11456_p7 }
  0x39   : > { %p11464_p1 = pnand %p11463_p2, %p11457_p9 }
  0x3b   : > { %11467 = shalt.err (!%p11464_p1)
}
  0x3c   : > { %11041 = dma.hbm_to_vmem [thread:$0]  (!%p11657_p11), %s15889_s2, 9216, %s11661_s28, [#allocation7], %s11572_s11, %s11572_s11, %s11573_s12  }
  0x3d   : > { %s11716_s9 = sadd.s32 1, %s11568_s18   ;;  %s28_s26 = sadd.s32 1, %s11564_s17 }
  0x3e   : > { %s25_s10 = ssub.s32 %s11568_s18, %s11716_s9  ;;  %p35_p13 = scmp.ne.s32.totalorder %s11564_s17, %s11560_s16 }
  0x3f   : > { %p26_p6 = scmp.eq.s32.totalorder %s25_s10, 0  ;;  %p36_p10 = scmp.eq.s32.totalorder %s11568_s18, 0 }
  0x40   : > { %p15974_p3 = scmp.eq.s32.totalorder %s11627_s19, 1  ;;  %p11052_p7 = scmp.lt.s32.totalorder %s11568_s18, 2 }
  0x41   : > { %s11732_s14 = scalar_select %p26_p6, %s11564_s17, %s28_s26  }
  0x42   : > { %p11726_p5 = por %p15974_p3, %p35_p13  ;;  %p37_p9 = por %p36_p10, %p35_p13 }
  0x43   : > { %s183_s20 = sand.u32 1, %s11564_s17   ;;  %s9917_s28 = sshll.u32 %s11568_s18, 12 }
  0x44   : > { %s15975_s13 = scalar_select %p11726_p5, 1, 0 }
  0x45   : > { %s9310_s24 = sshll.u32 %s183_s20, 8  ;;  %s11739_s27 = scalar_lea.hbm %s15887_s0, %s9917_s28 }
  0x46   : > { %s187_s29 = scalar_lea.vmem [#allocation3], %s9310_s24  ;;  %p11743_p11 = pnand %p11052_p7, %p37_p9 }
  0x47   : > { %s194_s30 = sshll.u32 %s187_s29, 4  ;;  %s11747_s6 = scalar_lea.sflag [#allocation4], %s183_s20  ;;  %s11741_s30 = int_to_ptr.vmem [resolvable:$true] %s194_s30 }
  0x48   : > { %s11468_s25 = scalar_lea.hbm %s11739_s27, 4096  ;;  %p11470_p0 = pneg %p11743_p11 }
  0x49   : > { %p11469_p12 = scmp.ne.s32.totalorder %s11739_s27, %s11468_s25  ;;  %s11473_s26 = scalar_lea.hbm %s15887_s0, 8192 }
  0x4a   : > { %p11474_p13 = scmp.lt.u32.totalorder %s11739_s27, %s15887_s0  ;;  %p11475_p6 = scmp.lt.u32.totalorder %s11473_s26, %s11468_s25 }
  0x4b   : > { %p11471_p2 = pnand %p11470_p0, %p11469_p12  ;;  %p11477_p3 = scmp.lt.u32.totalorder %s11468_s25, %s11739_s27 }
  0x4c   : > { %p11476_p10 = por %p11475_p6, %p11474_p13 }
  0x4d   : > { %p11472_p1 = pneg %p11471_p2 }
  0x4e   : > { %p11478_p7 = por %p11477_p3, %p11476_p10 }
  0x50   : > { %p11479_p9 = pnand %p11478_p7, %p11472_p1 }
  0x52   : > { %11482 = shalt.err (!%p11479_p9)
}
  0x53   : > { %s11483_s20 = scalar_lea.vmem %s11741_s30, 4096  ;;  %s11574_s28 = smov [#allocation3]  }
  0x54   : > { %p11484_p12 = scmp.ne.s32.totalorder %s11741_s30, %s11483_s20  ;;  %s11488_s11 = sshll.u32 %s11574_s28, 4  ;;  %s11489_s11 = int_to_ptr.vmem [resolvable:$false] %s11488_s11 }
  0x55   : > { %s11490_s12 = scalar_lea.vmem %s11489_s11, 8192  ;;  %p11491_p4 = scmp.lt.s32.totalorder %s11741_s30, %s11489_s11 }
  0x56   : > { %p11486_p2 = pnand %p11484_p12, %p11470_p0  ;;  %p11492_p13 = scmp.lt.s32.totalorder %s11490_s12, %s11483_s20 }
  0x58   : > { %p11487_p5 = pneg %p11486_p2  ;;  %p11493_p6 = por %p11492_p13, %p11491_p4 }
  0x5a   : > { %p11494_p10 = pnand %p11493_p6, %p11487_p5 }
  0x5c   : > { %11497 = shalt.err (!%p11494_p10)
}
  0x5d   : > { %s11575_s29 = smov 128   ;;  %s11576_s25 = smov 8  }
  0x5e   : > { %11045 = dma.hbm_to_vmem [thread:$0]  (!%p11743_p11), %s11739_s27, 4096, %s11741_s30, %s11747_s6, %s11575_s29, %s11575_s29, %s11576_s25  }
  0x5f   : > { %206 = sbr.rel (%p11646_p8) target bundleno = 1383 (0x567), region = 36 }
  0x66   : > { %s11778_s7 = sand.u32 1, %s11560_s16   ;;  %p15977_p4 = scmp.ne.s32.totalorder %s15970_s21, 0 }
  0x67   : > { %s9314_s8 = sshll.u32 %s11778_s7, 8  ;;  %s209_s26 = scalar_lea.sflag [#allocation4], %s11778_s7 }
  0x68   : > { %s11784_s10 = scalar_lea.vmem [#allocation3], %s9314_s8 }
  0x69   : > { %11543 = dma.done.wait (%p15977_p4), %s209_s26, 4096  }
  0x6a   : > { %11545 = vsyncadd (%p15977_p4), %s209_s26, 4294963200  ;;  %p15978_p5 = scmp.eq.s32.totalorder %s11627_s19, 0 }
  0x6c   : > { %11547 = dma.done.wait (%p15978_p5), [#allocation7], 18432   ;;  %p15979_p8 = pmov %p15978_p5 }
  0x6d   : > { %v11577_v0 = vmov 0   ;;  %v11097_v1 = vld [vmem:[#allocation6 + $0x40] sm:$0xff]   ;;  %v11101_v5 = vld [vmem:[#allocation6 + $0x48] sm:$0xff]   ;;  %v11105_v9 = vld [vmem:[#allocation6 + $0x50] sm:$0xff]   ;;  %vm951_vm0 = vsmask.f32 3328 }
  0x6e   : > { %11549 = vsyncadd (%p15979_p8), [#allocation7], 4294948864  ;;  %246 = vst [vmem:[#allocation2] sm:$0xf] %v11577_v0  ;;  %v11098_v2 = vld [vmem:[#allocation6] sm:$0xff]   ;;  %9983 = vmatprep.subr.bf16.mxu0 %v11097_v1  ;;  %v11102_v6 = vld [vmem:[#allocation6 + $0x8] sm:$0xff]  }
  0x6f   : > { %247 = vst [vmem:[#allocation2 + $0x4] sm:$0xf] %v11577_v0  ;;  %248 = vst [vmem:[#allocation2 + $0x8] sm:$0x1] %v11577_v0  ;;  %v11099_v3 = vld [vmem:[#allocation6 + $0xc0] sm:$0xff]   ;;  %9984 = vmatpush3.bf16.msra.mxu0 %v11098_v2  ;;  %v11103_v7 = vld [vmem:[#allocation6 + $0xc8] sm:$0xff]  }
  0x70   : > { %249 = vst [vmem:[#allocation2 + $0xc] sm:$0xf] %v11577_v0  ;;  %250 = vst [vmem:[#allocation2 + $0x10] sm:$0xf] %v11577_v0  ;;  %v11100_v4 = vld [vmem:[#allocation6 + $0x80] sm:$0xff]   ;;  %10095 = vmatprep.subr.bf16.mxu1 %v11099_v3  ;;  %9985 = vmatprep.subr.bf16.mxu0 %v11101_v5  ;;  %v11104_v8 = vld [vmem:[#allocation6 + $0x88] sm:$0xff]  }
  0x71   : > { %251 = vst [vmem:[#allocation2 + $0x14] sm:$0x1] %v11577_v0  ;;  %252 = vst [vmem:[#allocation2 + $0x18] sm:$0xf] %v11577_v0  ;;  %10096 = vmatpush3.bf16.msra.mxu1 %v11100_v4  ;;  %v11106_v10 = vld [vmem:[#allocation6 + $0x10] sm:$0xff]   ;;  %v11109_v13 = vld [vmem:[#allocation6 + $0x58] sm:$0xff]  }
  0x72   : > { %253 = vst [vmem:[#allocation2 + $0x1c] sm:$0xf] %v11577_v0  ;;  %254 = vst [vmem:[#allocation2 + $0x20] sm:$0x1] %v11577_v0  ;;  %10097 = vmatprep.subr.bf16.mxu1 %v11103_v7  ;;  %v11107_v11 = vld [vmem:[#allocation6 + $0xd0] sm:$0xff]   ;;  %v11110_v14 = vld [vmem:[#allocation6 + $0x18] sm:$0xff]  }
  0x73   : > { %255 = vst [vmem:[#allocation2 + $0x24] sm:$0xf] %v11577_v0  ;;  %256 = vst [vmem:[#allocation2 + $0x28] sm:$0xf] %v11577_v0  ;;  %9986 = vmatpush3.bf16.msra.mxu0 %v11102_v6  ;;  %v11108_v12 = vld [vmem:[#allocation6 + $0x90] sm:$0xff]   ;;  %v11111_v15 = vld [vmem:[#allocation6 + $0xd8] sm:$0xff]  }
  0x74   : > { %257 = vst [vmem:[#allocation2 + $0x2c] sm:$0x1] %v11577_v0  ;;  %258 = vst [vmem:[#allocation2 + $0x30] sm:$0xf] %v11577_v0  ;;  %9987 = vmatprep.subr.bf16.mxu0 %v11105_v9  ;;  %v11112_v16 = vld [vmem:[#allocation6 + $0x98] sm:$0xff]   ;;  %v11113_v17 = vld [vmem:[#allocation6 + $0x60] sm:$0xff]  }
  0x75   : > { %259 = vst [vmem:[#allocation2 + $0x34] sm:$0xf] %v11577_v0  ;;  %260 = vst [vmem:[#allocation2 + $0x38] sm:$0x1] %v11577_v0  ;;  %10098 = vmatpush3.bf16.msra.mxu1 %v11104_v8  ;;  %v11114_v18 = vld [vmem:[#allocation6 + $0x20] sm:$0xff]   ;;  %v11117_v21 = vld [vmem:[#allocation6 + $0x68] sm:$0xff]  }
  0x76   : > { %261 = vst [vmem:[#allocation2 + $0x3c] sm:$0xf] %v11577_v0  ;;  %262 = vst [vmem:[#allocation2 + $0x40] sm:$0xf] %v11577_v0  ;;  %10099 = vmatprep.subr.bf16.mxu1 %v11107_v11  ;;  %v11115_v19 = vld [vmem:[#allocation6 + $0xe0] sm:$0xff]   ;;  %v11118_v22 = vld [vmem:[#allocation6 + $0x28] sm:$0xff]  }
  0x77   : > { %263 = vst [vmem:[#allocation2 + $0x44] sm:$0x1] %v11577_v0  ;;  %264 = vst [vmem:[#allocation2 + $0x48] sm:$0xf] %v11577_v0  ;;  %9988 = vmatpush3.bf16.msra.mxu0 %v11106_v10  ;;  %v11116_v20 = vld [vmem:[#allocation6 + $0xa0] sm:$0xff]   ;;  %v11119_v23 = vld [vmem:[#allocation6 + $0xe8] sm:$0xff]  }
  0x78   : > { %265 = vst [vmem:[#allocation2 + $0x4c] sm:$0xf] %v11577_v0  ;;  %266 = vst [vmem:[#allocation2 + $0x50] sm:$0x1] %v11577_v0  ;;  %9989 = vmatprep.subr.bf16.mxu0 %v11109_v13  ;;  %v11120_v24 = vld [vmem:[#allocation6 + $0xa8] sm:$0xff]   ;;  %v11121_v25 = vld [vmem:[#allocation6 + $0x70] sm:$0xff]  }
  0x79   : > { %267 = vst [vmem:[#allocation2 + $0x54] sm:$0xf] %v11577_v0  ;;  %268 = vst [vmem:[#allocation2 + $0x58] sm:$0xf] %v11577_v0  ;;  %10100 = vmatpush3.bf16.msra.mxu1 %v11108_v12  ;;  %v11122_v26 = vld [vmem:[#allocation6 + $0x30] sm:$0xff]   ;;  %v11125_v29 = vld [vmem:[#allocation6 + $0x78] sm:$0xff]  }
  0x7a   : > { %269 = vst [vmem:[#allocation2 + $0x5c] sm:$0x1] %v11577_v0  ;;  %270 = vst [vmem:[#allocation2 + $0x60] sm:$0xf] %v11577_v0  ;;  %10101 = vmatprep.subr.bf16.mxu1 %v11111_v15  ;;  %v11123_v27 = vld [vmem:[#allocation6 + $0xf0] sm:$0xff]   ;;  %v11126_v30 = vld [vmem:[#allocation6 + $0x38] sm:$0xff]  }
  0x7b   : > { %271 = vst [vmem:[#allocation2 + $0x64] sm:$0xf] %v11577_v0  ;;  %272 = vst [vmem:[#allocation2 + $0x68] sm:$0x1] %v11577_v0  ;;  %9990 = vmatpush3.bf16.msra.mxu0 %v11110_v14  ;;  %vm952_vm1 = vsmask.f32 7440 }
  0x7c   : > { %273 = vst [vmem:[#allocation2 + $0x6c] sm:$0xf] %v11577_v0  ;;  %274 = vst [vmem:[#allocation2 + $0x70] sm:$0xf] %v11577_v0  ;;  %9991 = vmatprep.subr.bf16.mxu0 %v11113_v17  ;;  %v11124_v28 = vld [vmem:[#allocation6 + $0xb0] sm:$0xff]   ;;  %v11127_v31 = vld [vmem:[#allocation6 + $0xf8] sm:$0xff]  }
  0x7d   : > { %275 = vst [vmem:[#allocation2 + $0x74] sm:$0x1] %v11577_v0  ;;  %276 = vst [vmem:[#allocation2 + $0x78] sm:$0xf] %v11577_v0  ;;  %10102 = vmatpush3.bf16.msra.mxu1 %v11112_v16  ;;  %v11794_v32 = vld [vmem:[#allocation2] sm:$0xf] }
  0x7e   : > { %277 = vst [vmem:[#allocation2 + $0x7c] sm:$0xf] %v11577_v0  ;;  %278 = vst [vmem:[#allocation2 + $0x80] sm:$0x1] %v11577_v0  ;;  %10103 = vmatprep.subr.bf16.mxu1 %v11115_v19  ;;  %v11796_v33 = vld [vmem:[#allocation2 + $0x4] sm:$0xf] }
  0x7f   : > { %279 = vst [vmem:[#allocation2 + $0x84] sm:$0xf] %v11577_v0  ;;  %280 = vst [vmem:[#allocation2 + $0x88] sm:$0xf] %v11577_v0  ;;  %9992 = vmatpush3.bf16.msra.mxu0 %v11114_v18  ;;  %v11798_v34 = vld [vmem:[#allocation2 + $0x8] sm:$0x1]  ;;  %v9398_v62 = vcombine.low %v11794_v32, %v11796_v33 }
  0x80   : > { %281 = vst [vmem:[#allocation2 + $0x8c] sm:$0x1] %v11577_v0  ;;  %282 = vst [vmem:[#allocation2 + $0x90] sm:$0xf] %v11577_v0  ;;  %9993 = vmatprep.subr.bf16.mxu0 %v11117_v21  ;;  %vm460_vm2 = vsmask.f32 256 }
  0x81   : > { %283 = vst [vmem:[#allocation2 + $0x94] sm:$0xf] %v11577_v0  ;;  %284 = vst [vmem:[#allocation2 + $0x98] sm:$0x1] %v11577_v0  ;;  %10104 = vmatpush3.bf16.msra.mxu1 %v11116_v20  ;;  %vm461_vm3 = vsmask.f32 4368 }
  0x82   : > { %285 = vst [vmem:[#allocation2 + $0x9c] sm:$0xf] %v11577_v0  ;;  %286 = vst [vmem:[#allocation2 + $0xa0] sm:$0xf] %v11577_v0  ;;  %10105 = vmatprep.subr.bf16.mxu1 %v11119_v23  ;;  %v955_v35 = vshrl.u32 %v11794_v32, 16  ;;  %v958_v36 = vshll.u32 %v11794_v32, 16 }
  0x83   : > { %287 = vst [vmem:[#allocation2 + $0xa4] sm:$0x1] %v11577_v0  ;;  %288 = vst [vmem:[#allocation2 + $0xa8] sm:$0xf] %v11577_v0  ;;  %9994 = vmatpush3.bf16.msra.mxu0 %v11118_v22  ;;  %v964_v37 = vshll.u32 %v11796_v33, 16  ;;  %v968_v38 = vshrl.u32 %v11796_v33, 16 }
  0x84   : > { %289 = vst [vmem:[#allocation2 + $0xac] sm:$0xf] %v11577_v0  ;;  %290 = vst [vmem:[#allocation2 + $0xb0] sm:$0x1] %v11577_v0  ;;  %9995 = vmatprep.subr.bf16.mxu0 %v11121_v25  ;;  %vm785_vm4 = vsmask.f32 7938 }
  0x85   : > { %291 = vst [vmem:[#allocation2 + $0xb4] sm:$0xf] %v11577_v0  ;;  %292 = vst [vmem:[#allocation2 + $0xb8] sm:$0xf] %v11577_v0  ;;  %10106 = vmatpush3.bf16.msra.mxu1 %v11120_v24  ;;  %v974_v39 = vshll.u32 %v11798_v34, 16  ;;  %v11128_v40 = vld [vmem:[#allocation6 + $0xb8] sm:$0xff]  }
  0x86   : > { %293 = vst [vmem:[#allocation2 + $0xbc] sm:$0x1] %v11577_v0  ;;  %294 = vst [vmem:[#allocation2 + $0xc0] sm:$0xf] %v11577_v0  ;;  %10107 = vmatprep.subr.bf16.mxu1 %v11123_v27  ;;  %v11130_v41 = vld [vmem:[#allocation6 + $0x140] sm:$0xff]   ;;  %v957_v42 = vrot.slane %v955_v35, 4 }
  0x87   : > { %295 = vst [vmem:[#allocation2 + $0xc4] sm:$0xf] %v11577_v0  ;;  %296 = vst [vmem:[#allocation2 + $0xc8] sm:$0x1] %v11577_v0  ;;  %9996 = vmatpush3.bf16.msra.mxu0 %v11122_v26  ;;  %v960_v43 = vrot.slane %v958_v36, 5  ;;  %v966_v44 = vrot.slane %v964_v37, 5 }
  0x88   : > { %297 = vst [vmem:[#allocation2 + $0xcc] sm:$0xf] %v11577_v0  ;;  %298 = vst [vmem:[#allocation2 + $0xd0] sm:$0xf] %v11577_v0  ;;  %9997 = vmatprep.subr.bf16.mxu0 %v11125_v29  ;;  %v970_v45 = vrot.slane %v968_v38, 4  ;;  %v976_v46 = vrot.slane %v974_v39, 5 }
  0x89   : > { %299 = vst [vmem:[#allocation2 + $0xd4] sm:$0x1] %v11577_v0  ;;  %10108 = vmatpush3.bf16.msra.mxu1 %v11124_v28  ;;  %v300_v47 = vld [vmem:[%s11784_s10] sm:$0xff]  ;;  %v301_v48 = vld [vmem:[%s11784_s10 + $0x8] sm:$0xff]  ;;  %vm784_vm5 = vcmask 1043456   ;;  %v961_v49 = vor.u32 %v960_v43, %v957_v42  ;;  %vm11813_vm6 = vmor %vm951_vm0, %vm952_vm1  ;;  %v15982_v53 = vmov 0 }
  0x8a   : > { %10109 = vmatprep.subr.bf16.mxu1 %v11127_v31  ;;  %v971_v50 = vor.u32 %v970_v45, %v966_v44  ;;  %v11807_v51 = vmax.f32 %v300_v47, 0.0  ;;  %v11809_v52 = vmax.f32 %v301_v48, 0.0  ;;  %v15983_v53 = vsel %vm11813_vm6, 4294967295, %v15982_v53  ;;  %v302_v59 = vld [vmem:[%s11784_s10 + $0x10] sm:$0xff]  ;;  %v303_v60 = vld [vmem:[%s11784_s10 + $0x18] sm:$0xff]  ;;  %v11132_v63 = vld [vmem:[#allocation6 + $0x100] sm:$0xff]  }
  0x8b   : > { %9998 = vmatpush3.bf16.msra.mxu0 %v11126_v30  ;;  %15984 = vst [vmem:[#allocation15_spill] sm:$0xff] %v15983_v53  ;;  %vm791_vm7 = vcmask 1040384   ;;  %vm1402_vm8 = vcmask 1042432   ;;  %vm1403_vm9 = vcmask 1046532   ;;  %v1407_v54 = vrot.slane %v11796_v33, 5  ;;  %v304_v11 = vld [vmem:[%s11784_s10 + $0x20] sm:$0xff]  ;;  %vm11841_vm10 = vmor %vm460_vm2, %vm461_vm3 }
  0x8c   : > { %10207 = vmatprep.subr.bf16.mxu0 %v11130_v41  ;;  %15980 = vst [vmem:[#allocation13_spill] sm:$0xff] %v11807_v51  ;;  %15981 = vst [vmem:[#allocation14_spill] sm:$0xff] %v11809_v52  ;;  %v962_v55 = vrot.slane %v961_v49, 4  ;;  %v972_v56 = vrot.slane %v971_v50, 4  ;;  %v9918_v57 = vpack.c.bf16 %v11807_v51, %v11807_v51  ;;  %v9919_v58 = vpack.c.bf16 %v11809_v52, %v11809_v52  ;;  %v11835_v6 = vld [vmem:[#allocation2] sm:$0xe] }
  0x8d   : > { %10110 = vmatpush3.bf16.msra.mxu1 %v11128_v40  ;;  %v1410_v61 = vrot.slane %v11798_v34, 5  ;;  %v11827_v0 = vmax.f32 %v302_v59, 0.0  ;;  %v11829_v1 = vmax.f32 %v303_v60, 0.0  ;;  %v787_v10 = vld [vmem:[#allocation2 + $0xc] sm:$0xf]  ;;  %v305_v12 = vld [vmem:[%s11784_s10 + $0x28] sm:$0xff]  ;;  %vm11853_vm11 = vmand %vm784_vm5, %vm785_vm4 }
  0x8e   : > { %v967_v2 = vsel %vm11813_vm6, %v962_v55, %v966_v44  ;;  %v977_v3 = vsel %vm11813_vm6, %v972_v56, %v976_v46  ;;  %v464_v4 = vshrl.u32 %v9918_v57, 16  ;;  %v467_v5 = vshll.u32 %v9918_v57, 16  ;;  %v11136_v18 = vld [vmem:[#allocation6 + $0x148] sm:$0xff]   ;;  %vm11864_vm12 = vmand %vm791_vm7, %vm460_vm2  ;;  %v793_v27 = vld [vmem:[#allocation2 + $0x14] sm:$0x1]  ;;  %s15744_s24 = scalar_lea.vmem [#allocation9], %s9314_s8 }
  0x8f   : > { %15985 = vst [vmem:[#allocation16_spill] sm:$0xff] %v11827_v0  ;;  %15986 = vst [vmem:[#allocation17_spill] sm:$0xff] %v11829_v1  ;;  %v9414_v7 = vcombine.low %v967_v2, %v977_v3  ;;  %v472_v8 = vshrl.u32 %v9919_v58, 16  ;;  %v475_v9 = vshll.u32 %v9919_v58, 16  ;;  %v15987_v13 = vmov 0  ;;  %v306_v30 = vld [vmem:[%s11784_s10 + $0x30] sm:$0xff] }
  0x90   : > { %v15988_v13 = vsel %vm11841_vm10, 4294967295, %v15987_v13  ;;  %v466_v14 = vrot.slane %v464_v4, 7  ;;  %v1409_v15 = vrot.slane %v1407_v54, 4  ;;  %v9920_v16 = vpack.c.bf16 %v11827_v0, %v11827_v0  ;;  %v11138_v37 = vld [vmem:[#allocation6 + $0x108] sm:$0xff]   ;;  %v11142_v42 = vld [vmem:[#allocation6 + $0x150] sm:$0xff]   ;;  %vm11879_vm13 = vmor %vm1402_vm8, %vm1403_vm9  ;;  %s9982_s20 = sshll.u32 %s11627_s19, 12 }
  0x91   : > { %15989 = vst [vmem:[#allocation18_spill] sm:$0xff] %v15988_v13  ;;  %v9921_v17 = vpack.c.bf16 %v11829_v1, %v11829_v1  ;;  %3970 = vmatprep.mubr.bf16.mxu0 %v9414_v7  ;;  %v474_v19 = vrot.slane %v472_v8, 7  ;;  %v15990_v20 = vmov 0  ;;  %v9350_v21 = vrot.slane %v11835_v6, 9  ;;  %v796_v47 = vld [vmem:[#allocation2 + $0x18] sm:$0xf]  ;;  %s15837_s29 = scalar_lea.hbm %s15891_s4, %s9982_s20 }
  0x92   : > { %v15991_v20 = vsel %vm11853_vm11, 4294967295, %v15990_v20  ;;  %v11858_v22 = vmax.f32 %v304_v11, 0.0  ;;  %v11860_v23 = vmax.f32 %v305_v12, 0.0  ;;  %3971 = vmatmul.mubr.bf16.vlgmr.msra.gmra.mrb[0].mxu0 %v9398_v62  ;;  %v469_v24 = vor.u32 %v467_v5, %v466_v14  ;;  %v800_v55 = vld [vmem:[#allocation2 + $0x20] sm:$0x1]  ;;  %v307_v5 = vld [vmem:[%s11784_s10 + $0x38] sm:$0xff] }
  0x93   : > { %15992 = vst [vmem:[#allocation19_spill] sm:$0xff] %v15991_v20  ;;  %v470_v25 = vrot.slane %v466_v14, 4  ;;  %v15995_v26 = vmov 0  ;;  %v481_v28 = vshrl.u32 %v9920_v16, 16  ;;  %v484_v29 = vshll.u32 %v9920_v16, 16  ;;  %10208 = vmatpush3.bf16.msra.mxu0 %v11132_v63  ;;  %v11144_v63 = vld [vmem:[#allocation6 + $0x110] sm:$0xff]  }
  0x94   : > { %15993 = vst [vmem:[#allocation20_spill] sm:$0xff] %v11858_v22  ;;  %15994 = vst [vmem:[#allocation21_spill] sm:$0xff] %v11860_v23  ;;  %v15996_v26 = vsel %vm11864_vm12, 4294967295, %v15995_v26  ;;  %v477_v31 = vor.u32 %v475_v9, %v474_v19  ;;  %v479_v32 = vrot.slane %v474_v19, 4  ;;  %v489_v35 = vshrl.u32 %v9921_v17, 16  ;;  %10209 = vmatprep.subr.bf16.mxu0 %v11136_v18  ;;  %v308_v11 = vld [vmem:[%s11784_s10 + $0x40] sm:$0xff] }
  0x95   : > { %15997 = vst [vmem:[#allocation22_spill] sm:$0xff] %v15996_v26  ;;  %v492_v36 = vshll.u32 %v9921_v17, 16  ;;  %v788_v38 = vsel %vm11853_vm11, %v469_v24, %v787_v10  ;;  %v483_v39 = vrot.slane %v481_v28, 7  ;;  %v9922_v40 = vpack.c.bf16 %v11858_v22, %v11858_v22  ;;  %v803_v9 = vld [vmem:[#allocation2 + $0x24] sm:$0xf]  ;;  %s9213_s28 = sshll.u32 %s15744_s24, 4  ;;  %s15839_s28 = int_to_ptr.vmem [resolvable:$true] %s9213_s28 }
  0x96   : > { %v9923_v41 = vpack.c.bf16 %v11860_v23, %v11860_v23  ;;  %v478_v43 = vsel %vm11841_vm10, %v470_v25, %v477_v31  ;;  %789 = vst [vmem:[#allocation2 + $0xc] sm:$0xf] %v788_v38  ;;  %v794_v45 = vsel %vm11864_vm12, %v479_v32, %v793_v27  ;;  %v491_v46 = vrot.slane %v489_v35, 7  ;;  %v807_v10 = vld [vmem:[#allocation2 + $0x2c] sm:$0x1]  ;;  %s9200_s19 = scalar_lea.sflag [#allocation5], %s11778_s7 }
  0x97   : > { %v11885_v48 = vmax.f32 %v306_v30, 0.0  ;;  %790 = vst [vmem:[#allocation2 + $0x10] sm:$0xf] %v478_v43  ;;  %795 = vst [vmem:[#allocation2 + $0x14] sm:$0x1] %v794_v45  ;;  %v486_v49 = vor.u32 %v484_v29, %v483_v39  ;;  %v487_v50 = vrot.slane %v483_v39, 4  ;;  %10210 = vmatpush3.bf16.msra.mxu0 %v11138_v37  ;;  %v1411_v2 = vsel %vm11879_vm13, %v1409_v15, %v1410_v61 }
  0x98   : > { %v498_v56 = vshrl.u32 %v9922_v40, 16  ;;  %v501_v57 = vshll.u32 %v9922_v40, 16  ;;  %v494_v58 = vor.u32 %v492_v36, %v491_v46  ;;  %v496_v59 = vrot.slane %v491_v46, 4  ;;  %10211 = vmatprep.subr.bf16.mxu0 %v11142_v42  ;;  %v11150_v40 = vld [vmem:[#allocation6 + $0x118] sm:$0xff]   ;;  %v309_v46 = vld [vmem:[%s11784_s10 + $0x48] sm:$0xff]  ;;  %s11498_s25 = scalar_lea.vmem %s15839_s28, 4096 }
  0x99   : > { %16000 = vst [vmem:[#allocation23_spill] sm:$0xff] %v11885_v48  ;;  %v506_v60 = vshrl.u32 %v9923_v41, 16  ;;  %v509_v62 = vshll.u32 %v9923_v41, 16  ;;  %v797_v3 = vsel %vm11853_vm11, %v486_v49, %v796_v47  ;;  %v11896_v6 = vpack.c.bf16 %v11885_v48, %v11885_v48  ;;  %v15581_v44 = vld [vmem:[%s15890_s3 + $0x1] ss:$0 sm:$0xff]  ;;  %p11499_p11 = scmp.ne.s32.totalorder %s15839_s28, %s11498_s25  ;;  %p16355_p0 = scmp.ne.s32.totalorder %s15975_s13, 0 }
  0x9a   : > { %v500_v4 = vrot.slane %v498_v56, 7  ;;  %v1408_v7 = vsel %vm11879_vm13, %v9350_v21, %v1407_v54  ;;  %v495_v34 = vsel %vm11841_vm10, %v487_v50, %v494_v58  ;;  %798 = vst [vmem:[#allocation2 + $0x18] sm:$0xf] %v797_v3  ;;  %v801_v61 = vsel %vm11864_vm12, %v496_v59, %v800_v55  ;;  %v11148_v54 = vld [vmem:[#allocation6 + $0x158] sm:$0xff]   ;;  %s11578_s8 = smov [#allocation9]  }
  0x9b   : > { %v508_v8 = vrot.slane %v506_v60, 7  ;;  %799 = vst [vmem:[#allocation2 + $0x1c] sm:$0xf] %v495_v34  ;;  %802 = vst [vmem:[#allocation2 + $0x20] sm:$0x1] %v801_v61  ;;  %v11907_v16 = vmax.f32 %v307_v5, 0.0  ;;  %10212 = vmatpush3.bf16.msra.mxu0 %v11144_v63  ;;  %v9430_v18 = vcombine.low %v1408_v7, %v1411_v2  ;;  %p11500_p1 = pnand %p11499_p11, %p16355_p0 }
  0x9c   : > { %v503_v12 = vor.u32 %v501_v57, %v500_v4  ;;  %v504_v14 = vrot.slane %v500_v4, 4  ;;  %v515_v24 = vshrl.u32 %v11896_v6, 16  ;;  %v11914_v25 = vmax.f32 %v308_v11, 0.0  ;;  %10213 = vmatprep.subr.bf16.mxu0 %v11148_v54  ;;  %s11502_s26 = sshll.u32 %s11578_s8, 4  ;;  %s11503_s26 = int_to_ptr.vmem [resolvable:$false] %s11502_s26 }
  0x9d   : > { %v511_v15 = vor.u32 %v509_v62, %v508_v8  ;;  %v513_v33 = vrot.slane %v508_v8, 4  ;;  %16001 = vst [vmem:[#allocation24_spill] sm:$0xff] %v11907_v16  ;;  %v1517_v17 = vld [vmem:[#allocation2 + $0xc] sm:$0xf]  ;;  %v11937_v56 = vpack.c.bf16 %v11907_v16, %v11907_v16  ;;  %v518_v62 = vshll.u32 %v11896_v6, 16  ;;  %p11501_p3 = pneg %p11500_p1  ;;  %p11505_p7 = scmp.lt.s32.totalorder %s15839_s28, %s11503_s26 }
  0x9e   : > { %v11909_v19 = vld [vmem:[#allocation2 + $0xc] sm:$0xf]  ;;  %v804_v21 = vsel %vm11853_vm11, %v503_v12, %v803_v9  ;;  %16002 = vst [vmem:[#allocation25_spill] sm:$0xff] %v11914_v25  ;;  %v1518_v27 = vld [vmem:[#allocation2 + $0x10] sm:$0xf]  ;;  %v1566_v28 = vshrl.u32 %v1517_v17, 16  ;;  %v11949_v5 = vpack.c.bf16 %v11914_v25, %v11914_v25 }
  0x9f   : > { %v1569_v29 = vshll.u32 %v1517_v17, 16  ;;  %v11916_v30 = vld [vmem:[#allocation2 + $0x10] sm:$0xf]  ;;  %v512_v31 = vsel %vm11841_vm10, %v504_v14, %v511_v15  ;;  %805 = vst [vmem:[#allocation2 + $0x24] sm:$0xf] %v804_v21  ;;  %v808_v32 = vsel %vm11864_vm12, %v513_v33, %v807_v10  ;;  %v1575_v35 = vshll.u32 %v1518_v27, 16  ;;  %10214 = vmatpush3.bf16.msra.mxu0 %v11150_v40 }
  0xa0   : > { %v1579_v36 = vshrl.u32 %v1518_v27, 16  ;;  %v9446_v37 = vcombine.low %v1517_v17, %v1518_v27  ;;  %v11922_v38 = vld [vmem:[#allocation2 + $0x14] sm:$0x1]  ;;  %v979_v39 = vshrl.u32 %v11909_v19, 16  ;;  %806 = vst [vmem:[#allocation2 + $0x28] sm:$0xf] %v512_v31  ;;  %v9399_v8 = vcombine.low %v11909_v19, %v11916_v30 }
  0xa1   : > { %809 = vst [vmem:[#allocation2 + $0x2c] sm:$0x1] %v808_v32  ;;  %v11925_v41 = vrot.slane %v1566_v28, 4  ;;  %v11927_v42 = vrot.slane %v1569_v29, 5  ;;  %v982_v43 = vshll.u32 %v11909_v19, 16  ;;  %v988_v45 = vshll.u32 %v11916_v30, 16 }
  0xa2   : > { %4131 = vmatprep.mubr.bf16.mxu1 %v9446_v37  ;;  %v981_v47 = vrot.slane %v979_v39, 4  ;;  %v992_v49 = vshrl.u32 %v11916_v30, 16  ;;  %v11933_v50 = vld [vmem:[#allocation2 + $0x18] sm:$0xf]  ;;  %v1339_v55 = vld [vmem:[#allocation2 + $0xc] sm:$0xe] }
  0xa3   : > { %4132 = vmatmul.mubr.bf16.vlgmr.msra.gmra.mrb[0].mxu1 %v9430_v18  ;;  %v984_v57 = vrot.slane %v982_v43, 5  ;;  %v990_v58 = vrot.slane %v988_v45, 5  ;;  %v998_v59 = vshll.u32 %v11922_v38, 16  ;;  %v1520_v60 = vld [vmem:[#allocation2 + $0x1c] sm:$0xf]  ;;  %v11941_v63 = vrot.slane %v1575_v35, 5 }
  0xa4   : > { %v994_v2 = vrot.slane %v992_v49, 4  ;;  %v11943_v3 = vld [vmem:[#allocation2 + $0x18] sm:$0xf]  ;;  %v11945_v4 = vmax.f32 %v309_v46, 0.0  ;;  %v1572_v7 = vor.u32 %v11927_v42, %v11925_v41  ;;  %v11953_v34 = vrot.slane %v1579_v36, 4 }
  0xa5   : > { %v985_v61 = vor.u32 %v984_v57, %v981_v47  ;;  %v11957_v9 = vld [vmem:[#allocation2 + $0x1c] sm:$0xf]  ;;  %v1000_v11 = vrot.slane %v998_v59, 5  ;;  %v9447_v12 = vcombine.low %v11933_v50, %v1520_v60  ;;  %v9351_v14 = vrot.slane %v1339_v55, 9  ;;  %v937_v21 = vld [vmem:[#allocation2 + $0x20] sm:$0x1] }
  0xa6   : > { %16003 = vst [vmem:[#allocation26_spill] sm:$0xff] %v11945_v4  ;;  %v995_v10 = vor.u32 %v994_v2, %v990_v58  ;;  %v1414_v33 = vrot.slane %v11916_v30, 5  ;;  %v1417_v54 = vrot.slane %v11922_v38, 5  ;;  %v1003_v17 = vshrl.u32 %v11943_v3, 16  ;;  %v11970_v35 = vld [vmem:[#allocation2 + $0x24] sm:$0xf] }
  0xa7   : > { %v986_v15 = vrot.slane %v985_v61, 4  ;;  %4139 = vmatprep.mubr.bf16.mxu1 %v9447_v12  ;;  %v1006_v27 = vshll.u32 %v11943_v3, 16  ;;  %v1012_v19 = vshll.u32 %v11957_v9, 16  ;;  %v1016_v28 = vshrl.u32 %v11957_v9, 16  ;;  %v1340_v36 = vld [vmem:[#allocation2 + $0x18] sm:$0xe] }
  0xa8   : > { %v996_v18 = vrot.slane %v995_v10, 4  ;;  %v1415_v31 = vsel %vm11879_vm13, %v9351_v14, %v1414_v33  ;;  %v1416_v30 = vrot.slane %v1414_v33, 4  ;;  %v1005_v32 = vrot.slane %v1003_v17, 4  ;;  %v1522_v41 = vld [vmem:[#allocation2 + $0x28] sm:$0xf]  ;;  %v11154_v42 = vld [vmem:[#allocation6 + $0x160] sm:$0xff]  }
  0xa9   : > { %v991_v29 = vsel %vm11813_vm6, %v986_v15, %v990_v58  ;;  %v1008_v38 = vrot.slane %v1006_v27, 5  ;;  %v1014_v39 = vrot.slane %v1012_v19, 5  ;;  %v1018_v40 = vrot.slane %v1016_v28, 4  ;;  %v11979_v59 = vld [vmem:[#allocation2 + $0x24] sm:$0xf]  ;;  %10215 = vmatprep.subr.bf16.mxu0 %v11154_v42  ;;  %v11156_v14 = vld [vmem:[#allocation6 + $0x120] sm:$0xff]  }
  0xaa   : > { %v1001_v37 = vsel %vm11813_vm6, %v996_v18, %v1000_v11  ;;  %v1582_v43 = vor.u32 %v11953_v34, %v11941_v63  ;;  %v1418_v46 = vsel %vm11879_vm13, %v1416_v30, %v1417_v54  ;;  %v1022_v47 = vshll.u32 %v937_v21, 16  ;;  %v11981_v60 = vld [vmem:[#allocation2 + $0x28] sm:$0xf]  ;;  %v11986_v12 = vld [vmem:[#allocation2 + $0x2c] sm:$0x1]  ;;  %10216 = vmatpush3.bf16.msra.mxu0 %v11156_v14 }
  0xab   : > { %v9415_v45 = vcombine.low %v991_v29, %v1001_v37  ;;  %v9431_v55 = vcombine.low %v1415_v31, %v1418_v46  ;;  %v1009_v57 = vor.u32 %v1008_v38, %v1005_v32  ;;  %v1019_v58 = vor.u32 %v1018_v40, %v1014_v39  ;;  %v11168_v34 = vld [vmem:[#allocation6 + $0x130] sm:$0xff]   ;;  %v12636_v52 = vld [vmem:[#allocation2 + $0x20] sm:$0x1]  ;;  %v1950_v1 = vld [vmem:[#allocation2 + $0x18] sm:$0xe] }
  0xac   : > { %v11983_v2 = vrot.slane %v1572_v7, 4  ;;  %v1024_v61 = vrot.slane %v1022_v47, 5  ;;  %v9448_v10 = vcombine.low %v11970_v35, %v1522_v41  ;;  %v9352_v11 = vrot.slane %v1340_v36, 9  ;;  %v810_v47 = vld [vmem:[#allocation2 + $0x30] sm:$0xf] }
  0xad   : > { %3978 = vmatprep.mubr.bf16.mxu0 %v9415_v45  ;;  %4140 = vmatmul.mubr.bf16.gmra.mrb[4].mxu1 %v9431_v55  ;;  %v1010_v15 = vrot.slane %v1009_v57, 4  ;;  %v1020_v33 = vrot.slane %v1019_v58, 4  ;;  %v1421_v54 = vrot.slane %v11957_v9, 5  ;;  %v1424_v17 = vrot.slane %v937_v21, 5 }
  0xae   : > { %3979 = vmatmul.mubr.bf16.gmra.mrb[4].mxu0 %v9399_v8  ;;  %4147 = vmatprep.mubr.bf16.mxu1 %v9448_v10  ;;  %v1027_v18 = vshrl.u32 %v11979_v59, 16  ;;  %v1030_v7 = vshll.u32 %v11979_v59, 16  ;;  %v1036_v27 = vshll.u32 %v11981_v60, 16  ;;  %v1040_v19 = vshrl.u32 %v11981_v60, 16 }
  0xaf   : > { %v1015_v28 = vsel %vm11813_vm6, %v1010_v15, %v1014_v39  ;;  %v1025_v8 = vsel %vm11813_vm6, %v1020_v33, %v1024_v61  ;;  %v1422_v29 = vsel %vm11879_vm13, %v9352_v11, %v1421_v54  ;;  %v1423_v21 = vrot.slane %v1421_v54, 4  ;;  %v1341_v15 = vld [vmem:[#allocation2 + $0x24] sm:$0xe] }
  0xb0   : > { %v9416_v31 = vcombine.low %v1015_v28, %v1025_v8  ;;  %v1029_v30 = vrot.slane %v1027_v18, 4  ;;  %v1032_v32 = vrot.slane %v1030_v7, 5  ;;  %v1038_v36 = vrot.slane %v1036_v27, 5  ;;  %v11162_v33 = vld [vmem:[#allocation6 + $0x128] sm:$0xff]   ;;  %v310_v8 = vld [vmem:[%s11784_s10 + $0x50] sm:$0xff] }
  0xb1   : > { %v9400_v37 = vcombine.low %v11943_v3, %v11957_v9  ;;  %v1425_v38 = vsel %vm11879_vm13, %v1423_v21, %v1424_v17  ;;  %v1042_v40 = vrot.slane %v1040_v19, 4  ;;  %v1046_v39 = vshll.u32 %v11986_v12, 16  ;;  %v11160_v9 = vld [vmem:[#allocation6 + $0x168] sm:$0xff]  }
  0xb2   : > { %3986 = vmatprep.mubr.bf16.mxu0 %v9416_v31  ;;  %v9432_v41 = vcombine.low %v1422_v29, %v1425_v38  ;;  %v1033_v42 = vor.u32 %v1032_v32, %v1029_v30  ;;  %v517_v45 = vrot.slane %v515_v24, 7  ;;  %v523_v46 = vshrl.u32 %v11937_v56, 16  ;;  %10217 = vmatprep.subr.bf16.mxu0 %v11160_v9  ;;  %v311_v29 = vld [vmem:[%s11784_s10 + $0x58] sm:$0xff]  ;;  %v11166_v38 = vld [vmem:[#allocation6 + $0x170] sm:$0xff]   ;;  %v821_v9 = vld [vmem:[#allocation2 + $0x44] sm:$0x1] }
  0xb3   : > { %v1043_v57 = vor.u32 %v1042_v40, %v1038_v36  ;;  %v1048_v58 = vrot.slane %v1046_v39, 5  ;;  %v526_v3 = vshll.u32 %v11937_v56, 16  ;;  %v9401_v54 = vcombine.low %v11979_v59, %v11981_v60  ;;  %v814_v56 = vld [vmem:[#allocation2 + $0x38] sm:$0x1]  ;;  %10218 = vmatpush3.bf16.msra.mxu0 %v11162_v33 }
  0xb4   : > { %v1034_v61 = vrot.slane %v1033_v42, 4  ;;  %v520_v10 = vor.u32 %v518_v62, %v517_v45  ;;  %v521_v11 = vrot.slane %v517_v45, 4  ;;  %v525_v14 = vrot.slane %v523_v46, 7  ;;  %10219 = vmatprep.subr.bf16.mxu0 %v11166_v38  ;;  %v11171_v38 = vld [vmem:[#allocation6 + $0x1c8] sm:$0xff]   ;;  %v11190_v45 = vld [vmem:[#allocation6 + $0x1b0] sm:$0xff]  }
  0xb5   : > { %4148 = vmatmul.mubr.bf16.gmra.mrb[8].mxu1 %v9432_v41  ;;  %v1044_v24 = vrot.slane %v1043_v57, 4  ;;  %v1428_v17 = vrot.slane %v11981_v60, 5  ;;  %v9927_v18 = vpack.c.bf16 %v11945_v4, %v11945_v4  ;;  %v9353_v59 = vrot.slane %v1341_v15, 9  ;;  %v314_v57 = vld [vmem:[%s11784_s10 + $0x70] sm:$0xff]  ;;  %v12481_v4 = vld [vmem:[#allocation2 + $0x14] sm:$0x1] }
  0xb6   : > { %3987 = vmatmul.mubr.bf16.gmra.mrb[8].mxu0 %v9400_v37  ;;  %v1039_v6 = vsel %vm11813_vm6, %v1034_v61, %v1038_v36  ;;  %v528_v62 = vor.u32 %v526_v3, %v525_v14  ;;  %v811_v7 = vsel %vm11853_vm11, %v520_v10, %v810_v47  ;;  %v530_v27 = vrot.slane %v525_v14, 4  ;;  %v817_v36 = vld [vmem:[#allocation2 + $0x3c] sm:$0xf]  ;;  %v313_v47 = vld [vmem:[%s11784_s10 + $0x68] sm:$0xff] }
  0xb7   : > { %v1049_v19 = vsel %vm11813_vm6, %v1044_v24, %v1048_v58  ;;  %812 = vst [vmem:[#allocation2 + $0x30] sm:$0xf] %v811_v7  ;;  %v1431_v60 = vrot.slane %v11986_v12, 5  ;;  %v532_v28 = vshrl.u32 %v11949_v5, 16  ;;  %v535_v32 = vshll.u32 %v11949_v5, 16  ;;  %v312_v37 = vld [vmem:[%s11784_s10 + $0x60] sm:$0xff]  ;;  %10220 = vmatpush3.bf16.msra.mxu0 %v11168_v34 }
  0xb8   : > { %v9417_v21 = vcombine.low %v1039_v6, %v1049_v19  ;;  %v529_v31 = vsel %vm11841_vm10, %v521_v11, %v528_v62  ;;  %v815_v30 = vsel %vm11864_vm12, %v530_v27, %v814_v56  ;;  %v1430_v12 = vrot.slane %v1428_v17, 4  ;;  %v11169_v14 = vld [vmem:[#allocation6 + $0x1c0] sm:$0xff]  }
  0xb9   : > { %813 = vst [vmem:[#allocation2 + $0x34] sm:$0xf] %v529_v31  ;;  %816 = vst [vmem:[#allocation2 + $0x38] sm:$0x1] %v815_v30  ;;  %v534_v40 = vrot.slane %v532_v28, 7  ;;  %v540_v39 = vshrl.u32 %v9927_v18, 16  ;;  %10319 = vmatprep.subr.bf16.mxu1 %v11169_v14 }
  0xba   : > { %v543_v41 = vshll.u32 %v9927_v18, 16  ;;  %v12035_v42 = vrot.slane %v1582_v43, 4  ;;  %3994 = vmatprep.mubr.bf16.mxu0 %v9417_v21  ;;  %v12039_v5 = vmax.f32 %v310_v8, 0.0  ;;  %v12043_v61 = vmax.f32 %v311_v29, 0.0  ;;  %v11170_v18 = vld [vmem:[#allocation6 + $0x180] sm:$0xff]  }
  0xbb   : > { %v537_v58 = vor.u32 %v535_v32, %v534_v40  ;;  %v542_v3 = vrot.slane %v540_v39, 7  ;;  %v12045_v10 = vmax.f32 %v312_v37, 0.0  ;;  %v1429_v43 = vsel %vm11879_vm13, %v9353_v59, %v1428_v17  ;;  %10320 = vmatpush3.bf16.msra.mxu1 %v11170_v18 }
  0xbc   : > { %16004 = vst [vmem:[#allocation27_spill] sm:$0xff] %v12039_v5  ;;  %16005 = vst [vmem:[#allocation28_spill] sm:$0xff] %v12043_v61  ;;  %v538_v11 = vrot.slane %v534_v40, 4  ;;  %v1432_v15 = vsel %vm11879_vm13, %v1430_v12, %v1431_v60  ;;  %v12057_v7 = vmax.f32 %v313_v47, 0.0  ;;  %v12059_v17 = vmax.f32 %v314_v57, 0.0  ;;  %v11172_v47 = vld [vmem:[#allocation6 + $0x188] sm:$0xff]   ;;  %10321 = vmatprep.subr.bf16.mxu1 %v11171_v38 }
  0xbd   : > { %16006 = vst [vmem:[#allocation29_spill] sm:$0xff] %v12045_v10  ;;  %v545_v33 = vor.u32 %v543_v41, %v542_v3  ;;  %v818_v24 = vsel %vm11853_vm11, %v537_v58, %v817_v36  ;;  %v547_v56 = vrot.slane %v542_v3, 4  ;;  %v9433_v60 = vcombine.low %v1429_v43, %v1432_v15 }
  0xbe   : > { %3995 = vmatmul.mubr.bf16.gmra.mrb[12].mxu0 %v9401_v54  ;;  %v12053_v6 = vld [vmem:[#allocation2 + $0x30] sm:$0xf]  ;;  %819 = vst [vmem:[#allocation2 + $0x3c] sm:$0xf] %v818_v24  ;;  %16007 = vst [vmem:[#allocation30_spill] sm:$0xff] %v12057_v7  ;;  %v9928_v31 = vpack.c.bf16 %v12039_v5, %v12039_v5  ;;  %v12076_v41 = vpack.c.bf16 %v12043_v61, %v12043_v61  ;;  %v12085_v14 = vpack.c.bf16 %v12057_v7, %v12057_v7 }
  0xbf   : > { %v12055_v62 = vld [vmem:[#allocation2 + $0x30] sm:$0xf]  ;;  %16008 = vst [vmem:[#allocation31_spill] sm:$0xff] %v12059_v17  ;;  %v546_v29 = vsel %vm11841_vm10, %v538_v11, %v545_v33  ;;  %v822_v21 = vsel %vm11864_vm12, %v547_v56, %v821_v9  ;;  %v12081_v11 = vpack.c.bf16 %v12045_v10, %v12045_v10  ;;  %v12093_v18 = vpack.c.bf16 %v12059_v17, %v12059_v17 }
  0xc0   : > { %v1051_v54 = vshrl.u32 %v12055_v62, 16  ;;  %v1054_v27 = vshll.u32 %v12055_v62, 16  ;;  %v1342_v19 = vld [vmem:[#allocation2 + $0x30] sm:$0xe]  ;;  %v1524_v59 = vld [vmem:[#allocation2 + $0x34] sm:$0xf]  ;;  %10322 = vmatpush3.bf16.msra.mxu1 %v11172_v47 }
  0xc1   : > { %v12063_v28 = vld [vmem:[#allocation2 + $0x34] sm:$0xf]  ;;  %v939_v8 = vld [vmem:[#allocation2 + $0x38] sm:$0x1]  ;;  %v9449_v30 = vcombine.low %v12053_v6, %v1524_v59  ;;  %820 = vst [vmem:[#allocation2 + $0x40] sm:$0xf] %v546_v29 }
  0xc2   : > { %v1053_v32 = vrot.slane %v1051_v54, 4  ;;  %v1056_v36 = vrot.slane %v1054_v27, 5  ;;  %v1060_v37 = vshll.u32 %v12063_v28, 16  ;;  %823 = vst [vmem:[#allocation2 + $0x44] sm:$0x1] %v822_v21  ;;  %v1064_v12 = vshrl.u32 %v12063_v28, 16 }
  0xc3   : > { %v1070_v40 = vshll.u32 %v939_v8, 16  ;;  %v9354_v39 = vrot.slane %v1342_v19, 9  ;;  %4155 = vmatprep.mubr.bf16.mxu1 %v9449_v30  ;;  %v1435_v3 = vrot.slane %v12063_v28, 5  ;;  %v1438_v9 = vrot.slane %v939_v8, 5 }
  0xc4   : > { %v1057_v57 = vor.u32 %v1056_v36, %v1053_v32  ;;  %v1062_v58 = vrot.slane %v1060_v37, 5  ;;  %4156 = vmatmul.mubr.bf16.gmra.mrb[12].mxu1 %v9433_v60  ;;  %v1066_v34 = vrot.slane %v1064_v12, 4  ;;  %v549_v43 = vshrl.u32 %v9928_v31, 16 }
  0xc5   : > { %v1436_v33 = vsel %vm11879_vm13, %v9354_v39, %v1435_v3  ;;  %v1437_v24 = vrot.slane %v1435_v3, 4  ;;  %v12089_v56 = vld [vmem:[#allocation2 + $0x3c] sm:$0xf]  ;;  %v1072_v27 = vrot.slane %v1070_v40, 5  ;;  %v552_v60 = vshll.u32 %v9928_v31, 16 }
  0xc6   : > { %v1058_v15 = vrot.slane %v1057_v57, 4  ;;  %v1067_v54 = vor.u32 %v1066_v34, %v1062_v58  ;;  %v12095_v19 = vld [vmem:[#allocation2 + $0x3c] sm:$0xf]  ;;  %v1075_v59 = vshrl.u32 %v12089_v56, 16  ;;  %v1078_v21 = vshll.u32 %v12089_v56, 16 }
  0xc7   : > { %v1439_v29 = vsel %vm11879_vm13, %v1437_v24, %v1438_v9  ;;  %v12102_v30 = vrot.slane %v549_v43, 7  ;;  %v824_v39 = vld [vmem:[#allocation2 + $0x48] sm:$0xf]  ;;  %v12113_v34 = vld [vmem:[#allocation2 + $0x3c] sm:$0xe] }
  0xc8   : > { %v1063_v32 = vsel %vm11813_vm6, %v1058_v15, %v1062_v58  ;;  %v1068_v36 = vrot.slane %v1067_v54, 4  ;;  %v1526_v37 = vld [vmem:[#allocation2 + $0x40] sm:$0xf]  ;;  %v9434_v38 = vcombine.low %v1436_v33, %v1439_v29  ;;  %v1077_v40 = vrot.slane %v1075_v59, 4  ;;  %v11175_v43 = vld [vmem:[#allocation6 + $0x1d0] sm:$0xff]  }
  0xc9   : > { %v12106_v12 = vld [vmem:[#allocation2 + $0x40] sm:$0xf]  ;;  %v9450_v31 = vcombine.low %v12095_v19, %v1526_v37  ;;  %v12109_v47 = vld [vmem:[#allocation2 + $0x44] sm:$0x1]  ;;  %v1080_v57 = vrot.slane %v1078_v21, 5  ;;  %v9402_v15 = vcombine.low %v12055_v62, %v12063_v28  ;;  %v554_v24 = vor.u32 %v552_v60, %v12102_v30  ;;  %v11176_v54 = vld [vmem:[#allocation6 + $0x190] sm:$0xff]   ;;  %10323 = vmatprep.subr.bf16.mxu1 %v11175_v43 }
  0xca   : > { %v1084_v3 = vshll.u32 %v12106_v12, 16  ;;  %v1088_v9 = vshrl.u32 %v12106_v12, 16  ;;  %v1073_v58 = vsel %vm11813_vm6, %v1068_v36, %v1072_v27  ;;  %v1094_v33 = vshll.u32 %v12109_v47, 16  ;;  %10324 = vmatpush3.bf16.msra.mxu1 %v11176_v54 }
  0xcb   : > { %v9418_v59 = vcombine.low %v1063_v32, %v1073_v58  ;;  %4163 = vmatprep.mubr.bf16.mxu1 %v9450_v31  ;;  %v1081_v29 = vor.u32 %v1080_v57, %v1077_v40  ;;  %v557_v27 = vshrl.u32 %v12076_v41, 16  ;;  %v560_v36 = vshll.u32 %v12076_v41, 16  ;;  %v11177_v40 = vld [vmem:[#allocation6 + $0x1d8] sm:$0xff]  }
  0xcc   : > { %v1086_v21 = vrot.slane %v1084_v3, 5  ;;  %v1090_v37 = vrot.slane %v1088_v9, 4  ;;  %4164 = vmatmul.mubr.bf16.gmra.mrb[16].mxu1 %v9434_v38  ;;  %v1096_v46 = vrot.slane %v1094_v33, 5  ;;  %v555_v60 = vrot.slane %v12102_v30, 4  ;;  %v11178_v31 = vld [vmem:[#allocation6 + $0x198] sm:$0xff]   ;;  %10325 = vmatprep.subr.bf16.mxu1 %v11177_v40  ;;  %v316_v40 = vld [vmem:[%s11784_s10 + $0x80] sm:$0xff] }
  0xcd   : > { %4002 = vmatprep.mubr.bf16.mxu0 %v9418_v59  ;;  %v1082_v62 = vrot.slane %v1081_v29, 4  ;;  %v825_v32 = vsel %vm11853_vm11, %v554_v24, %v824_v39  ;;  %v559_v57 = vrot.slane %v557_v27, 7  ;;  %v9355_v38 = vrot.slane %v12113_v34, 9  ;;  %v828_v9 = vld [vmem:[#allocation2 + $0x50] sm:$0x1] }
  0xce   : > { %v1091_v28 = vor.u32 %v1090_v37, %v1086_v21  ;;  %4003 = vmatmul.mubr.bf16.gmra.mrb[16].mxu0 %v9402_v15  ;;  %826 = vst [vmem:[#allocation2 + $0x48] sm:$0xf] %v825_v32  ;;  %v1442_v3 = vrot.slane %v12106_v12, 5  ;;  %v566_v41 = vshrl.u32 %v12081_v11, 16  ;;  %v569_v39 = vshll.u32 %v12081_v11, 16  ;;  %v11180_v15 = vld [vmem:[#allocation6 + $0x178] sm:$0xff]   ;;  %10326 = vmatpush3.bf16.msra.mxu1 %v11178_v31 }
  0xcf   : > { %v1087_v30 = vsel %vm11813_vm6, %v1082_v62, %v1086_v21  ;;  %v574_v58 = vshrl.u32 %v12085_v14, 16  ;;  %v9403_v33 = vcombine.low %v12089_v56, %v12106_v12  ;;  %v562_v34 = vor.u32 %v560_v36, %v559_v57  ;;  %v831_v59 = vld [vmem:[#allocation2 + $0x54] sm:$0xf]  ;;  %10221 = vmatprep.subr.bf16.mxu0 %v11180_v15  ;;  %v835_v36 = vld [vmem:[#allocation2 + $0x5c] sm:$0x1] }
  0xd0   : > { %v1092_v43 = vrot.slane %v1091_v28, 4  ;;  %v1445_v24 = vrot.slane %v12109_v47, 5  ;;  %v564_v54 = vrot.slane %v559_v57, 4  ;;  %v568_v37 = vrot.slane %v566_v41, 7  ;;  %v315_v27 = vld [vmem:[%s11784_s10 + $0x78] sm:$0xff] }
  0xd1   : > { %v576_v21 = vrot.slane %v574_v58, 7  ;;  %v577_v11 = vshll.u32 %v12085_v14, 16  ;;  %v563_v56 = vsel %vm11841_vm10, %v555_v60, %v562_v34  ;;  %v1444_v12 = vrot.slane %v1442_v3, 4  ;;  %v11182_v14 = vld [vmem:[#allocation6 + $0x138] sm:$0xff]  }
  0xd2   : > { %v1097_v29 = vsel %vm11813_vm6, %v1092_v43, %v1096_v46  ;;  %v829_v47 = vsel %vm11864_vm12, %v564_v54, %v828_v9  ;;  %827 = vst [vmem:[#allocation2 + $0x4c] sm:$0xf] %v563_v56  ;;  %v571_v46 = vor.u32 %v569_v39, %v568_v37  ;;  %v572_v28 = vrot.slane %v568_v37, 4  ;;  %10222 = vmatpush3.bf16.msra.mxu0 %v11182_v14 }
  0xd3   : > { %v9419_v62 = vcombine.low %v1087_v30, %v1097_v29  ;;  %830 = vst [vmem:[#allocation2 + $0x50] sm:$0x1] %v829_v47  ;;  %v579_v32 = vor.u32 %v577_v11, %v576_v21  ;;  %v581_v57 = vrot.slane %v576_v21, 4  ;;  %v12147_v41 = vmax.f32 %v315_v27, 0.0  ;;  %v317_v30 = vld [vmem:[%s11784_s10 + $0x88] sm:$0xff]  ;;  %v11183_v11 = vld [vmem:[#allocation6 + $0x1e0] sm:$0xff]  }
  0xd4   : > { %v583_v60 = vshrl.u32 %v12093_v18, 16  ;;  %v832_v58 = vsel %vm11853_vm11, %v571_v46, %v831_v59  ;;  %v586_v34 = vshll.u32 %v12093_v18, 16  ;;  %v1443_v29 = vsel %vm11879_vm13, %v9355_v38, %v1442_v3  ;;  %v11184_v27 = vld [vmem:[#allocation6 + $0x1a0] sm:$0xff]   ;;  %10327 = vmatprep.subr.bf16.mxu1 %v11183_v11 }
  0xd5   : > { %4010 = vmatprep.mubr.bf16.mxu0 %v9419_v62  ;;  %16009 = vst [vmem:[#allocation32_spill] sm:$0xff] %v12147_v41  ;;  %v12152_v9 = vld [vmem:[#allocation2 + $0x48] sm:$0xf]  ;;  %v580_v39 = vsel %vm11841_vm10, %v572_v28, %v579_v32  ;;  %833 = vst [vmem:[#allocation2 + $0x54] sm:$0xf] %v832_v58  ;;  %v1446_v59 = vsel %vm11879_vm13, %v1444_v12, %v1445_v24  ;;  %v836_v18 = vsel %vm11864_vm12, %v581_v57, %v835_v36  ;;  %v11185_v24 = vld [vmem:[#allocation6 + $0x1e8] sm:$0xff]  }
  0xd6   : > { %v1344_v15 = vld [vmem:[#allocation2 + $0x48] sm:$0xe]  ;;  %4011 = vmatmul.mubr.bf16.gmra.mrb[20].mxu0 %v9403_v33  ;;  %v1099_v37 = vshrl.u32 %v12152_v9, 16  ;;  %v1102_v21 = vshll.u32 %v12152_v9, 16  ;;  %834 = vst [vmem:[#allocation2 + $0x58] sm:$0xf] %v580_v39  ;;  %v9933_v33 = vpack.c.bf16 %v12147_v41, %v12147_v41  ;;  %10328 = vmatpush3.bf16.msra.mxu1 %v11184_v27  ;;  %v9435_v36 = vcombine.low %v1443_v29, %v1446_v59 }
  0xd7   : > { %v12159_v54 = vld [vmem:[#allocation2 + $0x48] sm:$0xf]  ;;  %v12171_v62 = vrot.slane %v583_v60, 7  ;;  %v9356_v56 = vrot.slane %v1344_v15, 9  ;;  %837 = vst [vmem:[#allocation2 + $0x5c] sm:$0x1] %v836_v18  ;;  %10329 = vmatprep.subr.bf16.mxu1 %v11185_v24 }
  0xd8   : > { %v1101_v38 = vrot.slane %v1099_v37, 4  ;;  %v1104_v3 = vrot.slane %v1102_v21, 5  ;;  %v12173_v47 = vmax.f32 %v316_v40, 0.0  ;;  %v591_v46 = vshrl.u32 %v9933_v33, 16 }
  0xd9   : > { %v594_v28 = vshll.u32 %v9933_v33, 16  ;;  %v12175_v32 = vmax.f32 %v317_v30, 0.0  ;;  %v1528_v12 = vld [vmem:[#allocation2 + $0x4c] sm:$0xf]  ;;  %v12180_v39 = vor.u32 %v586_v34, %v12171_v62  ;;  %v11186_v30 = vld [vmem:[#allocation6 + $0x1a8] sm:$0xff]   ;;  %v589_v29 = vrot.slane %v12171_v62, 4 }
  0xda   : > { %16010 = vst [vmem:[#allocation33_spill] sm:$0xff] %v12173_v47  ;;  %v12177_v14 = vld [vmem:[#allocation2 + $0x4c] sm:$0xf]  ;;  %v941_v57 = vld [vmem:[#allocation2 + $0x50] sm:$0x1]  ;;  %v1105_v60 = vor.u32 %v1104_v3, %v1101_v38  ;;  %v9451_v58 = vcombine.low %v12159_v54, %v1528_v12  ;;  %v12189_v27 = vpack.c.bf16 %v12173_v47, %v12173_v47  ;;  %v12193_v38 = vrot.slane %v591_v46, 7  ;;  %10330 = vmatpush3.bf16.msra.mxu1 %v11186_v30 }
  0xdb   : > { %16011 = vst [vmem:[#allocation34_spill] sm:$0xff] %v12175_v32  ;;  %v1108_v40 = vshll.u32 %v12177_v14, 16  ;;  %v1112_v15 = vshrl.u32 %v12177_v14, 16  ;;  %v1118_v37 = vshll.u32 %v941_v57, 16  ;;  %v1449_v21 = vrot.slane %v12177_v14, 5  ;;  %v11191_v47 = vld [vmem:[#allocation6 + $0x1f8] sm:$0xff]  }
  0xdc   : > { %v1452_v11 = vrot.slane %v941_v57, 5  ;;  %4171 = vmatprep.mubr.bf16.mxu1 %v9451_v58  ;;  %v1106_v34 = vrot.slane %v1105_v60, 4  ;;  %v12191_v33 = vld [vmem:[#allocation2 + $0x54] sm:$0xf]  ;;  %v9404_v24 = vcombine.low %v12152_v9, %v12177_v14  ;;  %v12199_v57 = vpack.c.bf16 %v12175_v32, %v12175_v32  ;;  %v838_v14 = vld [vmem:[#allocation2 + $0x60] sm:$0xf] }
  0xdd   : > { %v1110_v59 = vrot.slane %v1108_v40, 5  ;;  %v1114_v18 = vrot.slane %v1112_v15, 4  ;;  %4172 = vmatmul.mubr.bf16.gmra.mrb[20].mxu1 %v9435_v36  ;;  %v1120_v3 = vrot.slane %v1118_v37, 5  ;;  %v1530_v12 = vld [vmem:[#allocation2 + $0x58] sm:$0xf]  ;;  %v1451_v62 = vrot.slane %v1449_v21, 4 }
  0xde   : > { %v9452_v60 = vcombine.low %v12191_v33, %v1530_v12  ;;  %v1450_v40 = vsel %vm11879_vm13, %v9356_v56, %v1449_v21  ;;  %v12204_v46 = vld [vmem:[#allocation2 + $0x54] sm:$0xf]  ;;  %v12206_v15 = vld [vmem:[#allocation2 + $0x58] sm:$0xf]  ;;  %v12208_v36 = vld [vmem:[#allocation2 + $0x5c] sm:$0x1]  ;;  %v596_v9 = vor.u32 %v594_v28, %v12193_v38 }
  0xdf   : > { %v1115_v58 = vor.u32 %v1114_v18, %v1110_v59  ;;  %v1453_v37 = vsel %vm11879_vm13, %v1451_v62, %v1452_v11  ;;  %v1123_v30 = vshrl.u32 %v12204_v46, 16  ;;  %v1126_v18 = vshll.u32 %v12204_v46, 16  ;;  %v1345_v43 = vld [vmem:[#allocation2 + $0x54] sm:$0xe]  ;;  %v11189_v56 = vld [vmem:[#allocation6 + $0x1f0] sm:$0xff]  }
  0xe0   : > { %v1132_v12 = vshll.u32 %v12206_v15, 16  ;;  %v1111_v21 = vsel %vm11813_vm6, %v1106_v34, %v1110_v59  ;;  %4179 = vmatprep.mubr.bf16.mxu1 %v9452_v60  ;;  %v1136_v8 = vshrl.u32 %v12206_v15, 16  ;;  %v1142_v28 = vshll.u32 %v12208_v36, 16  ;;  %v842_v32 = vld [vmem:[#allocation2 + $0x68] sm:$0x1]  ;;  %10331 = vmatprep.subr.bf16.mxu1 %v11189_v56 }
  0xe1   : > { %v1116_v31 = vrot.slane %v1115_v58, 4  ;;  %v9436_v55 = vcombine.low %v1450_v40, %v1453_v37  ;;  %v1125_v11 = vrot.slane %v1123_v30, 4  ;;  %v1128_v62 = vrot.slane %v1126_v18, 5  ;;  %10332 = vmatpush3.bf16.msra.mxu1 %v11190_v45  ;;  %v318_v30 = vld [vmem:[%s11784_s10 + $0x90] sm:$0xff]  ;;  %v11192_v18 = vld [vmem:[#allocation6 + $0x1b8] sm:$0xff]  }
  0xe2   : > { %v1134_v49 = vrot.slane %v1132_v12, 5  ;;  %v1138_v41 = vrot.slane %v1136_v8, 4  ;;  %v1144_v34 = vrot.slane %v1142_v28, 5  ;;  %v597_v59 = vsel %vm11841_vm10, %v589_v29, %v596_v9  ;;  %10333 = vmatprep.subr.bf16.mxu1 %v11191_v47 }
  0xe3   : > { %v1121_v7 = vsel %vm11813_vm6, %v1116_v31, %v1120_v3  ;;  %v1129_v60 = vor.u32 %v1128_v62, %v1125_v11  ;;  %v839_v40 = vsel %vm11853_vm11, %v12180_v39, %v838_v14  ;;  %841 = vst [vmem:[#allocation2 + $0x64] sm:$0xf] %v597_v59  ;;  %v9357_v37 = vrot.slane %v1345_v43, 9  ;;  %v845_v14 = vld [vmem:[#allocation2 + $0x6c] sm:$0xf] }
  0xe4   : > { %v9420_v58 = vcombine.low %v1111_v21, %v1121_v7  ;;  %v1139_v12 = vor.u32 %v1138_v41, %v1134_v49  ;;  %840 = vst [vmem:[#allocation2 + $0x60] sm:$0xf] %v839_v40  ;;  %v1456_v8 = vrot.slane %v12206_v15, 5  ;;  %v1459_v31 = vrot.slane %v12208_v36, 5  ;;  %v11193_v7 = vld [vmem:[#allocation6 + $0x200] sm:$0xff]  }
  0xe5   : > { %v598_v45 = vrot.slane %v12193_v38, 4  ;;  %4180 = vmatmul.mubr.bf16.gmra.mrb[24].mxu1 %v9436_v55  ;;  %v1130_v29 = vrot.slane %v1129_v60, 4  ;;  %v600_v39 = vshrl.u32 %v12189_v27, 16  ;;  %v603_v43 = vshll.u32 %v12189_v27, 16  ;;  %v319_v38 = vld [vmem:[%s11784_s10 + $0x98] sm:$0xff]  ;;  %10927 = vmatprep.subr.bf16.mxu0 %v11193_v7 }
  0xe6   : > { %4018 = vmatprep.mubr.bf16.mxu0 %v9420_v58  ;;  %v608_v47 = vshrl.u32 %v12199_v57, 16  ;;  %v1140_v3 = vrot.slane %v1139_v12, 4  ;;  %v1458_v9 = vrot.slane %v1456_v8, 4  ;;  %10334 = vmatpush3.bf16.msra.mxu1 %v11192_v18  ;;  %v611_v27 = vshll.u32 %v12199_v57, 16 }
  0xe7   : > { %4019 = vmatmul.mubr.bf16.gmra.mrb[24].mxu0 %v9404_v24  ;;  %v843_v36 = vsel %vm11864_vm12, %v598_v45, %v842_v32  ;;  %v1135_v55 = vsel %vm11813_vm6, %v1130_v29, %v1134_v49  ;;  %v602_v56 = vrot.slane %v600_v39, 7  ;;  %v1457_v28 = vsel %vm11879_vm13, %v9357_v37, %v1456_v8 }
  0xe8   : > { %844 = vst [vmem:[#allocation2 + $0x68] sm:$0x1] %v843_v36  ;;  %v610_v21 = vrot.slane %v608_v47, 7  ;;  %v1145_v24 = vsel %vm11813_vm6, %v1140_v3, %v1144_v34  ;;  %v1460_v32 = vsel %vm11879_vm13, %v1458_v9, %v1459_v31  ;;  %v12247_v11 = vmax.f32 %v318_v30, 0.0  ;;  %v849_v36 = vld [vmem:[#allocation2 + $0x74] sm:$0x1] }
  0xe9   : > { %v9421_v49 = vcombine.low %v1135_v55, %v1145_v24  ;;  %v605_v59 = vor.u32 %v603_v43, %v602_v56  ;;  %v12250_v58 = vmax.f32 %v319_v38, 0.0  ;;  %v9405_v60 = vcombine.low %v12204_v46, %v12206_v15 }
  0xea   : > { %16012 = vst [vmem:[#allocation35_spill] sm:$0xff] %v12247_v11  ;;  %v1532_v34 = vld [vmem:[#allocation2 + $0x64] sm:$0xf]  ;;  %v606_v37 = vrot.slane %v602_v56, 4  ;;  %v613_v18 = vor.u32 %v611_v27, %v610_v21  ;;  %v9437_v30 = vcombine.low %v1457_v28, %v1460_v32  ;;  %v615_v39 = vrot.slane %v610_v21, 4 }
  0xeb   : > { %16013 = vst [vmem:[#allocation36_spill] sm:$0xff] %v12250_v58  ;;  %v12255_v40 = vld [vmem:[#allocation2 + $0x64] sm:$0xf]  ;;  %4026 = vmatprep.mubr.bf16.mxu0 %v9421_v49  ;;  %v12257_v12 = vld [vmem:[#allocation2 + $0x60] sm:$0xf]  ;;  %v846_v7 = vsel %vm11853_vm11, %v605_v59, %v845_v14  ;;  %v9936_v43 = vpack.c.bf16 %v12247_v11, %v12247_v11  ;;  %v9937_v38 = vpack.c.bf16 %v12250_v58, %v12250_v58 }
  0xec   : > { %v12259_v8 = vld [vmem:[#allocation2 + $0x60] sm:$0xf]  ;;  %v1156_v31 = vshll.u32 %v12255_v40, 16  ;;  %v1160_v45 = vshrl.u32 %v12255_v40, 16  ;;  %v9453_v46 = vcombine.low %v12257_v12, %v1532_v34  ;;  %847 = vst [vmem:[#allocation2 + $0x6c] sm:$0xf] %v846_v7  ;;  %v614_v56 = vsel %vm11841_vm10, %v606_v37, %v613_v18 }
  0xed   : > { %v1147_v15 = vshrl.u32 %v12259_v8, 16  ;;  %v1346_v29 = vld [vmem:[#allocation2 + $0x60] sm:$0xe]  ;;  %v1150_v47 = vshll.u32 %v12259_v8, 16  ;;  %v1463_v27 = vrot.slane %v12255_v40, 5  ;;  %v620_v18 = vshll.u32 %v9936_v43, 16 }
  0xee   : > { %v1158_v3 = vrot.slane %v1156_v31, 5  ;;  %v1162_v9 = vrot.slane %v1160_v45, 4  ;;  %4187 = vmatprep.mubr.bf16.mxu1 %v9453_v46  ;;  %v9358_v21 = vrot.slane %v1346_v29, 9  ;;  %848 = vst [vmem:[#allocation2 + $0x70] sm:$0xf] %v614_v56  ;;  %v617_v31 = vshrl.u32 %v9936_v43, 16 }
  0xef   : > { %4027 = vmatmul.mubr.bf16.gmra.mrb[28].mxu0 %v9405_v60  ;;  %v943_v14 = vld [vmem:[#allocation2 + $0x68] sm:$0x1]  ;;  %v1149_v55 = vrot.slane %v1147_v15, 4  ;;  %4188 = vmatmul.mubr.bf16.gmra.mrb[28].mxu1 %v9437_v30  ;;  %v1152_v24 = vrot.slane %v1150_v47, 5  ;;  %v1465_v34 = vrot.slane %v1463_v27, 4  ;;  %v850_v60 = vsel %vm11864_vm12, %v615_v39, %v849_v36  ;;  %v320_v45 = vld [vmem:[%s11784_s10 + $0xa0] sm:$0xff] }
  0xf0   : > { %v1163_v28 = vor.u32 %v1162_v9, %v1158_v3  ;;  %v1166_v32 = vshll.u32 %v943_v14, 16  ;;  %v1466_v49 = vrot.slane %v943_v14, 5  ;;  %851 = vst [vmem:[#allocation2 + $0x74] sm:$0x1] %v850_v60  ;;  %v1464_v15 = vsel %vm11879_vm13, %v9358_v21, %v1463_v27 }
  0xf1   : > { %v1153_v7 = vor.u32 %v1152_v24, %v1149_v55  ;;  %v619_v29 = vrot.slane %v617_v31, 7  ;;  %v625_v47 = vshrl.u32 %v9937_v38, 16  ;;  %v12288_v55 = vmax.f32 %v320_v45, 0.0 }
  0xf2   : > { %v1164_v46 = vrot.slane %v1163_v28, 4  ;;  %v1168_v37 = vrot.slane %v1166_v32, 5  ;;  %v1467_v39 = vsel %vm11879_vm13, %v1465_v34, %v1466_v49  ;;  %v9406_v43 = vcombine.low %v12259_v8, %v12255_v40  ;;  %v852_v34 = vld [vmem:[#allocation2 + $0x78] sm:$0xf] }
  0xf3   : > { %v1154_v9 = vrot.slane %v1153_v7, 4  ;;  %v12286_v36 = vld [vmem:[#allocation2 + $0x6c] sm:$0xf]  ;;  %16014 = vst [vmem:[#allocation37_spill] sm:$0xff] %v12288_v55  ;;  %v628_v24 = vshll.u32 %v9937_v38, 16  ;;  %v622_v32 = vor.u32 %v620_v18, %v619_v29  ;;  %v623_v60 = vrot.slane %v619_v29, 4 }
  0xf4   : > { %v1169_v14 = vsel %vm11813_vm6, %v1164_v46, %v1168_v37  ;;  %v12292_v56 = vld [vmem:[#allocation2 + $0x6c] sm:$0xf]  ;;  %v1171_v21 = vshrl.u32 %v12286_v36, 16  ;;  %v1174_v27 = vshll.u32 %v12286_v36, 16  ;;  %v627_v49 = vrot.slane %v625_v47, 7 }
  0xf5   : > { %v1159_v28 = vsel %vm11813_vm6, %v1154_v9, %v1158_v3  ;;  %v1347_v31 = vld [vmem:[#allocation2 + $0x6c] sm:$0xe]  ;;  %v1534_v7 = vld [vmem:[#allocation2 + $0x70] sm:$0xf]  ;;  %v9438_v46 = vcombine.low %v1464_v15, %v1467_v39  ;;  %v856_v3 = vld [vmem:[#allocation2 + $0x80] sm:$0x1]  ;;  %v9938_v18 = vpack.c.bf16 %v12288_v55, %v12288_v55  ;;  %v853_v15 = vsel %vm11853_vm11, %v622_v32, %v852_v34 }
  0xf6   : > { %v9422_v45 = vcombine.low %v1159_v28, %v1169_v14  ;;  %v12298_v37 = vld [vmem:[#allocation2 + $0x70] sm:$0xf]  ;;  %v1173_v40 = vrot.slane %v1171_v21, 4  ;;  %v1176_v8 = vrot.slane %v1174_v27, 5  ;;  %v9454_v30 = vcombine.low %v12292_v56, %v1534_v7  ;;  %854 = vst [vmem:[#allocation2 + $0x78] sm:$0xf] %v853_v15 }
  0xf7   : > { %v1180_v59 = vshll.u32 %v12298_v37, 16  ;;  %v1184_v38 = vshrl.u32 %v12298_v37, 16  ;;  %v944_v29 = vld [vmem:[#allocation2 + $0x74] sm:$0x1]  ;;  %v630_v9 = vor.u32 %v628_v24, %v627_v49  ;;  %v9359_v14 = vrot.slane %v1347_v31, 9  ;;  %v321_v7 = vld [vmem:[%s11784_s10 + $0xa8] sm:$0xff] }
  0xf8   : > { %4034 = vmatprep.mubr.bf16.mxu0 %v9422_v45  ;;  %v1177_v47 = vor.u32 %v1176_v8, %v1173_v40  ;;  %4195 = vmatprep.mubr.bf16.mxu1 %v9454_v30  ;;  %v1190_v27 = vshll.u32 %v944_v29, 16  ;;  %v1470_v28 = vrot.slane %v12298_v37, 5  ;;  %v1473_v24 = vrot.slane %v944_v29, 5  ;;  %v322_v34 = vld [vmem:[%s11784_s10 + $0xb0] sm:$0xff] }
  0xf9   : > { %4035 = vmatmul.mubr.bf16.gmra.mrb[32].mxu0 %v9406_v43  ;;  %v1182_v39 = vrot.slane %v1180_v59, 5  ;;  %v1186_v21 = vrot.slane %v1184_v38, 4  ;;  %4196 = vmatmul.mubr.bf16.gmra.mrb[32].mxu1 %v9438_v46  ;;  %v631_v45 = vsel %vm11841_vm10, %v623_v60, %v630_v9  ;;  %v632_v40 = vrot.slane %v627_v49, 4  ;;  %v323_v9 = vld [vmem:[%s11784_s10 + $0xb8] sm:$0xff] }
  0xfa   : > { %v1178_v57 = vrot.slane %v1177_v47, 4  ;;  %v1192_v30 = vrot.slane %v1190_v27, 5  ;;  %855 = vst [vmem:[#allocation2 + $0x7c] sm:$0xf] %v631_v45  ;;  %v1472_v59 = vrot.slane %v1470_v28, 4  ;;  %v1471_v31 = vsel %vm11879_vm13, %v9359_v14, %v1470_v28  ;;  %v324_v27 = vld [vmem:[%s11784_s10 + $0xc0] sm:$0xff] }
  0xfb   : > { %v1187_v43 = vor.u32 %v1186_v21, %v1182_v39  ;;  %v857_v46 = vsel %vm11864_vm12, %v632_v40, %v856_v3  ;;  %v12317_v8 = vmax.f32 %v321_v7, 0.0  ;;  %v634_v60 = vshrl.u32 %v9938_v18, 16 }
  0xfc   : > { %v1183_v49 = vsel %vm11813_vm6, %v1178_v57, %v1182_v39  ;;  %v1474_v29 = vsel %vm11879_vm13, %v1472_v59, %v1473_v24  ;;  %858 = vst [vmem:[#allocation2 + $0x80] sm:$0x1] %v857_v46  ;;  %v637_v47 = vshll.u32 %v9938_v18, 16  ;;  %v12327_v3 = vmax.f32 %v322_v34, 0.0  ;;  %v859_v18 = vld [vmem:[#allocation2 + $0x84] sm:$0xf] }
  0xfd   : > { %16015 = vst [vmem:[#allocation38_spill] sm:$0xff] %v12317_v8  ;;  %v1188_v38 = vrot.slane %v1187_v43, 4  ;;  %v9939_v14 = vpack.c.bf16 %v12317_v8, %v12317_v8  ;;  %v636_v21 = vrot.slane %v634_v60, 7  ;;  %v9407_v39 = vcombine.low %v12286_v36, %v12298_v37  ;;  %v12335_v24 = vld [vmem:[#allocation2 + $0x78] sm:$0xf]  ;;  %v325_v8 = vld [vmem:[%s11784_s10 + $0xc8] sm:$0xff] }
  0xfe   : > { %16016 = vst [vmem:[#allocation39_spill] sm:$0xff] %v12327_v3  ;;  %v9439_v7 = vcombine.low %v1471_v31, %v1474_v29  ;;  %v12337_v40 = vld [vmem:[#allocation2 + $0x78] sm:$0xf]  ;;  %v12339_v34 = vmax.f32 %v323_v9, 0.0 }
  0xff   : > { %v1193_v57 = vsel %vm11813_vm6, %v1188_v38, %v1192_v30  ;;  %v639_v43 = vor.u32 %v637_v47, %v636_v21  ;;  %v642_v59 = vshrl.u32 %v9939_v14, 16  ;;  %v1195_v46 = vshrl.u32 %v12337_v40, 16  ;;  %v1348_v30 = vld [vmem:[#allocation2 + $0x78] sm:$0xe] }
 0x100   : > { %v9423_v45 = vcombine.low %v1183_v49, %v1193_v57  ;;  %16017 = vst [vmem:[#allocation40_spill] sm:$0xff] %v12339_v34  ;;  %v1198_v60 = vshll.u32 %v12337_v40, 16  ;;  %v640_v28 = vrot.slane %v636_v21, 4  ;;  %v12343_v38 = vmax.f32 %v324_v27, 0.0 }
 0x101   : > { %v1536_v36 = vld [vmem:[#allocation2 + $0x7c] sm:$0xf]  ;;  %v644_v31 = vrot.slane %v642_v59, 7  ;;  %v645_v49 = vshll.u32 %v9939_v14, 16  ;;  %v860_v29 = vsel %vm11853_vm11, %v639_v43, %v859_v18  ;;  %v9940_v47 = vpack.c.bf16 %v12327_v3, %v12327_v3 }
 0x102   : > { %16018 = vst [vmem:[#allocation41_spill] sm:$0xff] %v12343_v38  ;;  %4042 = vmatprep.mubr.bf16.mxu0 %v9423_v45  ;;  %v12345_v37 = vld [vmem:[#allocation2 + $0x7c] sm:$0xf]  ;;  %v9455_v9 = vcombine.low %v12335_v24, %v1536_v36  ;;  %v1197_v57 = vrot.slane %v1195_v46, 4  ;;  %v1200_v21 = vrot.slane %v1198_v60, 5  ;;  %v9360_v14 = vrot.slane %v1348_v30, 9 }
 0x103   : > { %4043 = vmatmul.mubr.bf16.gmra.mrb[36].mxu0 %v9407_v39  ;;  %v1204_v27 = vshll.u32 %v12345_v37, 16  ;;  %861 = vst [vmem:[#allocation2 + $0x84] sm:$0xf] %v860_v29  ;;  %v945_v45 = vld [vmem:[#allocation2 + $0x80] sm:$0x1]  ;;  %v1208_v15 = vshrl.u32 %v12345_v37, 16  ;;  %v647_v59 = vor.u32 %v645_v49, %v644_v31  ;;  %v9941_v18 = vpack.c.bf16 %v12339_v34, %v12339_v34 }
 0x104   : > { %4203 = vmatprep.mubr.bf16.mxu1 %v9455_v9  ;;  %v1201_v43 = vor.u32 %v1200_v21, %v1197_v57  ;;  %v1214_v39 = vshll.u32 %v945_v45, 16  ;;  %v1477_v36 = vrot.slane %v12345_v37, 5  ;;  %v863_v46 = vld [vmem:[#allocation2 + $0x8c] sm:$0x1]  ;;  %v1480_v62 = vrot.slane %v945_v45, 5 }
 0x105   : > { %v1206_v32 = vrot.slane %v1204_v27, 5  ;;  %4204 = vmatmul.mubr.bf16.gmra.mrb[36].mxu1 %v9439_v7  ;;  %v1210_v60 = vrot.slane %v1208_v15, 4  ;;  %v648_v29 = vsel %vm11841_vm10, %v640_v28, %v647_v59  ;;  %v649_v41 = vrot.slane %v644_v31, 4  ;;  %v870_v15 = vld [vmem:[#allocation2 + $0x98] sm:$0x1] }
 0x106   : > { %v1202_v49 = vrot.slane %v1201_v43, 4  ;;  %v1216_v30 = vrot.slane %v1214_v39, 5  ;;  %862 = vst [vmem:[#allocation2 + $0x88] sm:$0xf] %v648_v29  ;;  %v1478_v9 = vsel %vm11879_vm13, %v9360_v14, %v1477_v36  ;;  %v1479_v57 = vrot.slane %v1477_v36, 4 }
 0x107   : > { %v1211_v21 = vor.u32 %v1210_v60, %v1206_v32  ;;  %v864_v27 = vsel %vm11864_vm12, %v649_v41, %v863_v46  ;;  %v651_v34 = vshrl.u32 %v9940_v47, 16  ;;  %v654_v7 = vshll.u32 %v9940_v47, 16  ;;  %v866_v60 = vld [vmem:[#allocation2 + $0x90] sm:$0xf] }
 0x108   : > { %v1481_v28 = vsel %vm11879_vm13, %v1479_v57, %v1480_v62  ;;  %865 = vst [vmem:[#allocation2 + $0x8c] sm:$0x1] %v864_v27  ;;  %v659_v31 = vshrl.u32 %v9941_v18, 16  ;;  %v12367_v45 = vmax.f32 %v325_v8, 0.0  ;;  %v1207_v59 = vsel %vm11813_vm6, %v1202_v49, %v1206_v32 }
 0x109   : > { %v1212_v14 = vrot.slane %v1211_v21, 4  ;;  %v653_v39 = vrot.slane %v651_v34, 7  ;;  %v662_v36 = vshll.u32 %v9941_v18, 16  ;;  %v9408_v41 = vcombine.low %v12337_v40, %v12345_v37 }
 0x10a   : > { %16019 = vst [vmem:[#allocation42_spill] sm:$0xff] %v12367_v45  ;;  %v12371_v43 = vld [vmem:[#allocation2 + $0x84] sm:$0xf]  ;;  %v9440_v47 = vcombine.low %v1478_v9, %v1481_v28  ;;  %v661_v21 = vrot.slane %v659_v31, 7  ;;  %v9942_v40 = vpack.c.bf16 %v12343_v38, %v12343_v38 }
 0x10b   : > { %v1219_v46 = vshrl.u32 %v12371_v43, 16  ;;  %v1222_v62 = vshll.u32 %v12371_v43, 16  ;;  %v1349_v29 = vld [vmem:[#allocation2 + $0x84] sm:$0xe]  ;;  %v1217_v8 = vsel %vm11813_vm6, %v1212_v14, %v1216_v30  ;;  %v656_v32 = vor.u32 %v654_v7, %v653_v39 }
 0x10c   : > { %v12379_v57 = vld [vmem:[#allocation2 + $0x84] sm:$0xf]  ;;  %v657_v49 = vrot.slane %v653_v39, 4  ;;  %v9424_v34 = vcombine.low %v1207_v59, %v1217_v8  ;;  %v664_v28 = vor.u32 %v662_v36, %v661_v21  ;;  %v9361_v30 = vrot.slane %v1349_v29, 9 }
 0x10d   : > { %v1221_v18 = vrot.slane %v1219_v46, 4  ;;  %v1224_v27 = vrot.slane %v1222_v62, 5  ;;  %v1538_v37 = vld [vmem:[#allocation2 + $0x88] sm:$0xf]  ;;  %v867_v55 = vsel %vm11853_vm11, %v656_v32, %v866_v60  ;;  %v666_v14 = vrot.slane %v661_v21, 4 }
 0x10e   : > { %v12383_v9 = vld [vmem:[#allocation2 + $0x88] sm:$0xf]  ;;  %4050 = vmatprep.mubr.bf16.mxu0 %v9424_v34  ;;  %v9456_v7 = vcombine.low %v12379_v57, %v1538_v37  ;;  %868 = vst [vmem:[#allocation2 + $0x90] sm:$0xf] %v867_v55  ;;  %v665_v62 = vsel %vm11841_vm10, %v657_v49, %v664_v28  ;;  %v9943_v29 = vpack.c.bf16 %v12367_v45, %v12367_v45  ;;  %v873_v55 = vld [vmem:[#allocation2 + $0x9c] sm:$0xf] }
 0x10f   : > { %v1225_v31 = vor.u32 %v1224_v27, %v1221_v18  ;;  %v1228_v59 = vshll.u32 %v12383_v9, 16  ;;  %v1232_v39 = vshrl.u32 %v12383_v9, 16  ;;  %4051 = vmatmul.mubr.bf16.gmra.mrb[40].mxu0 %v9408_v41  ;;  %v946_v46 = vld [vmem:[#allocation2 + $0x8c] sm:$0x1]  ;;  %v1484_v36 = vrot.slane %v12383_v9, 5 }
 0x110   : > { %v871_v60 = vsel %vm11864_vm12, %v666_v14, %v870_v15  ;;  %4211 = vmatprep.mubr.bf16.mxu1 %v9456_v7  ;;  %v1238_v34 = vshll.u32 %v946_v46, 16  ;;  %869 = vst [vmem:[#allocation2 + $0x94] sm:$0xf] %v665_v62  ;;  %v1487_v49 = vrot.slane %v946_v46, 5  ;;  %v668_v18 = vshrl.u32 %v9942_v40, 16  ;;  %v326_v27 = vld [vmem:[%s11784_s10 + $0xd0] sm:$0xff] }
 0x111   : > { %v1226_v8 = vrot.slane %v1225_v31, 4  ;;  %v1230_v32 = vrot.slane %v1228_v59, 5  ;;  %v1234_v21 = vrot.slane %v1232_v39, 4  ;;  %872 = vst [vmem:[#allocation2 + $0x98] sm:$0x1] %v871_v60  ;;  %4212 = vmatmul.mubr.bf16.gmra.mrb[40].mxu1 %v9440_v47  ;;  %v1486_v41 = vrot.slane %v1484_v36, 4 }
 0x112   : > { %v1240_v28 = vrot.slane %v1238_v34, 5  ;;  %v671_v14 = vshll.u32 %v9942_v40, 16  ;;  %v1485_v7 = vsel %vm11879_vm13, %v9361_v30, %v1484_v36  ;;  %v670_v31 = vrot.slane %v668_v18, 7  ;;  %v327_v62 = vld [vmem:[%s11784_s10 + $0xd8] sm:$0xff] }
 0x113   : > { %v1235_v37 = vor.u32 %v1234_v21, %v1230_v32  ;;  %v676_v59 = vshrl.u32 %v9943_v29, 16  ;;  %v679_v39 = vshll.u32 %v9943_v29, 16  ;;  %v1231_v60 = vsel %vm11813_vm6, %v1226_v8, %v1230_v32 }
 0x114   : > { %v1488_v46 = vsel %vm11879_vm13, %v1486_v41, %v1487_v49  ;;  %v12407_v45 = vmax.f32 %v326_v27, 0.0  ;;  %v673_v34 = vor.u32 %v671_v14, %v670_v31  ;;  %v674_v30 = vrot.slane %v670_v31, 4 }
 0x115   : > { %v1236_v47 = vrot.slane %v1235_v37, 4  ;;  %v12409_v21 = vld [vmem:[#allocation2 + $0x90] sm:$0xf]  ;;  %v678_v36 = vrot.slane %v676_v59, 7  ;;  %v9409_v8 = vcombine.low %v12371_v43, %v12383_v9  ;;  %v12418_v41 = vmax.f32 %v327_v62, 0.0 }
 0x116   : > { %16020 = vst [vmem:[#allocation43_spill] sm:$0xff] %v12407_v45  ;;  %v12411_v40 = vld [vmem:[#allocation2 + $0x90] sm:$0xf]  ;;  %v9441_v37 = vcombine.low %v1485_v7, %v1488_v46  ;;  %v874_v31 = vsel %vm11853_vm11, %v673_v34, %v873_v55 }
 0x117   : > { %v1241_v29 = vsel %vm11813_vm6, %v1236_v47, %v1240_v28  ;;  %v1243_v32 = vshrl.u32 %v12411_v40, 16  ;;  %v1350_v18 = vld [vmem:[#allocation2 + $0x90] sm:$0xe]  ;;  %16021 = vst [vmem:[#allocation44_spill] sm:$0xff] %v12418_v41  ;;  %v1540_v27 = vld [vmem:[#allocation2 + $0x94] sm:$0xf]  ;;  %v681_v14 = vor.u32 %v679_v39, %v678_v36  ;;  %v9944_v39 = vpack.c.bf16 %v12407_v45, %v12407_v45 }
 0x118   : > { %v9425_v49 = vcombine.low %v1231_v60, %v1241_v29  ;;  %v12420_v15 = vld [vmem:[#allocation2 + $0x94] sm:$0xf]  ;;  %v947_v38 = vld [vmem:[#allocation2 + $0x98] sm:$0x1]  ;;  %v9457_v28 = vcombine.low %v12409_v21, %v1540_v27  ;;  %v1246_v43 = vshll.u32 %v12411_v40, 16  ;;  %v9362_v34 = vrot.slane %v1350_v18, 9 }
 0x119   : > { %v1245_v59 = vrot.slane %v1243_v32, 4  ;;  %v1252_v9 = vshll.u32 %v12420_v15, 16  ;;  %875 = vst [vmem:[#allocation2 + $0x9c] sm:$0xf] %v874_v31  ;;  %v1256_v62 = vshrl.u32 %v12420_v15, 16  ;;  %v1262_v60 = vshll.u32 %v947_v38, 16 }
 0x11a   : > { %4058 = vmatprep.mubr.bf16.mxu0 %v9425_v49  ;;  %v682_v7 = vsel %vm11841_vm10, %v674_v30, %v681_v14  ;;  %v877_v47 = vld [vmem:[#allocation2 + $0xa4] sm:$0x1]  ;;  %4219 = vmatprep.mubr.bf16.mxu1 %v9457_v28  ;;  %v1248_v55 = vrot.slane %v1246_v43, 5  ;;  %v1491_v29 = vrot.slane %v12420_v15, 5  ;;  %v1494_v27 = vrot.slane %v947_v38, 5 }
 0x11b   : > { %4059 = vmatmul.mubr.bf16.gmra.mrb[44].mxu0 %v9409_v8  ;;  %v1254_v46 = vrot.slane %v1252_v9, 5  ;;  %876 = vst [vmem:[#allocation2 + $0xa0] sm:$0xf] %v682_v7  ;;  %4220 = vmatmul.mubr.bf16.gmra.mrb[44].mxu1 %v9441_v37  ;;  %v1258_v49 = vrot.slane %v1256_v62, 4  ;;  %v683_v31 = vrot.slane %v678_v36, 4  ;;  %v1264_v30 = vrot.slane %v1262_v60, 5 }
 0x11c   : > { %v1249_v3 = vor.u32 %v1248_v55, %v1245_v59  ;;  %v1493_v14 = vrot.slane %v1491_v29, 4  ;;  %v9945_v45 = vpack.c.bf16 %v12418_v41, %v12418_v41  ;;  %v685_v43 = vshrl.u32 %v9944_v39, 16  ;;  %v12442_v37 = vld [vmem:[#allocation2 + $0x18] sm:$0xf]  ;;  %v12444_v59 = vld [vmem:[#allocation2 + $0x1c] sm:$0xf] }
 0x11d   : > { %v1259_v8 = vor.u32 %v1258_v49, %v1254_v46  ;;  %v878_v28 = vsel %vm11864_vm12, %v683_v31, %v877_v47  ;;  %v688_v18 = vshll.u32 %v9944_v39, 16  ;;  %v1492_v7 = vsel %vm11879_vm13, %v9362_v34, %v1491_v29  ;;  %v880_v31 = vld [vmem:[#allocation2 + $0xa8] sm:$0xf] }
 0x11e   : > { %v1250_v9 = vrot.slane %v1249_v3, 4  ;;  %v1495_v38 = vsel %vm11879_vm13, %v1493_v14, %v1494_v27  ;;  %879 = vst [vmem:[#allocation2 + $0xa4] sm:$0x1] %v878_v28  ;;  %v693_v36 = vshrl.u32 %v9945_v45, 16  ;;  %v687_v47 = vrot.slane %v685_v43, 7 }
 0x11f   : > { %v1260_v62 = vrot.slane %v1259_v8, 4  ;;  %v9410_v29 = vcombine.low %v12411_v40, %v12420_v15  ;;  %v696_v27 = vshll.u32 %v9945_v45, 16  ;;  %v9442_v28 = vcombine.low %v1492_v7, %v1495_v38  ;;  %v884_v45 = vld [vmem:[#allocation2 + $0xb0] sm:$0x1]  ;;  %v328_v7 = vld [vmem:[%s11784_s10 + $0xe0] sm:$0xff] }
 0x120   : > { %v12446_v60 = vld [vmem:[#allocation2 + $0x9c] sm:$0xf]  ;;  %v1255_v34 = vsel %vm11813_vm6, %v1250_v9, %v1254_v46  ;;  %v690_v39 = vor.u32 %v688_v18, %v687_v47 }
 0x121   : > { %16022 = vst [vmem:[#allocation45_spill] sm:$0xff] %v12446_v60  ;;  %v12448_v55 = vld [vmem:[#allocation2 + $0x9c] sm:$0xf]  ;;  %v1265_v14 = vsel %vm11813_vm6, %v1260_v62, %v1264_v30  ;;  %v691_v30 = vrot.slane %v687_v47, 4  ;;  %v695_v62 = vrot.slane %v693_v36, 7 }
 0x122   : > { %v1267_v49 = vshrl.u32 %v12448_v55, 16  ;;  %v1542_v8 = vld [vmem:[#allocation2 + $0xa0] sm:$0xf]  ;;  %v1270_v32 = vshll.u32 %v12448_v55, 16  ;;  %v9426_v3 = vcombine.low %v1255_v34, %v1265_v14  ;;  %v1351_v58 = vld [vmem:[#allocation2 + $0x9c] sm:$0xe]  ;;  %v881_v34 = vsel %vm11853_vm11, %v690_v39, %v880_v31 }
 0x123   : > { %v12463_v43 = vld [vmem:[#allocation2 + $0xa0] sm:$0xf]  ;;  %v9458_v46 = vcombine.low %v12446_v60, %v1542_v8  ;;  %v698_v8 = vor.u32 %v696_v27, %v695_v62  ;;  %882 = vst [vmem:[#allocation2 + $0xa8] sm:$0xf] %v881_v34  ;;  %v700_v11 = vrot.slane %v695_v62, 4  ;;  %v330_v31 = vld [vmem:[%s11784_s10 + $0xf0] sm:$0xff] }
 0x124   : > { %v1269_v15 = vrot.slane %v1267_v49, 4  ;;  %v1276_v40 = vshll.u32 %v12463_v43, 16  ;;  %v1272_v9 = vrot.slane %v1270_v32, 5  ;;  %v1280_v41 = vshrl.u32 %v12463_v43, 16  ;;  %4066 = vmatprep.mubr.bf16.mxu0 %v9426_v3  ;;  %v329_v14 = vld [vmem:[%s11784_s10 + $0xe8] sm:$0xff] }
 0x125   : > { %4227 = vmatprep.mubr.bf16.mxu1 %v9458_v46  ;;  %v1498_v49 = vrot.slane %v12463_v43, 5  ;;  %4067 = vmatmul.mubr.bf16.gmra.mrb[48].mxu0 %v9410_v29  ;;  %v948_v32 = vld [vmem:[#allocation2 + $0xa4] sm:$0x1]  ;;  %v9363_v3 = vrot.slane %v1351_v58, 9  ;;  %v699_v39 = vsel %vm11841_vm10, %v691_v30, %v698_v8  ;;  %v885_v29 = vsel %vm11864_vm12, %v700_v11, %v884_v45 }
 0x126   : > { %v1278_v18 = vrot.slane %v1276_v40, 5  ;;  %4228 = vmatmul.mubr.bf16.gmra.mrb[48].mxu1 %v9442_v28  ;;  %v1273_v47 = vor.u32 %v1272_v9, %v1269_v15  ;;  %v1282_v36 = vrot.slane %v1280_v41, 4  ;;  %v1286_v38 = vshll.u32 %v948_v32, 16  ;;  %v331_v28 = vld [vmem:[%s11784_s10 + $0xf8] sm:$0xff]  ;;  %883 = vst [vmem:[#allocation2 + $0xac] sm:$0xf] %v699_v39 }
 0x127   : > { %v1500_v46 = vrot.slane %v1498_v49, 4  ;;  %v1501_v40 = vrot.slane %v948_v32, 5  ;;  %886 = vst [vmem:[#allocation2 + $0xb0] sm:$0x1] %v885_v29  ;;  %v12484_v58 = vmax.f32 %v328_v7, 0.0  ;;  %v12486_v15 = vmax.f32 %v329_v14, 0.0 }
 0x128   : > { %v1274_v10 = vrot.slane %v1273_v47, 4  ;;  %v1283_v17 = vor.u32 %v1282_v36, %v1278_v18  ;;  %v1288_v27 = vrot.slane %v1286_v38, 5  ;;  %v1949_v9 = vld [vmem:[#allocation2 + $0xc] sm:$0xe]  ;;  %v9411_v34 = vcombine.low %v12448_v55, %v12463_v43  ;;  %v12511_v8 = vld [vmem:[#allocation2 + $0x24] sm:$0xf] }
 0x129   : > { %16023 = vst [vmem:[#allocation46_spill] sm:$0xff] %v12484_v58  ;;  %16024 = vst [vmem:[#allocation47_spill] sm:$0xff] %v12486_v15  ;;  %v1499_v38 = vsel %vm11879_vm13, %v9363_v3, %v1498_v49  ;;  %v9946_v7 = vpack.c.bf16 %v12484_v58, %v12484_v58  ;;  %v9947_v14 = vpack.c.bf16 %v12486_v15, %v12486_v15  ;;  %v9366_v36 = vrot.slane %v1949_v9, 9  ;;  %v12513_v3 = vld [vmem:[#allocation2 + $0x28] sm:$0xf]  ;;  %s11504_s10 = scalar_lea.vmem %s11503_s26, 8192 }
 0x12a   : > { %v1279_v11 = vsel %vm11813_vm6, %v1274_v10, %v1278_v18  ;;  %v1284_v45 = vrot.slane %v1283_v17, 4  ;;  %v1502_v47 = vsel %vm11879_vm13, %v1500_v46, %v1501_v40  ;;  %v12504_v10 = vmax.f32 %v330_v31, 0.0  ;;  %v12508_v43 = vld [vmem:[#allocation2 + $0xa8] sm:$0xf]  ;;  %v11337_v31 = vld [vmem:[#allocation2 + $0x10] sm:$0xf]  ;;  %p11506_p9 = scmp.lt.s32.totalorder %s11504_s10, %s11498_s25 }
 0x12b   : > { %v12506_v17 = vmax.f32 %v331_v28, 0.0  ;;  %v702_v18 = vshrl.u32 %v9946_v7, 16  ;;  %v12515_v39 = vld [vmem:[#allocation2 + $0xa8] sm:$0xf]  ;;  %v1291_v29 = vshrl.u32 %v12508_v43, 16  ;;  %v1294_v46 = vshll.u32 %v12508_v43, 16 }
 0x12c   : > { %v1289_v32 = vsel %vm11813_vm6, %v1284_v45, %v1288_v27  ;;  %16025 = vst [vmem:[#allocation48_spill] sm:$0xff] %v12504_v10  ;;  %16027 = vst [vmem:[#allocation50_spill] sm:$0xff] %v12515_v39  ;;  %v705_v40 = vshll.u32 %v9946_v7, 16  ;;  %v2015_v28 = vrot.slane %v11337_v31, 5  ;;  %v710_v45 = vshrl.u32 %v9947_v14, 16  ;;  %p11507_p12 = por %p11506_p9, %p11505_p7 }
 0x12d   : > { %16026 = vst [vmem:[#allocation49_spill] sm:$0xff] %v12506_v17  ;;  %v9427_v55 = vcombine.low %v1279_v11, %v1289_v32  ;;  %v704_v11 = vrot.slane %v702_v18, 7  ;;  %v713_v32 = vshll.u32 %v9947_v14, 16  ;;  %v12520_v9 = vld [vmem:[#allocation2 + $0xa8] sm:$0xe]  ;;  %v9443_v62 = vcombine.low %v1499_v38, %v1502_v47 }
 0x12e   : > { %v1544_v30 = vld [vmem:[#allocation2 + $0xac] sm:$0xf]  ;;  %v12524_v49 = vld [vmem:[#allocation2 + $0xb0] sm:$0x1]  ;;  %v9948_v7 = vpack.c.bf16 %v12504_v10, %v12504_v10  ;;  %v1293_v31 = vrot.slane %v1291_v29, 4  ;;  %v9364_v10 = vrot.slane %v12520_v9, 9  ;;  %v12544_v23 = vsel %vm11879_vm13, %v9366_v36, %v2015_v28  ;;  %p11508_p2 = pnand %p11507_p12, %p11501_p3 }
 0x12f   : > { %4074 = vmatprep.mubr.bf16.mxu0 %v9427_v55  ;;  %v12522_v41 = vld [vmem:[#allocation2 + $0xac] sm:$0xf]  ;;  %v12530_v55 = vpack.c.bf16 %v12506_v17, %v12506_v17  ;;  %v9459_v14 = vcombine.low %v12515_v39, %v1544_v30  ;;  %v887_v47 = vld [vmem:[#allocation2 + $0xb4] sm:$0xf]  ;;  %v1310_v15 = vshll.u32 %v12524_v49, 16  ;;  %v707_v58 = vor.u32 %v705_v40, %v704_v11 }
 0x130   : > { %4075 = vmatmul.mubr.bf16.gmra.mrb[52].mxu0 %v9411_v34  ;;  %v1296_v34 = vrot.slane %v1294_v46, 5  ;;  %v1300_v38 = vshll.u32 %v12522_v41, 16  ;;  %v1304_v27 = vshrl.u32 %v12522_v41, 16  ;;  %v708_v25 = vrot.slane %v704_v11, 4  ;;  %v891_v46 = vld [vmem:[#allocation2 + $0xbc] sm:$0x1] }
 0x131   : > { %4235 = vmatprep.mubr.bf16.mxu1 %v9459_v14  ;;  %v712_v5 = vrot.slane %v710_v45, 7  ;;  %v888_v30 = vsel %vm11853_vm11, %v707_v58, %v887_v47  ;;  %v1505_v29 = vrot.slane %v12522_v41, 5  ;;  %v12546_v40 = vld [vmem:[#allocation2 + $0x30] sm:$0xf]  ;;  %v1312_v14 = vrot.slane %v1310_v15, 5 }
 0x132   : > { %v1297_v17 = vor.u32 %v1296_v34, %v1293_v31  ;;  %v1302_v61 = vrot.slane %v1300_v38, 5  ;;  %4236 = vmatmul.mubr.bf16.gmra.mrb[52].mxu1 %v9443_v62  ;;  %v1306_v18 = vrot.slane %v1304_v27, 4  ;;  %889 = vst [vmem:[#allocation2 + $0xb4] sm:$0xf] %v888_v30  ;;  %v12548_v45 = vld [vmem:[#allocation2 + $0x34] sm:$0xf]  ;;  %v9412_v30 = vcombine.low %v12508_v43, %v12522_v41 }
 0x133   : > { %v715_v31 = vor.u32 %v713_v32, %v712_v5  ;;  %v717_v11 = vrot.slane %v712_v5, 4  ;;  %v1508_v27 = vrot.slane %v12524_v49, 5  ;;  %v719_v58 = vshrl.u32 %v9948_v7, 16  ;;  %v894_v32 = vld [vmem:[#allocation2 + $0xc0] sm:$0xf] }
 0x134   : > { %v1298_v9 = vrot.slane %v1297_v17, 4  ;;  %v1307_v62 = vor.u32 %v1306_v18, %v1302_v61  ;;  %v1507_v38 = vrot.slane %v1505_v29, 4  ;;  %v722_v15 = vshll.u32 %v9948_v7, 16 }
 0x135   : > { %v716_v36 = vsel %vm11841_vm10, %v708_v25, %v715_v31  ;;  %v892_v17 = vsel %vm11864_vm12, %v717_v11, %v891_v46  ;;  %v721_v49 = vrot.slane %v719_v58, 7  ;;  %v727_v18 = vshrl.u32 %v12530_v55, 16  ;;  %v12571_v58 = vld [vmem:[#allocation2 + $0x40] sm:$0xf] }
 0x136   : > { %v1303_v5 = vsel %vm11813_vm6, %v1298_v9, %v1302_v61  ;;  %v1308_v47 = vrot.slane %v1307_v62, 4  ;;  %890 = vst [vmem:[#allocation2 + $0xb8] sm:$0xf] %v716_v36  ;;  %893 = vst [vmem:[#allocation2 + $0xbc] sm:$0x1] %v892_v17  ;;  %v730_v25 = vshll.u32 %v12530_v55, 16  ;;  %v1506_v41 = vsel %vm11879_vm13, %v9364_v10, %v1505_v29 }
 0x137   : > { %v16028_v31 = vshll.u32 %v12481_v4, 16  ;;  %v2017_v46 = vrot.slane %v2015_v28, 4  ;;  %v724_v11 = vor.u32 %v722_v15, %v721_v49  ;;  %v725_v61 = vrot.slane %v721_v49, 4  ;;  %v12569_v62 = vld [vmem:[#allocation2 + $0x3c] sm:$0xf] }
 0x138   : > { %v1313_v7 = vsel %vm11813_vm6, %v1308_v47, %v1312_v14  ;;  %v12567_v9 = vrot.slane %v727_v18, 7  ;;  %v2018_v43 = vrot.slane %v12481_v4, 5  ;;  %v2175_v55 = vshrl.u32 %v12442_v37, 16  ;;  %v12577_v28 = vld [vmem:[#allocation2 + $0x48] sm:$0xf] }
 0x139   : > { %v1587_v34 = vrot.slane %v16028_v31, 5  ;;  %v9428_v36 = vcombine.low %v1303_v5, %v1313_v7  ;;  %v12579_v17 = vld [vmem:[#allocation2 + $0x4c] sm:$0xf]  ;;  %v1509_v14 = vsel %vm11879_vm13, %v1507_v38, %v1508_v27  ;;  %v12583_v15 = vld [vmem:[#allocation2 + $0xb4] sm:$0xf]  ;;  %v895_v5 = vsel %vm11853_vm11, %v724_v11, %v894_v32 }
 0x13a   : > { %16029 = vst [vmem:[#allocation51_spill] sm:$0xff] %v12567_v9  ;;  %v732_v47 = vor.u32 %v730_v25, %v12567_v9  ;;  %v1353_v49 = vld [vmem:[#allocation2 + $0xb4] sm:$0xe]  ;;  %v1315_v18 = vshrl.u32 %v12583_v15, 16  ;;  %v1318_v27 = vshll.u32 %v12583_v15, 16  ;;  %v12605_v31 = vsel %vm11879_vm13, %v2017_v46, %v2018_v43 }
 0x13b   : > { %v1588_v4 = vsel %vm11813_vm6, %v12035_v42, %v1587_v34  ;;  %v12591_v10 = vld [vmem:[#allocation2 + $0x54] sm:$0xf]  ;;  %4082 = vmatprep.mubr.bf16.mxu0 %v9428_v36  ;;  %896 = vst [vmem:[#allocation2 + $0xc0] sm:$0xf] %v895_v5  ;;  %v12599_v25 = vld [vmem:[#allocation2 + $0x58] sm:$0xf]  ;;  %v9444_v38 = vcombine.low %v1506_v41, %v1509_v14  ;;  %v16030_v46 = vsel %vm11813_vm6, %v11983_v2, %v11941_v63 }
 0x13c   : > { %v1545_v29 = vld [vmem:[#allocation2 + $0xb4] sm:$0xf]  ;;  %4083 = vmatmul.mubr.bf16.gmra.mrb[56].mxu0 %v9412_v30  ;;  %v733_v42 = vsel %vm11841_vm10, %v725_v61, %v732_v47  ;;  %v9365_v34 = vrot.slane %v1353_v49, 9  ;;  %v2177_v7 = vrot.slane %v2175_v55, 4  ;;  %v12607_v11 = vld [vmem:[#allocation2 + $0x60] sm:$0xf]  ;;  %v12620_v61 = vcombine.low %v16030_v46, %v1588_v4 }
 0x13d   : > { %v12609_v36 = vld [vmem:[#allocation2 + $0x64] sm:$0xf]  ;;  %v1546_v5 = vld [vmem:[#allocation2 + $0xb8] sm:$0xf]  ;;  %v950_v32 = vld [vmem:[#allocation2 + $0xbc] sm:$0x1] }
 0x13e   : > { %v12611_v16 = vld [vmem:[#allocation2 + $0xb8] sm:$0xf]  ;;  %897 = vst [vmem:[#allocation2 + $0xc4] sm:$0xf] %v733_v42  ;;  %v9460_v55 = vcombine.low %v1545_v29, %v1546_v5  ;;  %v1317_v47 = vrot.slane %v1315_v18, 4  ;;  %v1320_v41 = vrot.slane %v1318_v27, 5 }
 0x13f   : > { %v1324_v14 = vshll.u32 %v12611_v16, 16  ;;  %v12625_v49 = vld [vmem:[#allocation2 + $0x6c] sm:$0xf]  ;;  %v12627_v42 = vld [vmem:[#allocation2 + $0x70] sm:$0xf]  ;;  %v1328_v30 = vshrl.u32 %v12611_v16, 16 }
 0x140   : > { %v1334_v22 = vshll.u32 %v950_v32, 16  ;;  %v1512_v48 = vrot.slane %v12611_v16, 5  ;;  %4243 = vmatprep.mubr.bf16.mxu1 %v9460_v55  ;;  %v1321_v2 = vor.u32 %v1320_v41, %v1317_v47  ;;  %v1515_v29 = vrot.slane %v950_v32, 5  ;;  %v2158_v18 = vld [vmem:[#allocation2 + $0x20] sm:$0x1] }
 0x141   : > { %v1326_v4 = vrot.slane %v1324_v14, 5  ;;  %v2178_v27 = vshll.u32 %v12442_v37, 16  ;;  %4244 = vmatmul.mubr.bf16.gmra.mrb[56].mxu1 %v9444_v38  ;;  %v1330_v5 = vrot.slane %v1328_v30, 4  ;;  %v2184_v32 = vshll.u32 %v12444_v59, 16 }
 0x142   : > { %v1513_v46 = vsel %vm11879_vm13, %v9365_v34, %v1512_v48  ;;  %v1514_v43 = vrot.slane %v1512_v48, 4  ;;  %v1322_v63 = vrot.slane %v1321_v2, 4  ;;  %v1547_v55 = vld [vmem:[#allocation2 + $0xc0] sm:$0xf]  ;;  %v2188_v41 = vshrl.u32 %v12444_v59, 16 }
 0x143   : > { %v2180_v47 = vrot.slane %v2178_v27, 5  ;;  %v1331_v14 = vor.u32 %v1330_v5, %v1326_v4  ;;  %v1336_v38 = vrot.slane %v1334_v22, 5  ;;  %v9413_v30 = vcombine.low %v12583_v15, %v12611_v16  ;;  %v11338_v22 = vld [vmem:[#allocation2 + $0x1c] sm:$0xf] }
 0x144   : > { %v1516_v48 = vsel %vm11879_vm13, %v1514_v43, %v1515_v29  ;;  %v1327_v34 = vsel %vm11813_vm6, %v1322_v63, %v1326_v4  ;;  %v2186_v13 = vrot.slane %v2184_v32, 5  ;;  %v2190_v26 = vrot.slane %v2188_v41, 4  ;;  %v2159_v41 = vld [vmem:[#allocation2 + $0x2c] sm:$0x1] }
 0x145   : > { %v1548_v0 = vld [vmem:[#allocation2 + $0xc4] sm:$0xf]  ;;  %v9445_v51 = vcombine.low %v1513_v46, %v1516_v48  ;;  %v2181_v2 = vor.u32 %v2180_v47, %v2177_v7  ;;  %v1332_v27 = vrot.slane %v1331_v14, 4  ;;  %v2194_v9 = vshll.u32 %v2158_v18, 16  ;;  %v12659_v46 = vld [vmem:[#allocation2 + $0x78] sm:$0xf] }
 0x146   : > { %v9461_v20 = vcombine.low %v1547_v55, %v1548_v0  ;;  %v9367_v5 = vrot.slane %v1950_v1, 9  ;;  %v2022_v60 = vrot.slane %v11338_v22, 5  ;;  %v2025_v16 = vrot.slane %v12636_v52, 5  ;;  %v12661_v55 = vld [vmem:[#allocation2 + $0x7c] sm:$0xf] }
 0x147   : > { %v2182_v39 = vrot.slane %v2181_v2, 4  ;;  %v1337_v15 = vsel %vm11813_vm6, %v1332_v27, %v1336_v38  ;;  %v2191_v43 = vor.u32 %v2190_v26, %v2186_v13  ;;  %v2196_v63 = vrot.slane %v2194_v9, 5  ;;  %v1951_v14 = vld [vmem:[#allocation2 + $0x24] sm:$0xe] }
 0x148   : > { %4251 = vmatprep.mubr.bf16.mxu1 %v9461_v20  ;;  %v16031_v4 = vshrl.u32 %v11933_v50, 16  ;;  %v9429_v29 = vcombine.low %v1327_v34, %v1337_v15  ;;  %v12657_v1 = vsel %vm11879_vm13, %v9367_v5, %v2022_v60  ;;  %v2024_v18 = vrot.slane %v2022_v60, 4  ;;  %v1959_v34 = vld [vmem:[#allocation2 + $0x84] sm:$0xe] }
 0x149   : > { %v2187_v0 = vsel %vm11813_vm6, %v2182_v39, %v2186_v13  ;;  %4252 = vmatmul.mubr.bf16.gmra.mrb[60].mxu1 %v9445_v51  ;;  %v2192_v20 = vrot.slane %v2191_v43, 4  ;;  %v16032_v26 = vshll.u32 %v11933_v50, 16  ;;  %v1599_v47 = vshll.u32 %v11338_v22, 16 }
 0x14a   : > { %v1592_v7 = vrot.slane %v16031_v4, 4  ;;  %v1603_v32 = vshrl.u32 %v11338_v22, 16  ;;  %4090 = vmatprep.mubr.bf16.mxu0 %v9429_v29  ;;  %v2026_v13 = vsel %vm11879_vm13, %v2024_v18, %v2025_v16  ;;  %v1609_v39 = vshll.u32 %v12636_v52, 16  ;;  %v1551_v16 = vld [vmem:[#allocation2 + $0x2c] sm:$0x1] }
 0x14b   : > { %v1595_v9 = vrot.slane %v16032_v26, 5  ;;  %v2199_v60 = vshrl.u32 %v12511_v8, 16  ;;  %v2202_v38 = vshll.u32 %v12511_v8, 16  ;;  %4091 = vmatmul.mubr.bf16.gmra.mrb[60].mxu0 %v9413_v30  ;;  %v2197_v51 = vsel %vm11813_vm6, %v2192_v20, %v2196_v63 }
 0x14c   : > { %v1601_v48 = vrot.slane %v1599_v47, 5  ;;  %v16033_v2 = vcombine.low %v12544_v23, %v12605_v31  ;;  %v9510_v27 = vcombine.low %v2187_v0, %v2197_v51  ;;  %v9479_v52 = vcombine.low %v12657_v1, %v2026_v13 }
 0x14d   : > { %v1596_v50 = vor.u32 %v1595_v9, %v1592_v7  ;;  %v1605_v5 = vrot.slane %v1603_v32, 4  ;;  %v2201_v22 = vrot.slane %v2199_v60, 4  ;;  %v2204_v30 = vrot.slane %v2202_v38, 5  ;;  %v11339_v9 = vld [vmem:[#allocation2 + $0x28] sm:$0xf] }
 0x14e   : > { %4292 = vmatprep.mubr.bf16.mxu0 %v16033_v2  ;;  %v2208_v43 = vshll.u32 %v12513_v3, 16  ;;  %v2212_v63 = vshrl.u32 %v12513_v3, 16  ;;  %4453 = vmatprep.mubr.bf16.mxu1 %v9510_v27  ;;  %v1611_v7 = vrot.slane %v1609_v39, 5  ;;  %v2218_v29 = vshll.u32 %v2159_v41, 16 }
 0x14f   : > { %v1597_v15 = vrot.slane %v1596_v50, 4  ;;  %v1606_v4 = vor.u32 %v1605_v5, %v1601_v48  ;;  %v9368_v18 = vrot.slane %v1951_v14, 9  ;;  %v2205_v31 = vor.u32 %v2204_v30, %v2201_v22  ;;  %v11196_v50 = vld [vmem:[#allocation6 + $0x208] sm:$0xff]   ;;  %v2160_v30 = vld [vmem:[#allocation2 + $0x38] sm:$0x1] }
 0x150   : > { %v2210_v0 = vrot.slane %v2208_v43, 5  ;;  %v2214_v1 = vrot.slane %v2212_v63, 4  ;;  %v2220_v26 = vrot.slane %v2218_v29, 5  ;;  %v2029_v47 = vrot.slane %v11339_v9, 5  ;;  %v11340_v43 = vld [vmem:[#allocation6 + $0x200] sm:$0xff]  }
 0x151   : > { %v1602_v23 = vsel %vm11813_vm6, %v1597_v15, %v1601_v48  ;;  %v1607_v20 = vrot.slane %v1606_v4, 4  ;;  %v2032_v32 = vrot.slane %v1551_v16, 5  ;;  %v16034_v13 = vcombine.low %v12442_v37, %v12444_v59 }
 0x152   : > { %v2206_v60 = vrot.slane %v2205_v31, 4  ;;  %v2215_v38 = vor.u32 %v2214_v1, %v2210_v0  ;;  %v16035_v41 = vshrl.u32 %v11970_v35, 16  ;;  %v16036_v39 = vshll.u32 %v11970_v35, 16  ;;  %v1952_v35 = vld [vmem:[#allocation2 + $0x30] sm:$0xe] }
 0x153   : > { %4454 = vmatmul.mubr.bf16.vlgmr.msra.gmra.mrb[64].mxu1 %v16034_v13  ;;  %v1612_v48 = vsel %vm11813_vm6, %v1607_v20, %v1611_v7  ;;  %v2030_v2 = vsel %vm11879_vm13, %v9368_v18, %v2029_v47  ;;  %v2031_v27 = vrot.slane %v2029_v47, 4  ;;  %v1623_v5 = vshll.u32 %v11339_v9, 16  ;;  %4293 = vmatmul.mubr.bf16.vlgmr.msra.gmra.mrb[64].mxu0 %v12620_v61  ;;  %v12698_v18 = vld [vmem:[#allocation2 + $0x38] sm:$0x1]  ;;  %v11199_v61 = vld [vmem:[#allocation6 + $0x210] sm:$0xff]  }
 0x154   : > { %v1616_v14 = vrot.slane %v16035_v41, 4  ;;  %v1619_v51 = vrot.slane %v16036_v39, 5  ;;  %v9463_v37 = vcombine.low %v1602_v23, %v1612_v48  ;;  %v2211_v59 = vsel %vm11813_vm6, %v2206_v60, %v2210_v0  ;;  %10928 = vmatpush3.bf16.msra.mxu0 %v11340_v43  ;;  %4300 = vmatprep.mubr.bf16.mxu0 %v9479_v52 }
 0x155   : > { %v2216_v22 = vrot.slane %v2215_v38, 4  ;;  %v2033_v63 = vsel %vm11879_vm13, %v2031_v27, %v2032_v32  ;;  %v1625_v4 = vrot.slane %v1623_v5, 5  ;;  %v1627_v7 = vshrl.u32 %v11339_v9, 16  ;;  %10929 = vmatprep.subr.bf16.mxu0 %v11196_v50 }
 0x156   : > { %v1620_v15 = vor.u32 %v1619_v51, %v1616_v14  ;;  %v1633_v29 = vshll.u32 %v1551_v16, 16  ;;  %v9480_v31 = vcombine.low %v2030_v2, %v2033_v63  ;;  %v2223_v1 = vshrl.u32 %v12546_v40, 16  ;;  %v11341_v2 = vld [vmem:[#allocation2 + $0x34] sm:$0xf] }
 0x157   : > { %v2221_v23 = vsel %vm11813_vm6, %v2216_v22, %v2220_v26  ;;  %v1629_v47 = vrot.slane %v1627_v7, 4  ;;  %v2226_v13 = vshll.u32 %v12546_v40, 16  ;;  %v2232_v32 = vshll.u32 %v12548_v45, 16 }
 0x158   : > { %v1621_v0 = vrot.slane %v1620_v15, 4  ;;  %v9511_v20 = vcombine.low %v2211_v59, %v2221_v23  ;;  %v1635_v52 = vrot.slane %v1633_v29, 5  ;;  %v2225_v16 = vrot.slane %v2223_v1, 4  ;;  %10930 = vmatpush3.bf16.msra.mxu0 %v11196_v50  ;;  %v11202_v59 = vld [vmem:[#allocation6 + $0x218] sm:$0xff]  }
 0x159   : > { %v2236_v60 = vshrl.u32 %v12548_v45, 16  ;;  %v1630_v26 = vor.u32 %v1629_v47, %v1625_v4  ;;  %v2228_v38 = vrot.slane %v2226_v13, 5  ;;  %v2242_v41 = vshll.u32 %v2160_v30, 16  ;;  %10931 = vmatprep.subr.bf16.mxu0 %v11199_v61  ;;  %v2161_v13 = vld [vmem:[#allocation2 + $0x44] sm:$0x1] }
 0x15a   : > { %v1626_v9 = vsel %vm11813_vm6, %v1621_v0, %v1625_v4  ;;  %4461 = vmatprep.mubr.bf16.mxu1 %v9511_v20  ;;  %v9369_v14 = vrot.slane %v1952_v35, 9  ;;  %v16037_v39 = vcombine.low %v12511_v8, %v12513_v3  ;;  %v2234_v51 = vrot.slane %v2232_v32, 5 }
 0x15b   : > { %v2238_v48 = vrot.slane %v2236_v60, 4  ;;  %v2036_v27 = vrot.slane %v11341_v2, 5  ;;  %v2039_v5 = vrot.slane %v12698_v18, 5  ;;  %v1631_v22 = vrot.slane %v1630_v26, 4  ;;  %4301 = vmatmul.mubr.bf16.gmra.mrb[68].mxu0 %v9463_v37 }
 0x15c   : > { %4462 = vmatmul.mubr.bf16.gmra.mrb[68].mxu1 %v16037_v39  ;;  %v2229_v15 = vor.u32 %v2228_v38, %v2225_v16  ;;  %v2244_v43 = vrot.slane %v2242_v41, 5  ;;  %v16038_v63 = vshrl.u32 %v12053_v6, 16  ;;  %v16039_v35 = vshll.u32 %v12053_v6, 16  ;;  %4308 = vmatprep.mubr.bf16.mxu0 %v9480_v31  ;;  %v11205_v16 = vld [vmem:[#allocation6 + $0x220] sm:$0xff]  }
 0x15d   : > { %v2239_v50 = vor.u32 %v2238_v48, %v2234_v51  ;;  %v2037_v8 = vsel %vm11879_vm13, %v9369_v14, %v2036_v27  ;;  %v2038_v3 = vrot.slane %v2036_v27, 4  ;;  %v1636_v7 = vsel %vm11813_vm6, %v1631_v22, %v1635_v52  ;;  %10932 = vmatpush3.bf16.msra.mxu0 %v11199_v61  ;;  %v1553_v48 = vld [vmem:[#allocation2 + $0x44] sm:$0x1] }
 0x15e   : > { %v1640_v30 = vrot.slane %v16038_v63, 4  ;;  %v1643_v4 = vrot.slane %v16039_v35, 5  ;;  %v2230_v29 = vrot.slane %v2229_v15, 4  ;;  %v1647_v23 = vshll.u32 %v11341_v2, 16  ;;  %10933 = vmatprep.subr.bf16.mxu0 %v11202_v59 }
 0x15f   : > { %v1651_v0 = vshrl.u32 %v11341_v2, 16  ;;  %v9464_v1 = vcombine.low %v1626_v9, %v1636_v7  ;;  %v2240_v20 = vrot.slane %v2239_v50, 4  ;;  %v2040_v37 = vsel %vm11879_vm13, %v2038_v3, %v2039_v5  ;;  %v1953_v2 = vld [vmem:[#allocation2 + $0x3c] sm:$0xe]  ;;  %v11342_v3 = vld [vmem:[#allocation2 + $0x40] sm:$0xf] }
 0x160   : > { %v1644_v47 = vor.u32 %v1643_v4, %v1640_v30  ;;  %v2235_v6 = vsel %vm11813_vm6, %v2230_v29, %v2234_v51  ;;  %v9481_v31 = vcombine.low %v2037_v8, %v2040_v37  ;;  %v1649_v32 = vrot.slane %v1647_v23, 5 }
 0x161   : > { %v1653_v60 = vrot.slane %v1651_v0, 4  ;;  %v2245_v52 = vsel %vm11813_vm6, %v2240_v20, %v2244_v43  ;;  %v1657_v61 = vshll.u32 %v12698_v18, 16  ;;  %v2247_v9 = vshrl.u32 %v12569_v62, 16  ;;  %10934 = vmatpush3.bf16.msra.mxu0 %v11202_v59  ;;  %v11208_v18 = vld [vmem:[#allocation6 + $0x228] sm:$0xff]  }
 0x162   : > { %v1645_v26 = vrot.slane %v1644_v47, 4  ;;  %v9512_v38 = vcombine.low %v2235_v6, %v2245_v52  ;;  %v2250_v14 = vshll.u32 %v12569_v62, 16  ;;  %v2256_v39 = vshll.u32 %v12571_v58, 16  ;;  %10935 = vmatprep.subr.bf16.mxu0 %v11205_v16 }
 0x163   : > { %v1654_v41 = vor.u32 %v1653_v60, %v1649_v32  ;;  %v1659_v27 = vrot.slane %v1657_v61, 5  ;;  %v2249_v5 = vrot.slane %v2247_v9, 4  ;;  %v2260_v22 = vshrl.u32 %v12571_v58, 16  ;;  %4309 = vmatmul.mubr.bf16.gmra.mrb[72].mxu0 %v9464_v1  ;;  %v2162_v9 = vld [vmem:[#allocation2 + $0x50] sm:$0x1] }
 0x164   : > { %v1650_v51 = vsel %vm11813_vm6, %v1645_v26, %v1649_v32  ;;  %4469 = vmatprep.mubr.bf16.mxu1 %v9512_v38  ;;  %v2252_v43 = vrot.slane %v2250_v14, 5  ;;  %v2258_v63 = vrot.slane %v2256_v39, 5  ;;  %v2266_v30 = vshll.u32 %v2161_v13, 16  ;;  %4316 = vmatprep.mubr.bf16.mxu0 %v9481_v31  ;;  %v11211_v31 = vld [vmem:[#allocation6 + $0x230] sm:$0xff]  }
 0x165   : > { %v1655_v15 = vrot.slane %v1654_v41, 4  ;;  %v16040_v50 = vcombine.low %v12546_v40, %v12548_v45  ;;  %v2262_v59 = vrot.slane %v2260_v22, 4  ;;  %v9370_v8 = vrot.slane %v1953_v2, 9  ;;  %v12736_v7 = vpop.f32.mrb[0].mxu0  ;;  %10936 = vmatpush3.bf16.msra.mxu0 %v11205_v16  ;;  %v1954_v16 = vld [vmem:[#allocation2 + $0x48] sm:$0xe] }
 0x166   : > { %v2043_v35 = vrot.slane %v11342_v3, 5  ;;  %v2046_v4 = vrot.slane %v1553_v48, 5  ;;  %v2253_v23 = vor.u32 %v2252_v43, %v2249_v5  ;;  %v2268_v0 = vrot.slane %v2266_v30, 5  ;;  %v12742_v37 = vpop.f32.mrb[1].mxu0  ;;  %10937 = vmatprep.subr.bf16.mxu0 %v11208_v18  ;;  %v12757_v22 = vld [vmem:[#allocation2 + $0x50] sm:$0x1] }
 0x167   : > { %4470 = vmatmul.mubr.bf16.gmra.mrb[72].mxu1 %v16040_v50  ;;  %v1660_v29 = vsel %vm11813_vm6, %v1655_v15, %v1659_v27  ;;  %v16041_v20 = vshrl.u32 %v12095_v19, 16  ;;  %v2263_v45 = vor.u32 %v2262_v59, %v2258_v63  ;;  %v12746_v6 = vpop.f32.mrb[2].mxu0  ;;  %v16042_v60 = vshll.u32 %v12095_v19, 16 }
 0x168   : > { %v9465_v40 = vcombine.low %v1650_v51, %v1660_v29  ;;  %v2044_v47 = vsel %vm11879_vm13, %v9370_v8, %v2043_v35  ;;  %v2045_v13 = vrot.slane %v2043_v35, 4  ;;  %v2254_v32 = vrot.slane %v2253_v23, 4  ;;  %v12750_v38 = vpop.f32.mrb[3].mxu0 }
 0x169   : > { %v1664_v1 = vrot.slane %v16041_v20, 4  ;;  %v1667_v52 = vrot.slane %v16042_v60, 5  ;;  %v1671_v26 = vshll.u32 %v11342_v3, 16  ;;  %v1675_v61 = vshrl.u32 %v11342_v3, 16  ;;  %10938 = vmatpush3.bf16.msra.mxu0 %v11208_v18 }
 0x16a   : > { %v2264_v41 = vrot.slane %v2263_v45, 4  ;;  %v2047_v14 = vsel %vm11879_vm13, %v2045_v13, %v2046_v4  ;;  %v1681_v39 = vshll.u32 %v1553_v48, 16  ;;  %v2271_v2 = vshrl.u32 %v12577_v28, 16  ;;  %10939 = vmatprep.subr.bf16.mxu0 %v11211_v31 }
 0x16b   : > { %v2259_v51 = vsel %vm11813_vm6, %v2254_v32, %v2258_v63  ;;  %v9482_v27 = vcombine.low %v2044_v47, %v2047_v14  ;;  %v1668_v5 = vor.u32 %v1667_v52, %v1664_v1  ;;  %v1673_v19 = vrot.slane %v1671_v26, 5  ;;  %v11214_v63 = vld [vmem:[#allocation6 + $0x238] sm:$0xff]   ;;  %4317 = vmatmul.mubr.bf16.gmra.mrb[76].mxu0 %v9465_v40  ;;  %v11343_v1 = vld [vmem:[#allocation2 + $0x4c] sm:$0xf] }
 0x16c   : > { %v2269_v15 = vsel %vm11813_vm6, %v2264_v41, %v2268_v0  ;;  %v1677_v43 = vrot.slane %v1675_v61, 4  ;;  %v1683_v30 = vrot.slane %v1681_v39, 5  ;;  %v2273_v50 = vrot.slane %v2271_v2, 4 }
 0x16d   : > { %v9513_v59 = vcombine.low %v2259_v51, %v2269_v15  ;;  %v1669_v48 = vrot.slane %v1668_v5, 4  ;;  %v2274_v8 = vshll.u32 %v12577_v28, 16  ;;  %v2280_v3 = vshll.u32 %v12579_v17, 16  ;;  %4324 = vmatprep.mubr.bf16.mxu0 %v9482_v27  ;;  %10940 = vmatpush3.bf16.msra.mxu0 %v11211_v31 }
 0x16e   : > { %v1678_v35 = vor.u32 %v1677_v43, %v1673_v19  ;;  %v2284_v4 = vshrl.u32 %v12579_v17, 16  ;;  %v2290_v29 = vshll.u32 %v2162_v9, 16  ;;  %v9371_v18 = vrot.slane %v1954_v16, 9  ;;  %10941 = vmatprep.subr.bf16.mxu0 %v11214_v63 }
 0x16f   : > { %4477 = vmatprep.mubr.bf16.mxu1 %v9513_v59  ;;  %v1674_v23 = vsel %vm11813_vm6, %v1669_v48, %v1673_v19  ;;  %v2276_v0 = vrot.slane %v2274_v8, 5  ;;  %v2282_v20 = vrot.slane %v2280_v3, 5  ;;  %v2050_v45 = vrot.slane %v11343_v1, 5  ;;  %v1955_v59 = vld [vmem:[#allocation2 + $0x54] sm:$0xe] }
 0x170   : > { %v16043_v47 = vcombine.low %v12569_v62, %v12571_v58  ;;  %v1679_v13 = vrot.slane %v1678_v35, 4  ;;  %v2286_v40 = vrot.slane %v2284_v4, 4  ;;  %v2292_v32 = vrot.slane %v2290_v29, 5  ;;  %v1555_v3 = vld [vmem:[#allocation2 + $0x5c] sm:$0x1] }
 0x171   : > { %v2053_v60 = vrot.slane %v12757_v22, 5  ;;  %v2277_v52 = vor.u32 %v2276_v0, %v2273_v50  ;;  %v2051_v26 = vsel %vm11879_vm13, %v9371_v18, %v2050_v45  ;;  %v2052_v61 = vrot.slane %v2050_v45, 4  ;;  %v2163_v50 = vld [vmem:[#allocation2 + $0x5c] sm:$0x1]  ;;  %10942 = vmatpush3.bf16.msra.mxu0 %v11214_v63 }
 0x172   : > { %4478 = vmatmul.mubr.bf16.gmra.mrb[76].mxu1 %v16043_v47  ;;  %v16044_v9 = vshrl.u32 %v12159_v54, 16  ;;  %v1684_v41 = vsel %vm11813_vm6, %v1679_v13, %v1683_v30  ;;  %v2287_v62 = vor.u32 %v2286_v40, %v2282_v20  ;;  %v16045_v58 = vshll.u32 %v12159_v54, 16 }
 0x173   : > { %v1695_v39 = vshll.u32 %v11343_v1, 16  ;;  %v9466_v2 = vcombine.low %v1674_v23, %v1684_v41  ;;  %v2278_v51 = vrot.slane %v2277_v52, 4  ;;  %v2054_v31 = vsel %vm11879_vm13, %v2052_v61, %v2053_v60 }
 0x174   : > { %v1688_v16 = vrot.slane %v16044_v9, 4  ;;  %v1691_v14 = vrot.slane %v16045_v58, 5  ;;  %v1699_v27 = vshrl.u32 %v11343_v1, 16  ;;  %v2288_v5 = vrot.slane %v2287_v62, 4  ;;  %v11344_v9 = vld [vmem:[#allocation2 + $0x58] sm:$0xf] }
 0x175   : > { %v9483_v19 = vcombine.low %v2051_v26, %v2054_v31  ;;  %v1697_v43 = vrot.slane %v1695_v39, 5  ;;  %v2283_v30 = vsel %vm11813_vm6, %v2278_v51, %v2282_v20  ;;  %v1705_v54 = vshll.u32 %v12757_v22, 16  ;;  %4325 = vmatmul.mubr.bf16.gmra.mrb[80].mxu0 %v9466_v2 }
 0x176   : > { %v1692_v15 = vor.u32 %v1691_v14, %v1688_v16  ;;  %v1701_v48 = vrot.slane %v1699_v27, 4  ;;  %v2295_v8 = vshrl.u32 %v12591_v10, 16  ;;  %v12784_v35 = vpop.f32.mrb[0].mxu1  ;;  %v2293_v4 = vsel %vm11813_vm6, %v2288_v5, %v2292_v32 }
 0x177   : > { %v2298_v18 = vshll.u32 %v12591_v10, 16  ;;  %v2304_v63 = vshll.u32 %v12599_v25, 16  ;;  %v12790_v23 = vpop.f32.mrb[1].mxu1  ;;  %v9514_v0 = vcombine.low %v2283_v30, %v2293_v4  ;;  %4332 = vmatprep.mubr.bf16.mxu0 %v9483_v19  ;;  %v1707_v22 = vrot.slane %v1705_v54, 5  ;;  %v2164_v54 = vld [vmem:[#allocation2 + $0x68] sm:$0x1] }
 0x178   : > { %v1693_v29 = vrot.slane %v1692_v15, 4  ;;  %v1702_v20 = vor.u32 %v1701_v48, %v1697_v43  ;;  %v2297_v1 = vrot.slane %v2295_v8, 4  ;;  %v12792_v45 = vpop.f32.mrb[2].mxu1  ;;  %v2308_v32 = vshrl.u32 %v12599_v25, 16 }
 0x179   : > { %v2300_v13 = vrot.slane %v2298_v18, 5  ;;  %v2306_v40 = vrot.slane %v2304_v63, 5  ;;  %v12797_v60 = vpop.f32.mrb[3].mxu1  ;;  %4485 = vmatprep.mubr.bf16.mxu1 %v9514_v0  ;;  %v2314_v26 = vshll.u32 %v2163_v50, 16  ;;  %v9372_v61 = vrot.slane %v1955_v59, 9 }
 0x17a   : > { %v1698_v47 = vsel %vm11813_vm6, %v1693_v29, %v1697_v43  ;;  %v1703_v52 = vrot.slane %v1702_v20, 4  ;;  %v2057_v16 = vrot.slane %v11344_v9, 5  ;;  %v16046_v41 = vcombine.low %v12577_v28, %v12579_v17  ;;  %v1956_v63 = vld [vmem:[#allocation2 + $0x60] sm:$0xe] }
 0x17b   : > { %v2301_v62 = vor.u32 %v2300_v13, %v2297_v1  ;;  %v2310_v58 = vrot.slane %v2308_v32, 4  ;;  %v2060_v14 = vrot.slane %v1555_v3, 5  ;;  %v16047_v39 = vshrl.u32 %v12191_v33, 16 }
 0x17c   : > { %4486 = vmatmul.mubr.bf16.gmra.mrb[80].mxu1 %v16046_v41  ;;  %v1708_v51 = vsel %vm11813_vm6, %v1703_v52, %v1707_v22  ;;  %v2316_v31 = vrot.slane %v2314_v26, 5  ;;  %v2058_v27 = vsel %vm11879_vm13, %v9372_v61, %v2057_v16  ;;  %v2059_v5 = vrot.slane %v2057_v16, 4  ;;  %v1556_v16 = vld [vmem:[#allocation2 + $0x68] sm:$0x1] }
 0x17d   : > { %v1712_v2 = vrot.slane %v16047_v39, 4  ;;  %v9467_v19 = vcombine.low %v1698_v47, %v1708_v51  ;;  %v2302_v15 = vrot.slane %v2301_v62, 4  ;;  %v2311_v43 = vor.u32 %v2310_v58, %v2306_v40 }
 0x17e   : > { %v16048_v28 = vshll.u32 %v12191_v33, 16  ;;  %v2061_v50 = vsel %vm11879_vm13, %v2059_v5, %v2060_v14  ;;  %v1719_v59 = vshll.u32 %v11344_v9, 16  ;;  %v1723_v30 = vshrl.u32 %v11344_v9, 16 }
 0x17f   : > { %v1729_v48 = vshll.u32 %v1555_v3, 16  ;;  %4333 = vmatmul.mubr.bf16.gmra.mrb[84].mxu0 %v9467_v19  ;;  %v2307_v8 = vsel %vm11813_vm6, %v2302_v15, %v2306_v40  ;;  %v2312_v4 = vrot.slane %v2311_v43, 4  ;;  %v9484_v29 = vcombine.low %v2058_v27, %v2061_v50  ;;  %v11345_v15 = vld [vmem:[#allocation2 + $0x64] sm:$0xf] }
 0x180   : > { %v1715_v17 = vrot.slane %v16048_v28, 5  ;;  %v1721_v0 = vrot.slane %v1719_v59, 5  ;;  %v1725_v20 = vrot.slane %v1723_v30, 4  ;;  %v2319_v33 = vshrl.u32 %v12607_v11, 16  ;;  %v12821_v40 = vpop.f32.mrb[4].mxu1 }
 0x181   : > { %v1731_v22 = vrot.slane %v1729_v48, 5  ;;  %v2317_v1 = vsel %vm11813_vm6, %v2312_v4, %v2316_v31  ;;  %4340 = vmatprep.mubr.bf16.mxu0 %v9484_v29  ;;  %v2322_v3 = vshll.u32 %v12607_v11, 16  ;;  %v2328_v13 = vshll.u32 %v12609_v36, 16  ;;  %v12819_v32 = vpop.f32.mrb[4].mxu0  ;;  %v12826_v62 = vpop.f32.mrb[5].mxu1 }
 0x182   : > { %v1716_v18 = vor.u32 %v1715_v17, %v1712_v2  ;;  %v9515_v52 = vcombine.low %v2307_v8, %v2317_v1  ;;  %v1726_v26 = vor.u32 %v1725_v20, %v1721_v0  ;;  %v2321_v61 = vrot.slane %v2319_v33, 4  ;;  %v12824_v41 = vpop.f32.mrb[5].mxu0  ;;  %v12832_v31 = vpop.f32.mrb[6].mxu1  ;;  %v2165_v1 = vld [vmem:[#allocation2 + $0x74] sm:$0x1] }
 0x183   : > { %v2332_v9 = vshrl.u32 %v12609_v36, 16  ;;  %v2324_v14 = vrot.slane %v2322_v3, 5  ;;  %v2330_v39 = vrot.slane %v2328_v13, 5  ;;  %v2338_v2 = vshll.u32 %v2164_v54, 16  ;;  %v12830_v51 = vpop.f32.mrb[6].mxu0  ;;  %v12836_v17 = vpop.f32.mrb[7].mxu1 }
 0x184   : > { %v1717_v47 = vrot.slane %v1716_v18, 4  ;;  %4493 = vmatprep.mubr.bf16.mxu1 %v9515_v52  ;;  %v1727_v27 = vrot.slane %v1726_v26, 4  ;;  %v9373_v19 = vrot.slane %v1956_v63, 9  ;;  %v2064_v43 = vrot.slane %v11345_v15, 5  ;;  %v12834_v28 = vpop.f32.mrb[7].mxu0 }
 0x185   : > { %v2334_v5 = vrot.slane %v2332_v9, 4  ;;  %v16049_v50 = vcombine.low %v12591_v10, %v12599_v25  ;;  %v2325_v59 = vor.u32 %v2324_v14, %v2321_v61  ;;  %v2340_v30 = vrot.slane %v2338_v2, 5  ;;  %v1957_v26 = vld [vmem:[#allocation2 + $0x6c] sm:$0xe] }
 0x186   : > { %v1722_v58 = vsel %vm11813_vm6, %v1717_v47, %v1721_v0  ;;  %v2067_v48 = vrot.slane %v1556_v16, 5  ;;  %v16050_v54 = vshrl.u32 %v12257_v12, 16  ;;  %v1732_v4 = vsel %vm11813_vm6, %v1727_v27, %v1731_v22 }
 0x187   : > { %4494 = vmatmul.mubr.bf16.gmra.mrb[84].mxu1 %v16049_v50  ;;  %v2335_v29 = vor.u32 %v2334_v5, %v2330_v39  ;;  %v2065_v18 = vsel %vm11879_vm13, %v9373_v19, %v2064_v43  ;;  %v2066_v63 = vrot.slane %v2064_v43, 4  ;;  %v9468_v0 = vcombine.low %v1722_v58, %v1732_v4 }
 0x188   : > { %v1736_v8 = vrot.slane %v16050_v54, 4  ;;  %v2326_v20 = vrot.slane %v2325_v59, 4  ;;  %v16051_v33 = vshll.u32 %v12257_v12, 16  ;;  %v1743_v25 = vshll.u32 %v11345_v15, 16  ;;  %v12855_v12 = vpop.f32.mrb[8].mxu1 }
 0x189   : > { %v2336_v47 = vrot.slane %v2335_v29, 4  ;;  %v2068_v3 = vsel %vm11879_vm13, %v2066_v63, %v2067_v48  ;;  %v1747_v13 = vshrl.u32 %v11345_v15, 16  ;;  %v1753_v52 = vshll.u32 %v1556_v16, 16  ;;  %4341 = vmatmul.mubr.bf16.gmra.mrb[88].mxu0 %v9468_v0  ;;  %v12853_v14 = vpop.f32.mrb[8].mxu0  ;;  %v1557_v16 = vld [vmem:[#allocation2 + $0x74] sm:$0x1] }
 0x18a   : > { %v1739_v10 = vrot.slane %v16051_v33, 5  ;;  %v2331_v22 = vsel %vm11813_vm6, %v2326_v20, %v2330_v39  ;;  %v9485_v61 = vcombine.low %v2065_v18, %v2068_v3  ;;  %v1745_v58 = vrot.slane %v1743_v25, 5  ;;  %v12860_v15 = vpop.f32.mrb[9].mxu0  ;;  %v12862_v43 = vpop.f32.mrb[9].mxu1 }
 0x18b   : > { %v2341_v2 = vsel %vm11813_vm6, %v2336_v47, %v2340_v30  ;;  %v1749_v27 = vrot.slane %v1747_v13, 4  ;;  %v1755_v5 = vrot.slane %v1753_v52, 5  ;;  %v2343_v19 = vshrl.u32 %v12625_v49, 16  ;;  %v12866_v54 = vpop.f32.mrb[10].mxu0 }
 0x18c   : > { %v1740_v9 = vor.u32 %v1739_v10, %v1736_v8  ;;  %v9516_v39 = vcombine.low %v2331_v22, %v2341_v2  ;;  %4348 = vmatprep.mubr.bf16.mxu0 %v9485_v61  ;;  %v2346_v59 = vshll.u32 %v12625_v49, 16  ;;  %v2352_v48 = vshll.u32 %v12627_v42, 16  ;;  %v12868_v8 = vpop.f32.mrb[10].mxu1  ;;  %v12871_v63 = vpop.f32.mrb[11].mxu0  ;;  %v11346_v22 = vld [vmem:[#allocation2 + $0x70] sm:$0xf] }
 0x18d   : > { %v1750_v30 = vor.u32 %v1749_v27, %v1745_v58  ;;  %v2345_v4 = vrot.slane %v2343_v19, 4  ;;  %v2356_v29 = vshrl.u32 %v12627_v42, 16  ;;  %v2362_v18 = vshll.u32 %v2165_v1, 16  ;;  %v12873_v0 = vpop.f32.mrb[11].mxu1 }
 0x18e   : > { %v1741_v50 = vrot.slane %v1740_v9, 4  ;;  %4501 = vmatprep.mubr.bf16.mxu1 %v9516_v39  ;;  %v2348_v33 = vrot.slane %v2346_v59, 5  ;;  %v2354_v10 = vrot.slane %v2352_v48, 5  ;;  %v9374_v25 = vrot.slane %v1957_v26, 9 }
 0x18f   : > { %v16052_v47 = vcombine.low %v12607_v11, %v12609_v36  ;;  %v1751_v3 = vrot.slane %v1750_v30, 4  ;;  %v2358_v13 = vrot.slane %v2356_v29, 4  ;;  %v2364_v52 = vrot.slane %v2362_v18, 5 }
 0x190   : > { %v1746_v20 = vsel %vm11813_vm6, %v1741_v50, %v1745_v58  ;;  %v2071_v1 = vrot.slane %v11346_v22, 5  ;;  %v2349_v61 = vor.u32 %v2348_v33, %v2345_v4  ;;  %v2074_v9 = vrot.slane %v1557_v16, 5 }
 0x191   : > { %4502 = vmatmul.mubr.bf16.gmra.mrb[88].mxu1 %v16052_v47  ;;  %v16053_v2 = vshrl.u32 %v12292_v56, 16  ;;  %v16054_v19 = vshll.u32 %v12292_v56, 16  ;;  %v1756_v26 = vsel %vm11813_vm6, %v1751_v3, %v1755_v5  ;;  %v2359_v39 = vor.u32 %v2358_v13, %v2354_v10  ;;  %v12888_v4 = vpop.f32.mrb[12].mxu0  ;;  %v2166_v47 = vld [vmem:[#allocation2 + $0x80] sm:$0x1] }
 0x192   : > { %v2072_v11 = vsel %vm11879_vm13, %v9374_v25, %v2071_v1  ;;  %v2073_v36 = vrot.slane %v2071_v1, 4  ;;  %v9469_v50 = vcombine.low %v1746_v20, %v1756_v26  ;;  %v2350_v59 = vrot.slane %v2349_v61, 4  ;;  %v12896_v13 = vld [vmem:[#allocation2 + $0x80] sm:$0x1]  ;;  %v1958_v1 = vld [vmem:[#allocation2 + $0x78] sm:$0xe] }
 0x193   : > { %v1760_v27 = vrot.slane %v16053_v2, 4  ;;  %v1763_v58 = vrot.slane %v16054_v19, 5  ;;  %v1767_v30 = vshll.u32 %v11346_v22, 16  ;;  %v2360_v29 = vrot.slane %v2359_v39, 4  ;;  %v12892_v2 = vpop.f32.mrb[13].mxu0 }
 0x194   : > { %v2075_v18 = vsel %vm11879_vm13, %v2073_v36, %v2074_v9  ;;  %v1771_v56 = vshrl.u32 %v11346_v22, 16  ;;  %v1777_v33 = vshll.u32 %v1557_v16, 16  ;;  %4349 = vmatmul.mubr.bf16.gmra.mrb[92].mxu0 %v9469_v50  ;;  %v2355_v5 = vsel %vm11813_vm6, %v2350_v59, %v2354_v10  ;;  %v12898_v61 = vpop.f32.mrb[14].mxu0 }
 0x195   : > { %v1764_v48 = vor.u32 %v1763_v58, %v1760_v27  ;;  %v9486_v25 = vcombine.low %v2072_v11, %v2075_v18  ;;  %v1769_v3 = vrot.slane %v1767_v30, 5  ;;  %v2365_v9 = vsel %vm11813_vm6, %v2360_v29, %v2364_v52  ;;  %v12903_v19 = vpop.f32.mrb[15].mxu0  ;;  %v11347_v29 = vld [vmem:[#allocation2 + $0x7c] sm:$0xf] }
 0x196   : > { %v1773_v22 = vrot.slane %v1771_v56, 4  ;;  %v1779_v16 = vrot.slane %v1777_v33, 5  ;;  %v2367_v27 = vshrl.u32 %v12659_v46, 16  ;;  %v9517_v58 = vcombine.low %v2355_v5, %v2365_v9 }
 0x197   : > { %v1765_v20 = vrot.slane %v1764_v48, 4  ;;  %4356 = vmatprep.mubr.bf16.mxu0 %v9486_v25  ;;  %v2370_v26 = vshll.u32 %v12659_v46, 16  ;;  %v2376_v39 = vshll.u32 %v12661_v55, 16  ;;  %v2380_v50 = vshrl.u32 %v12661_v55, 16 }
 0x198   : > { %v1774_v11 = vor.u32 %v1773_v22, %v1769_v3  ;;  %v2369_v36 = vrot.slane %v2367_v27, 4  ;;  %v2386_v52 = vshll.u32 %v2166_v47, 16  ;;  %4509 = vmatprep.mubr.bf16.mxu1 %v9517_v58  ;;  %v9375_v30 = vrot.slane %v1958_v1, 9 }
 0x199   : > { %v1770_v10 = vsel %vm11813_vm6, %v1765_v20, %v1769_v3  ;;  %v2372_v59 = vrot.slane %v2370_v26, 5  ;;  %v2378_v48 = vrot.slane %v2376_v39, 5  ;;  %v2078_v18 = vrot.slane %v11347_v29, 5  ;;  %v12914_v3 = vpop.f32.mrb[12].mxu1 }
 0x19a   : > { %v16055_v56 = vcombine.low %v12625_v49, %v12627_v42  ;;  %v1775_v33 = vrot.slane %v1774_v11, 4  ;;  %v2382_v5 = vrot.slane %v2380_v50, 4  ;;  %v2388_v25 = vrot.slane %v2386_v52, 5  ;;  %v12920_v58 = vpop.f32.mrb[13].mxu1  ;;  %v12926_v50 = vld [vmem:[#allocation2 + $0x84] sm:$0xf] }
 0x19b   : > { %v2081_v20 = vrot.slane %v12896_v13, 5  ;;  %v2373_v9 = vor.u32 %v2372_v59, %v2369_v36  ;;  %v2079_v47 = vsel %vm11879_vm13, %v9375_v30, %v2078_v18  ;;  %v2080_v22 = vrot.slane %v2078_v18, 4  ;;  %v12928_v36 = vpop.f32.mrb[14].mxu1 }
 0x19c   : > { %4510 = vmatmul.mubr.bf16.gmra.mrb[92].mxu1 %v16055_v56  ;;  %v16056_v1 = vshrl.u32 %v12335_v24, 16  ;;  %v1780_v49 = vsel %vm11813_vm6, %v1775_v33, %v1779_v16  ;;  %v2383_v42 = vor.u32 %v2382_v5, %v2378_v48  ;;  %v16057_v26 = vshll.u32 %v12335_v24, 16  ;;  %16058 = vst [vmem:[#allocation52_spill] sm:$0xff] %v12928_v36  ;;  %v12932_v56 = vld [vmem:[#allocation2 + $0x88] sm:$0xf] }
 0x19d   : > { %v1791_v11 = vshll.u32 %v11347_v29, 16  ;;  %v9470_v52 = vcombine.low %v1770_v10, %v1780_v49  ;;  %v2374_v59 = vrot.slane %v2373_v9, 4  ;;  %v2082_v30 = vsel %vm11879_vm13, %v2080_v22, %v2081_v20 }
 0x19e   : > { %v1784_v27 = vrot.slane %v16056_v1, 4  ;;  %v1787_v39 = vrot.slane %v16057_v26, 5  ;;  %v1795_v18 = vshrl.u32 %v11347_v29, 16  ;;  %v12934_v1 = vpop.f32.mrb[15].mxu1  ;;  %v2384_v16 = vrot.slane %v2383_v42, 4 }
 0x19f   : > { %16059 = vst [vmem:[#allocation53_spill] sm:$0xff] %v12934_v1  ;;  %v9487_v33 = vcombine.low %v2079_v47, %v2082_v30  ;;  %v1793_v24 = vrot.slane %v1791_v11, 5  ;;  %v2167_v26 = vld [vmem:[#allocation2 + $0x8c] sm:$0x1]  ;;  %4357 = vmatmul.mubr.bf16.gmra.mrb[96].mxu0 %v9470_v52  ;;  %v2379_v36 = vsel %vm11813_vm6, %v2374_v59, %v2378_v48  ;;  %v1801_v9 = vshll.u32 %v12896_v13, 16  ;;  %v12945_v30 = vpop.f32.mrb[16].mxu1 }
 0x1a0   : > { %v1788_v5 = vor.u32 %v1787_v39, %v1784_v27  ;;  %v1797_v10 = vrot.slane %v1795_v18, 4  ;;  %v2391_v20 = vshrl.u32 %v12926_v50, 16  ;;  %v1559_v29 = vld [vmem:[#allocation2 + $0x8c] sm:$0x1]  ;;  %v2389_v22 = vsel %vm11813_vm6, %v2384_v16, %v2388_v25  ;;  %16060 = vst [vmem:[#allocation54_spill] sm:$0xff] %v12945_v30  ;;  %v12951_v1 = vpop.f32.mrb[17].mxu1 }
 0x1a1   : > { %4364 = vmatprep.mubr.bf16.mxu0 %v9487_v33  ;;  %v2394_v47 = vshll.u32 %v12926_v50, 16  ;;  %v2400_v27 = vshll.u32 %v12932_v56, 16  ;;  %v9518_v42 = vcombine.low %v2379_v36, %v2389_v22  ;;  %v1803_v11 = vrot.slane %v1801_v9, 5  ;;  %16061 = vst [vmem:[#allocation55_spill] sm:$0xff] %v12951_v1 }
 0x1a2   : > { %v1789_v49 = vrot.slane %v1788_v5, 4  ;;  %v1798_v39 = vor.u32 %v1797_v10, %v1793_v24  ;;  %v2393_v52 = vrot.slane %v2391_v20, 4  ;;  %v2404_v13 = vshrl.u32 %v12932_v56, 16  ;;  %v12949_v5 = vld [vmem:[#allocation2 + $0x90] sm:$0xf] }
 0x1a3   : > { %v2396_v48 = vrot.slane %v2394_v47, 5  ;;  %v2402_v59 = vrot.slane %v2400_v27, 5  ;;  %4517 = vmatprep.mubr.bf16.mxu1 %v9518_v42  ;;  %v2410_v16 = vshll.u32 %v2167_v26, 16  ;;  %v9376_v33 = vrot.slane %v1959_v34, 9  ;;  %v11348_v20 = vld [vmem:[#allocation2 + $0x88] sm:$0xf] }
 0x1a4   : > { %v1794_v25 = vsel %vm11813_vm6, %v1789_v49, %v1793_v24  ;;  %v1799_v18 = vrot.slane %v1798_v39, 4  ;;  %v16062_v36 = vcombine.low %v12659_v46, %v12661_v55  ;;  %v2406_v9 = vrot.slane %v2404_v13, 4  ;;  %v12956_v27 = vpop.f32.mrb[16].mxu0  ;;  %v12958_v42 = vpop.f32.mrb[18].mxu1 }
 0x1a5   : > { %v2397_v10 = vor.u32 %v2396_v48, %v2393_v52  ;;  %v2085_v22 = vrot.slane %v11348_v20, 5  ;;  %v2088_v47 = vrot.slane %v1559_v29, 5  ;;  %16063 = vst [vmem:[#allocation56_spill] sm:$0xff] %v12958_v42  ;;  %v2412_v24 = vrot.slane %v2410_v16, 5  ;;  %v12966_v55 = vpop.f32.mrb[17].mxu0  ;;  %v12968_v52 = vpop.f32.mrb[19].mxu1 }
 0x1a6   : > { %4518 = vmatmul.mubr.bf16.gmra.mrb[96].mxu1 %v16062_v36  ;;  %v1804_v34 = vsel %vm11813_vm6, %v1799_v18, %v1803_v11  ;;  %v16064_v26 = vshrl.u32 %v12379_v57, 16  ;;  %v16065_v39 = vshll.u32 %v12379_v57, 16  ;;  %16066 = vst [vmem:[#allocation57_spill] sm:$0xff] %v12968_v52  ;;  %v2407_v36 = vor.u32 %v2406_v9, %v2402_v59  ;;  %v12972_v1 = vpop.f32.mrb[18].mxu0  ;;  %v2168_v57 = vld [vmem:[#allocation2 + $0x98] sm:$0x1] }
 0x1a7   : > { %v9471_v48 = vcombine.low %v1794_v25, %v1804_v34  ;;  %v2398_v13 = vrot.slane %v2397_v10, 4  ;;  %v2086_v42 = vsel %vm11879_vm13, %v9376_v33, %v2085_v22  ;;  %16067 = vst [vmem:[#allocation58_spill] sm:$0xff] %v12972_v1  ;;  %v2087_v11 = vrot.slane %v2085_v22, 4 }
 0x1a8   : > { %v1808_v49 = vrot.slane %v16064_v26, 4  ;;  %v1811_v46 = vrot.slane %v16065_v39, 5  ;;  %v1815_v16 = vshll.u32 %v11348_v20, 16  ;;  %v1819_v30 = vshrl.u32 %v11348_v20, 16  ;;  %v12974_v26 = vld [vmem:[#allocation2 + $0x94] sm:$0xf] }
 0x1a9   : > { %v12976_v39 = vpop.f32.mrb[19].mxu0  ;;  %4365 = vmatmul.mubr.bf16.gmra.mrb[100].mxu0 %v9471_v48  ;;  %v2403_v25 = vsel %vm11813_vm6, %v2398_v13, %v2402_v59  ;;  %v2408_v10 = vrot.slane %v2407_v36, 4  ;;  %v1825_v9 = vshll.u32 %v1559_v29, 16  ;;  %v2415_v34 = vshrl.u32 %v12949_v5, 16  ;;  %v1960_v36 = vld [vmem:[#allocation2 + $0x90] sm:$0xe] }
 0x1aa   : > { %v1812_v18 = vor.u32 %v1811_v46, %v1808_v49  ;;  %16068 = vst [vmem:[#allocation59_spill] sm:$0xff] %v12976_v39  ;;  %v2089_v33 = vsel %vm11879_vm13, %v2087_v11, %v2088_v47  ;;  %v1817_v49 = vrot.slane %v1815_v16, 5  ;;  %v1821_v46 = vrot.slane %v1819_v30, 4  ;;  %v12992_v16 = vpop.f32.mrb[20].mxu0 }
 0x1ab   : > { %v2413_v20 = vsel %vm11813_vm6, %v2408_v10, %v2412_v24  ;;  %v9503_v52 = vcombine.low %v12926_v50, %v12932_v56  ;;  %v9488_v48 = vcombine.low %v2086_v42, %v2089_v33  ;;  %v1827_v39 = vrot.slane %v1825_v9, 5  ;;  %v13002_v10 = vpop.f32.mrb[21].mxu0  ;;  %v13004_v9 = vld [vmem:[#allocation2 + $0xa8] sm:$0xf] }
 0x1ac   : > { %v1813_v22 = vrot.slane %v1812_v18, 4  ;;  %v9519_v1 = vcombine.low %v2403_v25, %v2413_v20  ;;  %v1822_v59 = vor.u32 %v1821_v46, %v1817_v49  ;;  %v2417_v13 = vrot.slane %v2415_v34, 4  ;;  %v1560_v18 = vld [vmem:[#allocation2 + $0x98] sm:$0x1] }
 0x1ad   : > { %v2418_v29 = vshll.u32 %v12949_v5, 16  ;;  %4372 = vmatprep.mubr.bf16.mxu0 %v9488_v48  ;;  %v2424_v30 = vshll.u32 %v12974_v26, 16  ;;  %v2428_v11 = vshrl.u32 %v12974_v26, 16  ;;  %v2434_v24 = vshll.u32 %v2168_v57, 16 }
 0x1ae   : > { %v1818_v47 = vsel %vm11813_vm6, %v1813_v22, %v1817_v49  ;;  %4525 = vmatprep.mubr.bf16.mxu1 %v9519_v1  ;;  %v1823_v50 = vrot.slane %v1822_v59, 4  ;;  %v12996_v42 = vadd.f32 %v12742_v37, %v12736_v7  ;;  %v13000_v25 = vadd.f32 %v12750_v38, %v12746_v6  ;;  %v13011_v22 = vpop.f32.mrb[22].mxu0  ;;  %v13017_v49 = vld [vmem:[#allocation2 + $0x9c] sm:$0xf]  ;;  %v11350_v59 = vld [vmem:[#allocation2 + $0x94] sm:$0xf] }
 0x1af   : > { %v2420_v56 = vrot.slane %v2418_v29, 5  ;;  %4526 = vmatmul.mubr.bf16.gmra.mrb[100].mxu1 %v9503_v52  ;;  %v2426_v34 = vrot.slane %v2424_v30, 5  ;;  %v2430_v33 = vrot.slane %v2428_v11, 4  ;;  %v13009_v1 = vadd.f32 %v12790_v23, %v12784_v35  ;;  %v13019_v46 = vpop.f32.mrb[23].mxu0 }
 0x1b0   : > { %v1828_v7 = vsel %vm11813_vm6, %v1823_v50, %v1827_v39  ;;  %v2436_v6 = vrot.slane %v2434_v24, 5  ;;  %v9504_v38 = vcombine.low %v12949_v5, %v12974_v26  ;;  %v9377_v48 = vrot.slane %v1960_v36, 9  ;;  %v13031_v24 = vld [vmem:[#allocation2 + $0xa0] sm:$0xf]  ;;  %v2169_v50 = vld [vmem:[#allocation2 + $0xa4] sm:$0x1] }
 0x1b1   : > { %16069 = vst [vmem:[#allocation60_spill] sm:$0xff] %v13009_v1  ;;  %v2421_v37 = vor.u32 %v2420_v56, %v2417_v13  ;;  %v9472_v52 = vcombine.low %v1818_v47, %v1828_v7  ;;  %v2431_v20 = vor.u32 %v2430_v33, %v2426_v34  ;;  %v2092_v35 = vrot.slane %v11350_v59, 5  ;;  %16073 = vst [vmem:[#allocation62_spill] sm:$0xff] %v13031_v24 }
 0x1b2   : > { %v2095_v29 = vrot.slane %v1560_v18, 5  ;;  %v13023_v30 = vadd.f32 %v12797_v60, %v12792_v45  ;;  %v16071_v39 = vshrl.u32 %v12409_v21, 16  ;;  %v16072_v47 = vshll.u32 %v12409_v21, 16  ;;  %v13040_v21 = vpop.f32.mrb[20].mxu1 }
 0x1b3   : > { %v2422_v23 = vrot.slane %v2421_v37, 4  ;;  %4373 = vmatmul.mubr.bf16.gmra.mrb[104].mxu0 %v9472_v52  ;;  %v2432_v5 = vrot.slane %v2431_v20, 4  ;;  %v2093_v26 = vsel %vm11879_vm13, %v9377_v48, %v2092_v35  ;;  %v2094_v11 = vrot.slane %v2092_v35, 4  ;;  %v13042_v57 = vpop.f32.mrb[21].mxu1 }
 0x1b4   : > { %16070 = vst [vmem:[#allocation61_spill] sm:$0xff] %v13023_v30  ;;  %v1832_v13 = vrot.slane %v16071_v39, 4  ;;  %v1835_v36 = vrot.slane %v16072_v47, 5  ;;  %v1839_v45 = vshll.u32 %v11350_v59, 16  ;;  %v1843_v60 = vshrl.u32 %v11350_v59, 16 }
 0x1b5   : > { %v2427_v56 = vsel %vm11813_vm6, %v2422_v23, %v2426_v34  ;;  %v1849_v33 = vshll.u32 %v1560_v18, 16  ;;  %v2437_v7 = vsel %vm11813_vm6, %v2432_v5, %v2436_v6  ;;  %v2096_v37 = vsel %vm11879_vm13, %v2094_v11, %v2095_v29  ;;  %v1961_v6 = vld [vmem:[#allocation2 + $0x9c] sm:$0xe]  ;;  %v13045_v5 = vpop.f32.mrb[22].mxu1 }
 0x1b6   : > { %v1836_v52 = vor.u32 %v1835_v36, %v1832_v13  ;;  %v2439_v20 = vshrl.u32 %v13017_v49, 16  ;;  %v9520_v48 = vcombine.low %v2427_v56, %v2437_v7  ;;  %v9489_v35 = vcombine.low %v2093_v26, %v2096_v37  ;;  %v1561_v36 = vld [vmem:[#allocation2 + $0xa4] sm:$0x1]  ;;  %v13049_v56 = vpop.f32.mrb[23].mxu1 }
 0x1b7   : > { %v1841_v39 = vrot.slane %v1839_v45, 5  ;;  %v1845_v47 = vrot.slane %v1843_v60, 4  ;;  %v1851_v59 = vrot.slane %v1849_v33, 5  ;;  %v2442_v23 = vshll.u32 %v13017_v49, 16  ;;  %v13051_v45 = vld [vmem:[#allocation2 + $0xb4] sm:$0xf] }
 0x1b8   : > { %v1837_v34 = vrot.slane %v1836_v52, 4  ;;  %v2441_v18 = vrot.slane %v2439_v20, 4  ;;  %4533 = vmatprep.mubr.bf16.mxu1 %v9520_v48  ;;  %4380 = vmatprep.mubr.bf16.mxu0 %v9489_v35  ;;  %v2448_v13 = vshll.u32 %v13031_v24, 16  ;;  %v2452_v11 = vshrl.u32 %v13031_v24, 16 }
 0x1b9   : > { %v1846_v29 = vor.u32 %v1845_v47, %v1841_v39  ;;  %v2458_v26 = vshll.u32 %v2169_v50, 16  ;;  %4534 = vmatmul.mubr.bf16.gmra.mrb[104].mxu1 %v9504_v38  ;;  %v2444_v7 = vrot.slane %v2442_v23, 5  ;;  %v13058_v37 = vadd.f32 %v12824_v41, %v12819_v32  ;;  %v11352_v32 = vld [vmem:[#allocation2 + $0xa0] sm:$0xf] }
 0x1ba   : > { %v1842_v33 = vsel %vm11813_vm6, %v1837_v34, %v1841_v39  ;;  %v2450_v20 = vrot.slane %v2448_v13, 5  ;;  %v2454_v48 = vrot.slane %v2452_v11, 4  ;;  %v13062_v47 = vadd.f32 %v12834_v28, %v12830_v51  ;;  %v13074_v51 = vpop.f32.mrb[24].mxu1 }
 0x1bb   : > { %16074 = vst [vmem:[#allocation63_spill] sm:$0xff] %v13058_v37  ;;  %v1847_v52 = vrot.slane %v1846_v29, 4  ;;  %v2460_v50 = vrot.slane %v2458_v26, 5  ;;  %v2445_v35 = vor.u32 %v2444_v7, %v2441_v18  ;;  %v13066_v38 = vadd.f32 %v12826_v62, %v12821_v40  ;;  %v13072_v26 = vld [vmem:[#allocation2 + $0xa8] sm:$0xf]  ;;  %v13086_v7 = vpop.f32.mrb[24].mxu0 }
 0x1bc   : > { %16075 = vst [vmem:[#allocation64_spill] sm:$0xff] %v13062_v47  ;;  %v2455_v34 = vor.u32 %v2454_v48, %v2450_v20  ;;  %v9378_v23 = vrot.slane %v1961_v6, 9  ;;  %v2099_v41 = vrot.slane %v11352_v32, 5  ;;  %v9505_v18 = vcombine.low %v13017_v49, %v13031_v24  ;;  %v13082_v6 = vld [vmem:[#allocation2 + $0xac] sm:$0xf]  ;;  %v13088_v49 = vpop.f32.mrb[25].mxu1 }
 0x1bd   : > { %16076 = vst [vmem:[#allocation65_spill] sm:$0xff] %v13066_v38  ;;  %v1852_v39 = vsel %vm11813_vm6, %v1847_v52, %v1851_v59  ;;  %v2446_v13 = vrot.slane %v2445_v35, 4  ;;  %v2102_v11 = vrot.slane %v1561_v36, 5  ;;  %v13080_v59 = vadd.f32 %v12836_v17, %v12832_v31  ;;  %16078 = vst [vmem:[#allocation67_spill] sm:$0xff] %v13082_v6  ;;  %v16080_v48 = vld [vmem:[#allocation45_spill] sm:$0xff]  ;;  %v13096_v17 = vpop.f32.mrb[25].mxu0 }
 0x1be   : > { %v9473_v29 = vcombine.low %v1842_v33, %v1852_v39  ;;  %v2456_v28 = vrot.slane %v2455_v34, 4  ;;  %v2100_v40 = vsel %vm11879_vm13, %v9378_v23, %v2099_v41  ;;  %v2101_v62 = vrot.slane %v2099_v41, 4  ;;  %v13084_v33 = vld [vmem:[#allocation2 + $0xb0] sm:$0x1]  ;;  %v13098_v41 = vpop.f32.mrb[26].mxu1 }
 0x1bf   : > { %16077 = vst [vmem:[#allocation66_spill] sm:$0xff] %v13080_v59  ;;  %16079 = vst [vmem:[#allocation68_spill] sm:$0xff] %v13084_v33  ;;  %v2451_v52 = vsel %vm11813_vm6, %v2446_v13, %v2450_v20  ;;  %v16081_v35 = vshrl.u32 %v16080_v48, 16  ;;  %v16082_v34 = vshll.u32 %v16080_v48, 16  ;;  %v1863_v31 = vshll.u32 %v11352_v32, 16  ;;  %v13104_v20 = vpop.f32.mrb[26].mxu0 }
 0x1c0   : > { %4381 = vmatmul.mubr.bf16.gmra.mrb[108].mxu0 %v9473_v29  ;;  %v2461_v60 = vsel %vm11813_vm6, %v2456_v28, %v2460_v50  ;;  %v2103_v29 = vsel %vm11879_vm13, %v2101_v62, %v2102_v11  ;;  %v1867_v59 = vshrl.u32 %v11352_v32, 16  ;;  %v1873_v38 = vshll.u32 %v1561_v36, 16  ;;  %v13106_v13 = vpop.f32.mrb[27].mxu1  ;;  %v13108_v1 = vpop.f32.mrb[27].mxu0  ;;  %v1962_v28 = vld [vmem:[#allocation2 + $0xa8] sm:$0xe] }
 0x1c1   : > { %v1856_v39 = vrot.slane %v16081_v35, 4  ;;  %v1859_v23 = vrot.slane %v16082_v34, 5  ;;  %v9521_v35 = vcombine.low %v2451_v52, %v2461_v60  ;;  %v9490_v48 = vcombine.low %v2100_v40, %v2103_v29 }
 0x1c2   : > { %v1865_v30 = vrot.slane %v1863_v31, 5  ;;  %v1869_v24 = vrot.slane %v1867_v59, 4  ;;  %v1875_v47 = vrot.slane %v1873_v38, 5  ;;  %v2463_v37 = vshrl.u32 %v13072_v26, 16  ;;  %v1562_v31 = vld [vmem:[#allocation2 + $0xb0] sm:$0x1] }
 0x1c3   : > { %v1860_v34 = vor.u32 %v1859_v23, %v1856_v39  ;;  %v2466_v50 = vshll.u32 %v13072_v26, 16  ;;  %4541 = vmatprep.mubr.bf16.mxu1 %v9521_v35  ;;  %4388 = vmatprep.mubr.bf16.mxu0 %v9490_v48  ;;  %v2472_v32 = vshll.u32 %v13082_v6, 16  ;;  %v2476_v11 = vshrl.u32 %v13082_v6, 16 }
 0x1c4   : > { %v2482_v60 = vshll.u32 %v13084_v33, 16  ;;  %4542 = vmatmul.mubr.bf16.gmra.mrb[108].mxu1 %v9505_v18  ;;  %v1870_v40 = vor.u32 %v1869_v24, %v1865_v30  ;;  %v2465_v62 = vrot.slane %v2463_v37, 4  ;;  %v13119_v48 = vadd.f32 %v12860_v15, %v12853_v14  ;;  %v13125_v24 = vpop.f32.mrb[28].mxu0  ;;  %v13135_v14 = vpop.f32.mrb[28].mxu1 }
 0x1c5   : > { %v1861_v36 = vrot.slane %v1860_v34, 4  ;;  %v2468_v52 = vrot.slane %v2466_v50, 5  ;;  %v2474_v59 = vrot.slane %v2472_v32, 5  ;;  %v2478_v39 = vrot.slane %v2476_v11, 4  ;;  %v11353_v50 = vld [vmem:[#allocation2 + $0xac] sm:$0xf] }
 0x1c6   : > { %v2484_v23 = vrot.slane %v2482_v60, 5  ;;  %v1871_v29 = vrot.slane %v1870_v40, 4  ;;  %16083 = vst [vmem:[#allocation45_spill] sm:$0xff] %v13119_v48  ;;  %v13123_v34 = vadd.f32 %v12871_v63, %v12866_v54  ;;  %v9379_v18 = vrot.slane %v1962_v28, 9  ;;  %v13131_v32 = vld [vmem:[#allocation2 + $0xb4] sm:$0xf] }
 0x1c7   : > { %v1866_v38 = vsel %vm11813_vm6, %v1861_v36, %v1865_v30  ;;  %v2469_v35 = vor.u32 %v2468_v52, %v2465_v62  ;;  %v2479_v37 = vor.u32 %v2478_v39, %v2474_v59  ;;  %v13129_v30 = vadd.f32 %v12862_v43, %v12855_v12  ;;  %v13133_v11 = vpop.f32.mrb[29].mxu0  ;;  %v13144_v43 = vpop.f32.mrb[29].mxu1  ;;  %v13148_v39 = vld [vmem:[#allocation2 + $0xb8] sm:$0xf] }
 0x1c8   : > { %16084 = vst [vmem:[#allocation69_spill] sm:$0xff] %v13123_v34  ;;  %v2106_v36 = vrot.slane %v11353_v50, 5  ;;  %v1876_v54 = vsel %vm11813_vm6, %v1871_v29, %v1875_v47  ;;  %v9506_v60 = vcombine.low %v13072_v26, %v13082_v6  ;;  %v13142_v12 = vpop.f32.mrb[30].mxu0  ;;  %16086 = vst [vmem:[#allocation71_spill] sm:$0xff] %v13148_v39  ;;  %v2109_v26 = vrot.slane %v1562_v31, 5  ;;  %v11217_v34 = vld [vmem:[#allocation8 + $0x40] sm:$0xff]  }
 0x1c9   : > { %16085 = vst [vmem:[#allocation70_spill] sm:$0xff] %v13129_v30  ;;  %v2470_v63 = vrot.slane %v2469_v35, 4  ;;  %v9474_v28 = vcombine.low %v1866_v38, %v1876_v54  ;;  %v2480_v40 = vrot.slane %v2479_v37, 4  ;;  %v13150_v15 = vpop.f32.mrb[31].mxu0  ;;  %v13152_v30 = vpop.f32.mrb[30].mxu1  ;;  %v13158_v29 = vadd.f32 %v12873_v0, %v12868_v8  ;;  %v16089_v38 = vld [vmem:[#allocation50_spill] sm:$0xff]  ;;  %10455 = vmatprep.subr.bf16.mxu1 %v11217_v34 }
 0x1ca   : > { %v2107_v62 = vsel %vm11879_vm13, %v9379_v18, %v2106_v36  ;;  %v2108_v52 = vrot.slane %v2106_v36, 4  ;;  %16087 = vst [vmem:[#allocation72_spill] sm:$0xff] %v13152_v30  ;;  %v16090_v35 = vshrl.u32 %v16089_v38, 16  ;;  %v13162_v54 = vld [vmem:[#allocation2 + $0xbc] sm:$0x1]  ;;  %v13164_v18 = vpop.f32.mrb[31].mxu1  ;;  %v13179_v34 = vadd.f32 %v12892_v2, %v12888_v4 }
 0x1cb   : > { %v2475_v47 = vsel %vm11813_vm6, %v2470_v63, %v2474_v59  ;;  %16088 = vst [vmem:[#allocation73_spill] sm:$0xff] %v13158_v29  ;;  %16091 = vst [vmem:[#allocation50_spill] sm:$0xff] %v13162_v54  ;;  %4389 = vmatmul.mubr.bf16.gmra.mrb[112].mxu0 %v9474_v28  ;;  %v2485_v36 = vsel %vm11813_vm6, %v2480_v40, %v2484_v23  ;;  %v16093_v33 = vshll.u32 %v13004_v9, 16  ;;  %v1887_v59 = vshll.u32 %v11353_v50, 16  ;;  %v11218_v48 = vld [vmem:[#allocation8] sm:$0xff]  }
 0x1cc   : > { %v1880_v37 = vrot.slane %v16090_v35, 4  ;;  %16092 = vst [vmem:[#allocation74_spill] sm:$0xff] %v13164_v18  ;;  %v1891_v63 = vshrl.u32 %v11353_v50, 16  ;;  %v9522_v8 = vcombine.low %v2475_v47, %v2485_v36  ;;  %v2110_v0 = vsel %vm11879_vm13, %v2108_v52, %v2109_v26  ;;  %10456 = vmatpush3.bf16.msra.mxu1 %v11218_v48  ;;  %16094 = vst [vmem:[#allocation75_spill] sm:$0xff] %v13179_v34  ;;  %v1963_v26 = vld [vmem:[#allocation2 + $0xb4] sm:$0xe] }
 0x1cd   : > { %v1883_v6 = vrot.slane %v16093_v33, 5  ;;  %v1897_v38 = vshll.u32 %v1562_v31, 16  ;;  %v2487_v35 = vshrl.u32 %v13131_v32, 16  ;;  %v9491_v29 = vcombine.low %v2107_v62, %v2110_v0  ;;  %v13198_v0 = vpop.f32.mrb[32].mxu1 }
 0x1ce   : > { %v1889_v28 = vrot.slane %v1887_v59, 5  ;;  %v1893_v30 = vrot.slane %v1891_v63, 4  ;;  %4549 = vmatprep.mubr.bf16.mxu1 %v9522_v8  ;;  %v2490_v33 = vshll.u32 %v13131_v32, 16  ;;  %v2496_v50 = vshll.u32 %v13148_v39, 16 }
 0x1cf   : > { %v1884_v18 = vor.u32 %v1883_v6, %v1880_v37  ;;  %v1899_v23 = vrot.slane %v1897_v38, 5  ;;  %v2489_v9 = vrot.slane %v2487_v35, 4  ;;  %4550 = vmatmul.mubr.bf16.gmra.mrb[112].mxu1 %v9506_v60  ;;  %4396 = vmatprep.mubr.bf16.mxu0 %v9491_v29  ;;  %v2500_v31 = vshrl.u32 %v13148_v39, 16  ;;  %v13181_v37 = vld [vmem:[#allocation2 + $0xc0] sm:$0xf] }
 0x1d0   : > { %v1894_v52 = vor.u32 %v1893_v30, %v1889_v28  ;;  %v2506_v62 = vshll.u32 %v13162_v54, 16  ;;  %v2492_v6 = vrot.slane %v2490_v33, 5  ;;  %v2498_v47 = vrot.slane %v2496_v50, 5  ;;  %v1563_v29 = vld [vmem:[#allocation2 + $0xbc] sm:$0x1] }
 0x1d1   : > { %v1885_v40 = vrot.slane %v1884_v18, 4  ;;  %v2502_v30 = vrot.slane %v2500_v31, 4  ;;  %v13186_v18 = vpop.f32.mrb[32].mxu0  ;;  %v13190_v8 = vadd.f32 %v12903_v19, %v12898_v61  ;;  %v13194_v4 = vadd.f32 %v12920_v58, %v12914_v3  ;;  %v11355_v33 = vld [vmem:[#allocation2 + $0xb8] sm:$0xf] }
 0x1d2   : > { %v1895_v60 = vrot.slane %v1894_v52, 4  ;;  %v2493_v59 = vor.u32 %v2492_v6, %v2489_v9  ;;  %v2508_v63 = vrot.slane %v2506_v62, 5  ;;  %v13196_v2 = vpop.f32.mrb[33].mxu0  ;;  %v2113_v9 = vrot.slane %v11355_v33, 5  ;;  %v13226_v54 = vld [vmem:[#allocation2 + $0xc0] sm:$0xf] }
 0x1d3   : > { %v1890_v48 = vsel %vm11813_vm6, %v1885_v40, %v1889_v28  ;;  %16095 = vst [vmem:[#allocation76_spill] sm:$0xff] %v13190_v8  ;;  %16096 = vst [vmem:[#allocation77_spill] sm:$0xff] %v13194_v4  ;;  %v2503_v35 = vor.u32 %v2502_v30, %v2498_v47  ;;  %v9380_v28 = vrot.slane %v1963_v26, 9  ;;  %v13202_v50 = vpop.f32.mrb[34].mxu0  ;;  %v13204_v40 = vpop.f32.mrb[33].mxu1  ;;  %v9507_v3 = vcombine.low %v13131_v32, %v13148_v39  ;;  %v16097_v26 = vld [vmem:[#allocation52_spill] sm:$0xff] }
 0x1d4   : > { %v1900_v38 = vsel %vm11813_vm6, %v1895_v60, %v1899_v23  ;;  %v2494_v19 = vrot.slane %v2493_v59, 4  ;;  %v2116_v58 = vrot.slane %v1563_v29, 5  ;;  %v13208_v52 = vpop.f32.mrb[35].mxu0  ;;  %v13210_v31 = vpop.f32.mrb[34].mxu1  ;;  %v2115_v6 = vrot.slane %v2113_v9, 4  ;;  %v16098_v60 = vld [vmem:[#allocation53_spill] sm:$0xff] }
 0x1d5   : > { %v9475_v61 = vcombine.low %v1890_v48, %v1900_v38  ;;  %v2504_v62 = vrot.slane %v2503_v35, 4  ;;  %v2114_v23 = vsel %vm11879_vm13, %v9380_v28, %v2113_v9  ;;  %v13216_v30 = vadd.f32 %v16098_v60, %v16097_v26  ;;  %v13218_v36 = vpop.f32.mrb[35].mxu1  ;;  %v13232_v60 = vld [vmem:[#allocation2 + $0xc4] sm:$0xf]  ;;  %v898_v39 = vld [vmem:[#allocation2 + $0xc8] sm:$0x1] }
 0x1d6   : > { %16100 = vst [vmem:[#allocation53_spill] sm:$0xff] %v13218_v36  ;;  %v2499_v32 = vsel %vm11813_vm6, %v2494_v19, %v2498_v47  ;;  %v16101_v48 = vshrl.u32 %v13051_v45, 16  ;;  %v16102_v38 = vshll.u32 %v13051_v45, 16  ;;  %v1911_v4 = vshll.u32 %v11355_v33, 16  ;;  %v16103_v8 = vld [vmem:[#allocation51_spill] sm:$0xff] }
 0x1d7   : > { %16099 = vst [vmem:[#allocation52_spill] sm:$0xff] %v13216_v30  ;;  %4397 = vmatmul.mubr.bf16.gmra.mrb[116].mxu0 %v9475_v61  ;;  %v2509_v28 = vsel %vm11813_vm6, %v2504_v62, %v2508_v63  ;;  %v2117_v9 = vsel %vm11879_vm13, %v2115_v6, %v2116_v58  ;;  %v1915_v26 = vshrl.u32 %v11355_v33, 16  ;;  %v1921_v61 = vshll.u32 %v1563_v29, 16 }
 0x1d8   : > { %v1904_v59 = vrot.slane %v16101_v48, 4  ;;  %v1907_v35 = vrot.slane %v16102_v38, 5  ;;  %v9523_v47 = vcombine.low %v2499_v32, %v2509_v28  ;;  %v9492_v19 = vcombine.low %v2114_v23, %v2117_v9 }
 0x1d9   : > { %v1913_v48 = vrot.slane %v1911_v4, 5  ;;  %v1929_v45 = vshll.u32 %v13181_v37, 16  ;;  %v1917_v38 = vrot.slane %v1915_v26, 4  ;;  %v734_v34 = vrot.slane %v16103_v8, 4  ;;  %v13242_v8 = vpop.f32.mrb[36].mxu0 }
 0x1da   : > { %v1908_v30 = vor.u32 %v1907_v35, %v1904_v59  ;;  %v2511_v36 = vshrl.u32 %v13226_v54, 16  ;;  %4557 = vmatprep.mubr.bf16.mxu1 %v9523_v47  ;;  %4404 = vmatprep.mubr.bf16.mxu0 %v9492_v19  ;;  %v2514_v33 = vshll.u32 %v13226_v54, 16  ;;  %v2520_v29 = vshll.u32 %v13232_v60, 16  ;;  %v1964_v59 = vld [vmem:[#allocation2 + $0xc0] sm:$0xe]  ;;  %16105 = vst [vmem:[#allocation51_spill] sm:$0xff] %v13242_v8 }
 0x1db   : > { %v2524_v58 = vshrl.u32 %v13232_v60, 16  ;;  %4558 = vmatmul.mubr.bf16.gmra.mrb[116].mxu1 %v9507_v3  ;;  %v1918_v62 = vor.u32 %v1917_v38, %v1913_v48  ;;  %v1923_v4 = vrot.slane %v1921_v61, 5  ;;  %v899_v6 = vsel %vm11864_vm12, %v734_v34, %v898_v39  ;;  %v13248_v26 = vpop.f32.mrb[37].mxu0  ;;  %v16108_v39 = vld [vmem:[#allocation58_spill] sm:$0xff]  ;;  %v16109_v34 = vld [vmem:[#allocation59_spill] sm:$0xff] }
 0x1dc   : > { %v1909_v63 = vrot.slane %v1908_v30, 4  ;;  %v2513_v32 = vrot.slane %v2511_v36, 4  ;;  %900 = vst [vmem:[#allocation2 + $0xc8] sm:$0x1] %v899_v6  ;;  %v2516_v30 = vrot.slane %v2514_v33, 5  ;;  %v13246_v28 = vrot.slane %v2520_v29, 5 }
 0x1dd   : > { %v2526_v9 = vrot.slane %v2524_v58, 4  ;;  %16106 = vst [vmem:[#allocation78_spill] sm:$0xff] %v13248_v26  ;;  %v1919_v3 = vrot.slane %v1918_v62, 4  ;;  %v13252_v61 = vadd.f32 %v12966_v55, %v12956_v27  ;;  %v13256_v36 = vadd.f32 %v16109_v34, %v16108_v39  ;;  %v16111_v47 = vld [vmem:[#allocation54_spill] sm:$0xff]  ;;  %v16112_v19 = vld [vmem:[#allocation55_spill] sm:$0xff]  ;;  %v13265_v6 = vpop.f32.mrb[36].mxu1 }
 0x1de   : > { %v1914_v35 = vsel %vm11813_vm6, %v1909_v63, %v1913_v48  ;;  %v13260_v38 = vadd.f32 %v16112_v19, %v16111_v47  ;;  %v13262_v48 = vpop.f32.mrb[38].mxu0  ;;  %v2517_v63 = vor.u32 %v2516_v30, %v2513_v32  ;;  %v9381_v29 = vrot.slane %v1964_v59, 9  ;;  %v11356_v58 = vld [vmem:[#allocation2 + $0xc4] sm:$0xf]  ;;  %16115 = vst [vmem:[#allocation55_spill] sm:$0xff] %v13265_v6  ;;  %v16117_v39 = vld [vmem:[#allocation56_spill] sm:$0xff] }
 0x1df   : > { %16107 = vst [vmem:[#allocation79_spill] sm:$0xff] %v13252_v61  ;;  %16110 = vst [vmem:[#allocation58_spill] sm:$0xff] %v13256_v36  ;;  %v2527_v33 = vor.u32 %v2526_v9, %v13246_v28  ;;  %v2120_v62 = vrot.slane %v11356_v58, 5  ;;  %v13267_v27 = vpop.f32.mrb[39].mxu0  ;;  %v1924_v55 = vsel %vm11813_vm6, %v1919_v3, %v1923_v4  ;;  %v16118_v34 = vld [vmem:[#allocation57_spill] sm:$0xff]  ;;  %v13277_v19 = vpop.f32.mrb[37].mxu1 }
 0x1e0   : > { %16113 = vst [vmem:[#allocation59_spill] sm:$0xff] %v13260_v38  ;;  %16114 = vst [vmem:[#allocation54_spill] sm:$0xff] %v13262_v48  ;;  %v13273_v23 = vadd.f32 %v16118_v34, %v16117_v39  ;;  %v13275_v47 = vld [vmem:[#allocation2 + $0xcc] sm:$0xf]  ;;  %v11219_v32 = vld [vmem:[#allocation8 + $0x48] sm:$0xff]   ;;  %v9476_v59 = vcombine.low %v1914_v35, %v1924_v55  ;;  %v2518_v9 = vrot.slane %v2517_v63, 4 }
 0x1e1   : > { %16116 = vst [vmem:[#allocation80_spill] sm:$0xff] %v13267_v27  ;;  %16120 = vst [vmem:[#allocation57_spill] sm:$0xff] %v13277_v19  ;;  %v11220_v30 = vld [vmem:[#allocation8 + $0x8] sm:$0xff]   ;;  %v2528_v38 = vrot.slane %v2527_v33, 4  ;;  %v13281_v61 = vld [vmem:[#allocation2 + $0xd0] sm:$0xf]  ;;  %v2121_v4 = vsel %vm11879_vm13, %v9381_v29, %v2120_v62  ;;  %10457 = vmatprep.subr.bf16.mxu1 %v11219_v32 }
 0x1e2   : > { %16119 = vst [vmem:[#allocation56_spill] sm:$0xff] %v13273_v23  ;;  %16121 = vst [vmem:[#allocation81_spill] sm:$0xff] %v13281_v61  ;;  %v13283_v6 = vpop.f32.mrb[38].mxu1  ;;  %v16123_v3 = vshrl.u32 %v13181_v37, 16  ;;  %v1931_v34 = vrot.slane %v1929_v45, 5  ;;  %v1935_v23 = vshll.u32 %v11356_v58, 16  ;;  %4405 = vmatmul.mubr.bf16.gmra.mrb[120].mxu0 %v9476_v59  ;;  %10458 = vmatpush3.bf16.msra.mxu1 %v11220_v30  ;;  %v2523_v37 = vsel %vm11813_vm6, %v2518_v9, %v13246_v28 }
 0x1e3   : > { %16122 = vst [vmem:[#allocation82_spill] sm:$0xff] %v13283_v6  ;;  %v13289_v19 = vpop.f32.mrb[39].mxu1  ;;  %v2122_v35 = vrot.slane %v2120_v62, 4  ;;  %v1939_v63 = vshrl.u32 %v11356_v58, 16  ;;  %v2535_v33 = vshrl.u32 %v13275_v47, 16  ;;  %v2538_v55 = vshll.u32 %v13275_v47, 16 }
 0x1e4   : > { %v1928_v39 = vrot.slane %v16123_v3, 4  ;;  %16124 = vst [vmem:[#allocation83_spill] sm:$0xff] %v13289_v19  ;;  %v13293_v36 = vld [vmem:[#allocation2 + $0xc8] sm:$0x1]  ;;  %v1937_v3 = vrot.slane %v1935_v23, 5  ;;  %v2544_v19 = vshll.u32 %v13281_v61, 16 }
 0x1e5   : > { %16125 = vst [vmem:[#allocation84_spill] sm:$0xff] %v13293_v36  ;;  %v1564_v29 = vld [vmem:[#allocation2 + $0xc8] sm:$0x1]  ;;  %v2530_v32 = vshll.u32 %v13293_v36, 16  ;;  %v1941_v58 = vrot.slane %v1939_v63, 4  ;;  %v2537_v30 = vrot.slane %v2535_v33, 4 }
 0x1e6   : > { %v1932_v45 = vor.u32 %v1931_v34, %v1928_v39  ;;  %v2123_v62 = vrot.slane %v1564_v29, 5  ;;  %v1945_v59 = vshll.u32 %v1564_v29, 16  ;;  %v13300_v27 = vld [vmem:[#allocation2 + $0xd4] sm:$0x1]  ;;  %v2540_v48 = vrot.slane %v2538_v55, 5 }
 0x1e7   : > { %16126 = vst [vmem:[#allocation85_spill] sm:$0xff] %v13300_v27  ;;  %v2546_v26 = vrot.slane %v2544_v19, 5  ;;  %v2532_v8 = vrot.slane %v2530_v32, 5  ;;  %v1942_v9 = vor.u32 %v1941_v58, %v1937_v3  ;;  %v2548_v63 = vshrl.u32 %v13281_v61, 16 }
 0x1e8   : > { %v1933_v6 = vrot.slane %v1932_v45, 4  ;;  %v2124_v28 = vsel %vm11879_vm13, %v2122_v35, %v2123_v62  ;;  %v1947_v39 = vrot.slane %v1945_v59, 5  ;;  %v2541_v36 = vor.u32 %v2540_v48, %v2537_v30  ;;  %v13314_v35 = vpop.f32.mrb[40].mxu0 }
 0x1e9   : > { %v9493_v23 = vcombine.low %v2121_v4, %v2124_v28  ;;  %v2533_v29 = vsel %vm11813_vm6, %v2528_v38, %v2532_v8  ;;  %v1943_v45 = vrot.slane %v1942_v9, 4  ;;  %v2554_v33 = vshll.u32 %v13300_v27, 16  ;;  %v11357_v8 = vld [vmem:[#allocation2 + $0x2c] sm:$0x1] }
 0x1ea   : > { %v1938_v34 = vsel %vm11813_vm6, %v1933_v6, %v1937_v3  ;;  %v13312_v19 = vadd.f32 %v13002_v10, %v12992_v16  ;;  %v9524_v55 = vcombine.low %v2523_v37, %v2533_v29  ;;  %v2542_v4 = vrot.slane %v2541_v36, 4  ;;  %v2558_v6 = vld [vmem:[#allocation2 + $0x18] sm:$0xe]  ;;  %v13320_v3 = vpop.f32.mrb[41].mxu0  ;;  %v2559_v10 = vld [vmem:[#allocation2 + $0x24] sm:$0xe] }
 0x1eb   : > { %4412 = vmatprep.mubr.bf16.mxu0 %v9493_v23  ;;  %v2550_v32 = vrot.slane %v2548_v63, 4  ;;  %v13318_v48 = vadd.f32 %v13019_v46, %v13011_v22  ;;  %v2634_v38 = vrot.slane %v11357_v8, 5  ;;  %v1948_v62 = vsel %vm11813_vm6, %v1943_v45, %v1947_v39  ;;  %v13328_v37 = vpop.f32.mrb[42].mxu0  ;;  %v13330_v36 = vpop.f32.mrb[40].mxu1  ;;  %v11358_v39 = vld [vmem:[#allocation2 + $0x1c] sm:$0xf] }
 0x1ec   : > { %v13326_v16 = vadd.f32 %v13042_v57, %v13040_v21  ;;  %4565 = vmatprep.mubr.bf16.mxu1 %v9524_v55  ;;  %v9477_v22 = vcombine.low %v1938_v34, %v1948_v62  ;;  %v2547_v46 = vsel %vm11813_vm6, %v2542_v4, %v2546_v26  ;;  %v2556_v59 = vrot.slane %v2554_v33, 5  ;;  %v13334_v30 = vpop.f32.mrb[43].mxu0  ;;  %v13336_v28 = vpop.f32.mrb[41].mxu1  ;;  %v13341_v57 = vld [vmem:[%s15890_s3] ss:$0 sm:$0xff] }
 0x1ed   : > { %v2551_v58 = vor.u32 %v2550_v32, %v2546_v26  ;;  %v16128_v21 = vcombine.low %v13226_v54, %v13232_v60  ;;  %v9382_v9 = vrot.slane %v2558_v6, 9  ;;  %v2624_v23 = vrot.slane %v11358_v39, 5  ;;  %v11359_v34 = vld [vmem:[#allocation2 + $0x20] sm:$0x1]  ;;  %v13350_v29 = vpop.f32.mrb[42].mxu1 }
 0x1ee   : > { %16127 = vst [vmem:[#allocation86_spill] sm:$0xff] %v13326_v16  ;;  %v2627_v63 = vrot.slane %v11359_v34, 5  ;;  %v13348_v26 = vadd.f32 %v13049_v56, %v13045_v5  ;;  %4413 = vmatmul.mubr.bf16.gmra.mrb[124].mxu0 %v9477_v22  ;;  %v9383_v33 = vrot.slane %v2559_v10, 9  ;;  %v11360_v55 = vld [vmem:[#allocation2 + $0x28] sm:$0xf]  ;;  %v13354_v54 = vadd.f32 %v13096_v17, %v13086_v7  ;;  %v13356_v6 = vpop.f32.mrb[43].mxu1 }
 0x1ef   : > { %4566 = vmatmul.mubr.bf16.gmra.mrb[120].mxu1 %v16128_v21  ;;  %v2552_v45 = vrot.slane %v2551_v58, 4  ;;  %v2631_v4 = vrot.slane %v11360_v55, 5  ;;  %v2560_v32 = vld [vmem:[#allocation2 + $0x30] sm:$0xe]  ;;  %v2625_v8 = vsel %vm11879_vm13, %v9382_v9, %v2624_v23  ;;  %v2626_v62 = vrot.slane %v2624_v23, 4 }
 0x1f0   : > { %16129 = vst [vmem:[#allocation87_spill] sm:$0xff] %v13348_v26  ;;  %v13362_v5 = vadd.f32 %v13108_v1, %v13104_v20  ;;  %v13366_v56 = vadd.f32 %v13088_v49, %v13074_v51  ;;  %v13370_v10 = vadd.f32 %v12996_v42, %v13341_v57  ;;  %v2561_v58 = vld [vmem:[#allocation2 + $0x3c] sm:$0xe]  ;;  %v9509_v1 = vcombine.low %v13275_v47, %v13281_v61  ;;  %v11361_v9 = vld [vmem:[#allocation2 + $0x34] sm:$0xf] }
 0x1f1   : > { %v2557_v7 = vsel %vm11813_vm6, %v2552_v45, %v2556_v59  ;;  %v2632_v17 = vsel %vm11879_vm13, %v9383_v33, %v2631_v4  ;;  %v2633_v22 = vrot.slane %v2631_v4, 4  ;;  %v2628_v51 = vsel %vm11879_vm13, %v2626_v62, %v2627_v63  ;;  %v11362_v59 = vld [vmem:[#allocation2 + $0x38] sm:$0x1]  ;;  %v11363_v47 = vld [vmem:[#allocation2 + $0x40] sm:$0xf]  ;;  %v11221_v63 = vld [vmem:[#allocation8 + $0x50] sm:$0xff]  }
 0x1f2   : > { %16130 = vst [vmem:[#allocation88_spill] sm:$0xff] %v13366_v56  ;;  %v9525_v21 = vcombine.low %v2547_v46, %v2557_v7  ;;  %v9384_v49 = vrot.slane %v2560_v32, 9  ;;  %v9526_v20 = vcombine.low %v2625_v8, %v2628_v51  ;;  %v2638_v39 = vrot.slane %v11361_v9, 5  ;;  %v2562_v55 = vld [vmem:[#allocation2 + $0x48] sm:$0xe]  ;;  %10459 = vmatprep.subr.bf16.mxu1 %v11221_v63  ;;  %v16135_v63 = vld [vmem:[#allocation72_spill] sm:$0xff] }
 0x1f3   : > { %v2635_v42 = vsel %vm11879_vm13, %v2633_v22, %v2634_v38  ;;  %v2641_v23 = vrot.slane %v11362_v59, 5  ;;  %v13384_v46 = vadd.f32 %v13106_v13, %v13098_v41  ;;  %v9385_v45 = vrot.slane %v2561_v58, 9  ;;  %v11222_v4 = vld [vmem:[#allocation8 + $0x10] sm:$0xff]   ;;  %v11364_v8 = vld [vmem:[#allocation2 + $0x44] sm:$0x1] }
 0x1f4   : > { %4573 = vmatprep.mubr.bf16.mxu1 %v9525_v21  ;;  %v9527_v34 = vcombine.low %v2632_v17, %v2635_v42  ;;  %v2645_v33 = vrot.slane %v11363_v47, 5  ;;  %10943 = vmatprep.mubr.bf16.mxu0 %v9526_v20  ;;  %v2639_v38 = vsel %vm11879_vm13, %v9384_v49, %v2638_v39  ;;  %v2640_v32 = vrot.slane %v2638_v39, 4  ;;  %v13392_v17 = vpop.f32.mrb[44].mxu0  ;;  %v11365_v51 = vld [vmem:[#allocation2 + $0x4c] sm:$0xf] }
 0x1f5   : > { %16131 = vst [vmem:[#allocation89_spill] sm:$0xff] %v13384_v46  ;;  %v2648_v62 = vrot.slane %v11364_v8, 5  ;;  %v13390_v7 = vadd.f32 %v13133_v11, %v13125_v24  ;;  %v13396_v41 = vadd.f32 %v13000_v25, %v13341_v57  ;;  %v13400_v22 = vadd.f32 %v13150_v15, %v13142_v12  ;;  %v13406_v21 = vpop.f32.mrb[45].mxu0  ;;  %v13408_v24 = vpop.f32.mrb[44].mxu1  ;;  %v2563_v12 = vld [vmem:[#allocation2 + $0x54] sm:$0xe]  ;;  %10460 = vmatpush3.bf16.msra.mxu1 %v11222_v4 }
 0x1f6   : > { %v2647_v13 = vrot.slane %v2645_v33, 4  ;;  %v13404_v58 = vadd.f32 %v13144_v43, %v13135_v14  ;;  %10944 = vmatmul.mubr.bf16.vlgmr.msra.gmra.mrb[128].mxu0 %v9527_v34  ;;  %v2642_v25 = vsel %vm11879_vm13, %v2640_v32, %v2641_v23  ;;  %v2646_v11 = vsel %vm11879_vm13, %v9385_v45, %v2645_v33  ;;  %v13414_v49 = vpop.f32.mrb[46].mxu0  ;;  %v13416_v14 = vpop.f32.mrb[45].mxu1  ;;  %v16133_v43 = vld [vmem:[#allocation63_spill] sm:$0xff]  ;;  %v11366_v39 = vld [vmem:[#allocation2 + $0x50] sm:$0x1] }
 0x1f7   : > { %4574 = vmatmul.mubr.bf16.gmra.mrb[124].mxu1 %v9509_v1  ;;  %v9386_v1 = vrot.slane %v2562_v55, 9  ;;  %v2652_v15 = vrot.slane %v11365_v51, 5  ;;  %v13420_v20 = vadd.f32 %v16133_v43, %v13341_v57  ;;  %v9528_v42 = vcombine.low %v2639_v38, %v2642_v25  ;;  %v13424_v23 = vpop.f32.mrb[47].mxu0  ;;  %v13426_v34 = vpop.f32.mrb[46].mxu1  ;;  %v16134_v45 = vld [vmem:[#allocation64_spill] sm:$0xff]  ;;  %v16136_v4 = vld [vmem:[#allocation74_spill] sm:$0xff] }
 0x1f8   : > { %16132 = vst [vmem:[#allocation90_spill] sm:$0xff] %v13404_v58  ;;  %v2649_v9 = vsel %vm11879_vm13, %v2647_v13, %v2648_v62  ;;  %v2655_v59 = vrot.slane %v11366_v39, 5  ;;  %v13430_v47 = vadd.f32 %v16134_v45, %v13341_v57  ;;  %v13436_v38 = vadd.f32 %v16136_v4, %v16135_v63  ;;  %v2564_v32 = vld [vmem:[#allocation2 + $0x60] sm:$0xe]  ;;  %v13438_v8 = vpop.f32.mrb[47].mxu1 }
 0x1f9   : > { %v2653_v33 = vsel %vm11879_vm13, %v9386_v1, %v2652_v15  ;;  %v2654_v55 = vrot.slane %v2652_v15, 4  ;;  %10947 = vmatprep.mubr.bf16.mxu0 %v9528_v42  ;;  %v9529_v62 = vcombine.low %v2646_v11, %v2649_v9  ;;  %v9387_v13 = vrot.slane %v2563_v12, 9  ;;  %v11367_v25 = vld [vmem:[#allocation2 + $0x58] sm:$0xf]  ;;  %v11368_v1 = vld [vmem:[#allocation2 + $0x5c] sm:$0x1] }
 0x1fa   : > { %16137 = vst [vmem:[#allocation63_spill] sm:$0xff] %v13436_v38  ;;  %v2659_v51 = vrot.slane %v11367_v25, 5  ;;  %v10049_v43 = vadd.f32 %v13196_v2, %v13186_v18  ;;  %v2662_v15 = vrot.slane %v11368_v1, 5  ;;  %v10052_v45 = vadd.f32 %v13208_v52, %v13202_v50  ;;  %v11369_v25 = vld [vmem:[#allocation2 + $0x64] sm:$0xf]  ;;  %v16139_v50 = vld [vmem:[#allocation45_spill] sm:$0xff] }
 0x1fb   : > { %v2656_v39 = vsel %vm11879_vm13, %v2654_v55, %v2655_v59  ;;  %v10161_v63 = vadd.f32 %v13204_v40, %v13198_v0  ;;  %v9388_v12 = vrot.slane %v2564_v32, 9  ;;  %v2666_v18 = vrot.slane %v11369_v25, 5  ;;  %v11370_v2 = vld [vmem:[#allocation2 + $0x68] sm:$0x1]  ;;  %v16138_v59 = vld [vmem:[#allocation53_spill] sm:$0xff] }
 0x1fc   : > { %v9530_v4 = vcombine.low %v2653_v33, %v2656_v39  ;;  %v2661_v42 = vrot.slane %v2659_v51, 4  ;;  %v4037_v11 = vadd.f32 %v10049_v43, %v13341_v57  ;;  %v4040_v9 = vadd.f32 %v10052_v45, %v13341_v57  ;;  %v2565_v1 = vld [vmem:[#allocation2 + $0x6c] sm:$0xe]  ;;  %v16141_v0 = vld [vmem:[#allocation69_spill] sm:$0xff]  ;;  %v11371_v32 = vld [vmem:[#allocation2 + $0x70] sm:$0xf] }
 0x1fd   : > { %v2669_v53 = vrot.slane %v11370_v2, 5  ;;  %v10164_v55 = vadd.f32 %v16138_v59, %v13210_v31  ;;  %v13454_v52 = vadd.f32 %v16139_v50, %v13341_v57  ;;  %v13458_v40 = vadd.f32 %v16141_v0, %v13341_v57  ;;  %v16145_v2 = vld [vmem:[#allocation75_spill] sm:$0xff]  ;;  %v16147_v50 = vld [vmem:[#allocation76_spill] sm:$0xff]  ;;  %v16150_v0 = vld [vmem:[#allocation78_spill] sm:$0xff] }
 0x1fe   : > { %v13460_v33 = vadd.f32 %v10161_v63, %v4037_v11  ;;  %v2673_v43 = vrot.slane %v11371_v32, 5  ;;  %10948 = vmatmul.mubr.bf16.gmra.mrb[132].mxu0 %v9529_v62  ;;  %v2660_v39 = vsel %vm11879_vm13, %v9387_v13, %v2659_v51  ;;  %v2663_v31 = vsel %vm11879_vm13, %v2661_v42, %v2662_v15  ;;  %v16149_v62 = vld [vmem:[#allocation51_spill] sm:$0xff]  ;;  %v2566_v13 = vld [vmem:[#allocation2 + $0x78] sm:$0xe]  ;;  %v13478_v51 = vpop.f32.mrb[48].mxu0  ;;  %v13480_v15 = vpop.f32.mrb[48].mxu1 }
 0x1ff   : > { %16140 = vst [vmem:[#allocation64_spill] sm:$0xff] %v13454_v52  ;;  %16142 = vst [vmem:[#allocation72_spill] sm:$0xff] %v13458_v40  ;;  %v2668_v45 = vrot.slane %v2666_v18, 4  ;;  %v13466_v25 = vadd.f32 %v10164_v55, %v4040_v9  ;;  %v13470_v59 = vadd.f32 %v16145_v2, %v13341_v57  ;;  %v13474_v63 = vadd.f32 %v16147_v50, %v13341_v57  ;;  %v16151_v55 = vld [vmem:[#allocation54_spill] sm:$0xff]  ;;  %v16152_v2 = vld [vmem:[#allocation80_spill] sm:$0xff] }
 0x200   : > { %16143 = vst [vmem:[#allocation74_spill] sm:$0xff] %v13460_v33  ;;  %10951 = vmatprep.mubr.bf16.mxu0 %v9530_v4  ;;  %v9389_v11 = vrot.slane %v2565_v1, 9  ;;  %v10055_v32 = vadd.f32 %v16150_v0, %v16149_v62  ;;  %v2667_v42 = vsel %vm11879_vm13, %v9388_v12, %v2666_v18  ;;  %v10058_v50 = vadd.f32 %v16152_v2, %v16151_v55  ;;  %v16154_v4 = vld [vmem:[#allocation57_spill] sm:$0xff]  ;;  %v13490_v33 = vpop.f32.mrb[49].mxu0  ;;  %v13492_v62 = vpop.f32.mrb[49].mxu1 }
 0x201   : > { %16144 = vst [vmem:[#allocation53_spill] sm:$0xff] %v13466_v25  ;;  %16146 = vst [vmem:[#allocation45_spill] sm:$0xff] %v13470_v59  ;;  %v2670_v9 = vsel %vm11879_vm13, %v2668_v45, %v2669_v53  ;;  %v16153_v25 = vld [vmem:[#allocation55_spill] sm:$0xff]  ;;  %v9531_v0 = vcombine.low %v2660_v39, %v2663_v31  ;;  %v2675_v27 = vrot.slane %v2673_v43, 4  ;;  %v11372_v38 = vld [vmem:[#allocation2 + $0x7c] sm:$0xf] }
 0x202   : > { %16148 = vst [vmem:[#allocation69_spill] sm:$0xff] %v13474_v63  ;;  %v10167_v1 = vadd.f32 %v16154_v4, %v16153_v25  ;;  %v4045_v61 = vadd.f32 %v10055_v32, %v13341_v57  ;;  %v2680_v58 = vrot.slane %v11372_v38, 5  ;;  %v13495_v12 = vpop.f32.mrb[50].mxu0  ;;  %v13497_v18 = vpop.f32.mrb[50].mxu1  ;;  %v11373_v53 = vld [vmem:[#allocation2 + $0x74] sm:$0x1]  ;;  %v4048_v55 = vadd.f32 %v10058_v50, %v13341_v57 }
 0x203   : > { %v2676_v45 = vrot.slane %v11373_v53, 5  ;;  %v9390_v2 = vrot.slane %v2566_v13, 9  ;;  %v16155_v25 = vld [vmem:[#allocation82_spill] sm:$0xff]  ;;  %v16156_v4 = vld [vmem:[#allocation83_spill] sm:$0xff]  ;;  %v13502_v56 = vpop.f32.mrb[51].mxu0  ;;  %v13504_v39 = vpop.f32.mrb[51].mxu1  ;;  %v9532_v38 = vcombine.low %v2667_v42, %v2670_v9  ;;  %v13522_v42 = vadd.f32 %v13312_v19, %v13341_v57 }
 0x204   : > { %v10170_v46 = vadd.f32 %v16156_v4, %v16155_v25  ;;  %v16157_v31 = vld [vmem:[#allocation79_spill] sm:$0xff]  ;;  %v13510_v26 = vadd.f32 %v10167_v1, %v4045_v61  ;;  %v11374_v16 = vld [vmem:[#allocation2 + $0x80] sm:$0x1]  ;;  %v2682_v53 = vrot.slane %v2680_v58, 4  ;;  %v2567_v13 = vld [vmem:[#allocation2 + $0x84] sm:$0xe]  ;;  %v10061_v25 = vadd.f32 %v13320_v3, %v13314_v35 }
 0x205   : > { %v13508_v32 = vadd.f32 %v16157_v31, %v13341_v57  ;;  %v2683_v63 = vrot.slane %v11374_v16, 5  ;;  %v11375_v50 = vld [vmem:[#allocation2 + $0x88] sm:$0xf]  ;;  %v16158_v4 = vld [vmem:[#allocation58_spill] sm:$0xff]  ;;  %v10064_v61 = vadd.f32 %v13334_v30, %v13328_v37  ;;  %v10173_v16 = vadd.f32 %v13336_v28, %v13330_v36  ;;  %v2568_v37 = vld [vmem:[#allocation2 + $0x90] sm:$0xe] }
 0x206   : > { %v13512_v59 = vadd.f32 %v10170_v46, %v4048_v55  ;;  %v2687_v40 = vrot.slane %v11375_v50, 5  ;;  %v13518_v52 = vadd.f32 %v16158_v4, %v13341_v57  ;;  %10952 = vmatmul.mubr.bf16.gmra.mrb[136].mxu0 %v9531_v0  ;;  %v2674_v46 = vsel %vm11879_vm13, %v9389_v11, %v2673_v43  ;;  %v11376_v30 = vld [vmem:[#allocation2 + $0x94] sm:$0xf]  ;;  %v11377_v0 = vld [vmem:[#allocation2 + $0x8c] sm:$0x1]  ;;  %v16159_v50 = vld [vmem:[#allocation62_spill] sm:$0xff] }
 0x207   : > { %v2677_v35 = vsel %vm11879_vm13, %v2675_v27, %v2676_v45  ;;  %v2681_v3 = vsel %vm11879_vm13, %v9390_v2, %v2680_v58  ;;  %v4053_v9 = vadd.f32 %v10061_v25, %v13341_v57  ;;  %10955 = vmatprep.mubr.bf16.mxu0 %v9532_v38  ;;  %v9391_v19 = vrot.slane %v2567_v13, 9  ;;  %v11223_v28 = vld [vmem:[#allocation8 + $0x58] sm:$0xff]   ;;  %v2569_v13 = vld [vmem:[#allocation2 + $0x9c] sm:$0xe] }
 0x208   : > { %v4056_v1 = vadd.f32 %v10064_v61, %v13341_v57  ;;  %v2694_v55 = vrot.slane %v11376_v30, 5  ;;  %v10176_v36 = vadd.f32 %v13356_v6, %v13350_v29  ;;  %v11224_v43 = vld [vmem:[#allocation8 + $0x18] sm:$0xff]   ;;  %v2684_v27 = vsel %vm11879_vm13, %v2682_v53, %v2683_v63  ;;  %v13549_v6 = vpop.f32.mrb[52].mxu0  ;;  %10461 = vmatprep.subr.bf16.mxu1 %v11223_v28  ;;  %v11378_v53 = vld [vmem:[#allocation2 + $0x98] sm:$0x1] }
 0x209   : > { %v2689_v11 = vrot.slane %v2687_v40, 4  ;;  %v2690_v58 = vrot.slane %v11377_v0, 5  ;;  %v13540_v45 = vadd.f32 %v10173_v16, %v4053_v9  ;;  %v13544_v2 = vadd.f32 %v13318_v48, %v13341_v57  ;;  %v10078_v16 = vpop.f32.mrb[53].mxu0  ;;  %10462 = vmatpush3.bf16.msra.mxu1 %v11224_v43 }
 0x20a   : > { %v9533_v31 = vcombine.low %v2674_v46, %v2677_v35  ;;  %v13546_v38 = vadd.f32 %v10176_v36, %v4056_v1  ;;  %v2701_v29 = vrot.slane %v16159_v50, 5  ;;  %v9392_v25 = vrot.slane %v2568_v37, 9  ;;  %v2570_v1 = vld [vmem:[#allocation2 + $0xa8] sm:$0xe]  ;;  %v10080_v37 = vpop.f32.mrb[54].mxu0  ;;  %v16161_v50 = vld [vmem:[#allocation68_spill] sm:$0xff] }
 0x20b   : > { %v2696_v63 = vrot.slane %v2694_v55, 4  ;;  %v2697_v4 = vrot.slane %v11378_v53, 5  ;;  %v10067_v61 = vadd.f32 %v13406_v21, %v13392_v17  ;;  %v9534_v48 = vcombine.low %v2681_v3, %v2684_v27  ;;  %v16160_v21 = vld [vmem:[#allocation67_spill] sm:$0xff]  ;;  %v10081_v3 = vpop.f32.mrb[55].mxu0  ;;  %v11379_v27 = vld [vmem:[#allocation2 + $0xa4] sm:$0x1] }
 0x20c   : > { %v2688_v46 = vsel %vm11879_vm13, %v9391_v19, %v2687_v40  ;;  %v10070_v35 = vadd.f32 %v13424_v23, %v13414_v49  ;;  %v10179_v9 = vadd.f32 %v13416_v14, %v13408_v24  ;;  %v2691_v30 = vsel %vm11879_vm13, %v2689_v11, %v2690_v58  ;;  %v10189_v24 = vpop.f32.mrb[52].mxu1 }
 0x20d   : > { %v9393_v36 = vrot.slane %v2569_v13, 9  ;;  %v4061_v17 = vadd.f32 %v10067_v61, %v13341_v57  ;;  %v2708_v28 = vrot.slane %v16160_v21, 5  ;;  %v2703_v43 = vrot.slane %v2701_v29, 4  ;;  %v10190_v58 = vpop.f32.mrb[53].mxu1 }
 0x20e   : > { %v2704_v40 = vrot.slane %v11379_v27, 5  ;;  %v4064_v19 = vadd.f32 %v10070_v35, %v13341_v57  ;;  %v10182_v49 = vadd.f32 %v13438_v8, %v13426_v34  ;;  %10956 = vmatmul.mubr.bf16.gmra.mrb[140].mxu0 %v9533_v31  ;;  %v2695_v14 = vsel %vm11879_vm13, %v9392_v25, %v2694_v55  ;;  %v10192_v8 = vpop.f32.mrb[54].mxu1 }
 0x20f   : > { %v2698_v23 = vsel %vm11879_vm13, %v2696_v63, %v2697_v4  ;;  %v13570_v11 = vadd.f32 %v10179_v9, %v4061_v17  ;;  %v9394_v0 = vrot.slane %v2570_v1, 9  ;;  %10959 = vmatprep.mubr.bf16.mxu0 %v9534_v48  ;;  %v2710_v13 = vrot.slane %v2708_v28, 4  ;;  %v10193_v4 = vpop.f32.mrb[55].mxu1  ;;  %v13592_v9 = vld [vmem:[#allocation2 + $0xb4] sm:$0xe] }
 0x210   : > { %v2711_v53 = vrot.slane %v16161_v50, 5  ;;  %v13573_v61 = vadd.f32 %v10182_v49, %v4064_v19  ;;  %v10073_v34 = vadd.f32 %v13490_v33, %v13478_v51  ;;  %v4021_v55 = vadd.f32 %v13354_v54, %v13341_v57  ;;  %v16165_v50 = vld [vmem:[#allocation60_spill] sm:$0xff] }
 0x211   : > { %v4024_v31 = vadd.f32 %v13362_v5, %v13341_v57  ;;  %v10076_v25 = vadd.f32 %v13502_v56, %v13495_v12  ;;  %v10185_v63 = vadd.f32 %v13492_v62, %v13480_v15  ;;  %v4029_v48 = vadd.f32 %v13390_v7, %v13341_v57  ;;  %v13595_v12 = vld [vmem:[#allocation2 + $0xc0] sm:$0xe] }
 0x212   : > { %v2702_v33 = vsel %vm11879_vm13, %v9393_v36, %v2701_v29  ;;  %v2705_v51 = vsel %vm11879_vm13, %v2703_v43, %v2704_v40  ;;  %v4069_v54 = vadd.f32 %v10073_v34, %v13341_v57  ;;  %v9535_v35 = vcombine.low %v2688_v46, %v2691_v30  ;;  %v16162_v29 = vld [vmem:[#allocation71_spill] sm:$0xff] }
 0x213   : > { %v9536_v5 = vcombine.low %v2695_v14, %v2698_v23  ;;  %v4072_v56 = vadd.f32 %v10076_v25, %v13341_v57  ;;  %v10188_v15 = vadd.f32 %v13504_v39, %v13497_v18  ;;  %v2709_v7 = vsel %vm11879_vm13, %v9394_v0, %v2708_v28  ;;  %v16163_v39 = vld [vmem:[#allocation50_spill] sm:$0xff]  ;;  %v16164_v23 = vld [vmem:[#allocation84_spill] sm:$0xff] }
 0x214   : > { %v2712_v62 = vsel %vm11879_vm13, %v2710_v13, %v2711_v53  ;;  %v2715_v1 = vrot.slane %v16162_v29, 5  ;;  %v13604_v36 = vadd.f32 %v10185_v63, %v4069_v54  ;;  %v4032_v46 = vadd.f32 %v13400_v22, %v13341_v57  ;;  %v10083_v13 = vpop.f32.mrb[56].mxu0 }
 0x215   : > { %v9537_v30 = vcombine.low %v2702_v33, %v2705_v51  ;;  %v2722_v17 = vrot.slane %v13232_v60, 5  ;;  %v13609_v21 = vadd.f32 %v10188_v15, %v4072_v56  ;;  %v9395_v18 = vrot.slane %v13592_v9, 9  ;;  %v16169_v33 = vld [vmem:[#allocation64_spill] sm:$0xff]  ;;  %v16170_v51 = vld [vmem:[#allocation70_spill] sm:$0xff]  ;;  %v16172_v9 = vld [vmem:[#allocation73_spill] sm:$0xff] }
 0x216   : > { %v2718_v43 = vrot.slane %v16163_v39, 5  ;;  %v9396_v28 = vrot.slane %v13595_v12, 9  ;;  %v10079_v27 = vadd.f32 %v10078_v16, %v13549_v6  ;;  %10960 = vmatmul.mubr.bf16.gmra.mrb[144].mxu0 %v9535_v35  ;;  %v9538_v40 = vcombine.low %v2709_v7, %v2712_v62  ;;  %v10084_v6 = vpop.f32.mrb[57].mxu0  ;;  %v16166_v16 = vld [vmem:[#allocation61_spill] sm:$0xff]  ;;  %v16176_v62 = vld [vmem:[#allocation52_spill] sm:$0xff] }
 0x217   : > { %v10082_v19 = vadd.f32 %v10081_v3, %v10080_v37  ;;  %v10191_v49 = vadd.f32 %v10190_v58, %v10189_v24  ;;  %v10194_v14 = vadd.f32 %v10193_v4, %v10192_v8  ;;  %10963 = vmatprep.mubr.bf16.mxu0 %v9536_v5  ;;  %v2717_v22 = vrot.slane %v2715_v1, 4  ;;  %v16167_v3 = vld [vmem:[#allocation65_spill] sm:$0xff]  ;;  %v10086_v63 = vpop.f32.mrb[58].mxu0  ;;  %v16168_v4 = vld [vmem:[#allocation66_spill] sm:$0xff]  ;;  %v16171_v5 = vld [vmem:[#allocation72_spill] sm:$0xff] }
 0x218   : > { %v2725_v0 = vrot.slane %v16164_v23, 5  ;;  %v4077_v60 = vadd.f32 %v10079_v27, %v13341_v57  ;;  %v13619_v53 = vadd.f32 %v16165_v50, %v13370_v10  ;;  %v2724_v34 = vrot.slane %v2722_v17, 4  ;;  %v16174_v12 = vld [vmem:[#allocation77_spill] sm:$0xff]  ;;  %v16177_v27 = vld [vmem:[#allocation59_spill] sm:$0xff]  ;;  %v10195_v23 = vpop.f32.mrb[56].mxu1 }
 0x219   : > { %v4080_v25 = vadd.f32 %v10082_v19, %v13341_v57  ;;  %v13624_v37 = vadd.f32 %v16166_v16, %v13396_v41  ;;  %v13628_v24 = vadd.f32 %v16167_v3, %v13420_v20  ;;  %v10085_v8 = vadd.f32 %v10084_v6, %v10083_v13  ;;  %v10087_v41 = vpop.f32.mrb[59].mxu0  ;;  %v16173_v20 = vld [vmem:[#allocation45_spill] sm:$0xff]  ;;  %v16180_v50 = vld [vmem:[#allocation87_spill] sm:$0xff]  ;;  %v16181_v6 = vld [vmem:[#allocation88_spill] sm:$0xff] }
 0x21a   : > { %v13630_v58 = vadd.f32 %v10191_v49, %v4077_v60  ;;  %v13634_v10 = vadd.f32 %v16168_v4, %v13430_v47  ;;  %v13638_v54 = vadd.f32 %v16170_v51, %v16169_v33  ;;  %v13644_v56 = vadd.f32 %v16172_v9, %v16171_v5  ;;  %v16175_v7 = vld [vmem:[#allocation69_spill] sm:$0xff]  ;;  %v16178_v49 = vld [vmem:[#allocation56_spill] sm:$0xff]  ;;  %v16179_v60 = vld [vmem:[#allocation86_spill] sm:$0xff]  ;;  %v10196_v4 = vpop.f32.mrb[57].mxu1 }
 0x21b   : > { %v13640_v35 = vadd.f32 %v10194_v14, %v4080_v25  ;;  %v13648_v15 = vadd.f32 %v16174_v12, %v16173_v20  ;;  %v13652_v29 = vadd.f32 %v16176_v62, %v16175_v7  ;;  %v4085_v47 = vadd.f32 %v10085_v8, %v13341_v57  ;;  %v16182_v3 = vld [vmem:[#allocation89_spill] sm:$0xff]  ;;  %v16184_v51 = vld [vmem:[#allocation63_spill] sm:$0xff]  ;;  %v10198_v5 = vpop.f32.mrb[58].mxu1 }
 0x21c   : > { %v10088_v39 = vadd.f32 %v10087_v41, %v10086_v63  ;;  %v13657_v19 = vadd.f32 %v16177_v27, %v13508_v32  ;;  %v13661_v14 = vadd.f32 %v16178_v49, %v13518_v52  ;;  %v13665_v13 = vadd.f32 %v16179_v60, %v13522_v42  ;;  %v11225_v32 = vld [vmem:[#allocation8 + $0x60] sm:$0xff]   ;;  %v16183_v52 = vld [vmem:[#allocation90_spill] sm:$0xff]  ;;  %v2573_v12 = vld [vmem:[#allocation2 + $0xcc] sm:$0xe] }
 0x21d   : > { %v13669_v25 = vadd.f32 %v16180_v50, %v13544_v2  ;;  %v13672_v16 = vadd.f32 %v16181_v6, %v4021_v55  ;;  %v13675_v8 = vadd.f32 %v16182_v3, %v4024_v31  ;;  %v11226_v63 = vld [vmem:[#allocation8 + $0x20] sm:$0xff]   ;;  %v13678_v33 = vadd.f32 %v16183_v52, %v4029_v48  ;;  %10463 = vmatprep.subr.bf16.mxu1 %v11225_v32  ;;  %v10199_v48 = vpop.f32.mrb[59].mxu1 }
 0x21e   : > { %v13681_v41 = vadd.f32 %v16184_v51, %v4032_v46  ;;  %10964 = vmatmul.mubr.bf16.gmra.mrb[148].mxu0 %v9537_v30  ;;  %v4088_v42 = vadd.f32 %v10088_v39, %v13341_v57  ;;  %v10197_v2 = vadd.f32 %v10196_v4, %v10195_v23  ;;  %v2716_v55 = vsel %vm11879_vm13, %v9395_v18, %v2715_v1  ;;  %v16185_v9 = vld [vmem:[#allocation81_spill] sm:$0xff]  ;;  %v10201_v49 = vpop.f32.mrb[60].mxu1  ;;  %v10089_v60 = vpop.f32.mrb[60].mxu0 }
 0x21f   : > { %10967 = vmatprep.mubr.bf16.mxu0 %v9538_v40  ;;  %v2719_v31 = vsel %vm11879_vm13, %v2717_v22, %v2718_v43  ;;  %v2729_v20 = vrot.slane %v16185_v9, 5  ;;  %10464 = vmatpush3.bf16.msra.mxu1 %v11226_v63  ;;  %v2723_v46 = vsel %vm11879_vm13, %v9396_v28, %v2722_v17  ;;  %v2726_v30 = vsel %vm11879_vm13, %v2724_v34, %v2725_v0  ;;  %v16186_v22 = vld [vmem:[#allocation85_spill] sm:$0xff]  ;;  %v10202_v23 = vpop.f32.mrb[61].mxu1 }
 0x220   : > { %v13693_v7 = vadd.f32 %v10197_v2, %v4085_v47  ;;  %v10200_v40 = vadd.f32 %v10199_v48, %v10198_v5  ;;  %v9539_v62 = vcombine.low %v2716_v55, %v2719_v31  ;;  %v9540_v1 = vcombine.low %v2723_v46, %v2726_v30  ;;  %v10204_v28 = vpop.f32.mrb[62].mxu1  ;;  %v10090_v47 = vpop.f32.mrb[61].mxu0 }
 0x221   : > { %v9397_v18 = vrot.slane %v2573_v12, 9  ;;  %v2731_v43 = vrot.slane %v2729_v20, 4  ;;  %v2732_v27 = vrot.slane %v16186_v22, 5  ;;  %v10203_v17 = vadd.f32 %v10202_v23, %v10201_v49  ;;  %v10205_v50 = vpop.f32.mrb[63].mxu1  ;;  %v10092_v3 = vpop.f32.mrb[62].mxu0  ;;  %v11228_v22 = vld [vmem:[#allocation8 + $0x28] sm:$0xff]  }
 0x222   : > { %v13695_v39 = vadd.f32 %v10200_v40, %v4088_v42  ;;  %v10091_v6 = vadd.f32 %v10090_v47, %v10089_v60  ;;  %v10206_v32 = vadd.f32 %v10205_v50, %v10204_v28  ;;  %v10093_v63 = vpop.f32.mrb[63].mxu0 }
 0x223   : > { %v2730_v0 = vsel %vm11879_vm13, %v9397_v18, %v2729_v20  ;;  %v2733_v34 = vsel %vm11879_vm13, %v2731_v43, %v2732_v27  ;;  %v10094_v51 = vadd.f32 %v10093_v63, %v10092_v3 }
 0x224   : > { %v9541_v4 = vcombine.low %v2730_v0, %v2733_v34  ;;  %v4093_v52 = vadd.f32 %v10091_v6, %v13341_v57 }
 0x225   : > { %v4096_v42 = vadd.f32 %v10094_v51, %v13341_v57  ;;  %v11227_v57 = vld [vmem:[#allocation8 + $0x68] sm:$0xff]  }
 0x226   : > { %10968 = vmatmul.mubr.bf16.gmra.mrb[152].mxu0 %v9539_v62  ;;  %v13704_v2 = vadd.f32 %v10203_v17, %v4093_v52  ;;  %v10335_v5 = vpop.f32.mrb[64].mxu1  ;;  %v10223_v9 = vpop.f32.mrb[64].mxu0  ;;  %10465 = vmatprep.subr.bf16.mxu1 %v11227_v57 }
 0x227   : > { %10971 = vmatprep.mubr.bf16.mxu0 %v9540_v1  ;;  %v10336_v55 = vpop.f32.mrb[65].mxu1  ;;  %v13706_v31 = vadd.f32 %v10206_v32, %v4096_v42  ;;  %v10224_v46 = vpop.f32.mrb[65].mxu0  ;;  %10466 = vmatpush3.bf16.msra.mxu1 %v11228_v22 }
 0x228   : > { %v10337_v20 = vadd.f32 %v10336_v55, %v10335_v5  ;;  %v10338_v48 = vpop.f32.mrb[66].mxu1  ;;  %v10225_v12 = vadd.f32 %v10224_v46, %v10223_v9  ;;  %v10226_v40 = vpop.f32.mrb[66].mxu0 }
 0x229   : > { %v10339_v30 = vpop.f32.mrb[67].mxu1  ;;  %v10227_v1 = vpop.f32.mrb[67].mxu0 }
 0x22a   : > { %v10340_v62 = vadd.f32 %v10339_v30, %v10338_v48  ;;  %v4295_v18 = vadd.f32 %v10225_v12, %v13619_v53  ;;  %v10228_v43 = vadd.f32 %v10227_v1, %v10226_v40 }
 0x22c   : > { %v4298_v27 = vadd.f32 %v10228_v43, %v13624_v37  ;;  %v13710_v23 = vadd.f32 %v10337_v20, %v4295_v18 }
 0x22e   : > { %10972 = vmatmul.mubr.bf16.gmra.mrb[156].mxu0 %v9541_v4  ;;  %v10229_v17 = vpop.f32.mrb[68].mxu0  ;;  %v13712_v34 = vadd.f32 %v10340_v62, %v4298_v27 }
 0x22f   : > { %v10341_v49 = vpop.f32.mrb[68].mxu1  ;;  %v10230_v47 = vpop.f32.mrb[69].mxu0 }
 0x230   : > { %v10342_v60 = vpop.f32.mrb[69].mxu1  ;;  %v10231_v6 = vadd.f32 %v10230_v47, %v10229_v17  ;;  %v10232_v53 = vpop.f32.mrb[70].mxu0 }
 0x231   : > { %v10343_v28 = vadd.f32 %v10342_v60, %v10341_v49  ;;  %v10344_v0 = vpop.f32.mrb[70].mxu1  ;;  %v10233_v32 = vpop.f32.mrb[71].mxu0 }
 0x232   : > { %v10345_v50 = vpop.f32.mrb[71].mxu1  ;;  %v4303_v63 = vadd.f32 %v10231_v6, %v13628_v24  ;;  %v10234_v37 = vadd.f32 %v10233_v32, %v10232_v53  ;;  %v11229_v6 = vld [vmem:[#allocation8 + $0xc0] sm:$0xff]   ;;  %v11230_v32 = vld [vmem:[#allocation8 + $0x70] sm:$0xff]  }
 0x233   : > { %v10346_v3 = vadd.f32 %v10345_v50, %v10344_v0  ;;  %10567 = vmatprep.subr.bf16.mxu0 %v11229_v6  ;;  %10467 = vmatprep.subr.bf16.mxu1 %v11230_v32 }
 0x234   : > { %v4306_v4 = vadd.f32 %v10234_v37, %v13634_v10  ;;  %v13716_v52 = vadd.f32 %v10343_v28, %v4303_v63  ;;  %v11231_v63 = vld [vmem:[#allocation8 + $0x80] sm:$0xff]   ;;  %v11232_v37 = vld [vmem:[#allocation8 + $0x30] sm:$0xff]  }
 0x235   : > { %10568 = vmatpush3.bf16.msra.mxu0 %v11231_v63  ;;  %10468 = vmatpush3.bf16.msra.mxu1 %v11232_v37  ;;  %v11237_v63 = vld [vmem:[#allocation8 + $0xd8] sm:$0xff]  }
 0x236   : > { %v10235_v51 = vpop.f32.mrb[72].mxu0  ;;  %v13718_v5 = vadd.f32 %v10346_v3, %v4306_v4 }
 0x237   : > { %v10236_v55 = vpop.f32.mrb[73].mxu0 }
 0x238   : > { %v10237_v20 = vadd.f32 %v10236_v55, %v10235_v51  ;;  %v10238_v48 = vpop.f32.mrb[74].mxu0 }
 0x239   : > { %v10239_v12 = vpop.f32.mrb[75].mxu0 }
 0x23a   : > { %v10347_v42 = vpop.f32.mrb[72].mxu1  ;;  %v4311_v62 = vadd.f32 %v10237_v20, %v13638_v54  ;;  %v10240_v24 = vadd.f32 %v10239_v12, %v10238_v48 }
 0x23b   : > { %v10348_v9 = vpop.f32.mrb[73].mxu1 }
 0x23c   : > { %v10349_v46 = vadd.f32 %v10348_v9, %v10347_v42  ;;  %v10350_v30 = vpop.f32.mrb[74].mxu1  ;;  %v4314_v10 = vadd.f32 %v10240_v24, %v13644_v56 }
 0x23d   : > { %v10351_v40 = vpop.f32.mrb[75].mxu1 }
 0x23e   : > { %v10352_v1 = vadd.f32 %v10351_v40, %v10350_v30  ;;  %v13722_v18 = vadd.f32 %v10349_v46, %v4311_v62  ;;  %v10241_v43 = vpop.f32.mrb[76].mxu0 }
 0x23f   : > { %v10242_v22 = vpop.f32.mrb[77].mxu0 }
 0x240   : > { %v13724_v57 = vadd.f32 %v10352_v1, %v4314_v10  ;;  %v10243_v27 = vadd.f32 %v10242_v22, %v10241_v43  ;;  %v10244_v49 = vpop.f32.mrb[78].mxu0 }
 0x241   : > { %v10245_v17 = vpop.f32.mrb[79].mxu0 }
 0x242   : > { %v4319_v0 = vadd.f32 %v10243_v27, %v13648_v15  ;;  %v10246_v47 = vadd.f32 %v10245_v17, %v10244_v49  ;;  %v11233_v27 = vld [vmem:[#allocation8 + $0xc8] sm:$0xff]  }
 0x243   : > { %v11234_v17 = vld [vmem:[#allocation8 + $0x88] sm:$0xff]   ;;  %10569 = vmatprep.subr.bf16.mxu0 %v11233_v27  ;;  %v11241_v27 = vld [vmem:[#allocation8 + $0xa0] sm:$0xff]  }
 0x244   : > { %v4322_v56 = vadd.f32 %v10246_v47, %v13652_v29  ;;  %10570 = vmatpush3.bf16.msra.mxu0 %v11234_v17  ;;  %v11243_v17 = vld [vmem:[#allocation8 + $0xe8] sm:$0xff]  }
 0x245   : > { %v10353_v60 = vpop.f32.mrb[76].mxu1 }
 0x246   : > { %v10354_v28 = vpop.f32.mrb[77].mxu1 }
 0x247   : > { %v10355_v50 = vadd.f32 %v10354_v28, %v10353_v60  ;;  %v10356_v54 = vpop.f32.mrb[78].mxu1 }
 0x248   : > { %v10357_v53 = vpop.f32.mrb[79].mxu1  ;;  %v10247_v51 = vpop.f32.mrb[80].mxu0 }
 0x249   : > { %v10358_v3 = vadd.f32 %v10357_v53, %v10356_v54  ;;  %v13728_v4 = vadd.f32 %v10355_v50, %v4319_v0  ;;  %v10248_v15 = vpop.f32.mrb[81].mxu0  ;;  %v11236_v50 = vld [vmem:[#allocation8 + $0x90] sm:$0xff]  }
 0x24a   : > { %v10249_v55 = vadd.f32 %v10248_v15, %v10247_v51  ;;  %v10250_v9 = vpop.f32.mrb[82].mxu0  ;;  %v11238_v15 = vld [vmem:[#allocation8 + $0x98] sm:$0xff]  }
 0x24b   : > { %v13730_v42 = vadd.f32 %v10358_v3, %v4322_v56  ;;  %v10251_v20 = vpop.f32.mrb[83].mxu0 }
 0x24c   : > { %v4327_v48 = vadd.f32 %v10249_v55, %v13657_v19  ;;  %v10252_v46 = vadd.f32 %v10251_v20, %v10250_v9 }
 0x24e   : > { %v4330_v12 = vadd.f32 %v10252_v46, %v13661_v14  ;;  %v11235_v14 = vld [vmem:[#allocation8 + $0xd0] sm:$0xff]  }
 0x24f   : > { %v10359_v29 = vpop.f32.mrb[80].mxu1  ;;  %10571 = vmatprep.subr.bf16.mxu0 %v11235_v14 }
 0x250   : > { %v10360_v30 = vpop.f32.mrb[81].mxu1  ;;  %10572 = vmatpush3.bf16.msra.mxu0 %v11236_v50 }
 0x251   : > { %v10361_v40 = vadd.f32 %v10360_v30, %v10359_v29  ;;  %v10362_v62 = vpop.f32.mrb[82].mxu1  ;;  %10573 = vmatprep.subr.bf16.mxu0 %v11237_v63  ;;  %v11245_v63 = vld [vmem:[#allocation8 + $0xf0] sm:$0xff]  }
 0x252   : > { %v10363_v24 = vpop.f32.mrb[83].mxu1  ;;  %v10253_v10 = vpop.f32.mrb[84].mxu0 }
 0x253   : > { %v10364_v1 = vadd.f32 %v10363_v24, %v10362_v62  ;;  %v13734_v43 = vadd.f32 %v10361_v40, %v4327_v48  ;;  %v10254_v22 = vpop.f32.mrb[85].mxu0 }
 0x254   : > { %v10255_v49 = vadd.f32 %v10254_v22, %v10253_v10  ;;  %v10256_v60 = vpop.f32.mrb[86].mxu0  ;;  %10574 = vmatpush3.bf16.msra.mxu0 %v11238_v15  ;;  %v11240_v22 = vld [vmem:[#allocation8 + $0x78] sm:$0xff]   ;;  %v11246_v15 = vld [vmem:[#allocation8 + $0xb0] sm:$0xff]  }
 0x255   : > { %v13736_v28 = vadd.f32 %v10364_v1, %v4330_v12  ;;  %v10257_v19 = vpop.f32.mrb[87].mxu0  ;;  %v11239_v1 = vld [vmem:[#allocation8 + $0xe0] sm:$0xff]   ;;  %10469 = vmatprep.subr.bf16.mxu1 %v11240_v22  ;;  %v5303_v22 = vld [vmem:[#allocation2 + $0x4] sm:$0xf] }
 0x256   : > { %v4335_v0 = vadd.f32 %v10255_v49, %v13665_v13  ;;  %v10258_v47 = vadd.f32 %v10257_v19, %v10256_v60  ;;  %v11242_v49 = vld [vmem:[#allocation8 + $0x38] sm:$0xff]   ;;  %10575 = vmatprep.subr.bf16.mxu0 %v11239_v1 }
 0x257   : > { %10470 = vmatpush3.bf16.msra.mxu1 %v11242_v49  ;;  %v5334_v49 = vld [vmem:[#allocation2 + $0x8] sm:$0x1] }
 0x258   : > { %v4338_v6 = vadd.f32 %v10258_v47, %v13669_v25  ;;  %10576 = vmatpush3.bf16.msra.mxu0 %v11241_v27 }
 0x259   : > { %10577 = vmatprep.subr.bf16.mxu0 %v11243_v17 }
 0x25a   : > { %v10365_v54 = vpop.f32.mrb[84].mxu1 }
 0x25b   : > { %v10366_v53 = vpop.f32.mrb[85].mxu1 }
 0x25c   : > { %v10367_v56 = vadd.f32 %v10366_v53, %v10365_v54  ;;  %v10368_v3 = vpop.f32.mrb[86].mxu1  ;;  %v10259_v51 = vpop.f32.mrb[88].mxu0 }
 0x25d   : > { %v10369_v32 = vpop.f32.mrb[87].mxu1  ;;  %v10260_v13 = vpop.f32.mrb[89].mxu0 }
 0x25e   : > { %v10370_v37 = vadd.f32 %v10369_v32, %v10368_v3  ;;  %v13740_v55 = vadd.f32 %v10367_v56, %v4335_v0  ;;  %v10261_v9 = vadd.f32 %v10260_v13, %v10259_v51  ;;  %v10262_v20 = vpop.f32.mrb[90].mxu0 }
 0x25f   : > { %v10263_v25 = vpop.f32.mrb[91].mxu0 }
 0x260   : > { %v13742_v48 = vadd.f32 %v10370_v37, %v4338_v6  ;;  %v4343_v29 = vadd.f32 %v10261_v9, %v13672_v16  ;;  %v10264_v46 = vadd.f32 %v10263_v25, %v10262_v20  ;;  %v11244_v16 = vld [vmem:[#allocation8 + $0xa8] sm:$0xff]   ;;  %v11247_v25 = vld [vmem:[#allocation8 + $0xf8] sm:$0xff]  }
 0x261   : > { %10578 = vmatpush3.bf16.msra.mxu0 %v11244_v16  ;;  %v16188_v16 = vld [vmem:[#allocation53_spill] sm:$0xff] }
 0x262   : > { %v4346_v12 = vadd.f32 %v10264_v46, %v13675_v8  ;;  %10579 = vmatprep.subr.bf16.mxu0 %v11245_v63  ;;  %v5734_v63 = vld [vmem:[#allocation2] sm:$0xe] }
 0x264   : > { %v10371_v30 = vpop.f32.mrb[88].mxu1 }
 0x265   : > { %v10372_v40 = vpop.f32.mrb[89].mxu1  ;;  %10580 = vmatpush3.bf16.msra.mxu0 %v11246_v15  ;;  %v5803_v15 = vrot.slane %v5334_v49, 5 }
 0x266   : > { %v10373_v62 = vadd.f32 %v10372_v40, %v10371_v30  ;;  %v10374_v24 = vpop.f32.mrb[90].mxu1  ;;  %10581 = vmatprep.subr.bf16.mxu0 %v11247_v25  ;;  %v11252_v25 = vld [vmem:[#allocation8 + $0x140] sm:$0xff]  }
 0x267   : > { %v10375_v10 = vpop.f32.mrb[91].mxu1  ;;  %v10265_v0 = vpop.f32.mrb[92].mxu0  ;;  %10679 = vmatprep.subr.bf16.mxu1 %v11252_v25 }
 0x268   : > { %v10376_v60 = vadd.f32 %v10375_v10, %v10374_v24  ;;  %v13746_v19 = vadd.f32 %v10373_v62, %v4343_v29  ;;  %v10266_v47 = vpop.f32.mrb[93].mxu0  ;;  %v11248_v29 = vld [vmem:[#allocation8 + $0xb8] sm:$0xff]   ;;  %v16187_v62 = vld [vmem:[#allocation74_spill] sm:$0xff] }
 0x269   : > { %v10267_v14 = vadd.f32 %v10266_v47, %v10265_v0  ;;  %v10268_v50 = vpop.f32.mrb[94].mxu0  ;;  %10582 = vmatpush3.bf16.msra.mxu0 %v11248_v29  ;;  %v5302_v10 = vld [vmem:[#allocation2] sm:$0xf]  ;;  %v5360_v0 = vshll.u32 %v5303_v22, 16 }
 0x26a   : > { %v13748_v8 = vadd.f32 %v10376_v60, %v4346_v12  ;;  %v10269_v54 = vpop.f32.mrb[95].mxu0  ;;  %v5351_v60 = vshrl.u32 %v5302_v10, 16  ;;  %v5354_v17 = vshll.u32 %v5302_v10, 16 }
 0x26b   : > { %v4351_v6 = vadd.f32 %v10267_v14, %v13678_v33  ;;  %v10270_v53 = vadd.f32 %v10269_v54, %v10268_v50  ;;  %v5364_v50 = vshrl.u32 %v5303_v22, 16  ;;  %v5370_v54 = vshll.u32 %v5334_v49, 16 }
 0x26d   : > { %v4354_v3 = vadd.f32 %v10270_v53, %v13681_v41 }
 0x26f   : > { %v10377_v56 = vpop.f32.mrb[92].mxu1 }
 0x270   : > { %v10378_v32 = vpop.f32.mrb[93].mxu1 }
 0x271   : > { %v10379_v37 = vadd.f32 %v10378_v32, %v10377_v56  ;;  %v10380_v51 = vpop.f32.mrb[94].mxu1  ;;  %v5353_v56 = vrot.slane %v5351_v60, 4  ;;  %v5362_v32 = vrot.slane %v5360_v0, 5 }
 0x272   : > { %v10381_v13 = vpop.f32.mrb[95].mxu1  ;;  %v10271_v46 = vpop.f32.mrb[96].mxu0 }
 0x273   : > { %v10382_v9 = vadd.f32 %v10381_v13, %v10380_v51  ;;  %v13752_v20 = vadd.f32 %v10379_v37, %v4351_v6  ;;  %v10272_v33 = vpop.f32.mrb[97].mxu0  ;;  %v5366_v51 = vrot.slane %v5364_v50, 4  ;;  %v9647_v13 = vrot.slane %v5734_v63, 9 }
 0x274   : > { %v10273_v12 = vadd.f32 %v10272_v33, %v10271_v46  ;;  %v10274_v41 = vpop.f32.mrb[98].mxu0 }
 0x275   : > { %v13754_v30 = vadd.f32 %v10382_v9, %v4354_v3  ;;  %v10275_v40 = vpop.f32.mrb[99].mxu0  ;;  %v5356_v3 = vrot.slane %v5354_v17, 5  ;;  %v5800_v9 = vrot.slane %v5303_v22, 5 }
 0x276   : > { %v4359_v24 = vadd.f32 %v10273_v12, %v16187_v62  ;;  %v10276_v1 = vadd.f32 %v10275_v40, %v10274_v41  ;;  %v5367_v40 = vor.u32 %v5366_v51, %v5362_v32  ;;  %v5372_v62 = vrot.slane %v5370_v54, 5 }
 0x277   : > { %v5357_v33 = vor.u32 %v5356_v3, %v5353_v56 }
 0x278   : > { %v4362_v47 = vadd.f32 %v10276_v1, %v16188_v16  ;;  %v13762_v1 = vsel %vm11879_vm13, %v9647_v13, %v5800_v9  ;;  %v11253_v13 = vld [vmem:[#allocation8 + $0x100] sm:$0xff]  }
 0x279   : > { %v10383_v27 = vpop.f32.mrb[96].mxu1  ;;  %v5358_v49 = vrot.slane %v5357_v33, 4 }
 0x27a   : > { %v10384_v14 = vpop.f32.mrb[97].mxu1 }
 0x27b   : > { %v10385_v6 = vadd.f32 %v10384_v14, %v10383_v27  ;;  %v10386_v53 = vpop.f32.mrb[98].mxu1  ;;  %v5802_v27 = vrot.slane %v5800_v9, 4  ;;  %v5368_v14 = vrot.slane %v5367_v40, 4 }
 0x27c   : > { %v10387_v37 = vpop.f32.mrb[99].mxu1  ;;  %v10277_v46 = vpop.f32.mrb[100].mxu0 }
 0x27d   : > { %v10388_v29 = vadd.f32 %v10387_v37, %v10386_v53  ;;  %v13758_v12 = vadd.f32 %v10385_v6, %v4359_v24  ;;  %v10278_v41 = vpop.f32.mrb[101].mxu0  ;;  %v13768_v24 = vsel %vm11879_vm13, %v5802_v27, %v5803_v15  ;;  %v5363_v53 = vsel %vm11813_vm6, %v5358_v49, %v5362_v32 }
 0x27e   : > { %v10279_v60 = vadd.f32 %v10278_v41, %v10277_v46  ;;  %v10280_v17 = vpop.f32.mrb[102].mxu0  ;;  %v9727_v56 = vcombine.low %v13762_v1, %v13768_v24  ;;  %v5373_v3 = vsel %vm11813_vm6, %v5368_v14, %v5372_v62  ;;  %v11283_v1 = vld [vmem:[#allocation8 + $0x188] sm:$0xff]  }
 0x27f   : > { %v13764_v0 = vadd.f32 %v10388_v29, %v4362_v47  ;;  %v10281_v16 = vpop.f32.mrb[103].mxu0  ;;  %v9695_v47 = vcombine.low %v5302_v10, %v5303_v22  ;;  %v9711_v51 = vcombine.low %v5363_v53, %v5373_v3 }
 0x280   : > { %v4367_v50 = vadd.f32 %v10279_v60, %v13510_v26  ;;  %v10282_v54 = vadd.f32 %v10281_v16, %v10280_v17 }
 0x281   : > { %8362 = vmatprep.mubr.bf16.mxu1 %v9711_v51 }
 0x282   : > { %v10389_v63 = vpop.f32.mrb[100].mxu1  ;;  %v4370_v37 = vadd.f32 %v10282_v54, %v13512_v59  ;;  %8363 = vmatmul.mubr.bf16.vlgmr.msra.gmra.mrb[128].mxu1 %v9695_v47 }
 0x283   : > { %v10390_v15 = vpop.f32.mrb[101].mxu1  ;;  %10680 = vmatpush3.bf16.msra.mxu1 %v11253_v13 }
 0x284   : > { %v10391_v9 = vadd.f32 %v10390_v15, %v10389_v63  ;;  %v10392_v25 = vpop.f32.mrb[102].mxu1 }
 0x285   : > { %v10393_v26 = vpop.f32.mrb[103].mxu1 }
 0x286   : > { %v10394_v29 = vadd.f32 %v10393_v26, %v10392_v25  ;;  %v10283_v32 = vpop.f32.mrb[104].mxu0  ;;  %v13778_v46 = vadd.f32 %v10391_v9, %v4367_v50 }
 0x287   : > { %v10284_v33 = vpop.f32.mrb[105].mxu0 }
 0x288   : > { %v10285_v41 = vadd.f32 %v10284_v33, %v10283_v32  ;;  %v10286_v40 = vpop.f32.mrb[106].mxu0  ;;  %v13780_v10 = vadd.f32 %v10394_v29, %v4370_v37 }
 0x289   : > { %v10287_v22 = vpop.f32.mrb[107].mxu0 }
 0x28a   : > { %v4375_v59 = vadd.f32 %v10285_v41, %v13540_v45  ;;  %v10288_v62 = vadd.f32 %v10287_v22, %v10286_v40  ;;  %v11258_v41 = vld [vmem:[#allocation8 + $0x148] sm:$0xff]  }
 0x28b   : > { %10681 = vmatprep.subr.bf16.mxu1 %v11258_v41 }
 0x28c   : > { %v10395_v27 = vpop.f32.mrb[104].mxu1  ;;  %v4378_v60 = vadd.f32 %v10288_v62, %v13546_v38 }
 0x28d   : > { %v10396_v17 = vpop.f32.mrb[105].mxu1 }
 0x28e   : > { %v10397_v49 = vadd.f32 %v10396_v17, %v10395_v27  ;;  %v10398_v16 = vpop.f32.mrb[106].mxu1 }
 0x28f   : > { %v10399_v14 = vpop.f32.mrb[107].mxu1 }
 0x290   : > { %v10400_v54 = vadd.f32 %v10399_v14, %v10398_v16  ;;  %v13784_v53 = vadd.f32 %v10397_v49, %v4375_v59 }
 0x292   : > { %v13786_v3 = vadd.f32 %v10400_v54, %v4378_v60 }
 0x293   : > { %v10289_v50 = vpop.f32.mrb[108].mxu0 }
 0x294   : > { %v10290_v47 = vpop.f32.mrb[109].mxu0 }
 0x295   : > { %v10291_v63 = vadd.f32 %v10290_v47, %v10289_v50  ;;  %v10292_v37 = vpop.f32.mrb[110].mxu0 }
 0x296   : > { %v10293_v51 = vpop.f32.mrb[111].mxu0 }
 0x297   : > { %v4383_v45 = vadd.f32 %v10291_v63, %v13570_v11  ;;  %v10294_v13 = vadd.f32 %v10293_v51, %v10292_v37  ;;  %v10401_v15 = vpop.f32.mrb[108].mxu1  ;;  %v11259_v63 = vld [vmem:[#allocation8 + $0x108] sm:$0xff]  }
 0x298   : > { %v10402_v9 = vpop.f32.mrb[109].mxu1  ;;  %10682 = vmatpush3.bf16.msra.mxu1 %v11259_v63 }
 0x299   : > { %v4386_v38 = vadd.f32 %v10294_v13, %v13573_v61  ;;  %v10403_v25 = vadd.f32 %v10402_v9, %v10401_v15  ;;  %v10404_v26 = vpop.f32.mrb[110].mxu1 }
 0x29a   : > { %v10405_v29 = vpop.f32.mrb[111].mxu1 }
 0x29b   : > { %v10406_v32 = vadd.f32 %v10405_v29, %v10404_v26  ;;  %v13790_v33 = vadd.f32 %v10403_v25, %v4383_v45 }
 0x29d   : > { %v13792_v40 = vadd.f32 %v10406_v32, %v4386_v38 }
 0x29e   : > { %v10295_v22 = vpop.f32.mrb[112].mxu0 }
 0x29f   : > { %v10296_v59 = vpop.f32.mrb[113].mxu0 }
 0x2a0   : > { %v10297_v62 = vadd.f32 %v10296_v59, %v10295_v22  ;;  %v10298_v27 = vpop.f32.mrb[114].mxu0 }
 0x2a1   : > { %v10299_v11 = vpop.f32.mrb[115].mxu0 }
 0x2a2   : > { %v4391_v60 = vadd.f32 %v10297_v62, %v13604_v36  ;;  %v10407_v17 = vpop.f32.mrb[112].mxu1  ;;  %v10300_v61 = vadd.f32 %v10299_v11, %v10298_v27 }
 0x2a3   : > { %v10408_v49 = vpop.f32.mrb[113].mxu1 }
 0x2a4   : > { %v4394_v16 = vadd.f32 %v10300_v61, %v13609_v21  ;;  %v10409_v14 = vadd.f32 %v10408_v49, %v10407_v17  ;;  %v10410_v54 = vpop.f32.mrb[114].mxu1 }
 0x2a5   : > { %v10411_v50 = vpop.f32.mrb[115].mxu1 }
 0x2a6   : > { %v10412_v47 = vadd.f32 %v10411_v50, %v10410_v54  ;;  %v13796_v37 = vadd.f32 %v10409_v14, %v4391_v60 }
 0x2a8   : > { %v13798_v51 = vadd.f32 %v10412_v47, %v4394_v16 }
 0x2aa   : > { %v10301_v45 = vpop.f32.mrb[116].mxu0 }
 0x2ab   : > { %v10302_v13 = vpop.f32.mrb[117].mxu0 }
 0x2ac   : > { %v10303_v15 = vadd.f32 %v10302_v13, %v10301_v45  ;;  %v10304_v38 = vpop.f32.mrb[118].mxu0 }
 0x2ad   : > { %v10305_v36 = vpop.f32.mrb[119].mxu0 }
 0x2ae   : > { %v4399_v9 = vadd.f32 %v10303_v15, %v13630_v58  ;;  %v10306_v25 = vadd.f32 %v10305_v36, %v10304_v38  ;;  %v10413_v26 = vpop.f32.mrb[116].mxu1 }
 0x2af   : > { %v10414_v29 = vpop.f32.mrb[117].mxu1 }
 0x2b0   : > { %v4402_v21 = vadd.f32 %v10306_v25, %v13640_v35  ;;  %v10415_v32 = vadd.f32 %v10414_v29, %v10413_v26  ;;  %v10416_v41 = vpop.f32.mrb[118].mxu1  ;;  %v11264_v35 = vld [vmem:[#allocation8 + $0x150] sm:$0xff]  }
 0x2b1   : > { %v10417_v22 = vpop.f32.mrb[119].mxu1  ;;  %10683 = vmatprep.subr.bf16.mxu1 %v11264_v35 }
 0x2b2   : > { %v10418_v59 = vadd.f32 %v10417_v22, %v10416_v41  ;;  %v13802_v62 = vadd.f32 %v10415_v32, %v4399_v9 }
 0x2b4   : > { %v13804_v27 = vadd.f32 %v10418_v59, %v4402_v21 }
 0x2b5   : > { %v10307_v11 = vpop.f32.mrb[120].mxu0 }
 0x2b6   : > { %v10308_v60 = vpop.f32.mrb[121].mxu0 }
 0x2b7   : > { %v10309_v17 = vadd.f32 %v10308_v60, %v10307_v11  ;;  %v10310_v61 = vpop.f32.mrb[122].mxu0 }
 0x2b8   : > { %v10311_v49 = vpop.f32.mrb[123].mxu0 }
 0x2b9   : > { %v4407_v58 = vadd.f32 %v10309_v17, %v13693_v7  ;;  %v10312_v16 = vadd.f32 %v10311_v49, %v10310_v61  ;;  %v11265_v61 = vld [vmem:[#allocation8 + $0x110] sm:$0xff]  }
 0x2ba   : > { %10684 = vmatpush3.bf16.msra.mxu1 %v11265_v61 }
 0x2bb   : > { %v4410_v14 = vadd.f32 %v10312_v16, %v13695_v39 }
 0x2c1   : > { %v10313_v47 = vpop.f32.mrb[124].mxu0 }
 0x2c2   : > { %v10419_v54 = vpop.f32.mrb[120].mxu1  ;;  %v10314_v13 = vpop.f32.mrb[125].mxu0 }
 0x2c3   : > { %v10420_v50 = vpop.f32.mrb[121].mxu1  ;;  %v10315_v38 = vadd.f32 %v10314_v13, %v10313_v47  ;;  %v10316_v36 = vpop.f32.mrb[126].mxu0 }
 0x2c4   : > { %v10421_v63 = vadd.f32 %v10420_v50, %v10419_v54  ;;  %v10422_v45 = vpop.f32.mrb[122].mxu1  ;;  %v10317_v25 = vpop.f32.mrb[127].mxu0 }
 0x2c5   : > { %v10423_v15 = vpop.f32.mrb[123].mxu1  ;;  %v4415_v7 = vadd.f32 %v10315_v38, %v13704_v2  ;;  %v10318_v21 = vadd.f32 %v10317_v25, %v10316_v36 }
 0x2c6   : > { %v10424_v9 = vadd.f32 %v10423_v15, %v10422_v45  ;;  %v13808_v26 = vadd.f32 %v10421_v63, %v4407_v58 }
 0x2c7   : > { %v4418_v39 = vadd.f32 %v10318_v21, %v13706_v31 }
 0x2c8   : > { %16190 = vst [vmem:[#allocation75_spill] sm:$0xff] %v13808_v26  ;;  %v13811_v29 = vadd.f32 %v10424_v9, %v4410_v14 }
 0x2c9   : > { %v10945_v22 = vpop.f32.mrb[128].mxu0 }
 0x2ca   : > { %16191 = vst [vmem:[#allocation76_spill] sm:$0xff] %v13811_v29  ;;  %v10425_v32 = vpop.f32.mrb[124].mxu1  ;;  %v4625_v60 = vadd.f32 %v10945_v22, %v13716_v52  ;;  %v4616_v17 = vpop.f32.mrb[129].mxu0 }
 0x2cb   : > { %v10426_v41 = vpop.f32.mrb[125].mxu1  ;;  %v4617_v58 = vadd.f32 %v4616_v17, %v13710_v23  ;;  %v10946_v16 = vpop.f32.mrb[130].mxu0 }
 0x2cc   : > { %v10427_v59 = vadd.f32 %v10426_v41, %v10425_v32  ;;  %v10428_v11 = vpop.f32.mrb[126].mxu1  ;;  %v4745_v2 = vmax.f32 %v4625_v60, 0.0  ;;  %v4628_v14 = vadd.f32 %v10946_v16, %v13718_v5  ;;  %v4619_v54 = vpop.f32.mrb[131].mxu0 }
 0x2cd   : > { %v10429_v49 = vpop.f32.mrb[127].mxu1  ;;  %v4743_v31 = vmax.f32 %v4617_v58, 0.0  ;;  %v4620_v47 = vadd.f32 %v4619_v54, %v13712_v34 }
 0x2ce   : > { %v10430_v35 = vadd.f32 %v10429_v49, %v10428_v11  ;;  %v13817_v50 = vadd.f32 %v10427_v59, %v4415_v7  ;;  %v9952_v63 = vpack.c.bf16 %v4745_v2, %v4745_v2  ;;  %v4746_v45 = vmax.f32 %v4628_v14, 0.0  ;;  %v5197_v7 = vld [vmem:[#allocation2 + $0x18] sm:$0xf]  ;;  %v11270_v49 = vld [vmem:[#allocation8 + $0x158] sm:$0xff]  }
 0x2cf   : > { %v9950_v13 = vpack.c.bf16 %v4743_v31, %v4743_v31  ;;  %v4744_v15 = vmax.f32 %v4620_v47, 0.0  ;;  %v5201_v47 = vld [vmem:[#allocation2 + $0x20] sm:$0x1]  ;;  %10685 = vmatprep.subr.bf16.mxu1 %v11270_v49  ;;  %v11271_v49 = vld [vmem:[#allocation8 + $0x118] sm:$0xff]  }
 0x2d0   : > { %v13820_v52 = vadd.f32 %v10430_v35, %v4418_v39  ;;  %v4889_v38 = vshrl.u32 %v9952_v63, 16  ;;  %v9953_v23 = vpack.c.bf16 %v4746_v45, %v4746_v45  ;;  %v4892_v36 = vshll.u32 %v9952_v63, 16  ;;  %10686 = vmatpush3.bf16.msra.mxu1 %v11271_v49  ;;  %v5208_v49 = vld [vmem:[#allocation2 + $0x2c] sm:$0x1] }
 0x2d1   : > { %v4872_v9 = vshrl.u32 %v9950_v13, 16  ;;  %v4875_v25 = vshll.u32 %v9950_v13, 16  ;;  %v9951_v21 = vpack.c.bf16 %v4744_v15, %v4744_v15  ;;  %v10949_v5 = vpop.f32.mrb[132].mxu0 }
 0x2d2   : > { %16192 = vst [vmem:[#allocation51_spill] sm:$0xff] %v13820_v52  ;;  %v4891_v32 = vrot.slane %v4889_v38, 7  ;;  %v4897_v41 = vshrl.u32 %v9953_v23, 16  ;;  %v4900_v22 = vshll.u32 %v9953_v23, 16  ;;  %v4641_v59 = vadd.f32 %v10949_v5, %v13728_v4  ;;  %v4632_v34 = vpop.f32.mrb[133].mxu0 }
 0x2d3   : > { %v4874_v11 = vrot.slane %v4872_v9, 7  ;;  %v4880_v60 = vshrl.u32 %v9951_v21, 16  ;;  %v4883_v39 = vshll.u32 %v9951_v21, 16  ;;  %v4633_v17 = vadd.f32 %v4632_v34, %v13722_v18  ;;  %v10950_v61 = vpop.f32.mrb[134].mxu0  ;;  %v5194_v23 = vld [vmem:[#allocation2 + $0x14] sm:$0x1] }
 0x2d4   : > { %v4894_v58 = vor.u32 %v4892_v36, %v4891_v32  ;;  %v4895_v16 = vrot.slane %v4891_v32, 4  ;;  %v4899_v35 = vrot.slane %v4897_v41, 7  ;;  %v4749_v2 = vmax.f32 %v4641_v59, 0.0  ;;  %v4635_v14 = vpop.f32.mrb[135].mxu0  ;;  %v11380_v9 = vld [vmem:[#allocation2 + $0xc] sm:$0xf] }
 0x2d5   : > { %v4877_v54 = vor.u32 %v4875_v25, %v4874_v11  ;;  %v4878_v31 = vrot.slane %v4874_v11, 4  ;;  %v4882_v63 = vrot.slane %v4880_v60, 7  ;;  %v4747_v45 = vmax.f32 %v4633_v17, 0.0 }
 0x2d6   : > { %v5198_v13 = vsel %vm11853_vm11, %v4894_v58, %v5197_v7  ;;  %v4902_v15 = vor.u32 %v4900_v22, %v4899_v35  ;;  %v4904_v38 = vrot.slane %v4899_v35, 4  ;;  %v9956_v18 = vpack.c.bf16 %v4749_v2, %v4749_v2 }
 0x2d7   : > { %5199 = vst [vmem:[#allocation2 + $0x18] sm:$0xf] %v5198_v13  ;;  %v5191_v36 = vsel %vm11853_vm11, %v4877_v54, %v11380_v9  ;;  %v4885_v21 = vor.u32 %v4883_v39, %v4882_v63  ;;  %v4887_v5 = vrot.slane %v4882_v63, 4  ;;  %v9954_v25 = vpack.c.bf16 %v4747_v45, %v4747_v45 }
 0x2d8   : > { %5192 = vst [vmem:[#allocation2 + $0xc] sm:$0xf] %v5191_v36  ;;  %v4903_v41 = vsel %vm11841_vm10, %v4895_v16, %v4902_v15  ;;  %v5202_v34 = vsel %vm11864_vm12, %v4904_v38, %v5201_v47  ;;  %v4923_v7 = vshrl.u32 %v9956_v18, 16  ;;  %v4926_v60 = vshll.u32 %v9956_v18, 16  ;;  %v5211_v47 = vld [vmem:[#allocation2 + $0x30] sm:$0xf] }
 0x2d9   : > { %5200 = vst [vmem:[#allocation2 + $0x1c] sm:$0xf] %v4903_v41  ;;  %5203 = vst [vmem:[#allocation2 + $0x20] sm:$0x1] %v5202_v34  ;;  %v4886_v22 = vsel %vm11841_vm10, %v4878_v31, %v4885_v21  ;;  %v5195_v11 = vsel %vm11864_vm12, %v4887_v5, %v5194_v23  ;;  %v4906_v39 = vshrl.u32 %v9954_v25, 16  ;;  %v10953_v17 = vpop.f32.mrb[136].mxu0  ;;  %v4644_v16 = vadd.f32 %v10950_v61, %v13730_v42 }
 0x2da   : > { %5193 = vst [vmem:[#allocation2 + $0x10] sm:$0xf] %v4886_v22  ;;  %5196 = vst [vmem:[#allocation2 + $0x14] sm:$0x1] %v5195_v11  ;;  %v13836_v58 = vrot.slane %v4923_v7, 7  ;;  %v4636_v35 = vadd.f32 %v4635_v14, %v13724_v57  ;;  %v4657_v2 = vadd.f32 %v10953_v17, %v13740_v55  ;;  %v4648_v54 = vpop.f32.mrb[137].mxu0 }
 0x2db   : > { %v13841_v31 = vrot.slane %v4906_v39, 7  ;;  %v4909_v63 = vshll.u32 %v9954_v25, 16  ;;  %v4649_v45 = vadd.f32 %v4648_v54, %v13734_v43  ;;  %v10954_v13 = vpop.f32.mrb[138].mxu0  ;;  %v5204_v23 = vld [vmem:[#allocation2 + $0x24] sm:$0xf]  ;;  %v4750_v18 = vmax.f32 %v4644_v16, 0.0 }
 0x2dc   : > { %v4928_v15 = vor.u32 %v4926_v60, %v13836_v58  ;;  %v4929_v38 = vrot.slane %v13836_v58, 4  ;;  %v4748_v42 = vmax.f32 %v4636_v35, 0.0  ;;  %v4651_v61 = vpop.f32.mrb[139].mxu0  ;;  %v4753_v14 = vmax.f32 %v4657_v2, 0.0  ;;  %v5215_v17 = vld [vmem:[#allocation2 + $0x38] sm:$0x1] }
 0x2dd   : > { %v4911_v57 = vor.u32 %v4909_v63, %v13841_v31  ;;  %v4912_v55 = vrot.slane %v13841_v31, 4  ;;  %v4751_v9 = vmax.f32 %v4649_v45, 0.0  ;;  %v9957_v43 = vpack.c.bf16 %v4750_v18, %v4750_v18  ;;  %v11274_v54 = vld [vmem:[#allocation8 + $0x1c0] sm:$0xff]  }
 0x2de   : > { %v5212_v36 = vsel %vm11853_vm11, %v4928_v15, %v5211_v47  ;;  %v9955_v21 = vpack.c.bf16 %v4748_v42, %v4748_v42  ;;  %v4660_v5 = vadd.f32 %v10954_v13, %v13742_v48  ;;  %v9960_v41 = vpack.c.bf16 %v4753_v14, %v4753_v14  ;;  %10791 = vmatprep.subr.bf16.mxu0 %v11274_v54 }
 0x2df   : > { %5213 = vst [vmem:[#allocation2 + $0x30] sm:$0xf] %v5212_v36  ;;  %v5205_v25 = vsel %vm11853_vm11, %v4911_v57, %v5204_v23  ;;  %v9958_v34 = vpack.c.bf16 %v4751_v9, %v4751_v9  ;;  %v4652_v7 = vadd.f32 %v4651_v61, %v13736_v28  ;;  %v4931_v22 = vshrl.u32 %v9957_v43, 16  ;;  %v5225_v28 = vld [vmem:[#allocation2 + $0x48] sm:$0xf]  ;;  %v11278_v57 = vld [vmem:[#allocation8 + $0x160] sm:$0xff]  }
 0x2e0   : > { %5206 = vst [vmem:[#allocation2 + $0x24] sm:$0xf] %v5205_v25  ;;  %v4934_v11 = vshll.u32 %v9957_v43, 16  ;;  %v4914_v60 = vshrl.u32 %v9955_v21, 16  ;;  %v4917_v39 = vshll.u32 %v9955_v21, 16  ;;  %v4957_v58 = vshrl.u32 %v9960_v41, 16  ;;  %10687 = vmatprep.subr.bf16.mxu1 %v11278_v57 }
 0x2e1   : > { %v4960_v16 = vshll.u32 %v9960_v41, 16  ;;  %v4940_v35 = vshrl.u32 %v9958_v34, 16  ;;  %v4943_v2 = vshll.u32 %v9958_v34, 16  ;;  %v10957_v48 = vpop.f32.mrb[140].mxu0  ;;  %v4933_v47 = vrot.slane %v4931_v22, 7 }
 0x2e2   : > { %v4916_v31 = vrot.slane %v4914_v60, 7  ;;  %v4754_v63 = vmax.f32 %v4660_v5, 0.0  ;;  %v4752_v45 = vmax.f32 %v4652_v7, 0.0  ;;  %v4664_v13 = vpop.f32.mrb[141].mxu0  ;;  %v13854_v15 = vrot.slane %v4957_v58, 7  ;;  %v11279_v58 = vld [vmem:[#allocation8 + $0x120] sm:$0xff]  }
 0x2e3   : > { %v13856_v23 = vrot.slane %v4940_v35, 7  ;;  %v4673_v18 = vadd.f32 %v10957_v48, %v13752_v20  ;;  %v4665_v42 = vadd.f32 %v4664_v13, %v13746_v19  ;;  %v10958_v61 = vpop.f32.mrb[142].mxu0  ;;  %v4936_v14 = vor.u32 %v4934_v11, %v4933_v47  ;;  %v5218_v21 = vld [vmem:[#allocation2 + $0x3c] sm:$0xf]  ;;  %10688 = vmatpush3.bf16.msra.mxu1 %v11279_v58 }
 0x2e4   : > { %v4938_v9 = vrot.slane %v4933_v47, 4  ;;  %v4919_v36 = vor.u32 %v4917_v39, %v4916_v31  ;;  %v4921_v43 = vrot.slane %v4916_v31, 4  ;;  %v4667_v5 = vpop.f32.mrb[143].mxu0  ;;  %v4962_v25 = vor.u32 %v4960_v16, %v13854_v15  ;;  %v5229_v47 = vld [vmem:[#allocation2 + $0x50] sm:$0x1] }
 0x2e5   : > { %v4945_v41 = vor.u32 %v4943_v2, %v13856_v23  ;;  %v4937_v34 = vsel %vm11841_vm10, %v4929_v38, %v4936_v14  ;;  %v9961_v38 = vpack.c.bf16 %v4754_v63, %v4754_v63  ;;  %v9959_v60 = vpack.c.bf16 %v4752_v45, %v4752_v45  ;;  %v5222_v31 = vld [vmem:[#allocation2 + $0x44] sm:$0x1] }
 0x2e6   : > { %v5216_v19 = vsel %vm11864_vm12, %v4938_v9, %v5215_v17  ;;  %v4920_v20 = vsel %vm11841_vm10, %v4912_v55, %v4919_v36  ;;  %v5209_v7 = vsel %vm11864_vm12, %v4921_v43, %v5208_v49  ;;  %5214 = vst [vmem:[#allocation2 + $0x34] sm:$0xf] %v4937_v34  ;;  %v5226_v22 = vsel %vm11853_vm11, %v4962_v25, %v5225_v28 }
 0x2e7   : > { %5217 = vst [vmem:[#allocation2 + $0x38] sm:$0x1] %v5216_v19  ;;  %5207 = vst [vmem:[#allocation2 + $0x28] sm:$0xf] %v4920_v20  ;;  %v5219_v11 = vsel %vm11853_vm11, %v4945_v41, %v5218_v21  ;;  %v4757_v39 = vmax.f32 %v4673_v18, 0.0  ;;  %v4755_v17 = vmax.f32 %v4665_v42, 0.0  ;;  %v4676_v55 = vadd.f32 %v10958_v61, %v13754_v30 }
 0x2e8   : > { %5210 = vst [vmem:[#allocation2 + $0x2c] sm:$0x1] %v5209_v7  ;;  %5227 = vst [vmem:[#allocation2 + $0x48] sm:$0xf] %v5226_v22  ;;  %v4668_v49 = vadd.f32 %v4667_v5, %v13748_v8  ;;  %v4963_v16 = vrot.slane %v13854_v15, 4  ;;  %v4946_v35 = vrot.slane %v13856_v23, 4 }
 0x2e9   : > { %5220 = vst [vmem:[#allocation2 + $0x3c] sm:$0xf] %v5219_v11  ;;  %v4965_v2 = vshrl.u32 %v9961_v38, 16  ;;  %v4948_v48 = vshrl.u32 %v9959_v60, 16  ;;  %v13878_v54 = vpop.f32.mrb[144].mxu0  ;;  %v9964_v63 = vpack.c.bf16 %v4757_v39, %v4757_v39  ;;  %v9962_v45 = vpack.c.bf16 %v4755_v17, %v4755_v17 }
 0x2ea   : > { %v4758_v13 = vmax.f32 %v4676_v55, 0.0  ;;  %v4756_v28 = vmax.f32 %v4668_v49, 0.0  ;;  %v13880_v18 = vpop.f32.mrb[145].mxu0  ;;  %v4968_v8 = vshll.u32 %v9961_v38, 16  ;;  %v4951_v61 = vshll.u32 %v9959_v60, 16 }
 0x2eb   : > { %v4967_v30 = vrot.slane %v4965_v2, 7  ;;  %v4950_v42 = vrot.slane %v4948_v48, 7  ;;  %v13882_v15 = vpop.f32.mrb[146].mxu0  ;;  %v4991_v23 = vshrl.u32 %v9964_v63, 16  ;;  %v4994_v57 = vshll.u32 %v9964_v63, 16 }
 0x2ec   : > { %v4974_v14 = vshrl.u32 %v9962_v45, 16  ;;  %v4977_v9 = vshll.u32 %v9962_v45, 16  ;;  %v13884_v36 = vpop.f32.mrb[147].mxu0  ;;  %v5910_v41 = vld [vmem:[#allocation2 + $0xc] sm:$0xf]  ;;  %v9965_v20 = vpack.c.bf16 %v4758_v13, %v4758_v13  ;;  %v9963_v7 = vpack.c.bf16 %v4756_v28, %v4756_v28 }
 0x2ed   : > { %v4970_v43 = vor.u32 %v4968_v8, %v4967_v30  ;;  %v4972_v21 = vrot.slane %v4967_v30, 4  ;;  %v4953_v5 = vor.u32 %v4951_v61, %v4950_v42  ;;  %v4955_v25 = vrot.slane %v4950_v42, 4  ;;  %v5239_v39 = vld [vmem:[#allocation2 + $0x60] sm:$0xf]  ;;  %v5232_v17 = vld [vmem:[#allocation2 + $0x54] sm:$0xf] }
 0x2ee   : > { %v4993_v34 = vrot.slane %v4991_v23, 7  ;;  %v4976_v19 = vrot.slane %v4974_v14, 7  ;;  %v5959_v58 = vshrl.u32 %v5910_v41, 16  ;;  %v5962_v2 = vshll.u32 %v5910_v41, 16  ;;  %v13894_v63 = vld [vmem:[#allocation2 + $0x10] sm:$0xf] }
 0x2ef   : > { %v4971_v22 = vsel %vm11841_vm10, %v4963_v16, %v4970_v43  ;;  %v5230_v11 = vsel %vm11864_vm12, %v4972_v21, %v5229_v47  ;;  %v4954_v38 = vsel %vm11841_vm10, %v4946_v35, %v4953_v5  ;;  %v5223_v60 = vsel %vm11864_vm12, %v4955_v25, %v5222_v31  ;;  %v5243_v13 = vld [vmem:[#allocation2 + $0x68] sm:$0x1]  ;;  %v5236_v28 = vld [vmem:[#allocation2 + $0x5c] sm:$0x1] }
 0x2f0   : > { %5228 = vst [vmem:[#allocation2 + $0x4c] sm:$0xf] %v4971_v22  ;;  %5231 = vst [vmem:[#allocation2 + $0x50] sm:$0x1] %v5230_v11  ;;  %v4996_v55 = vor.u32 %v4994_v57, %v4993_v34  ;;  %v4979_v49 = vor.u32 %v4977_v9, %v4976_v19  ;;  %v4999_v16 = vshrl.u32 %v9965_v20, 16  ;;  %v4982_v48 = vshrl.u32 %v9963_v7, 16 }
 0x2f1   : > { %5221 = vst [vmem:[#allocation2 + $0x40] sm:$0xf] %v4954_v38  ;;  %5224 = vst [vmem:[#allocation2 + $0x44] sm:$0x1] %v5223_v60  ;;  %v13896_v47 = vpop.f32.mrb[148].mxu0  ;;  %v4997_v35 = vrot.slane %v4993_v34, 4  ;;  %v9743_v25 = vcombine.low %v5910_v41, %v13894_v63  ;;  %v4689_v24 = vadd.f32 %v13878_v54, %v13778_v46 }
 0x2f2   : > { %v5240_v31 = vsel %vm11853_vm11, %v4996_v55, %v5239_v39  ;;  %v5233_v45 = vsel %vm11853_vm11, %v4979_v49, %v5232_v17  ;;  %v13902_v30 = vpop.f32.mrb[149].mxu0  ;;  %v5001_v8 = vrot.slane %v4999_v16, 7  ;;  %v5002_v42 = vshll.u32 %v9965_v20, 16  ;;  %v13904_v57 = vld [vmem:[#allocation2 + $0x18] sm:$0xf]  ;;  %v11286_v9 = vld [vmem:[#allocation8 + $0x168] sm:$0xff]  }
 0x2f3   : > { %5241 = vst [vmem:[#allocation2 + $0x60] sm:$0xf] %v5240_v31  ;;  %5234 = vst [vmem:[#allocation2 + $0x54] sm:$0xf] %v5233_v45  ;;  %v4984_v61 = vrot.slane %v4982_v48, 7  ;;  %v4985_v23 = vshll.u32 %v9963_v7, 16  ;;  %10689 = vmatprep.subr.bf16.mxu1 %v11286_v9  ;;  %8523 = vmatprep.mubr.bf16.mxu0 %v9743_v25  ;;  %v4692_v45 = vadd.f32 %v13882_v15, %v13780_v10 }
 0x2f4   : > { %v13906_v14 = vpop.f32.mrb[150].mxu0  ;;  %v4980_v43 = vrot.slane %v4976_v19, 4  ;;  %v13908_v21 = vrot.slane %v5959_v58, 4  ;;  %v13910_v5 = vrot.slane %v5962_v2, 5  ;;  %v11275_v22 = vld [vmem:[#allocation8 + $0x180] sm:$0xff]   ;;  %v5004_v11 = vor.u32 %v5002_v42, %v5001_v8  ;;  %v11282_v39 = vld [vmem:[#allocation8 + $0x1c8] sm:$0xff]   ;;  %8524 = vmatmul.mubr.bf16.vlgmr.msra.gmra.mrb[160].mxu0 %v9727_v56 }
 0x2f5   : > { %v13913_v34 = vpop.f32.mrb[151].mxu0  ;;  %v5006_v38 = vrot.slane %v5001_v8, 4  ;;  %v4987_v20 = vor.u32 %v4985_v23, %v4984_v61  ;;  %v4989_v60 = vrot.slane %v4984_v61, 4  ;;  %v13915_v7 = vld [vmem:[#allocation2 + $0x1c] sm:$0xf]  ;;  %v5968_v17 = vshll.u32 %v13894_v63, 16  ;;  %10792 = vmatpush3.bf16.msra.mxu0 %v11275_v22 }
 0x2f6   : > { %v5972_v19 = vshrl.u32 %v13894_v63, 16  ;;  %v5005_v55 = vsel %vm11841_vm10, %v4997_v35, %v5004_v11  ;;  %v13930_v2 = vld [vmem:[#allocation2 + $0xc] sm:$0xf]  ;;  %v13932_v16 = vld [vmem:[#allocation2 + $0x10] sm:$0xf]  ;;  %v9744_v31 = vcombine.low %v13904_v57, %v13915_v7  ;;  %v4681_v56 = vadd.f32 %v13880_v18, %v13758_v12  ;;  %10793 = vmatprep.subr.bf16.mxu0 %v11282_v39  ;;  %v11287_v42 = vld [vmem:[#allocation8 + $0x128] sm:$0xff]  }
 0x2f7   : > { %v5244_v41 = vsel %vm11864_vm12, %v5006_v38, %v5243_v13  ;;  %v4988_v49 = vsel %vm11841_vm10, %v4980_v43, %v4987_v20  ;;  %v5237_v58 = vsel %vm11864_vm12, %v4989_v60, %v5236_v28  ;;  %5242 = vst [vmem:[#allocation2 + $0x64] sm:$0xf] %v5005_v55  ;;  %v4684_v13 = vadd.f32 %v13884_v36, %v13764_v0  ;;  %v13948_v28 = vld [vmem:[#allocation2 + $0x14] sm:$0x1]  ;;  %v13957_v18 = vld [vmem:[#allocation2 + $0xc] sm:$0xe] }
 0x2f8   : > { %5245 = vst [vmem:[#allocation2 + $0x68] sm:$0x1] %v5244_v41  ;;  %5235 = vst [vmem:[#allocation2 + $0x58] sm:$0xf] %v4988_v49  ;;  %v13952_v61 = vrot.slane %v5968_v17, 5  ;;  %8531 = vmatprep.mubr.bf16.mxu0 %v9744_v31  ;;  %v5375_v46 = vshrl.u32 %v13930_v2, 16  ;;  %10690 = vmatpush3.bf16.msra.mxu1 %v11287_v42 }
 0x2f9   : > { %5238 = vst [vmem:[#allocation2 + $0x5c] sm:$0x1] %v5237_v58  ;;  %v13950_v8 = vpop.f32.mrb[152].mxu0  ;;  %v5378_v54 = vshll.u32 %v13930_v2, 16  ;;  %v5384_v12 = vshll.u32 %v13932_v16, 16  ;;  %v4761_v0 = vmax.f32 %v4689_v24, 0.0  ;;  %10794 = vmatpush3.bf16.msra.mxu0 %v11283_v1 }
 0x2fa   : > { %v13959_v10 = vpop.f32.mrb[153].mxu0  ;;  %v4759_v15 = vmax.f32 %v4681_v56, 0.0  ;;  %v4762_v36 = vmax.f32 %v4692_v45, 0.0  ;;  %v4760_v23 = vmax.f32 %v4684_v13, 0.0  ;;  %v5377_v43 = vrot.slane %v5375_v46, 4 }
 0x2fb   : > { %v13961_v9 = vpop.f32.mrb[154].mxu0  ;;  %v5380_v25 = vrot.slane %v5378_v54, 5  ;;  %v13963_v22 = vrot.slane %v5384_v12, 5  ;;  %v5388_v11 = vshrl.u32 %v13932_v16, 16  ;;  %v9968_v20 = vpack.c.bf16 %v4761_v0, %v4761_v0  ;;  %v5253_v13 = vld [vmem:[#allocation2 + $0x78] sm:$0xf] }
 0x2fc   : > { %v13966_v38 = vpop.f32.mrb[155].mxu0  ;;  %v9966_v60 = vpack.c.bf16 %v4759_v15, %v4759_v15  ;;  %v9969_v39 = vpack.c.bf16 %v4762_v36, %v4762_v36  ;;  %v9967_v17 = vpack.c.bf16 %v4760_v23, %v4760_v23  ;;  %v13968_v55 = vrot.slane %v5972_v19, 4  ;;  %v5246_v46 = vld [vmem:[#allocation2 + $0x6c] sm:$0xf]  ;;  %v5257_v36 = vld [vmem:[#allocation2 + $0x80] sm:$0x1] }
 0x2fd   : > { %v5381_v41 = vor.u32 %v5380_v25, %v5377_v43  ;;  %v5390_v49 = vrot.slane %v5388_v11, 4  ;;  %v5394_v58 = vshll.u32 %v13948_v28, 16  ;;  %v5025_v31 = vshrl.u32 %v9968_v20, 16  ;;  %v5739_v32 = vld [vmem:[#allocation2 + $0x3c] sm:$0xe] }
 0x2fe   : > { %v5028_v24 = vshll.u32 %v9968_v20, 16  ;;  %v5008_v56 = vshrl.u32 %v9966_v60, 16  ;;  %v9648_v45 = vrot.slane %v13957_v18, 9  ;;  %v5011_v42 = vshll.u32 %v9966_v60, 16  ;;  %v11290_v60 = vld [vmem:[#allocation8 + $0x1d0] sm:$0xff]  }
 0x2ff   : > { %v5033_v54 = vshrl.u32 %v9969_v39, 16  ;;  %v5036_v1 = vshll.u32 %v9969_v39, 16  ;;  %v5016_v12 = vshrl.u32 %v9967_v17, 16  ;;  %v5027_v0 = vrot.slane %v5025_v31, 7  ;;  %v5250_v31 = vld [vmem:[#allocation2 + $0x74] sm:$0x1]  ;;  %10795 = vmatprep.subr.bf16.mxu0 %v11290_v60 }
 0x300   : > { %v5010_v15 = vrot.slane %v5008_v56, 7  ;;  %v5019_v19 = vshll.u32 %v9967_v17, 16  ;;  %v5391_v23 = vor.u32 %v5390_v49, %v13963_v22  ;;  %v5382_v20 = vrot.slane %v5381_v41, 4  ;;  %v11291_v17 = vld [vmem:[#allocation8 + $0x190] sm:$0xff]  }
 0x301   : > { %v13973_v43 = vpop.f32.mrb[156].mxu0  ;;  %v5035_v25 = vrot.slane %v5033_v54, 7  ;;  %v5018_v11 = vrot.slane %v5016_v12, 7  ;;  %v5807_v35 = vrot.slane %v13932_v16, 5  ;;  %v5030_v63 = vor.u32 %v5028_v24, %v5027_v0  ;;  %v11294_v41 = vld [vmem:[#allocation8 + $0x170] sm:$0xff]   ;;  %10796 = vmatpush3.bf16.msra.mxu0 %v11291_v17 }
 0x302   : > { %16196 = vst [vmem:[#allocation78_spill] sm:$0xff] %v13973_v43  ;;  %v13976_v18 = vpop.f32.mrb[157].mxu0  ;;  %v5031_v48 = vrot.slane %v5027_v0, 4  ;;  %v5013_v39 = vor.u32 %v5011_v42, %v5010_v15  ;;  %v5014_v29 = vrot.slane %v5010_v15, 4  ;;  %v5392_v42 = vrot.slane %v5391_v23, 4  ;;  %10691 = vmatprep.subr.bf16.mxu1 %v11294_v41 }
 0x303   : > { %v13978_v56 = vpop.f32.mrb[158].mxu0  ;;  %v5038_v52 = vor.u32 %v5036_v1, %v5035_v25  ;;  %v5040_v49 = vrot.slane %v5035_v25, 4  ;;  %v5021_v26 = vor.u32 %v5019_v19, %v5018_v11  ;;  %v5023_v43 = vrot.slane %v5018_v11, 4  ;;  %v14011_v11 = vld [vmem:[#allocation2 + $0x28] sm:$0xf] }
 0x304   : > { %v13980_v54 = vpop.f32.mrb[159].mxu0  ;;  %v5254_v12 = vsel %vm11853_vm11, %v5030_v63, %v5253_v13  ;;  %v5247_v24 = vsel %vm11853_vm11, %v5013_v39, %v5246_v46  ;;  %v5396_v0 = vrot.slane %v5394_v58, 5  ;;  %v13994_v13 = vld [vmem:[#allocation2 + $0x18] sm:$0xf]  ;;  %v5809_v58 = vrot.slane %v5807_v35, 4 }
 0x305   : > { %5255 = vst [vmem:[#allocation2 + $0x78] sm:$0xf] %v5254_v12  ;;  %5248 = vst [vmem:[#allocation2 + $0x6c] sm:$0xf] %v5247_v24  ;;  %v5039_v1 = vsel %vm11841_vm10, %v5031_v48, %v5038_v52  ;;  %v5258_v15 = vsel %vm11864_vm12, %v5040_v49, %v5257_v36  ;;  %v5022_v19 = vsel %vm11841_vm10, %v5014_v29, %v5021_v26  ;;  %v5810_v26 = vrot.slane %v13948_v28, 5  ;;  %v11295_v29 = vld [vmem:[#allocation8 + $0x130] sm:$0xff]  }
 0x306   : > { %v5251_v63 = vsel %vm11864_vm12, %v5023_v43, %v5250_v31  ;;  %5256 = vst [vmem:[#allocation2 + $0x7c] sm:$0xf] %v5039_v1  ;;  %5259 = vst [vmem:[#allocation2 + $0x80] sm:$0x1] %v5258_v15  ;;  %v5387_v52 = vsel %vm11813_vm6, %v5382_v20, %v13963_v22  ;;  %v5397_v48 = vsel %vm11813_vm6, %v5392_v42, %v5396_v0  ;;  %v16198_v23 = vshrl.u32 %v13904_v57, 16 }
 0x307   : > { %5249 = vst [vmem:[#allocation2 + $0x70] sm:$0xf] %v5022_v19  ;;  %5252 = vst [vmem:[#allocation2 + $0x74] sm:$0x1] %v5251_v63  ;;  %v16197_v46 = vor.u32 %v13910_v5, %v13908_v21  ;;  %v9712_v25 = vcombine.low %v5387_v52, %v5397_v48  ;;  %v14013_v22 = vld [vmem:[#allocation2 + $0x1c] sm:$0xf]  ;;  %v5808_v20 = vsel %vm11879_vm13, %v9648_v45, %v5807_v35  ;;  %10692 = vmatpush3.bf16.msra.mxu1 %v11295_v29 }
 0x308   : > { %v14009_v43 = vrot.slane %v16198_v23, 4  ;;  %v5811_v28 = vsel %vm11879_vm13, %v5809_v58, %v5810_v26  ;;  %v9696_v21 = vcombine.low %v13930_v2, %v13932_v16  ;;  %v5399_v5 = vshrl.u32 %v13994_v13, 16  ;;  %v14028_v49 = vld [vmem:[#allocation2 + $0x24] sm:$0xf]  ;;  %v14030_v35 = vld [vmem:[#allocation2 + $0x20] sm:$0x1] }
 0x309   : > { %v14005_v36 = vrot.slane %v16197_v46, 4  ;;  %v5975_v60 = vor.u32 %v13968_v55, %v13952_v61  ;;  %v16199_v39 = vshll.u32 %v13904_v57, 16  ;;  %8370 = vmatprep.mubr.bf16.mxu1 %v9712_v25  ;;  %v9728_v17 = vcombine.low %v5808_v20, %v5811_v28  ;;  %v5736_v1 = vld [vmem:[#allocation2 + $0x18] sm:$0xe]  ;;  %v11299_v20 = vld [vmem:[#allocation8 + $0x198] sm:$0xff]  }
 0x30a   : > { %v5402_v45 = vshll.u32 %v13994_v13, 16  ;;  %8371 = vmatmul.mubr.bf16.gmra.mrb[132].mxu1 %v9696_v21  ;;  %v9745_v2 = vcombine.low %v14028_v49, %v14011_v11  ;;  %v5401_v16 = vrot.slane %v5399_v5, 4  ;;  %v5408_v41 = vshll.u32 %v14013_v22, 16 }
 0x30b   : > { %v14026_v31 = vrot.slane %v16199_v39, 5  ;;  %v5412_v12 = vshrl.u32 %v14013_v22, 16  ;;  %8532 = vmatmul.mubr.bf16.gmra.mrb[164].mxu0 %v9728_v17  ;;  %v4705_v24 = vadd.f32 %v13896_v47, %v13790_v33  ;;  %v4697_v42 = vadd.f32 %v13902_v30, %v13784_v53  ;;  %v11298_v30 = vld [vmem:[#allocation8 + $0x1d8] sm:$0xff]  }
 0x30c   : > { %v5404_v57 = vrot.slane %v5402_v45, 5  ;;  %v4708_v0 = vadd.f32 %v13906_v14, %v13792_v40  ;;  %8539 = vmatprep.mubr.bf16.mxu0 %v9745_v2  ;;  %v5410_v15 = vrot.slane %v5408_v41, 5  ;;  %v5418_v63 = vshll.u32 %v14030_v35, 16  ;;  %10797 = vmatprep.subr.bf16.mxu0 %v11298_v30  ;;  %v11300_v2 = vld [vmem:[#allocation8 + $0x1e0] sm:$0xff]  }
 0x30d   : > { %v5414_v19 = vrot.slane %v5412_v12, 4  ;;  %v4700_v52 = vadd.f32 %v13913_v34, %v13786_v3  ;;  %v4765_v58 = vmax.f32 %v4705_v24, 0.0  ;;  %v4763_v26 = vmax.f32 %v4697_v42, 0.0  ;;  %10798 = vmatpush3.bf16.msra.mxu0 %v11299_v20  ;;  %v11303_v24 = vld [vmem:[#allocation8 + $0x178] sm:$0xff]  }
 0x30e   : > { %v5405_v48 = vor.u32 %v5404_v57, %v5401_v16  ;;  %v4766_v29 = vmax.f32 %v4708_v0, 0.0  ;;  %v9649_v46 = vrot.slane %v5736_v1, 9  ;;  %v5814_v53 = vrot.slane %v14013_v22, 5  ;;  %v5267_v1 = vld [vmem:[#allocation2 + $0x90] sm:$0xf]  ;;  %10799 = vmatprep.subr.bf16.mxu0 %v11300_v2  ;;  %10693 = vmatprep.subr.bf16.mxu1 %v11303_v24  ;;  %v11308_v2 = vld [vmem:[#allocation8 + $0x1f0] sm:$0xff]  }
 0x30f   : > { %v5415_v33 = vor.u32 %v5414_v19, %v5410_v15  ;;  %v4764_v47 = vmax.f32 %v4700_v52, 0.0  ;;  %v9972_v14 = vpack.c.bf16 %v4765_v58, %v4765_v58  ;;  %v9970_v23 = vpack.c.bf16 %v4763_v26, %v4763_v26  ;;  %v11304_v52 = vld [vmem:[#allocation8 + $0x1a0] sm:$0xff]   ;;  %v14075_v24 = vld [vmem:[#allocation2 + $0x28] sm:$0xf] }
 0x310   : > { %v5406_v40 = vrot.slane %v5405_v48, 4  ;;  %v9973_v25 = vpack.c.bf16 %v4766_v29, %v4766_v29  ;;  %v5420_v21 = vrot.slane %v5418_v63, 5  ;;  %v14049_v3 = vsel %vm11879_vm13, %v9649_v46, %v5814_v53 }
 0x311   : > { %v5416_v28 = vrot.slane %v5415_v33, 4  ;;  %v9971_v5 = vpack.c.bf16 %v4764_v47, %v4764_v47  ;;  %v5059_v39 = vshrl.u32 %v9972_v14, 16  ;;  %v5042_v17 = vshrl.u32 %v9970_v23, 16  ;;  %10800 = vmatpush3.bf16.msra.mxu0 %v11304_v52  ;;  %v14090_v52 = vld [vmem:[#allocation2 + $0x2c] sm:$0x1] }
 0x312   : > { %v5411_v34 = vsel %vm11813_vm6, %v5406_v40, %v5410_v15  ;;  %v5816_v45 = vrot.slane %v5814_v53, 4  ;;  %v5062_v41 = vshll.u32 %v9972_v14, 16  ;;  %v5045_v12 = vshll.u32 %v9970_v23, 16  ;;  %v5260_v15 = vld [vmem:[#allocation2 + $0x84] sm:$0xf] }
 0x313   : > { %v5421_v16 = vsel %vm11813_vm6, %v5416_v28, %v5420_v21  ;;  %v5067_v57 = vshrl.u32 %v9973_v25, 16  ;;  %v5061_v0 = vrot.slane %v5059_v39, 7  ;;  %v5044_v19 = vrot.slane %v5042_v17, 7  ;;  %v5271_v53 = vld [vmem:[#allocation2 + $0x98] sm:$0x1]  ;;  %v11306_v28 = vld [vmem:[#allocation8 + $0x1e8] sm:$0xff]  }
 0x314   : > { %v9713_v42 = vcombine.low %v5411_v34, %v5421_v16  ;;  %v5050_v63 = vshrl.u32 %v9971_v5, 16  ;;  %v5070_v58 = vshll.u32 %v9973_v25, 16  ;;  %v5817_v26 = vrot.slane %v14030_v35, 5  ;;  %v14058_v40 = vld [vmem:[#allocation2 + $0x34] sm:$0xf]  ;;  %10801 = vmatprep.subr.bf16.mxu0 %v11306_v28 }
 0x315   : > { %v5069_v48 = vrot.slane %v5067_v57, 7  ;;  %v9697_v29 = vcombine.low %v13994_v13, %v14013_v22  ;;  %v5064_v33 = vor.u32 %v5062_v41, %v5061_v0  ;;  %v5065_v47 = vrot.slane %v5061_v0, 4  ;;  %v11305_v35 = vld [vmem:[#allocation8 + $0x138] sm:$0xff]   ;;  %v11307_v13 = vld [vmem:[#allocation8 + $0x1a8] sm:$0xff]   ;;  %v5264_v34 = vld [vmem:[#allocation2 + $0x8c] sm:$0x1] }
 0x316   : > { %8378 = vmatprep.mubr.bf16.mxu1 %v9713_v42  ;;  %v5047_v46 = vor.u32 %v5045_v12, %v5044_v19  ;;  %v5053_v30 = vshll.u32 %v9971_v5, 16  ;;  %v5052_v20 = vrot.slane %v5050_v63, 7  ;;  %v5818_v25 = vsel %vm11879_vm13, %v5816_v45, %v5817_v26  ;;  %v14067_v17 = vld [vmem:[#allocation2 + $0x24] sm:$0xf]  ;;  %v14073_v57 = vld [vmem:[#allocation2 + $0x30] sm:$0xf]  ;;  %10694 = vmatpush3.bf16.msra.mxu1 %v11305_v35 }
 0x317   : > { %v5072_v14 = vor.u32 %v5070_v58, %v5069_v48  ;;  %v5074_v23 = vrot.slane %v5069_v48, 4  ;;  %8379 = vmatmul.mubr.bf16.gmra.mrb[136].mxu1 %v9697_v29  ;;  %v5268_v22 = vsel %vm11853_vm11, %v5064_v33, %v5267_v1  ;;  %v5048_v21 = vrot.slane %v5044_v19, 4  ;;  %10802 = vmatpush3.bf16.msra.mxu0 %v11307_v13  ;;  %v11311_v33 = vld [vmem:[#allocation8 + $0x1f8] sm:$0xff]  }
 0x318   : > { %v5261_v5 = vsel %vm11853_vm11, %v5047_v46, %v5260_v15  ;;  %v9729_v39 = vcombine.low %v14049_v3, %v5818_v25  ;;  %5269 = vst [vmem:[#allocation2 + $0x90] sm:$0xf] %v5268_v22  ;;  %v5055_v41 = vor.u32 %v5053_v30, %v5052_v20  ;;  %v5057_v12 = vrot.slane %v5052_v20, 4  ;;  %v11310_v15 = vld [vmem:[#allocation8 + $0x1b0] sm:$0xff]   ;;  %10803 = vmatprep.subr.bf16.mxu0 %v11308_v2 }
 0x319   : > { %5262 = vst [vmem:[#allocation2 + $0x84] sm:$0xf] %v5261_v5  ;;  %v5073_v45 = vsel %vm11841_vm10, %v5065_v47, %v5072_v14  ;;  %v5272_v16 = vsel %vm11864_vm12, %v5074_v23, %v5271_v53  ;;  %v14080_v3 = vrot.slane %v5975_v60, 4  ;;  %v6007_v0 = vshrl.u32 %v14028_v49, 16  ;;  %v11312_v5 = vld [vmem:[#allocation8 + $0x1b8] sm:$0xff]  }
 0x31a   : > { %5270 = vst [vmem:[#allocation2 + $0x94] sm:$0xf] %v5073_v45  ;;  %5273 = vst [vmem:[#allocation2 + $0x98] sm:$0x1] %v5272_v16  ;;  %8540 = vmatmul.mubr.bf16.gmra.mrb[168].mxu0 %v9729_v39  ;;  %v9746_v1 = vcombine.low %v14073_v57, %v14058_v40  ;;  %v5056_v19 = vsel %vm11841_vm10, %v5048_v21, %v5055_v41  ;;  %v5265_v63 = vsel %vm11864_vm12, %v5057_v12, %v5264_v34  ;;  %v5737_v21 = vld [vmem:[#allocation2 + $0x24] sm:$0xe] }
 0x31b   : > { %v5423_v55 = vshrl.u32 %v14067_v17, 16  ;;  %v5426_v60 = vshll.u32 %v14067_v17, 16  ;;  %v6010_v48 = vshll.u32 %v14028_v49, 16  ;;  %5263 = vst [vmem:[#allocation2 + $0x88] sm:$0xf] %v5056_v19  ;;  %v5432_v26 = vshll.u32 %v14075_v24, 16  ;;  %10804 = vmatpush3.bf16.msra.mxu0 %v11310_v15 }
 0x31c   : > { %5266 = vst [vmem:[#allocation2 + $0x8c] sm:$0x1] %v5265_v63  ;;  %8547 = vmatprep.mubr.bf16.mxu0 %v9746_v1  ;;  %v5436_v29 = vshrl.u32 %v14075_v24, 16  ;;  %v4721_v53 = vadd.f32 %v13950_v8, %v13802_v62  ;;  %v4713_v30 = vadd.f32 %v13959_v10, %v13796_v37  ;;  %v5442_v20 = vshll.u32 %v14090_v52, 16  ;;  %10805 = vmatprep.subr.bf16.mxu0 %v11311_v33 }
 0x31d   : > { %v5425_v47 = vrot.slane %v5423_v55, 4  ;;  %v5428_v46 = vrot.slane %v5426_v60, 5  ;;  %v5434_v14 = vrot.slane %v5432_v26, 5  ;;  %v4724_v25 = vadd.f32 %v13961_v9, %v13804_v27  ;;  %v11314_v60 = vld [vmem:[#allocation8 + $0x200] sm:$0xff]  }
 0x31e   : > { %v5438_v23 = vrot.slane %v5436_v29, 4  ;;  %v4769_v28 = vmax.f32 %v4721_v53, 0.0  ;;  %v4767_v13 = vmax.f32 %v4713_v30, 0.0  ;;  %v4716_v22 = vadd.f32 %v13966_v38, %v13798_v51  ;;  %v5281_v29 = vld [vmem:[#allocation2 + $0xa8] sm:$0xf]  ;;  %10975 = vmatprep.subr.bf16.mxu1 %v11314_v60 }
 0x31f   : > { %v5429_v35 = vor.u32 %v5428_v46, %v5425_v47  ;;  %v14107_v62 = vrot.slane %v6007_v0, 4  ;;  %v4770_v37 = vmax.f32 %v4724_v25, 0.0  ;;  %v5821_v10 = vrot.slane %v14075_v24, 5  ;;  %10806 = vmatpush3.bf16.msra.mxu0 %v11312_v5  ;;  %v5274_v53 = vld [vmem:[#allocation2 + $0x9c] sm:$0xf] }
 0x320   : > { %v5439_v8 = vor.u32 %v5438_v23, %v5434_v14  ;;  %v9976_v39 = vpack.c.bf16 %v4769_v28, %v4769_v28  ;;  %v9974_v2 = vpack.c.bf16 %v4767_v13, %v4767_v13  ;;  %v4768_v27 = vmax.f32 %v4716_v22, 0.0  ;;  %v14120_v22 = vld [vmem:[#allocation2 + $0x30] sm:$0xf] }
 0x321   : > { %v5430_v34 = vrot.slane %v5429_v35, 4  ;;  %v5444_v45 = vrot.slane %v5442_v20, 5  ;;  %v9977_v16 = vpack.c.bf16 %v4770_v37, %v4770_v37  ;;  %v9650_v41 = vrot.slane %v5737_v21, 9  ;;  %v5285_v35 = vld [vmem:[#allocation2 + $0xb0] sm:$0x1] }
 0x322   : > { %v5440_v9 = vrot.slane %v5439_v8, 4  ;;  %v5093_v38 = vshrl.u32 %v9976_v39, 16  ;;  %v5076_v12 = vshrl.u32 %v9974_v2, 16  ;;  %v5823_v0 = vrot.slane %v5821_v10, 4 }
 0x323   : > { %v5435_v51 = vsel %vm11813_vm6, %v5430_v34, %v5434_v14  ;;  %v5096_v19 = vshll.u32 %v9976_v39, 16  ;;  %v5079_v63 = vshll.u32 %v9974_v2, 16  ;;  %v5101_v55 = vshrl.u32 %v9977_v16, 16  ;;  %v14122_v34 = vld [vmem:[#allocation2 + $0x40] sm:$0xf] }
 0x324   : > { %v5445_v1 = vsel %vm11813_vm6, %v5440_v9, %v5444_v45  ;;  %v5095_v26 = vrot.slane %v5093_v38, 7  ;;  %v5078_v33 = vrot.slane %v5076_v12, 7  ;;  %v9975_v47 = vpack.c.bf16 %v4768_v27, %v4768_v27  ;;  %v5278_v12 = vld [vmem:[#allocation2 + $0xa4] sm:$0x1] }
 0x325   : > { %v9714_v15 = vcombine.low %v5435_v51, %v5445_v1  ;;  %v6031_v46 = vshrl.u32 %v14073_v57, 16  ;;  %v5103_v30 = vrot.slane %v5101_v55, 7  ;;  %v5104_v14 = vshll.u32 %v9977_v16, 16  ;;  %v14136_v16 = vld [vmem:[#allocation2 + $0x3c] sm:$0xf] }
 0x326   : > { %v9698_v23 = vcombine.low %v14067_v17, %v14075_v24  ;;  %v5098_v20 = vor.u32 %v5096_v19, %v5095_v26  ;;  %v5081_v25 = vor.u32 %v5079_v63, %v5078_v33  ;;  %v5822_v28 = vsel %vm11879_vm13, %v9650_v41, %v5821_v10  ;;  %v14138_v41 = vld [vmem:[#allocation2 + $0x38] sm:$0x1] }
 0x327   : > { %8386 = vmatprep.mubr.bf16.mxu1 %v9714_v15  ;;  %v5824_v13 = vrot.slane %v14090_v52, 5  ;;  %v5099_v21 = vrot.slane %v5095_v26, 4  ;;  %v5106_v5 = vor.u32 %v5104_v14, %v5103_v30  ;;  %v5108_v8 = vrot.slane %v5103_v30, 4  ;;  %v14130_v52 = vld [vmem:[#allocation2 + $0x34] sm:$0xf]  ;;  %v16200_v14 = vld [vmem:[#allocation78_spill] sm:$0xff] }
 0x328   : > { %v5084_v37 = vshrl.u32 %v9975_v47, 16  ;;  %8387 = vmatmul.mubr.bf16.gmra.mrb[140].mxu1 %v9698_v23  ;;  %v5282_v17 = vsel %vm11853_vm11, %v5098_v20, %v5281_v29  ;;  %v5275_v24 = vsel %vm11853_vm11, %v5081_v25, %v5274_v53  ;;  %v5087_v39 = vshll.u32 %v9975_v47, 16  ;;  %v16201_v20 = vld [vmem:[#allocation75_spill] sm:$0xff] }
 0x329   : > { %v5825_v10 = vsel %vm11879_vm13, %v5823_v0, %v5824_v13  ;;  %5283 = vst [vmem:[#allocation2 + $0xa8] sm:$0xf] %v5282_v17  ;;  %5276 = vst [vmem:[#allocation2 + $0x9c] sm:$0xf] %v5275_v24  ;;  %v5107_v2 = vsel %vm11841_vm10, %v5099_v21, %v5106_v5  ;;  %v5286_v27 = vsel %vm11864_vm12, %v5108_v8, %v5285_v35  ;;  %v14142_v51 = vrot.slane %v6010_v48, 5  ;;  %v16202_v13 = vld [vmem:[#allocation51_spill] sm:$0xff] }
 0x32a   : > { %v5086_v9 = vrot.slane %v5084_v37, 7  ;;  %v9730_v45 = vcombine.low %v5822_v28, %v5825_v10  ;;  %v5082_v38 = vrot.slane %v5078_v33, 4  ;;  %5284 = vst [vmem:[#allocation2 + $0xac] sm:$0xf] %v5107_v2  ;;  %5287 = vst [vmem:[#allocation2 + $0xb0] sm:$0x1] %v5286_v27  ;;  %v9747_v0 = vcombine.low %v14136_v16, %v14122_v34 }
 0x32b   : > { %v5447_v1 = vshrl.u32 %v14120_v22, 16  ;;  %v5450_v55 = vshll.u32 %v14120_v22, 16  ;;  %v5456_v60 = vshll.u32 %v14130_v52, 16  ;;  %v14149_v15 = vrot.slane %v6031_v46, 4  ;;  %v16203_v5 = vld [vmem:[#allocation76_spill] sm:$0xff] }
 0x32c   : > { %v5089_v19 = vor.u32 %v5087_v39, %v5086_v9  ;;  %v5091_v63 = vrot.slane %v5086_v9, 4  ;;  %8548 = vmatmul.mubr.bf16.gmra.mrb[172].mxu0 %v9730_v45  ;;  %v5460_v48 = vshrl.u32 %v14130_v52, 16  ;;  %v5466_v26 = vshll.u32 %v14138_v41, 16  ;;  %v5738_v37 = vld [vmem:[#allocation2 + $0x30] sm:$0xe] }
 0x32d   : > { %8555 = vmatprep.mubr.bf16.mxu0 %v9747_v0  ;;  %v5449_v49 = vrot.slane %v5447_v1, 4  ;;  %v5452_v47 = vrot.slane %v5450_v55, 5  ;;  %v5458_v53 = vrot.slane %v5456_v60, 5  ;;  %v6034_v30 = vshll.u32 %v14073_v57, 16 }
 0x32e   : > { %v5090_v29 = vsel %vm11841_vm10, %v5082_v38, %v5089_v19  ;;  %v5279_v33 = vsel %vm11864_vm12, %v5091_v63, %v5278_v12  ;;  %v5462_v46 = vrot.slane %v5460_v48, 4  ;;  %v4737_v23 = vadd.f32 %v16200_v14, %v13817_v50 }
 0x32f   : > { %5277 = vst [vmem:[#allocation2 + $0xa0] sm:$0xf] %v5090_v29  ;;  %5280 = vst [vmem:[#allocation2 + $0xa4] sm:$0x1] %v5279_v33  ;;  %v4729_v25 = vadd.f32 %v13976_v18, %v16201_v20  ;;  %v5453_v28 = vor.u32 %v5452_v47, %v5449_v49  ;;  %v4740_v21 = vadd.f32 %v13978_v56, %v16202_v13  ;;  %v5828_v10 = vrot.slane %v14130_v52, 5 }
 0x330   : > { %v4732_v8 = vadd.f32 %v13980_v54, %v16203_v5  ;;  %v5463_v17 = vor.u32 %v5462_v46, %v5458_v53  ;;  %v4773_v24 = vmax.f32 %v4737_v23, 0.0  ;;  %v5468_v50 = vrot.slane %v5466_v26, 5  ;;  %v5288_v23 = vld [vmem:[#allocation2 + $0xb4] sm:$0xf] }
 0x331   : > { %v4771_v39 = vmax.f32 %v4729_v25, 0.0  ;;  %v5454_v2 = vrot.slane %v5453_v28, 4  ;;  %v4774_v27 = vmax.f32 %v4740_v21, 0.0  ;;  %v9651_v12 = vrot.slane %v5738_v37, 9 }
 0x332   : > { %v4772_v9 = vmax.f32 %v4732_v8, 0.0  ;;  %v5464_v18 = vrot.slane %v5463_v17, 4  ;;  %v9980_v45 = vpack.c.bf16 %v4773_v24, %v4773_v24  ;;  %v5830_v56 = vrot.slane %v5828_v10, 4  ;;  %v5299_v8 = vld [vmem:[#allocation2 + $0xc8] sm:$0x1] }
 0x333   : > { %v9978_v38 = vpack.c.bf16 %v4771_v39, %v4771_v39  ;;  %v9981_v0 = vpack.c.bf16 %v4774_v27, %v4774_v27  ;;  %v5831_v19 = vrot.slane %v14138_v41, 5  ;;  %v5459_v54 = vsel %vm11813_vm6, %v5454_v2, %v5458_v53  ;;  %v5295_v41 = vld [vmem:[#allocation2 + $0xc0] sm:$0xf]  ;;  %v14179_v17 = vld [vmem:[#allocation2 + $0x48] sm:$0xf] }
 0x334   : > { %v9979_v1 = vpack.c.bf16 %v4772_v9, %v4772_v9  ;;  %v5469_v63 = vsel %vm11813_vm6, %v5464_v18, %v5468_v50  ;;  %v5127_v55 = vshrl.u32 %v9980_v45, 16  ;;  %v5130_v48 = vshll.u32 %v9980_v45, 16  ;;  %v14181_v50 = vld [vmem:[#allocation2 + $0x4c] sm:$0xf]  ;;  %v14183_v27 = vld [vmem:[#allocation2 + $0x3c] sm:$0xf] }
 0x335   : > { %v5110_v60 = vshrl.u32 %v9978_v38, 16  ;;  %v9715_v49 = vcombine.low %v5459_v54, %v5469_v63  ;;  %v5135_v26 = vshrl.u32 %v9981_v0, 16  ;;  %v5829_v29 = vsel %vm11879_vm13, %v9651_v12, %v5828_v10  ;;  %v5292_v45 = vld [vmem:[#allocation2 + $0xbc] sm:$0x1] }
 0x336   : > { %v5129_v33 = vrot.slane %v5127_v55, 7  ;;  %v5113_v46 = vshll.u32 %v9978_v38, 16  ;;  %v5118_v14 = vshrl.u32 %v9979_v1, 16  ;;  %v5138_v53 = vshll.u32 %v9981_v0, 16  ;;  %v14190_v38 = vld [vmem:[#allocation2 + $0x40] sm:$0xf] }
 0x337   : > { %v5112_v47 = vrot.slane %v5110_v60, 7  ;;  %8394 = vmatprep.mubr.bf16.mxu1 %v9715_v49  ;;  %v5137_v20 = vrot.slane %v5135_v26, 7  ;;  %v5832_v25 = vsel %vm11879_vm13, %v5830_v56, %v5831_v19  ;;  %v9699_v28 = vcombine.low %v14120_v22, %v14130_v52  ;;  %v5339_v19 = vld [vmem:[#allocation2 + $0x44] sm:$0x1] }
 0x338   : > { %v5132_v13 = vor.u32 %v5130_v48, %v5129_v33  ;;  %v5133_v21 = vrot.slane %v5129_v33, 4  ;;  %v5121_v37 = vshll.u32 %v9979_v1, 16  ;;  %v5120_v10 = vrot.slane %v5118_v14, 7 }
 0x339   : > { %v5115_v5 = vor.u32 %v5113_v46, %v5112_v47  ;;  %v5140_v24 = vor.u32 %v5138_v53, %v5137_v20  ;;  %v5142_v39 = vrot.slane %v5137_v20, 4  ;;  %v9731_v2 = vcombine.low %v5829_v29, %v5832_v25  ;;  %8395 = vmatmul.mubr.bf16.gmra.mrb[144].mxu1 %v9699_v28  ;;  %v14222_v25 = vld [vmem:[#allocation2 + $0x48] sm:$0xf] }
 0x33a   : > { %v6055_v9 = vshrl.u32 %v14136_v16, 16  ;;  %v5296_v22 = vsel %vm11853_vm11, %v5132_v13, %v5295_v41  ;;  %v5116_v52 = vrot.slane %v5112_v47, 4  ;;  %v5123_v1 = vor.u32 %v5121_v37, %v5120_v10 }
 0x33b   : > { %v5289_v18 = vsel %vm11853_vm11, %v5115_v5, %v5288_v23  ;;  %5297 = vst [vmem:[#allocation2 + $0xc0] sm:$0xf] %v5296_v22  ;;  %v5141_v12 = vsel %vm11841_vm10, %v5133_v21, %v5140_v24  ;;  %v5300_v0 = vsel %vm11864_vm12, %v5142_v39, %v5299_v8  ;;  %v5125_v56 = vrot.slane %v5120_v10, 4  ;;  %8556 = vmatmul.mubr.bf16.gmra.mrb[176].mxu0 %v9731_v2  ;;  %v14215_v23 = vld [vmem:[#allocation2 + $0x54] sm:$0xf] }
 0x33c   : > { %5290 = vst [vmem:[#allocation2 + $0xb4] sm:$0xf] %v5289_v18  ;;  %v6058_v54 = vshll.u32 %v14136_v16, 16  ;;  %5298 = vst [vmem:[#allocation2 + $0xc4] sm:$0xf] %v5141_v12  ;;  %v6079_v4 = vshrl.u32 %v14179_v17, 16  ;;  %v9748_v63 = vcombine.low %v14179_v17, %v14181_v50  ;;  %v5124_v60 = vsel %vm11841_vm10, %v5116_v52, %v5123_v1 }
 0x33d   : > { %5301 = vst [vmem:[#allocation2 + $0xc8] sm:$0x1] %v5300_v0  ;;  %v5471_v55 = vshrl.u32 %v14183_v27, 16  ;;  %v5293_v49 = vsel %vm11864_vm12, %v5125_v56, %v5292_v45  ;;  %v5474_v48 = vshll.u32 %v14183_v27, 16  ;;  %v5480_v26 = vshll.u32 %v14190_v38, 16 }
 0x33e   : > { %v14209_v16 = vrot.slane %v6034_v30, 5  ;;  %5291 = vst [vmem:[#allocation2 + $0xb8] sm:$0xf] %v5124_v60  ;;  %5294 = vst [vmem:[#allocation2 + $0xbc] sm:$0x1] %v5293_v49  ;;  %8563 = vmatprep.mubr.bf16.mxu0 %v9748_v63  ;;  %v5484_v33 = vshrl.u32 %v14190_v38, 16 }
 0x33f   : > { %v5473_v29 = vrot.slane %v5471_v55, 4  ;;  %v5490_v47 = vshll.u32 %v5339_v19, 16  ;;  %v14212_v46 = vrot.slane %v6055_v9, 4  ;;  %v5476_v59 = vrot.slane %v5474_v48, 5  ;;  %v14224_v8 = vld [vmem:[#allocation2 + $0x4c] sm:$0xf] }
 0x340   : > { %v5482_v14 = vrot.slane %v5480_v26, 5  ;;  %v5835_v41 = vrot.slane %v14190_v38, 5  ;;  %v14217_v20 = vrot.slane %v6058_v54, 5  ;;  %v14220_v30 = vrot.slane %v6079_v4, 4  ;;  %v14227_v10 = vld [vmem:[#allocation2 + $0x58] sm:$0xf] }
 0x341   : > { %v5486_v53 = vrot.slane %v5484_v33, 4  ;;  %v5477_v28 = vor.u32 %v5476_v59, %v5473_v29  ;;  %v9652_v13 = vrot.slane %v5739_v32, 9  ;;  %v5838_v5 = vrot.slane %v5339_v19, 5  ;;  %v5340_v18 = vld [vmem:[#allocation2 + $0x50] sm:$0x1] }
 0x342   : > { %v5837_v21 = vrot.slane %v5835_v41, 4  ;;  %v6082_v37 = vshll.u32 %v14179_v17, 16  ;;  %v5492_v39 = vrot.slane %v5490_v47, 5  ;;  %v6103_v2 = vshrl.u32 %v14215_v23, 16  ;;  %v5740_v48 = vld [vmem:[#allocation2 + $0x48] sm:$0xe] }
 0x343   : > { %v5487_v24 = vor.u32 %v5486_v53, %v5482_v14  ;;  %v5478_v9 = vrot.slane %v5477_v28, 4  ;;  %v5836_v22 = vsel %vm11879_vm13, %v9652_v13, %v5835_v41  ;;  %v5495_v45 = vshrl.u32 %v14222_v25, 16  ;;  %v14247_v32 = vld [vmem:[#allocation2 + $0x60] sm:$0xf]  ;;  %v14253_v28 = vld [vmem:[#allocation2 + $0x64] sm:$0xf] }
 0x344   : > { %v5839_v52 = vsel %vm11879_vm13, %v5837_v21, %v5838_v5  ;;  %v5498_v17 = vshll.u32 %v14222_v25, 16  ;;  %v5504_v1 = vshll.u32 %v14224_v8, 16  ;;  %v9749_v19 = vcombine.low %v14215_v23, %v14227_v10  ;;  %v14255_v13 = vld [vmem:[#allocation2 + $0x54] sm:$0xf]  ;;  %v14375_v59 = vld [vmem:[#allocation2 + $0x88] sm:$0xf] }
 0x345   : > { %v5488_v12 = vrot.slane %v5487_v24, 4  ;;  %v9732_v0 = vcombine.low %v5836_v22, %v5839_v52  ;;  %v5483_v56 = vsel %vm11813_vm6, %v5478_v9, %v5482_v14  ;;  %v5497_v54 = vrot.slane %v5495_v45, 4 }
 0x346   : > { %v5508_v4 = vshrl.u32 %v14224_v8, 16  ;;  %v5500_v55 = vrot.slane %v5498_v17, 5  ;;  %v5506_v60 = vrot.slane %v5504_v1, 5  ;;  %v5514_v49 = vshll.u32 %v5340_v18, 16 }
 0x347   : > { %v5493_v63 = vsel %vm11813_vm6, %v5488_v12, %v5492_v39  ;;  %8564 = vmatmul.mubr.bf16.gmra.mrb[180].mxu0 %v9732_v0  ;;  %v14244_v26 = vrot.slane %v6082_v37, 5  ;;  %v5842_v47 = vrot.slane %v14224_v8, 5  ;;  %v9700_v14 = vcombine.low %v14183_v27, %v14190_v38  ;;  %v14257_v39 = vld [vmem:[#allocation2 + $0x58] sm:$0xf]  ;;  %v5341_v12 = vld [vmem:[#allocation2 + $0x5c] sm:$0x1] }
 0x348   : > { %v9716_v29 = vcombine.low %v5483_v56, %v5493_v63  ;;  %8571 = vmatprep.mubr.bf16.mxu0 %v9749_v19  ;;  %v5510_v33 = vrot.slane %v5508_v4, 4  ;;  %v6106_v41 = vshll.u32 %v14215_v23, 16  ;;  %v5501_v53 = vor.u32 %v5500_v55, %v5497_v54  ;;  %v5741_v63 = vld [vmem:[#allocation2 + $0x54] sm:$0xe] }
 0x349   : > { %v9653_v5 = vrot.slane %v5740_v48, 9  ;;  %v5844_v37 = vrot.slane %v5842_v47, 4  ;;  %v5845_v24 = vrot.slane %v5340_v18, 5  ;;  %v14259_v9 = vrot.slane %v6103_v2, 4 }
 0x34a   : > { %8402 = vmatprep.mubr.bf16.mxu1 %v9716_v29  ;;  %v5511_v21 = vor.u32 %v5510_v33, %v5506_v60  ;;  %v5502_v22 = vrot.slane %v5501_v53, 4  ;;  %v5516_v52 = vrot.slane %v5514_v49, 5  ;;  %v6127_v27 = vshrl.u32 %v14247_v32, 16 }
 0x34b   : > { %8403 = vmatmul.mubr.bf16.gmra.mrb[148].mxu1 %v9700_v14  ;;  %v5843_v23 = vsel %vm11879_vm13, %v9653_v5, %v5842_v47  ;;  %v5846_v45 = vsel %vm11879_vm13, %v5844_v37, %v5845_v24  ;;  %v5519_v0 = vshrl.u32 %v14255_v13, 16  ;;  %v9750_v17 = vcombine.low %v14247_v32, %v14253_v28  ;;  %v14283_v24 = vld [vmem:[#allocation2 + $0x60] sm:$0xf] }
 0x34c   : > { %v5512_v38 = vrot.slane %v5511_v21, 4  ;;  %v9733_v18 = vcombine.low %v5843_v23, %v5846_v45  ;;  %v5522_v2 = vshll.u32 %v14255_v13, 16  ;;  %v5528_v1 = vshll.u32 %v14257_v39, 16  ;;  %v14289_v45 = vld [vmem:[#allocation2 + $0x70] sm:$0xf] }
 0x34d   : > { %v5507_v56 = vsel %vm11813_vm6, %v5502_v22, %v5506_v60  ;;  %v5521_v54 = vrot.slane %v5519_v0, 4  ;;  %v5532_v4 = vshrl.u32 %v14257_v39, 16  ;;  %v5538_v29 = vshll.u32 %v5341_v12, 16  ;;  %v14285_v22 = vld [vmem:[#allocation2 + $0x64] sm:$0xf] }
 0x34e   : > { %v5517_v19 = vsel %vm11813_vm6, %v5512_v38, %v5516_v52  ;;  %v5524_v49 = vrot.slane %v5522_v2, 5  ;;  %v5530_v48 = vrot.slane %v5528_v1, 5  ;;  %v14276_v33 = vrot.slane %v6106_v41, 5 }
 0x34f   : > { %v9717_v55 = vcombine.low %v5507_v56, %v5517_v19  ;;  %8572 = vmatmul.mubr.bf16.gmra.mrb[184].mxu0 %v9733_v18  ;;  %v5534_v14 = vrot.slane %v5532_v4, 4  ;;  %v5849_v60 = vrot.slane %v14257_v39, 5  ;;  %v9701_v53 = vcombine.low %v14222_v25, %v14224_v8 }
 0x350   : > { %8579 = vmatprep.mubr.bf16.mxu0 %v9750_v17  ;;  %v6130_v21 = vshll.u32 %v14247_v32, 16  ;;  %v5525_v5 = vor.u32 %v5524_v49, %v5521_v54  ;;  %v9654_v37 = vrot.slane %v5741_v63, 9  ;;  %v14287_v41 = vrot.slane %v6127_v27, 4  ;;  %v5342_v32 = vld [vmem:[#allocation2 + $0x68] sm:$0x1] }
 0x351   : > { %8410 = vmatprep.mubr.bf16.mxu1 %v9717_v55  ;;  %v5535_v52 = vor.u32 %v5534_v14, %v5530_v48  ;;  %v5851_v38 = vrot.slane %v5849_v60, 4  ;;  %v5852_v23 = vrot.slane %v5341_v12, 5  ;;  %v5540_v25 = vrot.slane %v5538_v29, 5  ;;  %v5926_v27 = vld [vmem:[#allocation2 + $0x6c] sm:$0xf] }
 0x352   : > { %v5526_v18 = vrot.slane %v5525_v5, 4  ;;  %v5850_v8 = vsel %vm11879_vm13, %v9654_v37, %v5849_v60  ;;  %v5543_v1 = vshrl.u32 %v14283_v24, 16  ;;  %v5546_v12 = vshll.u32 %v14283_v24, 16  ;;  %v5742_v14 = vld [vmem:[#allocation2 + $0x60] sm:$0xe] }
 0x353   : > { %8411 = vmatmul.mubr.bf16.gmra.mrb[152].mxu1 %v9701_v53  ;;  %v5536_v17 = vrot.slane %v5535_v52, 4  ;;  %v5853_v2 = vsel %vm11879_vm13, %v5851_v38, %v5852_v23  ;;  %v9751_v19 = vcombine.low %v5926_v27, %v14289_v45  ;;  %v5552_v54 = vshll.u32 %v14285_v22, 16 }
 0x354   : > { %v9734_v56 = vcombine.low %v5850_v8, %v5853_v2  ;;  %v5556_v4 = vshrl.u32 %v14285_v22, 16  ;;  %v5531_v63 = vsel %vm11813_vm6, %v5526_v18, %v5530_v48  ;;  %v5545_v49 = vrot.slane %v5543_v1, 4  ;;  %v14310_v18 = vld [vmem:[#allocation2 + $0x78] sm:$0xf] }
 0x355   : > { %v5541_v55 = vsel %vm11813_vm6, %v5536_v17, %v5540_v25  ;;  %v5548_v29 = vrot.slane %v5546_v12, 5  ;;  %v5554_v53 = vrot.slane %v5552_v54, 5  ;;  %v5562_v37 = vshll.u32 %v5342_v32, 16  ;;  %v14312_v25 = vld [vmem:[#allocation2 + $0x7c] sm:$0xf] }
 0x356   : > { %v9718_v60 = vcombine.low %v5531_v63, %v5541_v55  ;;  %v5558_v5 = vrot.slane %v5556_v4, 4  ;;  %v14305_v52 = vrot.slane %v6130_v21, 5  ;;  %v9702_v38 = vcombine.low %v14255_v13, %v14257_v39  ;;  %16204 = vst [vmem:[#allocation54_spill] sm:$0xff] %v14312_v25  ;;  %v14314_v12 = vld [vmem:[#allocation2 + $0x6c] sm:$0xf] }
 0x357   : > { %8580 = vmatmul.mubr.bf16.gmra.mrb[188].mxu0 %v9734_v56  ;;  %v5549_v23 = vor.u32 %v5548_v29, %v5545_v49  ;;  %v5856_v48 = vrot.slane %v14285_v22, 5  ;;  %v6151_v8 = vshrl.u32 %v5926_v27, 16  ;;  %v6154_v17 = vshll.u32 %v5926_v27, 16  ;;  %v14317_v39 = vld [vmem:[#allocation2 + $0x70] sm:$0xf] }
 0x358   : > { %8587 = vmatprep.mubr.bf16.mxu0 %v9751_v19  ;;  %8418 = vmatprep.mubr.bf16.mxu1 %v9718_v60  ;;  %v5559_v2 = vor.u32 %v5558_v5, %v5554_v53  ;;  %v9655_v1 = vrot.slane %v5742_v14, 9  ;;  %v5859_v13 = vrot.slane %v5342_v32, 5  ;;  %v5564_v4 = vrot.slane %v5562_v37, 5  ;;  %v5343_v55 = vld [vmem:[#allocation2 + $0x74] sm:$0x1] }
 0x359   : > { %v5550_v56 = vrot.slane %v5549_v23, 4  ;;  %v5858_v54 = vrot.slane %v5856_v48, 4  ;;  %v9752_v27 = vcombine.low %v14310_v18, %v14312_v25  ;;  %v5567_v32 = vshrl.u32 %v14314_v12, 16  ;;  %v14428_v25 = vld [vmem:[#allocation2 + $0xac] sm:$0xf] }
 0x35a   : > { %v5560_v19 = vrot.slane %v5559_v2, 4  ;;  %v5857_v63 = vsel %vm11879_vm13, %v9655_v1, %v5856_v48  ;;  %v5570_v14 = vshll.u32 %v14314_v12, 16  ;;  %v5576_v37 = vshll.u32 %v14317_v39, 16  ;;  %16212 = vst [vmem:[#allocation62_spill] sm:$0xff] %v14428_v25 }
 0x35b   : > { %8419 = vmatmul.mubr.bf16.gmra.mrb[156].mxu1 %v9702_v38  ;;  %v5555_v49 = vsel %vm11813_vm6, %v5550_v56, %v5554_v53  ;;  %v5860_v29 = vsel %vm11879_vm13, %v5858_v54, %v5859_v13  ;;  %v5580_v38 = vshrl.u32 %v14317_v39, 16  ;;  %v5569_v48 = vrot.slane %v5567_v32, 4  ;;  %v5743_v53 = vld [vmem:[#allocation2 + $0x6c] sm:$0xe] }
 0x35c   : > { %v5565_v60 = vsel %vm11813_vm6, %v5560_v19, %v5564_v4  ;;  %v9735_v5 = vcombine.low %v5857_v63, %v5860_v29  ;;  %v5572_v2 = vrot.slane %v5570_v14, 5  ;;  %v5586_v1 = vshll.u32 %v5343_v55, 16 }
 0x35d   : > { %v9719_v23 = vcombine.low %v5555_v49, %v5565_v60  ;;  %v14333_v56 = vrot.slane %v6151_v8, 4  ;;  %v5578_v54 = vrot.slane %v5576_v37, 5  ;;  %v5582_v13 = vrot.slane %v5580_v38, 4  ;;  %v14341_v49 = vld [vmem:[#allocation2 + $0x78] sm:$0xf] }
 0x35e   : > { %v5863_v21 = vrot.slane %v14317_v39, 5  ;;  %v14336_v0 = vrot.slane %v6154_v17, 5  ;;  %v9703_v19 = vcombine.low %v14283_v24, %v14285_v22  ;;  %v6175_v4 = vshrl.u32 %v14310_v18, 16  ;;  %v14345_v38 = vld [vmem:[#allocation2 + $0x7c] sm:$0xf] }
 0x35f   : > { %8588 = vmatmul.mubr.bf16.gmra.mrb[192].mxu0 %v9735_v5  ;;  %8426 = vmatprep.mubr.bf16.mxu1 %v9719_v23  ;;  %v5573_v63 = vor.u32 %v5572_v2, %v5569_v48  ;;  %v5583_v29 = vor.u32 %v5582_v13, %v5578_v54  ;;  %v9656_v8 = vrot.slane %v5743_v53, 9  ;;  %v5866_v14 = vrot.slane %v5343_v55, 5  ;;  %v14351_v23 = vld [vmem:[#allocation2 + $0x88] sm:$0xf]  ;;  %v5344_v48 = vld [vmem:[#allocation2 + $0x80] sm:$0x1] }
 0x360   : > { %8595 = vmatprep.mubr.bf16.mxu0 %v9752_v27  ;;  %v5865_v32 = vrot.slane %v5863_v21, 4  ;;  %v6178_v60 = vshll.u32 %v14310_v18, 16  ;;  %v5588_v37 = vrot.slane %v5586_v1, 5  ;;  %16205 = vst [vmem:[#allocation80_spill] sm:$0xff] %v14351_v23  ;;  %v5591_v55 = vshrl.u32 %v14341_v49, 16 }
 0x361   : > { %v5574_v17 = vrot.slane %v5573_v63, 4  ;;  %v5584_v24 = vrot.slane %v5583_v29, 4  ;;  %v5864_v22 = vsel %vm11879_vm13, %v9656_v8, %v5863_v21  ;;  %v14354_v18 = vrot.slane %v6175_v4, 4  ;;  %v5930_v21 = vld [vmem:[#allocation2 + $0x84] sm:$0xf] }
 0x362   : > { %v5867_v27 = vsel %vm11879_vm13, %v5865_v32, %v5866_v14  ;;  %v5594_v53 = vshll.u32 %v14341_v49, 16  ;;  %v5600_v63 = vshll.u32 %v14345_v38, 16  ;;  %v5604_v29 = vshrl.u32 %v14345_v38, 16  ;;  %v5744_v5 = vld [vmem:[#allocation2 + $0x78] sm:$0xe] }
 0x363   : > { %8427 = vmatmul.mubr.bf16.gmra.mrb[160].mxu1 %v9703_v19  ;;  %v5579_v2 = vsel %vm11813_vm6, %v5574_v17, %v5578_v54  ;;  %v9736_v1 = vcombine.low %v5864_v22, %v5867_v27  ;;  %v5589_v13 = vsel %vm11813_vm6, %v5584_v24, %v5588_v37  ;;  %v5593_v19 = vrot.slane %v5591_v55, 4  ;;  %v14367_v37 = vld [vmem:[#allocation2 + $0x90] sm:$0xf] }
 0x364   : > { %v9720_v8 = vcombine.low %v5579_v2, %v5589_v13  ;;  %v9753_v32 = vcombine.low %v5930_v21, %v14351_v23  ;;  %v5596_v4 = vrot.slane %v5594_v53, 5  ;;  %v5610_v14 = vshll.u32 %v5344_v48, 16  ;;  %v14371_v53 = vld [vmem:[#allocation2 + $0x94] sm:$0xf]  ;;  %v14373_v13 = vld [vmem:[#allocation2 + $0x84] sm:$0xf] }
 0x365   : > { %v14364_v47 = vrot.slane %v6178_v60, 5  ;;  %v5602_v54 = vrot.slane %v5600_v63, 5  ;;  %v5606_v17 = vrot.slane %v5604_v29, 4  ;;  %v5870_v22 = vrot.slane %v14345_v38, 5  ;;  %16206 = vst [vmem:[#allocation55_spill] sm:$0xff] %v14371_v53 }
 0x366   : > { %8434 = vmatprep.mubr.bf16.mxu1 %v9720_v8  ;;  %v9704_v24 = vcombine.low %v14314_v12, %v14317_v39  ;;  %v6199_v27 = vshrl.u32 %v5930_v21, 16  ;;  %v6202_v55 = vshll.u32 %v5930_v21, 16  ;;  %v5597_v2 = vor.u32 %v5596_v4, %v5593_v19 }
 0x367   : > { %8596 = vmatmul.mubr.bf16.gmra.mrb[196].mxu0 %v9736_v1  ;;  %v5607_v60 = vor.u32 %v5606_v17, %v5602_v54  ;;  %v9657_v1 = vrot.slane %v5744_v5, 9  ;;  %v5872_v63 = vrot.slane %v5870_v22, 4  ;;  %v5873_v29 = vrot.slane %v5344_v48, 5 }
 0x368   : > { %8603 = vmatprep.mubr.bf16.mxu0 %v9753_v32  ;;  %v5598_v8 = vrot.slane %v5597_v2, 4  ;;  %v5612_v35 = vrot.slane %v5610_v14, 5  ;;  %v6223_v12 = vshrl.u32 %v14367_v37, 16  ;;  %v5345_v32 = vld [vmem:[#allocation2 + $0x8c] sm:$0x1]  ;;  %v5615_v5 = vshrl.u32 %v14373_v13, 16 }
 0x369   : > { %v5608_v39 = vrot.slane %v5607_v60, 4  ;;  %v5871_v21 = vsel %vm11879_vm13, %v9657_v1, %v5870_v22  ;;  %v5874_v19 = vsel %vm11879_vm13, %v5872_v63, %v5873_v29  ;;  %v9754_v4 = vcombine.low %v14367_v37, %v14371_v53  ;;  %v5745_v1 = vld [vmem:[#allocation2 + $0x84] sm:$0xe] }
 0x36a   : > { %v5603_v48 = vsel %vm11813_vm6, %v5598_v8, %v5602_v54  ;;  %v5618_v14 = vshll.u32 %v14373_v13, 16  ;;  %v5624_v17 = vshll.u32 %v14375_v59, 16  ;;  %v9737_v22 = vcombine.low %v5871_v21, %v5874_v19 }
 0x36b   : > { %8435 = vmatmul.mubr.bf16.gmra.mrb[164].mxu1 %v9704_v24  ;;  %v5613_v24 = vsel %vm11813_vm6, %v5608_v39, %v5612_v35  ;;  %v5617_v2 = vrot.slane %v5615_v5, 4  ;;  %v5628_v60 = vshrl.u32 %v14375_v59, 16  ;;  %v5634_v58 = vshll.u32 %v5345_v32, 16  ;;  %v14401_v5 = vld [vmem:[#allocation2 + $0x90] sm:$0xf] }
 0x36c   : > { %v9721_v63 = vcombine.low %v5603_v48, %v5613_v24  ;;  %v5620_v29 = vrot.slane %v5618_v14, 5  ;;  %v5626_v57 = vrot.slane %v5624_v17, 5  ;;  %v14393_v54 = vrot.slane %v6199_v27, 4  ;;  %v14403_v48 = vld [vmem:[#allocation2 + $0x94] sm:$0xf] }
 0x36d   : > { %v14395_v8 = vrot.slane %v6202_v55, 5  ;;  %v5630_v42 = vrot.slane %v5628_v60, 4  ;;  %v5877_v23 = vrot.slane %v14375_v59, 5  ;;  %v9705_v35 = vcombine.low %v14341_v49, %v14345_v38  ;;  %v14407_v24 = vld [vmem:[#allocation2 + $0xa0] sm:$0xf] }
 0x36e   : > { %16207 = vst [vmem:[#allocation57_spill] sm:$0xff] %v14393_v54  ;;  %8442 = vmatprep.mubr.bf16.mxu1 %v9721_v63  ;;  %v6226_v39 = vshll.u32 %v14367_v37, 16  ;;  %v5621_v21 = vor.u32 %v5620_v29, %v5617_v2  ;;  %v9658_v19 = vrot.slane %v5745_v1, 9  ;;  %v14405_v27 = vrot.slane %v6223_v12, 4  ;;  %16210 = vst [vmem:[#allocation79_spill] sm:$0xff] %v14407_v24 }
 0x36f   : > { %16208 = vst [vmem:[#allocation82_spill] sm:$0xff] %v14395_v8  ;;  %8604 = vmatmul.mubr.bf16.gmra.mrb[200].mxu0 %v9737_v22  ;;  %v5631_v55 = vor.u32 %v5630_v42, %v5626_v57  ;;  %v5879_v14 = vrot.slane %v5877_v23, 4  ;;  %v5880_v17 = vrot.slane %v5345_v32, 5  ;;  %v5636_v49 = vrot.slane %v5634_v58, 5  ;;  %v5346_v37 = vld [vmem:[#allocation2 + $0x98] sm:$0x1] }
 0x370   : > { %8611 = vmatprep.mubr.bf16.mxu0 %v9754_v4  ;;  %16209 = vst [vmem:[#allocation83_spill] sm:$0xff] %v14405_v27  ;;  %v5622_v60 = vrot.slane %v5621_v21, 4  ;;  %v5878_v38 = vsel %vm11879_vm13, %v9658_v19, %v5877_v23  ;;  %v5934_v12 = vld [vmem:[#allocation2 + $0x9c] sm:$0xf]  ;;  %v5639_v42 = vshrl.u32 %v14401_v5, 16  ;;  %v5642_v32 = vshll.u32 %v14401_v5, 16 }
 0x371   : > { %v5632_v4 = vrot.slane %v5631_v55, 4  ;;  %v5881_v2 = vsel %vm11879_vm13, %v5879_v14, %v5880_v17  ;;  %v9755_v63 = vcombine.low %v5934_v12, %v14407_v24  ;;  %v5648_v58 = vshll.u32 %v14403_v48, 16  ;;  %v5746_v55 = vld [vmem:[#allocation2 + $0x90] sm:$0xe]  ;;  %v5936_v54 = vld [vmem:[#allocation2 + $0xa8] sm:$0xf] }
 0x372   : > { %v5627_v1 = vsel %vm11813_vm6, %v5622_v60, %v5626_v57  ;;  %v5652_v23 = vshrl.u32 %v14403_v48, 16  ;;  %v5641_v21 = vrot.slane %v5639_v42, 4  ;;  %v5644_v19 = vrot.slane %v5642_v32, 5  ;;  %v14430_v42 = vld [vmem:[#allocation2 + $0x9c] sm:$0xf] }
 0x373   : > { %8443 = vmatmul.mubr.bf16.gmra.mrb[168].mxu1 %v9705_v35  ;;  %v5637_v29 = vsel %vm11813_vm6, %v5632_v4, %v5636_v49  ;;  %v9738_v35 = vcombine.low %v5878_v38, %v5881_v2  ;;  %v5650_v17 = vrot.slane %v5648_v58, 5  ;;  %v5658_v53 = vshll.u32 %v5346_v37, 16 }
 0x374   : > { %v9722_v14 = vcombine.low %v5627_v1, %v5637_v29  ;;  %v5654_v22 = vrot.slane %v5652_v23, 4  ;;  %v14423_v27 = vrot.slane %v6226_v39, 5  ;;  %v9706_v57 = vcombine.low %v14373_v13, %v14375_v59  ;;  %v14433_v59 = vld [vmem:[#allocation2 + $0xa0] sm:$0xf]  ;;  %v5747_v39 = vld [vmem:[#allocation2 + $0x9c] sm:$0xe] }
 0x375   : > { %v5645_v60 = vor.u32 %v5644_v19, %v5641_v21  ;;  %v5884_v8 = vrot.slane %v14403_v48, 5  ;;  %v6247_v49 = vshrl.u32 %v5934_v12, 16  ;;  %v6250_v38 = vshll.u32 %v5934_v12, 16 }
 0x376   : > { %16211 = vst [vmem:[#allocation58_spill] sm:$0xff] %v14423_v27  ;;  %8450 = vmatprep.mubr.bf16.mxu1 %v9722_v14  ;;  %v5655_v4 = vor.u32 %v5654_v22, %v5650_v17  ;;  %v9659_v2 = vrot.slane %v5746_v55, 9  ;;  %v5887_v58 = vrot.slane %v5346_v37, 5  ;;  %v5660_v23 = vrot.slane %v5658_v53, 5 }
 0x377   : > { %8612 = vmatmul.mubr.bf16.gmra.mrb[204].mxu0 %v9738_v35  ;;  %v5646_v32 = vrot.slane %v5645_v60, 4  ;;  %v5886_v1 = vrot.slane %v5884_v8, 4  ;;  %v6271_v35 = vshrl.u32 %v5936_v54, 16  ;;  %v9756_v12 = vcombine.low %v5936_v54, %v14428_v25  ;;  %v5940_v25 = vld [vmem:[#allocation2 + $0xc0] sm:$0xf] }
 0x378   : > { %8619 = vmatprep.mubr.bf16.mxu0 %v9755_v63  ;;  %v5656_v13 = vrot.slane %v5655_v4, 4  ;;  %v5885_v29 = vsel %vm11879_vm13, %v9659_v2, %v5884_v8  ;;  %v5347_v63 = vld [vmem:[#allocation2 + $0xa4] sm:$0x1]  ;;  %v5663_v21 = vshrl.u32 %v14430_v42, 16  ;;  %v5666_v19 = vshll.u32 %v14430_v42, 16 }
 0x379   : > { %v5888_v22 = vsel %vm11879_vm13, %v5886_v1, %v5887_v58  ;;  %v5651_v37 = vsel %vm11813_vm6, %v5646_v32, %v5650_v17  ;;  %v5672_v8 = vshll.u32 %v14433_v59, 16  ;;  %v5676_v55 = vshrl.u32 %v14433_v59, 16 }
 0x37a   : > { %v5661_v53 = vsel %vm11813_vm6, %v5656_v13, %v5660_v23  ;;  %v5665_v60 = vrot.slane %v5663_v21, 4  ;;  %v5668_v4 = vrot.slane %v5666_v19, 5  ;;  %v5682_v58 = vshll.u32 %v5347_v63, 16  ;;  %v14453_v23 = vld [vmem:[#allocation2 + $0xa8] sm:$0xf] }
 0x37b   : > { %8451 = vmatmul.mubr.bf16.gmra.mrb[172].mxu1 %v9706_v57  ;;  %v9723_v14 = vcombine.low %v5651_v37, %v5661_v53  ;;  %v9739_v57 = vcombine.low %v5885_v29, %v5888_v22  ;;  %v5674_v2 = vrot.slane %v5672_v8, 5  ;;  %v5678_v1 = vrot.slane %v5676_v55, 4  ;;  %v14460_v8 = vld [vmem:[#allocation2 + $0xac] sm:$0xf] }
 0x37c   : > { %v5891_v24 = vrot.slane %v14433_v59, 5  ;;  %v14449_v27 = vrot.slane %v6247_v49, 4  ;;  %v14451_v17 = vrot.slane %v6250_v38, 5  ;;  %v6274_v32 = vshll.u32 %v5936_v54, 16 }
 0x37d   : > { %8458 = vmatprep.mubr.bf16.mxu1 %v9723_v14  ;;  %v5669_v13 = vor.u32 %v5668_v4, %v5665_v60  ;;  %v9707_v29 = vcombine.low %v14401_v5, %v14403_v48  ;;  %v5679_v22 = vor.u32 %v5678_v1, %v5674_v2  ;;  %v5894_v19 = vrot.slane %v5347_v63, 5  ;;  %v5748_v60 = vld [vmem:[#allocation2 + $0xa8] sm:$0xe]  ;;  %v14474_v1 = vld [vmem:[#allocation2 + $0xb4] sm:$0xf] }
 0x37e   : > { %16213 = vst [vmem:[#allocation67_spill] sm:$0xff] %v14449_v27  ;;  %16214 = vst [vmem:[#allocation68_spill] sm:$0xff] %v14451_v17  ;;  %v5893_v21 = vrot.slane %v5891_v24, 4  ;;  %v14457_v37 = vrot.slane %v6271_v35, 4  ;;  %v9660_v38 = vrot.slane %v5747_v39, 9  ;;  %v5684_v54 = vrot.slane %v5682_v58, 5 }
 0x37f   : > { %8620 = vmatmul.mubr.bf16.gmra.mrb[208].mxu0 %v9739_v57  ;;  %v5670_v53 = vrot.slane %v5669_v13, 4  ;;  %v5680_v55 = vrot.slane %v5679_v22, 4  ;;  %v5348_v57 = vld [vmem:[#allocation2 + $0xb0] sm:$0x1]  ;;  %v5687_v5 = vshrl.u32 %v14453_v23, 16  ;;  %v14465_v48 = vrot.slane %v6274_v32, 5 }
 0x380   : > { %8627 = vmatprep.mubr.bf16.mxu0 %v9756_v12  ;;  %16215 = vst [vmem:[#allocation71_spill] sm:$0xff] %v14457_v37  ;;  %v5895_v14 = vsel %vm11879_vm13, %v5893_v21, %v5894_v19  ;;  %v5892_v12 = vsel %vm11879_vm13, %v9660_v38, %v5891_v24  ;;  %v5939_v39 = vld [vmem:[#allocation2 + $0xb8] sm:$0xf]  ;;  %v5690_v63 = vshll.u32 %v14453_v23, 16  ;;  %16217 = vst [vmem:[#allocation84_spill] sm:$0xff] %v14474_v1  ;;  %v5696_v13 = vshll.u32 %v14460_v8, 16 }
 0x381   : > { %16216 = vst [vmem:[#allocation50_spill] sm:$0xff] %v14465_v48  ;;  %v5675_v35 = vsel %vm11813_vm6, %v5670_v53, %v5674_v2  ;;  %v5685_v4 = vsel %vm11813_vm6, %v5680_v55, %v5684_v54  ;;  %v5689_v58 = vrot.slane %v5687_v5, 4  ;;  %v5700_v32 = vshrl.u32 %v14460_v8, 16 }
 0x382   : > { %v9740_v22 = vcombine.low %v5892_v12, %v5895_v14  ;;  %v5692_v2 = vrot.slane %v5690_v63, 5  ;;  %v5706_v21 = vshll.u32 %v5348_v57, 16  ;;  %v9757_v24 = vcombine.low %v14474_v1, %v5939_v39  ;;  %v14483_v14 = vld [vmem:[#allocation2 + $0xb4] sm:$0xf] }
 0x383   : > { %8459 = vmatmul.mubr.bf16.gmra.mrb[176].mxu1 %v9707_v29  ;;  %v9724_v29 = vcombine.low %v5675_v35, %v5685_v4  ;;  %v5698_v19 = vrot.slane %v5696_v13, 5  ;;  %v5702_v53 = vrot.slane %v5700_v32, 4  ;;  %v5898_v38 = vrot.slane %v14460_v8, 5  ;;  %v5941_v35 = vld [vmem:[#allocation2 + $0xc4] sm:$0xf] }
 0x384   : > { %v9708_v55 = vcombine.low %v14430_v42, %v14433_v59  ;;  %v5693_v5 = vor.u32 %v5692_v2, %v5689_v58  ;;  %v9661_v49 = vrot.slane %v5748_v60, 9  ;;  %v5901_v4 = vrot.slane %v5348_v57, 5  ;;  %v14486_v13 = vld [vmem:[#allocation2 + $0xb8] sm:$0xf]  ;;  %v5349_v60 = vld [vmem:[#allocation2 + $0xbc] sm:$0x1] }
 0x385   : > { %8466 = vmatprep.mubr.bf16.mxu1 %v9724_v29  ;;  %v5703_v39 = vor.u32 %v5702_v53, %v5698_v19  ;;  %v5900_v63 = vrot.slane %v5898_v38, 4  ;;  %v5708_v29 = vrot.slane %v5706_v21, 5  ;;  %v9709_v59 = vcombine.low %v14453_v23, %v14460_v8  ;;  %v14492_v58 = vpop.f32.mrb[128].mxu1  ;;  %v5749_v53 = vld [vmem:[#allocation2 + $0xb4] sm:$0xe] }
 0x386   : > { %v5694_v32 = vrot.slane %v5693_v5, 4  ;;  %v5899_v42 = vsel %vm11879_vm13, %v9661_v49, %v5898_v38  ;;  %16218 = vst [vmem:[#allocation60_spill] sm:$0xff] %v14492_v58  ;;  %v5711_v57 = vshrl.u32 %v14483_v14, 16  ;;  %v14497_v12 = vpop.f32.mrb[129].mxu1  ;;  %v5714_v23 = vshll.u32 %v14483_v14, 16 }
 0x387   : > { %8628 = vmatmul.mubr.bf16.gmra.mrb[212].mxu0 %v9740_v22  ;;  %v5704_v22 = vrot.slane %v5703_v39, 4  ;;  %v5902_v2 = vsel %vm11879_vm13, %v5900_v63, %v5901_v4  ;;  %16219 = vst [vmem:[#allocation61_spill] sm:$0xff] %v14497_v12  ;;  %v5720_v8 = vshll.u32 %v14486_v13, 16  ;;  %v14503_v38 = vpop.f32.mrb[130].mxu1  ;;  %v5730_v39 = vshll.u32 %v5349_v60, 16 }
 0x388   : > { %8635 = vmatprep.mubr.bf16.mxu0 %v9757_v24  ;;  %v9758_v24 = vcombine.low %v5940_v25, %v5941_v35  ;;  %v5699_v49 = vsel %vm11813_vm6, %v5694_v32, %v5698_v19  ;;  %v9741_v21 = vcombine.low %v5899_v42, %v5902_v2  ;;  %16220 = vst [vmem:[#allocation65_spill] sm:$0xff] %v14503_v38  ;;  %v5713_v25 = vrot.slane %v5711_v57, 4  ;;  %v14508_v63 = vld [vmem:[#allocation2 + $0x18] sm:$0xf]  ;;  %v14512_v2 = vld [vmem:[#allocation2 + $0x1c] sm:$0xf] }
 0x389   : > { %v5709_v5 = vsel %vm11813_vm6, %v5704_v22, %v5708_v29  ;;  %v5724_v35 = vshrl.u32 %v14486_v13, 16  ;;  %v5716_v19 = vrot.slane %v5714_v23, 5  ;;  %v5722_v32 = vrot.slane %v5720_v8, 5  ;;  %v6550_v57 = vld [vmem:[#allocation2 + $0x20] sm:$0x1] }
 0x38a   : > { %v9725_v4 = vcombine.low %v5699_v49, %v5709_v5  ;;  %v9662_v42 = vrot.slane %v5749_v53, 9  ;;  %v5732_v48 = vrot.slane %v5730_v39, 5  ;;  %v5905_v37 = vrot.slane %v14486_v13, 5  ;;  %v11381_v58 = vld [vmem:[#allocation2 + $0x10] sm:$0xf] }
 0x38b   : > { %8467 = vmatmul.mubr.bf16.gmra.mrb[180].mxu1 %v9708_v55  ;;  %v14510_v55 = vpop.f32.mrb[131].mxu1  ;;  %v5726_v54 = vrot.slane %v5724_v35, 4  ;;  %v5908_v17 = vrot.slane %v5349_v60, 5  ;;  %v5717_v29 = vor.u32 %v5716_v19, %v5713_v25  ;;  %v9710_v22 = vcombine.low %v14483_v14, %v14486_v13  ;;  %v5942_v60 = vld [vmem:[#allocation2 + $0x14] sm:$0x1] }
 0x38c   : > { %16221 = vst [vmem:[#allocation66_spill] sm:$0xff] %v14510_v55  ;;  %8474 = vmatprep.mubr.bf16.mxu1 %v9725_v4  ;;  %v6567_v27 = vshrl.u32 %v14508_v63, 16  ;;  %v6570_v49 = vshll.u32 %v14508_v63, 16  ;;  %v5906_v23 = vsel %vm11879_vm13, %v9662_v42, %v5905_v37  ;;  %v5907_v8 = vrot.slane %v5905_v37, 4  ;;  %v6342_v14 = vld [vmem:[#allocation2 + $0xc] sm:$0xe] }
 0x38d   : > { %v5727_v53 = vor.u32 %v5726_v54, %v5722_v32  ;;  %v6576_v5 = vshll.u32 %v14512_v2, 16  ;;  %v5718_v35 = vrot.slane %v5717_v29, 4  ;;  %v6580_v39 = vshrl.u32 %v14512_v2, 16 }
 0x38e   : > { %v6572_v25 = vrot.slane %v6570_v49, 5  ;;  %v5909_v4 = vsel %vm11879_vm13, %v5907_v8, %v5908_v17  ;;  %v5978_v49 = vshll.u32 %v5942_v60, 16  ;;  %v9663_v55 = vrot.slane %v6342_v14, 9  ;;  %v14529_v8 = vld [vmem:[#allocation2 + $0x24] sm:$0xf] }
 0x38f   : > { %8636 = vmatmul.mubr.bf16.gmra.mrb[216].mxu0 %v9741_v21  ;;  %v6569_v21 = vrot.slane %v6567_v27, 4  ;;  %v5728_v13 = vrot.slane %v5727_v53, 4  ;;  %v6578_v19 = vrot.slane %v6576_v5, 5  ;;  %v5723_v54 = vsel %vm11813_vm6, %v5718_v35, %v5722_v32 }
 0x390   : > { %8643 = vmatprep.mubr.bf16.mxu0 %v9758_v24  ;;  %v6586_v24 = vshll.u32 %v6550_v57, 16  ;;  %v9742_v37 = vcombine.low %v5906_v23, %v5909_v4  ;;  %v6582_v1 = vrot.slane %v6580_v39, 4  ;;  %v6408_v17 = vrot.slane %v11381_v58, 5  ;;  %v6343_v39 = vld [vmem:[#allocation2 + $0x18] sm:$0xe] }
 0x391   : > { %v6573_v42 = vor.u32 %v6572_v25, %v6569_v21  ;;  %v5733_v27 = vsel %vm11813_vm6, %v5728_v13, %v5732_v48  ;;  %v5980_v57 = vrot.slane %v5978_v49, 5  ;;  %v6411_v32 = vrot.slane %v5942_v60, 5  ;;  %v6951_v21 = vld [vmem:[#allocation2 + $0x24] sm:$0xe] }
 0x392   : > { %v6588_v29 = vrot.slane %v6586_v24, 5  ;;  %v9726_v38 = vcombine.low %v5723_v54, %v5733_v27  ;;  %v6583_v12 = vor.u32 %v6582_v1, %v6578_v19  ;;  %v9791_v23 = vcombine.low %v14508_v63, %v14512_v2  ;;  %v6551_v2 = vld [vmem:[#allocation2 + $0x2c] sm:$0x1] }
 0x393   : > { %8475 = vmatmul.mubr.bf16.gmra.mrb[184].mxu1 %v9709_v59  ;;  %v6574_v53 = vrot.slane %v6573_v42, 4  ;;  %v14531_v59 = vld [vmem:[#allocation2 + $0x28] sm:$0xf]  ;;  %v5971_v48 = vsel %vm11813_vm6, %v14005_v36, %v13952_v61  ;;  %v6409_v5 = vsel %vm11879_vm13, %v9663_v55, %v6408_v17  ;;  %v6410_v35 = vrot.slane %v6408_v17, 4 }
 0x394   : > { %8482 = vmatprep.mubr.bf16.mxu1 %v9726_v38  ;;  %v6584_v58 = vrot.slane %v6583_v12, 4  ;;  %v5981_v63 = vsel %vm11813_vm6, %v14080_v3, %v5980_v57  ;;  %v6591_v60 = vshrl.u32 %v14529_v8, 16  ;;  %v6594_v61 = vshll.u32 %v14529_v8, 16 }
 0x395   : > { %v6579_v1 = vsel %vm11813_vm6, %v6574_v53, %v6578_v19  ;;  %v6600_v36 = vshll.u32 %v14531_v59, 16  ;;  %v6412_v12 = vsel %vm11879_vm13, %v6410_v35, %v6411_v32  ;;  %v9759_v55 = vcombine.low %v5971_v48, %v5981_v63  ;;  %v5943_v19 = vld [vmem:[#allocation2 + $0x20] sm:$0x1]  ;;  %v11382_v32 = vld [vmem:[#allocation2 + $0x1c] sm:$0xf] }
 0x396   : > { %v6589_v38 = vsel %vm11813_vm6, %v6584_v58, %v6588_v29  ;;  %v6604_v25 = vshrl.u32 %v14531_v59, 16  ;;  %v9775_v13 = vcombine.low %v6409_v5, %v6412_v12  ;;  %v6593_v3 = vrot.slane %v6591_v60, 4 }
 0x397   : > { %8644 = vmatmul.mubr.bf16.gmra.mrb[220].mxu0 %v9742_v37  ;;  %v9807_v14 = vcombine.low %v6579_v1, %v6589_v38  ;;  %v6596_v4 = vrot.slane %v6594_v61, 5  ;;  %v6602_v24 = vrot.slane %v6600_v36, 5  ;;  %v6610_v37 = vshll.u32 %v6551_v2, 16 }
 0x398   : > { %v6606_v54 = vrot.slane %v6604_v25, 4  ;;  %v9680_v42 = vrot.slane %v6951_v21, 9  ;;  %v7023_v29 = vrot.slane %v14531_v59, 5  ;;  %v7026_v49 = vrot.slane %v6551_v2, 5 }
 0x399   : > { %8845 = vmatprep.mubr.bf16.mxu0 %v9807_v14  ;;  %v6597_v27 = vor.u32 %v6596_v4, %v6593_v3  ;;  %v9664_v53 = vrot.slane %v6343_v39, 9  ;;  %v6612_v57 = vrot.slane %v6610_v37, 5  ;;  %v6415_v48 = vrot.slane %v11382_v32, 5  ;;  %v6552_v14 = vld [vmem:[#allocation2 + $0x38] sm:$0x1] }
 0x39a   : > { %v6607_v17 = vor.u32 %v6606_v54, %v6602_v24  ;;  %v6418_v1 = vrot.slane %v5943_v19, 5  ;;  %v7025_v5 = vrot.slane %v7023_v29, 4  ;;  %v9792_v35 = vcombine.low %v14529_v8, %v14531_v59  ;;  %v14573_v59 = vld [vmem:[#allocation2 + $0x30] sm:$0xf] }
 0x39b   : > { %8483 = vmatmul.mubr.bf16.gmra.mrb[188].mxu1 %v9710_v22  ;;  %v6598_v58 = vrot.slane %v6597_v27, 4  ;;  %v14557_v22 = vsel %vm11879_vm13, %v9680_v42, %v7023_v29  ;;  %v6416_v63 = vsel %vm11879_vm13, %v9664_v53, %v6415_v48  ;;  %v6417_v2 = vrot.slane %v6415_v48, 4  ;;  %v6344_v29 = vld [vmem:[#allocation2 + $0x24] sm:$0xe] }
 0x39c   : > { %8684 = vmatprep.mubr.bf16.mxu1 %v9775_v13  ;;  %v6608_v21 = vrot.slane %v6607_v17, 4  ;;  %v5989_v60 = vor.u32 %v14026_v31, %v14009_v43  ;;  %v14569_v36 = vsel %vm11879_vm13, %v7025_v5, %v7026_v49  ;;  %v5992_v38 = vshll.u32 %v11382_v32, 16  ;;  %v11383_v32 = vld [vmem:[#allocation8 + $0x200] sm:$0xff]  }
 0x39d   : > { %v6603_v61 = vsel %vm11813_vm6, %v6598_v58, %v6602_v24  ;;  %v16222_v12 = vshrl.u32 %v13915_v7, 16  ;;  %v6419_v31 = vsel %vm11879_vm13, %v6417_v2, %v6418_v1  ;;  %v6002_v7 = vshll.u32 %v5943_v19, 16  ;;  %v11317_v24 = vld [vmem:[#allocation8 + $0x208] sm:$0xff]   ;;  %v5944_v19 = vld [vmem:[#allocation2 + $0x2c] sm:$0x1] }
 0x39e   : > { %v6613_v25 = vsel %vm11813_vm6, %v6608_v21, %v6612_v57  ;;  %v5990_v39 = vrot.slane %v5989_v60, 4  ;;  %v9776_v3 = vcombine.low %v6416_v63, %v6419_v31  ;;  %v5994_v4 = vrot.slane %v5992_v38, 5  ;;  %v11384_v2 = vld [vmem:[#allocation2 + $0x28] sm:$0xf] }
 0x39f   : > { %8846 = vmatmul.mubr.bf16.vlgmr.msra.gmra.mrb[224].mxu0 %v9791_v23  ;;  %v5998_v8 = vrot.slane %v16222_v12, 4  ;;  %v14575_v23 = vld [vmem:[#allocation2 + $0x34] sm:$0xf]  ;;  %v9808_v13 = vcombine.low %v6603_v61, %v6613_v25  ;;  %v6615_v54 = vshrl.u32 %v14573_v59, 16  ;;  %v6618_v37 = vshll.u32 %v14573_v59, 16  ;;  %v11320_v61 = vld [vmem:[#allocation8 + $0x210] sm:$0xff]  }
 0x3a0   : > { %v6624_v42 = vshll.u32 %v14575_v23, 16  ;;  %v6628_v27 = vshrl.u32 %v14575_v23, 16  ;;  %v5995_v49 = vsel %vm11813_vm6, %v5990_v39, %v5994_v4  ;;  %v6004_v17 = vrot.slane %v6002_v7, 5 }
 0x3a1   : > { %8853 = vmatprep.mubr.bf16.mxu0 %v9808_v13  ;;  %v5999_v53 = vor.u32 %v5998_v8, %v5994_v4  ;;  %v6634_v57 = vshll.u32 %v6552_v14, 16  ;;  %v6620_v48 = vrot.slane %v6618_v37, 5  ;;  %v9665_v63 = vrot.slane %v6344_v29, 9  ;;  %v14603_v29 = vld [vmem:[#allocation2 + $0x40] sm:$0xf] }
 0x3a2   : > { %v6626_v1 = vrot.slane %v6624_v42, 5  ;;  %v6630_v58 = vrot.slane %v6628_v27, 4  ;;  %v6422_v60 = vrot.slane %v11384_v2, 5  ;;  %v6425_v8 = vrot.slane %v5944_v19, 5 }
 0x3a3   : > { %8685 = vmatmul.mubr.bf16.vlgmr.msra.gmra.mrb[192].mxu1 %v9759_v55  ;;  %v6617_v55 = vrot.slane %v6615_v54, 4  ;;  %v6000_v5 = vrot.slane %v5999_v53, 4  ;;  %v6636_v21 = vrot.slane %v6634_v57, 5  ;;  %v9793_v25 = vcombine.low %v14573_v59, %v14575_v23  ;;  %v14597_v54 = vld [vmem:[#allocation2 + $0x3c] sm:$0xf]  ;;  %v11323_v53 = vld [vmem:[#allocation8 + $0x218] sm:$0xff]  }
 0x3a4   : > { %8692 = vmatprep.mubr.bf16.mxu1 %v9776_v3  ;;  %10976 = vmatpush3.bf16.msra.mxu1 %v11383_v32  ;;  %v6631_v12 = vor.u32 %v6630_v58, %v6626_v1  ;;  %v6423_v39 = vsel %vm11879_vm13, %v9665_v63, %v6422_v60  ;;  %v6424_v14 = vrot.slane %v6422_v60, 4  ;;  %v6013_v13 = vor.u32 %v14142_v51, %v14107_v62  ;;  %v6953_v57 = vld [vmem:[#allocation2 + $0x3c] sm:$0xe] }
 0x3a5   : > { %10977 = vmatprep.subr.bf16.mxu1 %v11317_v24  ;;  %v6621_v38 = vor.u32 %v6620_v48, %v6617_v55  ;;  %v6005_v31 = vsel %vm11813_vm6, %v6000_v5, %v6004_v17  ;;  %v16223_v37 = vshrl.u32 %v14011_v11, 16  ;;  %v6026_v27 = vshll.u32 %v5944_v19, 16  ;;  %v6553_v17 = vld [vmem:[#allocation2 + $0x44] sm:$0x1] }
 0x3a6   : > { %v9760_v3 = vcombine.low %v5995_v49, %v6005_v31  ;;  %v6632_v7 = vrot.slane %v6631_v12, 4  ;;  %v6426_v59 = vsel %vm11879_vm13, %v6424_v14, %v6425_v8  ;;  %v6014_v23 = vrot.slane %v6013_v13, 4  ;;  %v11327_v12 = vld [vmem:[#allocation8 + $0x220] sm:$0xff]  }
 0x3a7   : > { %8854 = vmatmul.mubr.bf16.gmra.mrb[228].mxu0 %v9792_v35  ;;  %v6622_v4 = vrot.slane %v6621_v38, 4  ;;  %v6016_v35 = vshll.u32 %v11384_v2, 16  ;;  %v6022_v42 = vrot.slane %v16223_v37, 4  ;;  %v6028_v55 = vrot.slane %v6026_v27, 5  ;;  %v5945_v13 = vld [vmem:[#allocation2 + $0x38] sm:$0x1] }
 0x3a8   : > { %10978 = vmatpush3.bf16.msra.mxu1 %v11317_v24  ;;  %v6637_v51 = vsel %vm11813_vm6, %v6632_v7, %v6636_v21  ;;  %v9777_v24 = vcombine.low %v6423_v39, %v6426_v59  ;;  %v6639_v11 = vshrl.u32 %v14597_v54, 16  ;;  %v6642_v19 = vshll.u32 %v14597_v54, 16  ;;  %v6345_v21 = vld [vmem:[#allocation2 + $0x30] sm:$0xe]  ;;  %v11385_v27 = vld [vmem:[#allocation2 + $0x34] sm:$0xf] }
 0x3a9   : > { %10979 = vmatprep.subr.bf16.mxu1 %v11320_v61  ;;  %v6627_v62 = vsel %vm11813_vm6, %v6622_v4, %v6626_v1  ;;  %v6018_v49 = vrot.slane %v6016_v35, 5  ;;  %v6648_v1 = vshll.u32 %v14603_v29, 16  ;;  %v6652_v5 = vshrl.u32 %v14603_v29, 16 }
 0x3aa   : > { %v9809_v32 = vcombine.low %v6627_v62, %v6637_v51  ;;  %v6641_v63 = vrot.slane %v6639_v11, 4  ;;  %v6644_v2 = vrot.slane %v6642_v19, 5  ;;  %v6658_v60 = vshll.u32 %v6553_v17, 16 }
 0x3ab   : > { %8693 = vmatmul.mubr.bf16.gmra.mrb[196].mxu1 %v9760_v3  ;;  %v6019_v48 = vsel %vm11813_vm6, %v6014_v23, %v6018_v49  ;;  %v6023_v58 = vor.u32 %v6022_v42, %v6018_v49  ;;  %v9682_v38 = vrot.slane %v6953_v57, 9  ;;  %v6650_v31 = vrot.slane %v6648_v1, 5 }
 0x3ac   : > { %8700 = vmatprep.mubr.bf16.mxu1 %v9777_v24  ;;  %10980 = vmatpush3.bf16.msra.mxu1 %v11320_v61  ;;  %v6654_v39 = vrot.slane %v6652_v5, 4  ;;  %v7037_v14 = vrot.slane %v14603_v29, 5  ;;  %v6645_v3 = vor.u32 %v6644_v2, %v6641_v63  ;;  %v6660_v4 = vrot.slane %v6658_v60, 5  ;;  %v11330_v24 = vld [vmem:[#allocation8 + $0x228] sm:$0xff]   ;;  %v6554_v5 = vld [vmem:[#allocation2 + $0x50] sm:$0x1] }
 0x3ad   : > { %8861 = vmatprep.mubr.bf16.mxu0 %v9809_v32  ;;  %10981 = vmatprep.subr.bf16.mxu1 %v11323_v53  ;;  %v6024_v8 = vrot.slane %v6023_v58, 4  ;;  %v7040_v7 = vrot.slane %v6553_v17, 5  ;;  %v9666_v35 = vrot.slane %v6345_v21, 9  ;;  %v6429_v62 = vrot.slane %v11385_v27, 5  ;;  %v14638_v58 = vld [vmem:[#allocation2 + $0x4c] sm:$0xf] }
 0x3ae   : > { %v6655_v59 = vor.u32 %v6654_v39, %v6650_v31  ;;  %v14620_v23 = vsel %vm11879_vm13, %v9682_v38, %v7037_v14  ;;  %v7039_v37 = vrot.slane %v7037_v14, 4  ;;  %v6646_v42 = vrot.slane %v6645_v3, 4  ;;  %v6346_v14 = vld [vmem:[#allocation2 + $0x3c] sm:$0xe]  ;;  %v11333_v3 = vld [vmem:[#allocation8 + $0x230] sm:$0xff]  }
 0x3af   : > { %8862 = vmatmul.mubr.bf16.gmra.mrb[232].mxu0 %v9793_v25  ;;  %v6029_v61 = vsel %vm11813_vm6, %v6024_v8, %v6028_v55  ;;  %16224 = vst [vmem:[#allocation64_spill] sm:$0xff] %v14620_v23  ;;  %v6432_v51 = vrot.slane %v5945_v13, 5  ;;  %v9794_v57 = vcombine.low %v14597_v54, %v14603_v29  ;;  %v6037_v32 = vor.u32 %v14209_v16, %v14149_v15  ;;  %v14630_v55 = vld [vmem:[#allocation2 + $0x48] sm:$0xf] }
 0x3b0   : > { %10982 = vmatpush3.bf16.msra.mxu1 %v11323_v53  ;;  %v9761_v25 = vcombine.low %v6019_v48, %v6029_v61  ;;  %v6656_v49 = vrot.slane %v6655_v59, 4  ;;  %v14624_v17 = vsel %vm11879_vm13, %v7039_v37, %v7040_v7  ;;  %v6651_v53 = vsel %vm11813_vm6, %v6646_v42, %v6650_v31 }
 0x3b1   : > { %10983 = vmatprep.subr.bf16.mxu1 %v11327_v12  ;;  %16225 = vst [vmem:[#allocation70_spill] sm:$0xff] %v14624_v17  ;;  %v6430_v19 = vsel %vm11879_vm13, %v9666_v35, %v6429_v62  ;;  %v6431_v48 = vrot.slane %v6429_v62, 4  ;;  %v6038_v29 = vrot.slane %v6037_v32, 4  ;;  %v6040_v15 = vshll.u32 %v11385_v27, 16  ;;  %v5946_v35 = vld [vmem:[#allocation2 + $0x44] sm:$0x1] }
 0x3b2   : > { %v6661_v54 = vsel %vm11813_vm6, %v6656_v49, %v6660_v4  ;;  %v16226_v16 = vshrl.u32 %v14058_v40, 16  ;;  %v6050_v2 = vshll.u32 %v5945_v13, 16  ;;  %v6663_v60 = vshrl.u32 %v14630_v55, 16  ;;  %v11386_v62 = vld [vmem:[#allocation2 + $0x40] sm:$0xf] }
 0x3b3   : > { %8701 = vmatmul.mubr.bf16.gmra.mrb[200].mxu1 %v9761_v25  ;;  %v9810_v21 = vcombine.low %v6651_v53, %v6661_v54  ;;  %v6433_v63 = vsel %vm11879_vm13, %v6431_v48, %v6432_v51  ;;  %v6042_v8 = vrot.slane %v6040_v15, 5  ;;  %v6666_v31 = vshll.u32 %v14630_v55, 16 }
 0x3b4   : > { %v6046_v1 = vrot.slane %v16226_v16, 4  ;;  %10984 = vmatpush3.bf16.msra.mxu1 %v11327_v12  ;;  %v9778_v38 = vcombine.low %v6430_v19, %v6433_v63  ;;  %v6672_v39 = vshll.u32 %v14638_v58, 16  ;;  %v6052_v40 = vrot.slane %v6050_v2, 5  ;;  %v14658_v16 = vld [vmem:[#allocation2 + $0x54] sm:$0xf] }
 0x3b5   : > { %10985 = vmatprep.subr.bf16.mxu1 %v11330_v24  ;;  %8869 = vmatprep.mubr.bf16.mxu0 %v9810_v21  ;;  %v6665_v4 = vrot.slane %v6663_v60, 4  ;;  %v6676_v12 = vshrl.u32 %v14638_v58, 16  ;;  %v6682_v7 = vshll.u32 %v6554_v5, 16  ;;  %v6043_v13 = vsel %vm11813_vm6, %v6038_v29, %v6042_v8 }
 0x3b6   : > { %8708 = vmatprep.mubr.bf16.mxu1 %v9778_v38  ;;  %v6047_v61 = vor.u32 %v6046_v1, %v6042_v8  ;;  %v6668_v59 = vrot.slane %v6666_v31, 5  ;;  %v6674_v37 = vrot.slane %v6672_v39, 5  ;;  %v9667_v27 = vrot.slane %v6346_v14, 9  ;;  %v6555_v39 = vld [vmem:[#allocation2 + $0x5c] sm:$0x1] }
 0x3b7   : > { %8870 = vmatmul.mubr.bf16.gmra.mrb[236].mxu0 %v9794_v57  ;;  %v6678_v25 = vrot.slane %v6676_v12, 4  ;;  %v6684_v42 = vrot.slane %v6682_v7, 5  ;;  %v6436_v51 = vrot.slane %v11386_v62, 5  ;;  %v6439_v53 = vrot.slane %v5946_v35, 5  ;;  %v11335_v57 = vld [vmem:[#allocation8 + $0x238] sm:$0xff]  }
 0x3b8   : > { %10986 = vmatpush3.bf16.msra.mxu1 %v11330_v24  ;;  %v6048_v49 = vrot.slane %v6047_v61, 4  ;;  %v6669_v32 = vor.u32 %v6668_v59, %v6665_v4  ;;  %v9795_v19 = vcombine.low %v14630_v55, %v14638_v58  ;;  %v6061_v15 = vor.u32 %v14217_v20, %v14212_v46  ;;  %v14664_v58 = vld [vmem:[#allocation2 + $0x58] sm:$0xf]  ;;  %v6955_v12 = vld [vmem:[#allocation2 + $0x54] sm:$0xe] }
 0x3b9   : > { %10987 = vmatprep.subr.bf16.mxu1 %v11333_v3  ;;  %v6679_v48 = vor.u32 %v6678_v25, %v6674_v37  ;;  %v6437_v54 = vsel %vm11879_vm13, %v9667_v27, %v6436_v51  ;;  %v6438_v29 = vrot.slane %v6436_v51, 4  ;;  %v6064_v5 = vshll.u32 %v11386_v62, 16  ;;  %v6347_v61 = vld [vmem:[#allocation2 + $0x48] sm:$0xe] }
 0x3ba   : > { %v6053_v24 = vsel %vm11813_vm6, %v6048_v49, %v6052_v40  ;;  %v6670_v1 = vrot.slane %v6669_v32, 4  ;;  %v16227_v21 = vshrl.u32 %v14122_v34, 16  ;;  %v6062_v38 = vrot.slane %v6061_v15, 4 }
 0x3bb   : > { %v9762_v63 = vcombine.low %v6043_v13, %v6053_v24  ;;  %v6680_v2 = vrot.slane %v6679_v48, 4  ;;  %v6440_v60 = vsel %vm11879_vm13, %v6438_v29, %v6439_v53  ;;  %v6066_v8 = vrot.slane %v6064_v5, 5 }
 0x3bc   : > { %v6070_v55 = vrot.slane %v16227_v21, 4  ;;  %10988 = vmatpush3.bf16.msra.mxu1 %v11333_v3  ;;  %v6675_v46 = vsel %vm11813_vm6, %v6670_v1, %v6674_v37  ;;  %v9779_v20 = vcombine.low %v6437_v54, %v6440_v60  ;;  %v6074_v31 = vshll.u32 %v5946_v35, 16  ;;  %v5947_v54 = vld [vmem:[#allocation2 + $0x50] sm:$0x1] }
 0x3bd   : > { %10989 = vmatprep.subr.bf16.mxu1 %v11335_v57  ;;  %8709 = vmatmul.mubr.bf16.gmra.mrb[204].mxu1 %v9762_v63  ;;  %v6685_v34 = vsel %vm11813_vm6, %v6680_v2, %v6684_v42  ;;  %v6687_v14 = vshrl.u32 %v14658_v16, 16  ;;  %v6690_v40 = vshll.u32 %v14658_v16, 16  ;;  %v6696_v4 = vshll.u32 %v14664_v58, 16  ;;  %v11387_v63 = vld [vmem:[#allocation2 + $0x4c] sm:$0xf] }
 0x3be   : > { %v9811_v3 = vcombine.low %v6675_v46, %v6685_v34  ;;  %8716 = vmatprep.mubr.bf16.mxu1 %v9779_v20  ;;  %v6067_v7 = vsel %vm11813_vm6, %v6062_v38, %v6066_v8  ;;  %v6071_v13 = vor.u32 %v6070_v55, %v6066_v8  ;;  %v6076_v35 = vrot.slane %v6074_v31, 5  ;;  %v14693_v20 = vld [vmem:[#allocation2 + $0x60] sm:$0xf] }
 0x3bf   : > { %v6689_v59 = vrot.slane %v6687_v14, 4  ;;  %v6692_v37 = vrot.slane %v6690_v40, 5  ;;  %v6698_v25 = vrot.slane %v6696_v4, 5  ;;  %v6700_v42 = vshrl.u32 %v14664_v58, 16  ;;  %v14701_v14 = vld [vmem:[#allocation2 + $0x64] sm:$0xf] }
 0x3c0   : > { %10990 = vmatpush3.bf16.msra.mxu1 %v11335_v57  ;;  %8877 = vmatprep.mubr.bf16.mxu0 %v9811_v3  ;;  %v6072_v27 = vrot.slane %v6071_v13, 4  ;;  %v6706_v62 = vshll.u32 %v6555_v39, 16  ;;  %v9684_v51 = vrot.slane %v6955_v12, 9  ;;  %v7051_v49 = vrot.slane %v14664_v58, 5  ;;  %v6348_v13 = vld [vmem:[#allocation2 + $0x54] sm:$0xe] }
 0x3c1   : > { %8878 = vmatmul.mubr.bf16.gmra.mrb[240].mxu0 %v9795_v19  ;;  %v6693_v32 = vor.u32 %v6692_v37, %v6689_v59  ;;  %v6702_v53 = vrot.slane %v6700_v42, 4  ;;  %v7054_v48 = vrot.slane %v6555_v39, 5  ;;  %v9668_v29 = vrot.slane %v6347_v61, 9 }
 0x3c2   : > { %v6077_v15 = vsel %vm11813_vm6, %v6072_v27, %v6076_v35  ;;  %v6708_v24 = vrot.slane %v6706_v62, 5  ;;  %v14683_v1 = vsel %vm11879_vm13, %v9684_v51, %v7051_v49  ;;  %v7053_v57 = vrot.slane %v7051_v49, 4 }
 0x3c3   : > { %16228 = vst [vmem:[#allocation72_spill] sm:$0xff] %v14683_v1  ;;  %v9763_v5 = vcombine.low %v6067_v7, %v6077_v15  ;;  %v6694_v21 = vrot.slane %v6693_v32, 4  ;;  %v6703_v55 = vor.u32 %v6702_v53, %v6698_v25  ;;  %v6443_v2 = vrot.slane %v11387_v63, 5  ;;  %v5948_v32 = vld [vmem:[#allocation2 + $0x5c] sm:$0x1] }
 0x3c4   : > { %v14687_v19 = vsel %vm11879_vm13, %v7053_v57, %v7054_v48  ;;  %v6446_v60 = vrot.slane %v5947_v54, 5  ;;  %v9796_v38 = vcombine.low %v14658_v16, %v14664_v58  ;;  %v6085_v46 = vor.u32 %v14244_v26, %v14220_v30 }
 0x3c5   : > { %16229 = vst [vmem:[#allocation73_spill] sm:$0xff] %v14687_v19  ;;  %8717 = vmatmul.mubr.bf16.gmra.mrb[208].mxu1 %v9763_v5  ;;  %v6699_v8 = vsel %vm11813_vm6, %v6694_v21, %v6698_v25  ;;  %v6704_v31 = vrot.slane %v6703_v55, 4  ;;  %v6444_v34 = vsel %vm11879_vm13, %v9668_v29, %v6443_v2  ;;  %v6445_v40 = vrot.slane %v6443_v2, 4  ;;  %v6556_v25 = vld [vmem:[#allocation2 + $0x68] sm:$0x1] }
 0x3c6   : > { %v6086_v16 = vrot.slane %v6085_v46, 4  ;;  %v6088_v58 = vshll.u32 %v11387_v63, 16  ;;  %v16230_v30 = vshrl.u32 %v14181_v50, 16  ;;  %v6098_v12 = vshll.u32 %v5947_v54, 16  ;;  %v11388_v55 = vld [vmem:[#allocation2 + $0x58] sm:$0xf] }
 0x3c7   : > { %v6709_v4 = vsel %vm11813_vm6, %v6704_v31, %v6708_v24  ;;  %v6711_v3 = vshrl.u32 %v14693_v20, 16  ;;  %v6714_v7 = vshll.u32 %v14693_v20, 16  ;;  %v14709_v35 = vpop.f32.mrb[160].mxu0  ;;  %v6447_v59 = vsel %vm11879_vm13, %v6445_v40, %v6446_v60 }
 0x3c8   : > { %v6094_v26 = vrot.slane %v16230_v30, 4  ;;  %v9812_v61 = vcombine.low %v6699_v8, %v6709_v4  ;;  %v6090_v37 = vrot.slane %v6088_v58, 5  ;;  %v6720_v50 = vshll.u32 %v14701_v14, 16  ;;  %v14714_v42 = vpop.f32.mrb[161].mxu0  ;;  %v14731_v4 = vld [vmem:[#allocation2 + $0x6c] sm:$0xf] }
 0x3c9   : > { %v9780_v27 = vcombine.low %v6444_v34, %v6447_v59  ;;  %v6100_v62 = vrot.slane %v6098_v12, 5  ;;  %v6713_v51 = vrot.slane %v6711_v3, 4  ;;  %v6716_v49 = vrot.slane %v6714_v7, 5  ;;  %v14716_v53 = vpop.f32.mrb[162].mxu0  ;;  %v14733_v12 = vld [vmem:[#allocation2 + $0x70] sm:$0xf] }
 0x3ca   : > { %8885 = vmatprep.mubr.bf16.mxu0 %v9812_v61  ;;  %v6091_v48 = vsel %vm11813_vm6, %v6086_v16, %v6090_v37  ;;  %v6095_v54 = vor.u32 %v6094_v26, %v6090_v37  ;;  %v6722_v29 = vrot.slane %v6720_v50, 5  ;;  %v6724_v15 = vshrl.u32 %v14701_v14, 16  ;;  %v14721_v24 = vpop.f32.mrb[163].mxu0 }
 0x3cb   : > { %8724 = vmatprep.mubr.bf16.mxu1 %v9780_v27  ;;  %8886 = vmatmul.mubr.bf16.gmra.mrb[244].mxu0 %v9796_v38  ;;  %v6717_v57 = vor.u32 %v6716_v49, %v6713_v51  ;;  %v6730_v5 = vshll.u32 %v6556_v25, 16  ;;  %v9669_v21 = vrot.slane %v6348_v13, 9  ;;  %v6450_v63 = vrot.slane %v11388_v55, 5 }
 0x3cc   : > { %v6096_v2 = vrot.slane %v6095_v54, 4  ;;  %v6726_v60 = vrot.slane %v6724_v15, 4  ;;  %v6453_v46 = vrot.slane %v5948_v32, 5  ;;  %v9797_v8 = vcombine.low %v14693_v20, %v14701_v14  ;;  %v6957_v54 = vld [vmem:[#allocation2 + $0x6c] sm:$0xe] }
 0x3cd   : > { %v6718_v31 = vrot.slane %v6717_v57, 4  ;;  %v6732_v34 = vrot.slane %v6730_v5, 5  ;;  %v6451_v40 = vsel %vm11879_vm13, %v9669_v21, %v6450_v63  ;;  %v6452_v16 = vrot.slane %v6450_v63, 4  ;;  %v6349_v5 = vld [vmem:[#allocation2 + $0x60] sm:$0xe] }
 0x3ce   : > { %v6101_v38 = vsel %vm11813_vm6, %v6096_v2, %v6100_v62  ;;  %v6727_v58 = vor.u32 %v6726_v60, %v6722_v29  ;;  %v6109_v30 = vor.u32 %v14276_v33, %v14259_v9  ;;  %v6112_v26 = vshll.u32 %v11388_v55, 16  ;;  %v6557_v33 = vld [vmem:[#allocation2 + $0x74] sm:$0x1] }
 0x3cf   : > { %v9764_v3 = vcombine.low %v6091_v48, %v6101_v38  ;;  %v6723_v20 = vsel %vm11813_vm6, %v6718_v31, %v6722_v29  ;;  %v6454_v14 = vsel %vm11879_vm13, %v6452_v16, %v6453_v46  ;;  %v16231_v7 = vshrl.u32 %v14227_v10, 16 }
 0x3d0   : > { %v6728_v61 = vrot.slane %v6727_v58, 4  ;;  %v9781_v59 = vcombine.low %v6451_v40, %v6454_v14  ;;  %v6110_v37 = vrot.slane %v6109_v30, 4  ;;  %v6114_v25 = vrot.slane %v6112_v26, 5  ;;  %v5949_v40 = vld [vmem:[#allocation2 + $0x68] sm:$0x1] }
 0x3d1   : > { %v6118_v13 = vrot.slane %v16231_v7, 4  ;;  %8725 = vmatmul.mubr.bf16.gmra.mrb[212].mxu1 %v9764_v3  ;;  %v6122_v9 = vshll.u32 %v5948_v32, 16  ;;  %v6735_v50 = vshrl.u32 %v14731_v4, 16  ;;  %v6738_v27 = vshll.u32 %v14731_v4, 16 }
 0x3d2   : > { %v6744_v62 = vshll.u32 %v14733_v12, 16  ;;  %v6733_v51 = vsel %vm11813_vm6, %v6728_v61, %v6732_v34  ;;  %8732 = vmatprep.mubr.bf16.mxu1 %v9781_v59  ;;  %v6115_v10 = vsel %vm11813_vm6, %v6110_v37, %v6114_v25  ;;  %v6748_v48 = vshrl.u32 %v14733_v12, 16 }
 0x3d3   : > { %v6119_v49 = vor.u32 %v6118_v13, %v6114_v25  ;;  %v9813_v29 = vcombine.low %v6723_v20, %v6733_v51  ;;  %v6124_v32 = vrot.slane %v6122_v9, 5  ;;  %v6737_v15 = vrot.slane %v6735_v50, 4  ;;  %v11389_v13 = vld [vmem:[#allocation2 + $0x64] sm:$0xf]  ;;  %v14766_v50 = vld [vmem:[#allocation2 + $0x78] sm:$0xf] }
 0x3d4   : > { %v6740_v57 = vrot.slane %v6738_v27, 5  ;;  %v6746_v55 = vrot.slane %v6744_v62, 5  ;;  %v6750_v63 = vrot.slane %v6748_v48, 4  ;;  %v6754_v2 = vshll.u32 %v6557_v33, 16  ;;  %v14774_v51 = vld [vmem:[#allocation2 + $0x7c] sm:$0xf] }
 0x3d5   : > { %v6120_v21 = vrot.slane %v6119_v49, 4  ;;  %8893 = vmatprep.mubr.bf16.mxu0 %v9813_v29  ;;  %v9686_v46 = vrot.slane %v6957_v54, 9  ;;  %v7065_v31 = vrot.slane %v14733_v12, 5  ;;  %v7068_v34 = vrot.slane %v6557_v33, 5  ;;  %v6558_v54 = vld [vmem:[#allocation2 + $0x80] sm:$0x1] }
 0x3d6   : > { %v6741_v60 = vor.u32 %v6740_v57, %v6737_v15  ;;  %8894 = vmatmul.mubr.bf16.gmra.mrb[248].mxu0 %v9797_v8  ;;  %v6751_v38 = vor.u32 %v6750_v63, %v6746_v55  ;;  %v6756_v58 = vrot.slane %v6754_v2, 5  ;;  %v9670_v30 = vrot.slane %v6349_v5, 9  ;;  %v6350_v29 = vld [vmem:[#allocation2 + $0x6c] sm:$0xe] }
 0x3d7   : > { %v6125_v16 = vsel %vm11813_vm6, %v6120_v21, %v6124_v32  ;;  %v14754_v20 = vsel %vm11879_vm13, %v9686_v46, %v7065_v31  ;;  %v7067_v14 = vrot.slane %v7065_v31, 4  ;;  %v6457_v61 = vrot.slane %v11389_v13, 5  ;;  %v5950_v31 = vld [vmem:[#allocation2 + $0x74] sm:$0x1] }
 0x3d8   : > { %v9765_v26 = vcombine.low %v6115_v10, %v6125_v16  ;;  %v6742_v3 = vrot.slane %v6741_v60, 4  ;;  %16232 = vst [vmem:[#allocation45_spill] sm:$0xff] %v14754_v20  ;;  %v6752_v7 = vrot.slane %v6751_v38, 4  ;;  %v6460_v59 = vrot.slane %v5949_v40, 5 }
 0x3d9   : > { %v9798_v8 = vcombine.low %v14731_v4, %v14733_v12  ;;  %v14762_v25 = vsel %vm11879_vm13, %v7067_v14, %v7068_v34  ;;  %v6133_v9 = vor.u32 %v14305_v52, %v14287_v41  ;;  %v6136_v33 = vshll.u32 %v11389_v13, 16 }
 0x3da   : > { %8733 = vmatmul.mubr.bf16.gmra.mrb[216].mxu1 %v9765_v26  ;;  %v6747_v37 = vsel %vm11813_vm6, %v6742_v3, %v6746_v55  ;;  %16233 = vst [vmem:[#allocation77_spill] sm:$0xff] %v14762_v25  ;;  %v6757_v27 = vsel %vm11813_vm6, %v6752_v7, %v6756_v58  ;;  %v6458_v12 = vsel %vm11879_vm13, %v9670_v30, %v6457_v61  ;;  %v6459_v62 = vrot.slane %v6457_v61, 4 }
 0x3db   : > { %v9814_v10 = vcombine.low %v6747_v37, %v6757_v27  ;;  %v6134_v49 = vrot.slane %v6133_v9, 4  ;;  %v6138_v48 = vrot.slane %v6136_v33, 5  ;;  %v16234_v41 = vshrl.u32 %v14253_v28, 16  ;;  %v11390_v33 = vld [vmem:[#allocation2 + $0x70] sm:$0xf] }
 0x3dc   : > { %v6461_v15 = vsel %vm11879_vm13, %v6459_v62, %v6460_v59  ;;  %v6146_v57 = vshll.u32 %v5949_v40, 16  ;;  %v6759_v5 = vshrl.u32 %v14766_v50, 16  ;;  %v6762_v21 = vshll.u32 %v14766_v50, 16 }
 0x3dd   : > { %v6142_v52 = vrot.slane %v16234_v41, 4  ;;  %v14778_v32 = vpop.f32.mrb[132].mxu1  ;;  %8901 = vmatprep.mubr.bf16.mxu0 %v9814_v10  ;;  %v9782_v2 = vcombine.low %v6458_v12, %v6461_v15  ;;  %v6139_v28 = vsel %vm11813_vm6, %v6134_v49, %v6138_v48  ;;  %v6768_v46 = vshll.u32 %v14774_v51, 16 }
 0x3de   : > { %v14784_v55 = vpop.f32.mrb[164].mxu0  ;;  %v14786_v63 = vpop.f32.mrb[133].mxu1  ;;  %8902 = vmatmul.mubr.bf16.gmra.mrb[252].mxu0 %v9798_v8  ;;  %v6148_v16 = vrot.slane %v6146_v57, 5  ;;  %v6761_v38 = vrot.slane %v6759_v5, 4  ;;  %v6764_v58 = vrot.slane %v6762_v21, 5  ;;  %v6772_v30 = vshrl.u32 %v14774_v51, 16 }
 0x3df   : > { %v6143_v60 = vor.u32 %v6142_v52, %v6138_v48  ;;  %v14791_v34 = vpop.f32.mrb[165].mxu0  ;;  %v14793_v40 = vpop.f32.mrb[134].mxu1  ;;  %8740 = vmatprep.mubr.bf16.mxu1 %v9782_v2  ;;  %v6770_v7 = vrot.slane %v6768_v46, 5  ;;  %v6778_v13 = vshll.u32 %v6558_v54, 16  ;;  %v9799_v61 = vcombine.low %v14766_v50, %v14774_v51  ;;  %v14808_v48 = vld [vmem:[#allocation2 + $0x84] sm:$0xf] }
 0x3e0   : > { %v14796_v26 = vpop.f32.mrb[166].mxu0  ;;  %v14798_v3 = vpop.f32.mrb[135].mxu1  ;;  %v6765_v37 = vor.u32 %v6764_v58, %v6761_v38  ;;  %v6774_v8 = vrot.slane %v6772_v30, 4  ;;  %v9671_v9 = vrot.slane %v6350_v29, 9  ;;  %v6464_v27 = vrot.slane %v11390_v33, 5 }
 0x3e1   : > { %v6144_v14 = vrot.slane %v6143_v60, 4  ;;  %v14802_v59 = vpop.f32.mrb[167].mxu0  ;;  %v6780_v62 = vrot.slane %v6778_v13, 5  ;;  %v6467_v10 = vrot.slane %v5950_v31, 5  ;;  %v6157_v49 = vor.u32 %v14336_v0, %v14333_v56  ;;  %v14812_v54 = vld [vmem:[#allocation2 + $0x88] sm:$0xf] }
 0x3e2   : > { %v6766_v52 = vrot.slane %v6765_v37, 4  ;;  %v6775_v50 = vor.u32 %v6774_v8, %v6770_v7  ;;  %v6465_v51 = vsel %vm11879_vm13, %v9671_v9, %v6464_v27  ;;  %v6466_v29 = vrot.slane %v6464_v27, 4  ;;  %v6959_v60 = vld [vmem:[#allocation2 + $0x84] sm:$0xe]  ;;  %v6559_v38 = vld [vmem:[#allocation2 + $0x8c] sm:$0x1] }
 0x3e3   : > { %v6149_v12 = vsel %vm11813_vm6, %v6144_v14, %v6148_v16  ;;  %v6158_v15 = vrot.slane %v6157_v49, 4  ;;  %v6160_v57 = vshll.u32 %v11390_v33, 16  ;;  %v16235_v5 = vshrl.u32 %v14289_v45, 16  ;;  %v6351_v33 = vld [vmem:[#allocation2 + $0x78] sm:$0xe] }
 0x3e4   : > { %v9766_v41 = vcombine.low %v6139_v28, %v6149_v12  ;;  %v6771_v0 = vsel %vm11813_vm6, %v6766_v52, %v6770_v7  ;;  %v6776_v56 = vrot.slane %v6775_v50, 4  ;;  %v6170_v2 = vshll.u32 %v5950_v31, 16 }
 0x3e5   : > { %v6166_v21 = vrot.slane %v16235_v5, 4  ;;  %v6783_v28 = vshrl.u32 %v14808_v48, 16  ;;  %v6468_v46 = vsel %vm11879_vm13, %v6466_v29, %v6467_v10  ;;  %v6162_v16 = vrot.slane %v6160_v57, 5 }
 0x3e6   : > { %8741 = vmatmul.mubr.bf16.gmra.mrb[220].mxu1 %v9766_v41  ;;  %v6786_v58 = vshll.u32 %v14808_v48, 16  ;;  %v6792_v30 = vshll.u32 %v14812_v54, 16  ;;  %v6781_v45 = vsel %vm11813_vm6, %v6776_v56, %v6780_v62  ;;  %v9783_v14 = vcombine.low %v6465_v51, %v6468_v46 }
 0x3e7   : > { %v6172_v13 = vrot.slane %v6170_v2, 5  ;;  %v6785_v7 = vrot.slane %v6783_v28, 4  ;;  %v9815_v37 = vcombine.low %v6771_v0, %v6781_v45  ;;  %v6163_v31 = vsel %vm11813_vm6, %v6158_v15, %v6162_v16  ;;  %v5951_v15 = vld [vmem:[#allocation2 + $0x80] sm:$0x1]  ;;  %v11391_v45 = vld [vmem:[#allocation2 + $0x7c] sm:$0xf] }
 0x3e8   : > { %v6167_v8 = vor.u32 %v6166_v21, %v6162_v16  ;;  %v6788_v9 = vrot.slane %v6786_v58, 5  ;;  %8748 = vmatprep.mubr.bf16.mxu1 %v9783_v14  ;;  %v6794_v12 = vrot.slane %v6792_v30, 5  ;;  %v6796_v10 = vshrl.u32 %v14812_v54, 16 }
 0x3e9   : > { %v6802_v49 = vshll.u32 %v6559_v38, 16  ;;  %v9688_v41 = vrot.slane %v6959_v60, 9  ;;  %8909 = vmatprep.mubr.bf16.mxu0 %v9815_v37  ;;  %v7079_v51 = vrot.slane %v14812_v54, 5  ;;  %v7082_v29 = vrot.slane %v6559_v38, 5 }
 0x3ea   : > { %v14827_v27 = vpop.f32.mrb[136].mxu1  ;;  %v6168_v62 = vrot.slane %v6167_v8, 4  ;;  %v6789_v50 = vor.u32 %v6788_v9, %v6785_v7  ;;  %8910 = vmatmul.mubr.bf16.gmra.mrb[0].mxu0 %v9799_v61  ;;  %v6798_v5 = vrot.slane %v6796_v10, 4  ;;  %v9800_v0 = vcombine.low %v14808_v48, %v14812_v54  ;;  %v14859_v9 = vld [vmem:[#allocation2 + $0x90] sm:$0xf] }
 0x3eb   : > { %v14830_v52 = vpop.f32.mrb[137].mxu1  ;;  %v6804_v21 = vrot.slane %v6802_v49, 5  ;;  %v9672_v56 = vrot.slane %v6351_v33, 9  ;;  %v14845_v16 = vsel %vm11879_vm13, %v9688_v41, %v7079_v51  ;;  %v7081_v38 = vrot.slane %v7079_v51, 4 }
 0x3ec   : > { %v14833_v57 = vpop.f32.mrb[138].mxu1  ;;  %v6173_v60 = vsel %vm11813_vm6, %v6168_v62, %v6172_v13  ;;  %v6790_v46 = vrot.slane %v6789_v50, 4  ;;  %16236 = vst [vmem:[#allocation69_spill] sm:$0xff] %v14845_v16  ;;  %v6799_v30 = vor.u32 %v6798_v5, %v6794_v12  ;;  %v6471_v48 = vrot.slane %v11391_v45, 5  ;;  %v16238_v50 = vld [vmem:[#allocation54_spill] sm:$0xff] }
 0x3ed   : > { %v14837_v2 = vpop.f32.mrb[168].mxu0  ;;  %v14839_v28 = vpop.f32.mrb[139].mxu1  ;;  %v9767_v58 = vcombine.low %v6163_v31, %v6173_v60  ;;  %v6474_v54 = vrot.slane %v5951_v15, 5  ;;  %v14855_v13 = vsel %vm11879_vm13, %v7081_v38, %v7082_v29  ;;  %v6181_v37 = vor.u32 %v14364_v47, %v14354_v18  ;;  %v14869_v18 = vld [vmem:[#allocation2 + $0x94] sm:$0xf] }
 0x3ee   : > { %v14847_v61 = vpop.f32.mrb[169].mxu0  ;;  %v6795_v7 = vsel %vm11813_vm6, %v6790_v46, %v6794_v12  ;;  %16237 = vst [vmem:[#allocation52_spill] sm:$0xff] %v14855_v13  ;;  %v6184_v8 = vshll.u32 %v11391_v45, 16  ;;  %v6800_v33 = vrot.slane %v6799_v30, 4  ;;  %v6472_v12 = vsel %vm11879_vm13, %v9672_v56, %v6471_v48  ;;  %v6560_v46 = vld [vmem:[#allocation2 + $0x98] sm:$0x1] }
 0x3ef   : > { %v14849_v14 = vpop.f32.mrb[170].mxu0  ;;  %8749 = vmatmul.mubr.bf16.gmra.mrb[224].mxu1 %v9767_v58  ;;  %v6473_v49 = vrot.slane %v6471_v48, 4  ;;  %v6182_v41 = vrot.slane %v6181_v37, 4  ;;  %v16239_v51 = vshrl.u32 %v16238_v50, 16  ;;  %v6194_v47 = vshll.u32 %v5951_v15, 16 }
 0x3f0   : > { %v14861_v31 = vpop.f32.mrb[171].mxu0  ;;  %v6186_v62 = vrot.slane %v6184_v8, 5  ;;  %v6805_v5 = vsel %vm11813_vm6, %v6800_v33, %v6804_v21  ;;  %v6807_v38 = vshrl.u32 %v14859_v9, 16  ;;  %v6810_v56 = vshll.u32 %v14859_v9, 16  ;;  %v6352_v15 = vld [vmem:[#allocation2 + $0x84] sm:$0xe] }
 0x3f1   : > { %v6190_v29 = vrot.slane %v16239_v51, 4  ;;  %v6475_v60 = vsel %vm11879_vm13, %v6473_v49, %v6474_v54  ;;  %v9816_v58 = vcombine.low %v6795_v7, %v6805_v5  ;;  %v6196_v37 = vrot.slane %v6194_v47, 5  ;;  %v5952_v33 = vld [vmem:[#allocation2 + $0x8c] sm:$0x1] }
 0x3f2   : > { %v9784_v30 = vcombine.low %v6472_v12, %v6475_v60  ;;  %v6187_v45 = vsel %vm11813_vm6, %v6182_v41, %v6186_v62  ;;  %v6809_v8 = vrot.slane %v6807_v38, 4  ;;  %v6812_v50 = vrot.slane %v6810_v56, 5 }
 0x3f3   : > { %v6191_v48 = vor.u32 %v6190_v29, %v6186_v62  ;;  %v6816_v21 = vshll.u32 %v14869_v18, 16  ;;  %8917 = vmatprep.mubr.bf16.mxu0 %v9816_v58  ;;  %v6820_v49 = vshrl.u32 %v14869_v18, 16  ;;  %v6826_v51 = vshll.u32 %v6560_v46, 16  ;;  %v11392_v29 = vld [vmem:[#allocation2 + $0x88] sm:$0xf] }
 0x3f4   : > { %8756 = vmatprep.mubr.bf16.mxu1 %v9784_v30  ;;  %v9801_v7 = vcombine.low %v14859_v9, %v14869_v18  ;;  %8918 = vmatmul.mubr.bf16.gmra.mrb[4].mxu0 %v9800_v0  ;;  %v6813_v12 = vor.u32 %v6812_v50, %v6809_v8  ;;  %v9673_v62 = vrot.slane %v6352_v15, 9  ;;  %v6478_v47 = vrot.slane %v11392_v29, 5  ;;  %v14885_v58 = vld [vmem:[#allocation2 + $0x9c] sm:$0xf]  ;;  %v16241_v8 = vld [vmem:[#allocation82_spill] sm:$0xff] }
 0x3f5   : > { %v6192_v54 = vrot.slane %v6191_v48, 4  ;;  %v6818_v41 = vrot.slane %v6816_v21, 5  ;;  %v6822_v60 = vrot.slane %v6820_v49, 4  ;;  %v6828_v38 = vrot.slane %v6826_v51, 5  ;;  %v16240_v18 = vld [vmem:[#allocation57_spill] sm:$0xff]  ;;  %v16242_v21 = vld [vmem:[#allocation80_spill] sm:$0xff] }
 0x3f6   : > { %v6481_v56 = vrot.slane %v5952_v33, 5  ;;  %v6814_v48 = vrot.slane %v6813_v12, 4  ;;  %v6479_v46 = vsel %vm11879_vm13, %v9673_v62, %v6478_v47  ;;  %v6480_v9 = vrot.slane %v6478_v47, 4  ;;  %v6961_v12 = vld [vmem:[#allocation2 + $0x9c] sm:$0xe] }
 0x3f7   : > { %v6197_v5 = vsel %vm11813_vm6, %v6192_v54, %v6196_v37  ;;  %v6823_v0 = vor.u32 %v6822_v60, %v6818_v41  ;;  %v6205_v15 = vor.u32 %v16241_v8, %v16240_v18  ;;  %v6208_v50 = vshll.u32 %v11392_v29, 16  ;;  %v14893_v37 = vld [vmem:[#allocation2 + $0xa0] sm:$0xf] }
 0x3f8   : > { %v9768_v30 = vcombine.low %v6187_v45, %v6197_v5  ;;  %v16243_v10 = vshrl.u32 %v16242_v21, 16  ;;  %v6819_v54 = vsel %vm11813_vm6, %v6814_v48, %v6818_v41  ;;  %v6482_v45 = vsel %vm11879_vm13, %v6480_v9, %v6481_v56 }
 0x3f9   : > { %v6218_v49 = vshll.u32 %v5952_v33, 16  ;;  %v6831_v51 = vshrl.u32 %v14885_v58, 16  ;;  %v6824_v47 = vrot.slane %v6823_v0, 4  ;;  %v9785_v29 = vcombine.low %v6479_v46, %v6482_v45 }
 0x3fa   : > { %v6214_v4 = vrot.slane %v16243_v10, 4  ;;  %8757 = vmatmul.mubr.bf16.gmra.mrb[228].mxu1 %v9768_v30  ;;  %v6206_v5 = vrot.slane %v6205_v15, 4  ;;  %v6210_v60 = vrot.slane %v6208_v50, 5  ;;  %v6561_v10 = vld [vmem:[#allocation2 + $0xa4] sm:$0x1]  ;;  %v6834_v41 = vshll.u32 %v14885_v58, 16 }
 0x3fb   : > { %v14900_v62 = vpop.f32.mrb[140].mxu1  ;;  %v6220_v30 = vrot.slane %v6218_v49, 5  ;;  %v6833_v8 = vrot.slane %v6831_v51, 4  ;;  %v6840_v48 = vshll.u32 %v14893_v37, 16  ;;  %v6829_v33 = vsel %vm11813_vm6, %v6824_v47, %v6828_v38  ;;  %8764 = vmatprep.mubr.bf16.mxu1 %v9785_v29  ;;  %v6353_v51 = vld [vmem:[#allocation2 + $0x90] sm:$0xe] }
 0x3fc   : > { %v14902_v18 = vpop.f32.mrb[141].mxu1  ;;  %v6211_v46 = vsel %vm11813_vm6, %v6206_v5, %v6210_v60  ;;  %v6215_v9 = vor.u32 %v6214_v4, %v6210_v60  ;;  %v6844_v0 = vshrl.u32 %v14893_v37, 16  ;;  %v9817_v50 = vcombine.low %v6819_v54, %v6829_v33  ;;  %v5953_v60 = vld [vmem:[#allocation2 + $0x98] sm:$0x1] }
 0x3fd   : > { %v14906_v56 = vpop.f32.mrb[142].mxu1  ;;  %v6836_v21 = vrot.slane %v6834_v41, 5  ;;  %v6842_v45 = vrot.slane %v6840_v48, 5  ;;  %v6850_v49 = vshll.u32 %v6561_v10, 16  ;;  %v9690_v13 = vrot.slane %v6961_v12, 9 }
 0x3fe   : > { %v14913_v15 = vpop.f32.mrb[143].mxu1  ;;  %v6216_v11 = vrot.slane %v6215_v9, 4  ;;  %v6846_v43 = vrot.slane %v6844_v0, 4  ;;  %v7093_v38 = vrot.slane %v14893_v37, 5  ;;  %8925 = vmatprep.mubr.bf16.mxu0 %v9817_v50  ;;  %v7096_v5 = vrot.slane %v6561_v10, 5 }
 0x3ff   : > { %v14915_v39 = vpop.f32.mrb[172].mxu0  ;;  %v6837_v4 = vor.u32 %v6836_v21, %v6833_v8  ;;  %v6852_v29 = vrot.slane %v6850_v49, 5  ;;  %v9802_v54 = vcombine.low %v14885_v58, %v14893_v37  ;;  %8926 = vmatmul.mubr.bf16.gmra.mrb[8].mxu0 %v9801_v7  ;;  %v9674_v50 = vrot.slane %v6353_v51, 9  ;;  %v11393_v21 = vld [vmem:[#allocation2 + $0x94] sm:$0xf] }
 0x400   : > { %v14918_v47 = vpop.f32.mrb[173].mxu0  ;;  %v6221_v48 = vsel %vm11813_vm6, %v6216_v11, %v6220_v30  ;;  %v6847_v33 = vor.u32 %v6846_v43, %v6842_v45  ;;  %v14928_v12 = vsel %vm11879_vm13, %v9690_v13, %v7093_v38  ;;  %v7095_v9 = vrot.slane %v7093_v38, 4  ;;  %v14935_v7 = vld [vmem:[%s15890_s3 + $0x1] ss:$0 sm:$0xff]  ;;  %v16246_v13 = vld [vmem:[#allocation60_spill] sm:$0xff]  ;;  %v16247_v30 = vld [vmem:[#allocation61_spill] sm:$0xff] }
 0x401   : > { %v14922_v41 = vpop.f32.mrb[174].mxu0  ;;  %16244 = vst [vmem:[#allocation59_spill] sm:$0xff] %v14928_v12  ;;  %v9769_v8 = vcombine.low %v6211_v46, %v6221_v48  ;;  %v6838_v10 = vrot.slane %v6837_v4, 4  ;;  %v6485_v58 = vrot.slane %v11393_v21, 5  ;;  %v6488_v11 = vrot.slane %v5953_v60, 5 }
 0x402   : > { %v14930_v0 = vpop.f32.mrb[175].mxu0  ;;  %v6848_v37 = vrot.slane %v6847_v33, 4  ;;  %v14939_v43 = vsel %vm11879_vm13, %v7095_v9, %v7096_v5  ;;  %v10473_v49 = vadd.f32 %v16247_v30, %v16246_v13  ;;  %v16248_v33 = vld [vmem:[#allocation65_spill] sm:$0xff]  ;;  %v16249_v9 = vld [vmem:[#allocation66_spill] sm:$0xff]  ;;  %v14956_v13 = vld [vmem:[#allocation2 + $0xa8] sm:$0xf] }
 0x403   : > { %16245 = vst [vmem:[#allocation56_spill] sm:$0xff] %v14939_v43  ;;  %8765 = vmatmul.mubr.bf16.gmra.mrb[232].mxu1 %v9769_v8  ;;  %v6843_v46 = vsel %vm11813_vm6, %v6838_v10, %v6842_v45  ;;  %v6486_v38 = vsel %vm11879_vm13, %v9674_v50, %v6485_v58  ;;  %v6487_v4 = vrot.slane %v6485_v58, 4  ;;  %v10476_v16 = vadd.f32 %v16249_v9, %v16248_v33  ;;  %v16250_v58 = vld [vmem:[#allocation83_spill] sm:$0xff]  ;;  %v16251_v30 = vld [vmem:[#allocation58_spill] sm:$0xff] }
 0x404   : > { %v6853_v48 = vsel %vm11813_vm6, %v6848_v37, %v6852_v29  ;;  %v8365_v5 = vadd.f32 %v10473_v49, %v14935_v7  ;;  %v10585_v8 = vadd.f32 %v14714_v42, %v14709_v35  ;;  %v10588_v50 = vadd.f32 %v14721_v24, %v14716_v53  ;;  %v14964_v37 = vld [vmem:[#allocation2 + $0xac] sm:$0xf]  ;;  %v14969_v42 = vld [vmem:[#allocation2 + $0xb0] sm:$0x1] }
 0x405   : > { %v9818_v45 = vcombine.low %v6843_v46, %v6853_v48  ;;  %v6489_v10 = vsel %vm11879_vm13, %v6487_v4, %v6488_v11  ;;  %v6229_v29 = vor.u32 %v16251_v30, %v16250_v58  ;;  %16252 = vst [vmem:[#allocation86_spill] sm:$0xff] %v14964_v37  ;;  %v8368_v33 = vadd.f32 %v10476_v16, %v14935_v7  ;;  %v16255_v48 = vld [vmem:[#allocation55_spill] sm:$0xff]  ;;  %v6354_v58 = vld [vmem:[#allocation2 + $0x9c] sm:$0xe]  ;;  %v16258_v30 = vld [vmem:[#allocation84_spill] sm:$0xff] }
 0x406   : > { %v9786_v49 = vcombine.low %v6486_v38, %v6489_v10  ;;  %v14967_v9 = vadd.f32 %v10585_v8, %v8365_v5  ;;  %v6232_v35 = vshll.u32 %v11393_v21, 16  ;;  %16254 = vst [vmem:[#allocation88_spill] sm:$0xff] %v14969_v42  ;;  %v16256_v11 = vshrl.u32 %v16255_v48, 16  ;;  %v14978_v21 = vld [vmem:[#allocation2 + $0xb8] sm:$0xf] }
 0x407   : > { %8933 = vmatprep.mubr.bf16.mxu0 %v9818_v45  ;;  %v6230_v46 = vrot.slane %v6229_v29, 4  ;;  %v6242_v51 = vshll.u32 %v5953_v60, 16  ;;  %v6855_v53 = vshrl.u32 %v14956_v13, 16  ;;  %v14974_v24 = vadd.f32 %v10588_v50, %v8368_v33  ;;  %v5954_v8 = vld [vmem:[#allocation2 + $0xa4] sm:$0x1] }
 0x408   : > { %16253 = vst [vmem:[#allocation87_spill] sm:$0xff] %v14967_v9  ;;  %v6238_v4 = vrot.slane %v16256_v11, 4  ;;  %8772 = vmatprep.mubr.bf16.mxu1 %v9786_v49  ;;  %8934 = vmatmul.mubr.bf16.gmra.mrb[12].mxu0 %v9802_v54  ;;  %v6234_v38 = vrot.slane %v6232_v35, 5  ;;  %v6858_v16 = vshll.u32 %v14956_v13, 16  ;;  %v6864_v5 = vshll.u32 %v14964_v37, 16 }
 0x409   : > { %16257 = vst [vmem:[#allocation89_spill] sm:$0xff] %v14974_v24  ;;  %v6857_v45 = vrot.slane %v6855_v53, 4  ;;  %v6868_v10 = vshrl.u32 %v14964_v37, 16  ;;  %v6874_v60 = vshll.u32 %v14969_v42, 16  ;;  %v16259_v29 = vshrl.u32 %v16258_v30, 16 }
 0x40a   : > { %v6239_v54 = vor.u32 %v6238_v4, %v6234_v38  ;;  %v6860_v49 = vrot.slane %v6858_v16, 5  ;;  %v6866_v33 = vrot.slane %v6864_v5, 5  ;;  %v6235_v35 = vsel %vm11813_vm6, %v6230_v46, %v6234_v38  ;;  %v11395_v42 = vld [vmem:[#allocation2 + $0xa0] sm:$0xf] }
 0x40b   : > { %v14985_v50 = vrot.slane %v16259_v29, 4  ;;  %v6244_v48 = vrot.slane %v6242_v51, 5  ;;  %v6870_v11 = vrot.slane %v6868_v10, 4  ;;  %v6876_v24 = vrot.slane %v6874_v60, 5 }
 0x40c   : > { %v14989_v53 = vpop.f32.mrb[144].mxu1  ;;  %v6240_v9 = vrot.slane %v6239_v54, 4  ;;  %v6861_v43 = vor.u32 %v6860_v49, %v6857_v45  ;;  %v9675_v12 = vrot.slane %v6354_v58, 9  ;;  %v6492_v25 = vrot.slane %v11395_v42, 5  ;;  %v16262_v54 = vld [vmem:[#allocation67_spill] sm:$0xff]  ;;  %v16263_v49 = vld [vmem:[#allocation68_spill] sm:$0xff] }
 0x40d   : > { %v14991_v20 = vpop.f32.mrb[145].mxu1  ;;  %v6871_v29 = vor.u32 %v6870_v11, %v6866_v33  ;;  %v14995_v4 = vadd.f32 %v14791_v34, %v14784_v55  ;;  %v14999_v51 = vadd.f32 %v14786_v63, %v14778_v32  ;;  %v15003_v46 = vadd.f32 %v14802_v59, %v14796_v26  ;;  %v15029_v11 = vld [vmem:[#allocation2 + $0xb4] sm:$0xf] }
 0x40e   : > { %v15005_v38 = vpop.f32.mrb[176].mxu0  ;;  %v15007_v16 = vpop.f32.mrb[146].mxu1  ;;  %v6245_v5 = vsel %vm11813_vm6, %v6240_v9, %v6244_v48  ;;  %v6862_v45 = vrot.slane %v6861_v43, 4  ;;  %v6494_v10 = vrot.slane %v6492_v25, 4  ;;  %v6495_v60 = vrot.slane %v5954_v8, 5 }
 0x40f   : > { %16260 = vst [vmem:[#allocation90_spill] sm:$0xff] %v14995_v4  ;;  %16261 = vst [vmem:[#allocation63_spill] sm:$0xff] %v15003_v46  ;;  %v15011_v55 = vpop.f32.mrb[177].mxu0  ;;  %v15013_v34 = vpop.f32.mrb[147].mxu1  ;;  %v9770_v32 = vcombine.low %v6235_v35, %v6245_v5  ;;  %v6872_v63 = vrot.slane %v6871_v29, 4  ;;  %v9803_v26 = vcombine.low %v14956_v13, %v14964_v37  ;;  %v15019_v59 = vadd.f32 %v14798_v3, %v14793_v40 }
 0x410   : > { %v15021_v58 = vpop.f32.mrb[178].mxu0  ;;  %v6493_v43 = vsel %vm11879_vm13, %v9675_v12, %v6492_v25  ;;  %v6496_v9 = vsel %vm11879_vm13, %v6494_v10, %v6495_v60  ;;  %v6253_v48 = vor.u32 %v16263_v49, %v16262_v54  ;;  %v6256_v35 = vshll.u32 %v11395_v42, 16  ;;  %v15031_v29 = vld [vmem:[#allocation2 + $0xb8] sm:$0xf]  ;;  %v16264_v12 = vld [vmem:[#allocation79_spill] sm:$0xff] }
 0x411   : > { %v15033_v13 = vpop.f32.mrb[179].mxu0  ;;  %8773 = vmatmul.mubr.bf16.gmra.mrb[236].mxu1 %v9770_v32  ;;  %v6867_v40 = vsel %vm11813_vm6, %v6862_v45, %v6866_v33  ;;  %v6877_v25 = vsel %vm11813_vm6, %v6872_v63, %v6876_v24  ;;  %v9787_v3 = vcombine.low %v6493_v43, %v6496_v9  ;;  %v16265_v5 = vshrl.u32 %v16264_v12, 16  ;;  %v6563_v60 = vld [vmem:[#allocation2 + $0xbc] sm:$0x1]  ;;  %v6963_v45 = vld [vmem:[#allocation2 + $0xb4] sm:$0xe] }
 0x412   : > { %v9819_v54 = vcombine.low %v6867_v40, %v6877_v25  ;;  %v6254_v42 = vrot.slane %v6253_v48, 4  ;;  %v6258_v49 = vrot.slane %v6256_v35, 5  ;;  %v6266_v37 = vshll.u32 %v5954_v8, 16  ;;  %v15045_v24 = vld [vmem:[#allocation2 + $0xc0] sm:$0xf] }
 0x413   : > { %v6262_v10 = vrot.slane %v16265_v5, 4  ;;  %8780 = vmatprep.mubr.bf16.mxu1 %v9787_v3  ;;  %v6879_v19 = vshrl.u32 %v15029_v11, 16  ;;  %v6882_v32 = vshll.u32 %v15029_v11, 16  ;;  %v6888_v1 = vshll.u32 %v15031_v29, 16 }
 0x414   : > { %v6892_v33 = vshrl.u32 %v15031_v29, 16  ;;  %8941 = vmatprep.mubr.bf16.mxu0 %v9819_v54  ;;  %v6259_v43 = vsel %vm11813_vm6, %v6254_v42, %v6258_v49  ;;  %v6898_v8 = vshll.u32 %v6563_v60, 16  ;;  %v6268_v12 = vrot.slane %v6266_v37, 5  ;;  %v6355_v54 = vld [vmem:[#allocation2 + $0xa8] sm:$0xe] }
 0x415   : > { %v6263_v9 = vor.u32 %v6262_v10, %v6258_v49  ;;  %8942 = vmatmul.mubr.bf16.gmra.mrb[16].mxu0 %v9803_v26  ;;  %v6881_v48 = vrot.slane %v6879_v19, 4  ;;  %v6884_v35 = vrot.slane %v6882_v32, 5  ;;  %v6890_v40 = vrot.slane %v6888_v1, 5  ;;  %v5955_v37 = vld [vmem:[#allocation2 + $0xb0] sm:$0x1] }
 0x416   : > { %v6894_v25 = vrot.slane %v6892_v33, 4  ;;  %v9692_v5 = vrot.slane %v6963_v45, 9  ;;  %v7107_v46 = vrot.slane %v15031_v29, 5  ;;  %v6900_v23 = vrot.slane %v6898_v8, 5  ;;  %v11397_v45 = vld [vmem:[#allocation2 + $0xac] sm:$0xf] }
 0x417   : > { %v6264_v3 = vrot.slane %v6263_v9, 4  ;;  %v6885_v4 = vor.u32 %v6884_v35, %v6881_v48  ;;  %v7110_v63 = vrot.slane %v6563_v60, 5  ;;  %v9804_v1 = vcombine.low %v15029_v11, %v15031_v29  ;;  %v15083_v35 = vld [vmem:[#allocation2 + $0xc0] sm:$0xf] }
 0x418   : > { %v6895_v17 = vor.u32 %v6894_v25, %v6890_v40  ;;  %v15055_v26 = vsel %vm11879_vm13, %v9692_v5, %v7107_v46  ;;  %v7109_v19 = vrot.slane %v7107_v46, 4  ;;  %v6499_v60 = vrot.slane %v11397_v45, 5 }
 0x419   : > { %v6269_v42 = vsel %vm11813_vm6, %v6264_v3, %v6268_v12  ;;  %16266 = vst [vmem:[#allocation81_spill] sm:$0xff] %v15055_v26  ;;  %v6886_v32 = vrot.slane %v6885_v4, 4  ;;  %v9676_v48 = vrot.slane %v6355_v54, 9  ;;  %v15069_v46 = vadd.f32 %v14847_v61, %v14837_v2  ;;  %v16272_v3 = vld [vmem:[#allocation71_spill] sm:$0xff]  ;;  %v16273_v12 = vld [vmem:[#allocation50_spill] sm:$0xff] }
 0x41a   : > { %v15059_v10 = vpop.f32.mrb[180].mxu0  ;;  %v9771_v49 = vcombine.low %v6259_v43, %v6269_v42  ;;  %v6896_v33 = vrot.slane %v6895_v17, 4  ;;  %v15065_v8 = vsel %vm11879_vm13, %v7109_v19, %v7110_v63  ;;  %v15073_v11 = vadd.f32 %v14830_v52, %v14827_v27  ;;  %v16274_v42 = vld [vmem:[#allocation62_spill] sm:$0xff] }
 0x41b   : > { %v15061_v9 = vpop.f32.mrb[181].mxu0  ;;  %16267 = vst [vmem:[#allocation85_spill] sm:$0xff] %v15065_v8  ;;  %16268 = vst [vmem:[#allocation74_spill] sm:$0xff] %v15069_v46  ;;  %v6891_v17 = vsel %vm11813_vm6, %v6886_v32, %v6890_v40  ;;  %v6502_v43 = vrot.slane %v5955_v37, 5  ;;  %v6500_v27 = vsel %vm11879_vm13, %v9676_v48, %v6499_v60  ;;  %v6501_v52 = vrot.slane %v6499_v60, 4 }
 0x41c   : > { %16269 = vst [vmem:[#allocation53_spill] sm:$0xff] %v15073_v11  ;;  %v15075_v29 = vpop.f32.mrb[182].mxu0  ;;  %8781 = vmatmul.mubr.bf16.gmra.mrb[240].mxu1 %v9771_v49  ;;  %v6901_v4 = vsel %vm11813_vm6, %v6896_v33, %v6900_v23  ;;  %v15091_v25 = vadd.f32 %v14861_v31, %v14849_v14  ;;  %v15097_v23 = vadd.f32 %v14839_v28, %v14833_v57  ;;  %v6280_v54 = vshll.u32 %v11397_v45, 16  ;;  %v15103_v32 = vld [vmem:[#allocation2 + $0xc4] sm:$0xf] }
 0x41d   : > { %v15085_v2 = vpop.f32.mrb[183].mxu0  ;;  %v9820_v61 = vcombine.low %v6891_v17, %v6901_v4  ;;  %v6277_v5 = vor.u32 %v16273_v12, %v16272_v3  ;;  %v16275_v19 = vshrl.u32 %v16274_v42, 16  ;;  %16276 = vst [vmem:[#allocation18_spill] sm:$0xff] %v15103_v32  ;;  %v6503_v14 = vsel %vm11879_vm13, %v6501_v52, %v6502_v43  ;;  %v15117_v12 = vld [vmem:[#allocation2 + $0xc8] sm:$0x1] }
 0x41e   : > { %16270 = vst [vmem:[#allocation15_spill] sm:$0xff] %v15091_v25  ;;  %v15093_v40 = vpop.f32.mrb[148].mxu1  ;;  %16271 = vst [vmem:[#allocation19_spill] sm:$0xff] %v15097_v23  ;;  %v6290_v31 = vshll.u32 %v5955_v37, 16  ;;  %v6903_v60 = vshrl.u32 %v15083_v35, 16  ;;  %v6906_v57 = vshll.u32 %v15083_v35, 16  ;;  %v9788_v17 = vcombine.low %v6500_v27, %v6503_v14 }
 0x41f   : > { %v6286_v49 = vrot.slane %v16275_v19, 4  ;;  %v15105_v33 = vpop.f32.mrb[149].mxu1  ;;  %8949 = vmatprep.mubr.bf16.mxu0 %v9820_v61  ;;  %v16277_v45 = vshll.u32 %v16258_v30, 16  ;;  %v6278_v4 = vrot.slane %v6277_v5, 4  ;;  %v6282_v3 = vrot.slane %v6280_v54, 5  ;;  %16278 = vst [vmem:[#allocation22_spill] sm:$0xff] %v15117_v12 }
 0x420   : > { %v15111_v28 = vpop.f32.mrb[150].mxu1  ;;  %8950 = vmatmul.mubr.bf16.gmra.mrb[20].mxu0 %v9804_v1  ;;  %v6322_v37 = vshll.u32 %v15045_v24, 16  ;;  %v6905_v43 = vrot.slane %v6903_v60, 4  ;;  %v6908_v52 = vrot.slane %v6906_v57, 5  ;;  %v6912_v42 = vshll.u32 %v15103_v32, 16  ;;  %8788 = vmatprep.mubr.bf16.mxu1 %v9788_v17 }
 0x421   : > { %v15115_v48 = vrot.slane %v16277_v45, 5  ;;  %v15119_v61 = vpop.f32.mrb[151].mxu1  ;;  %v16279_v30 = vshrl.u32 %v15045_v24, 16  ;;  %v15129_v27 = vld [vmem:[#allocation2 + $0xc4] sm:$0xf]  ;;  %v6287_v5 = vor.u32 %v6286_v49, %v6282_v3  ;;  %v6916_v54 = vshrl.u32 %v15103_v32, 16 }
 0x422   : > { %v15123_v19 = vpop.f32.mrb[184].mxu0  ;;  %v6356_v14 = vld [vmem:[#allocation2 + $0xb4] sm:$0xe]  ;;  %v6292_v60 = vrot.slane %v6290_v31, 5  ;;  %v6909_v57 = vor.u32 %v6908_v52, %v6905_v43  ;;  %v6914_v8 = vrot.slane %v6912_v42, 5  ;;  %v6922_v26 = vshll.u32 %v15117_v12, 16 }
 0x423   : > { %v15127_v45 = vrot.slane %v16279_v30, 4  ;;  %v15133_v63 = vpop.f32.mrb[185].mxu0  ;;  %v5956_v25 = vld [vmem:[#allocation2 + $0xbc] sm:$0x1]  ;;  %v6283_v30 = vsel %vm11813_vm6, %v6278_v4, %v6282_v3  ;;  %v6288_v46 = vrot.slane %v6287_v5, 4  ;;  %v6918_v1 = vrot.slane %v6916_v54, 4 }
 0x424   : > { %v15136_v24 = vpop.f32.mrb[186].mxu0  ;;  %v6506_v49 = vrot.slane %v14978_v21, 5  ;;  %v6910_v23 = vrot.slane %v6909_v57, 4  ;;  %v9677_v11 = vrot.slane %v6356_v14, 9  ;;  %v15145_v31 = vadd.f32 %v14918_v47, %v14915_v39 }
 0x425   : > { %v15141_v17 = vpop.f32.mrb[187].mxu0  ;;  %v15149_v43 = vadd.f32 %v14902_v18, %v14900_v62  ;;  %v6293_v4 = vsel %vm11813_vm6, %v6288_v46, %v6292_v60  ;;  %v6919_v3 = vor.u32 %v6918_v1, %v6914_v8  ;;  %v6509_v5 = vrot.slane %v5956_v25, 5 }
 0x426   : > { %16280 = vst [vmem:[#allocation78_spill] sm:$0xff] %v15145_v31  ;;  %v15151_v52 = vpop.f32.mrb[152].mxu1  ;;  %v6508_v42 = vrot.slane %v6506_v49, 4  ;;  %v9772_v57 = vcombine.low %v6283_v30, %v6293_v4  ;;  %v6924_v14 = vrot.slane %v6922_v26, 5  ;;  %v6507_v39 = vsel %vm11879_vm13, %v9677_v11, %v6506_v49  ;;  %v6357_v4 = vld [vmem:[#allocation2 + $0xc0] sm:$0xe] }
 0x427   : > { %v15155_v54 = vpop.f32.mrb[153].mxu1  ;;  %v15161_v47 = vadd.f32 %v14930_v0, %v14922_v41  ;;  %v6920_v18 = vrot.slane %v6919_v3, 4  ;;  %v15169_v1 = vadd.f32 %v14913_v15, %v14906_v56  ;;  %v6301_v26 = vor.u32 %v15115_v48, %v14985_v50  ;;  %v5957_v48 = vld [vmem:[#allocation2 + $0xc8] sm:$0x1] }
 0x428   : > { %v15163_v62 = vpop.f32.mrb[154].mxu1  ;;  %v6510_v46 = vsel %vm11879_vm13, %v6508_v42, %v6509_v5  ;;  %8789 = vmatmul.mubr.bf16.gmra.mrb[244].mxu1 %v9772_v57  ;;  %v6304_v41 = vshll.u32 %v14978_v21, 16  ;;  %v16282_v0 = vshrl.u32 %v14978_v21, 16  ;;  %v6314_v49 = vshll.u32 %v5956_v25, 16 }
 0x429   : > { %16281 = vst [vmem:[#allocation75_spill] sm:$0xff] %v15161_v47  ;;  %v15173_v60 = vpop.f32.mrb[155].mxu1  ;;  %v9789_v11 = vcombine.low %v6507_v39, %v6510_v46  ;;  %v6324_v42 = vrot.slane %v6322_v37, 5  ;;  %v6915_v56 = vsel %vm11813_vm6, %v6910_v23, %v6914_v8  ;;  %v6925_v15 = vsel %vm11813_vm6, %v6920_v18, %v6924_v14 }
 0x42a   : > { %v6310_v30 = vrot.slane %v16282_v0, 4  ;;  %v15178_v3 = vpop.f32.mrb[188].mxu0  ;;  %v9805_v50 = vcombine.low %v15083_v35, %v15103_v32  ;;  %v9821_v57 = vcombine.low %v6915_v56, %v6925_v15  ;;  %v6302_v21 = vrot.slane %v6301_v26, 4  ;;  %v6950_v32 = vld [vmem:[#allocation2 + $0x18] sm:$0xe] }
 0x42b   : > { %v15186_v5 = vpop.f32.mrb[189].mxu0  ;;  %8796 = vmatprep.mubr.bf16.mxu1 %v9789_v11  ;;  %v6306_v25 = vrot.slane %v6304_v41, 5  ;;  %v6513_v39 = vrot.slane %v15129_v27, 5  ;;  %v9678_v37 = vrot.slane %v6357_v4, 9  ;;  %v15193_v8 = vadd.f32 %v15011_v55, %v15005_v38 }
 0x42c   : > { %v15189_v46 = vpop.f32.mrb[190].mxu0  ;;  %v15197_v23 = vadd.f32 %v14991_v20, %v14989_v53  ;;  %v15201_v35 = vadd.f32 %v15033_v13, %v15021_v58  ;;  %8957 = vmatprep.mubr.bf16.mxu0 %v9821_v57  ;;  %v6316_v26 = vrot.slane %v6314_v49, 5  ;;  %v6516_v41 = vrot.slane %v5957_v48, 5  ;;  %v15215_v58 = vld [vmem:[#allocation2 + $0xcc] sm:$0xf] }
 0x42d   : > { %16283 = vst [vmem:[#allocation51_spill] sm:$0xff] %v15193_v8  ;;  %v15203_v14 = vpop.f32.mrb[191].mxu0  ;;  %v6311_v18 = vor.u32 %v6310_v30, %v6306_v25  ;;  %v6515_v11 = vrot.slane %v6513_v39, 4  ;;  %8958 = vmatmul.mubr.bf16.gmra.mrb[24].mxu0 %v9805_v50  ;;  %v6514_v38 = vsel %vm11879_vm13, %v9678_v37, %v6513_v39  ;;  %v15211_v20 = vadd.f32 %v15013_v34, %v15007_v16  ;;  %v15223_v50 = vld [vmem:[#allocation2 + $0xd0] sm:$0xf] }
 0x42e   : > { %16284 = vst [vmem:[#allocation76_spill] sm:$0xff] %v15201_v35  ;;  %v15205_v0 = vpop.f32.mrb[156].mxu1  ;;  %v6325_v53 = vor.u32 %v6324_v42, %v15127_v45  ;;  %v6328_v55 = vshll.u32 %v15129_v27, 16  ;;  %v16286_v4 = vshrl.u32 %v15129_v27, 16  ;;  %v6338_v15 = vshll.u32 %v5957_v48, 16 }
 0x42f   : > { %16285 = vst [vmem:[#allocation54_spill] sm:$0xff] %v15211_v20  ;;  %v15217_v13 = vpop.f32.mrb[157].mxu1  ;;  %v6312_v30 = vrot.slane %v6311_v18, 4  ;;  %v6517_v49 = vsel %vm11879_vm13, %v6515_v11, %v6516_v41  ;;  %v6307_v34 = vsel %vm11813_vm6, %v6302_v21, %v6306_v25  ;;  %v6565_v57 = vld [vmem:[#allocation2 + $0xd4] sm:$0x1]  ;;  %v6927_v27 = vshrl.u32 %v15215_v58, 16 }
 0x430   : > { %v6334_v56 = vrot.slane %v16286_v4, 4  ;;  %v15225_v16 = vpop.f32.mrb[158].mxu1  ;;  %v9790_v45 = vcombine.low %v6514_v38, %v6517_v49  ;;  %v6330_v42 = vrot.slane %v6328_v55, 5  ;;  %v6326_v18 = vrot.slane %v6325_v53, 4  ;;  %v6965_v11 = vld [vmem:[#allocation2 + $0xcc] sm:$0xe] }
 0x431   : > { %v15229_v39 = vpop.f32.mrb[159].mxu1  ;;  %v6317_v37 = vsel %vm11813_vm6, %v6312_v30, %v6316_v26  ;;  %v6930_v48 = vshll.u32 %v15215_v58, 16  ;;  %v6340_v8 = vrot.slane %v6338_v15, 5  ;;  %v6936_v21 = vshll.u32 %v15223_v50, 16 }
 0x432   : > { %v15235_v41 = vpop.f32.mrb[192].mxu0  ;;  %v9773_v4 = vcombine.low %v6307_v34, %v6317_v37  ;;  %v6335_v35 = vor.u32 %v6334_v56, %v6330_v42  ;;  %v6929_v38 = vrot.slane %v6927_v27, 4  ;;  %v6940_v49 = vshrl.u32 %v15223_v50, 16 }
 0x433   : > { %v15238_v25 = vpop.f32.mrb[193].mxu0  ;;  %v6932_v55 = vrot.slane %v6930_v48, 5  ;;  %v6946_v26 = vshll.u32 %v6565_v57, 16  ;;  %v6938_v47 = vrot.slane %v6936_v21, 5  ;;  %v9694_v31 = vrot.slane %v6965_v11, 9 }
 0x434   : > { %v15241_v53 = vpop.f32.mrb[194].mxu0  ;;  %8797 = vmatmul.mubr.bf16.gmra.mrb[248].mxu1 %v9773_v4  ;;  %v6336_v30 = vrot.slane %v6335_v35, 4  ;;  %v7121_v12 = vrot.slane %v15223_v50, 5  ;;  %v6942_v15 = vrot.slane %v6940_v49, 4  ;;  %v7124_v37 = vrot.slane %v6565_v57, 5 }
 0x435   : > { %v15244_v34 = vpop.f32.mrb[195].mxu0  ;;  %8804 = vmatprep.mubr.bf16.mxu1 %v9790_v45  ;;  %v6933_v56 = vor.u32 %v6932_v55, %v6929_v38  ;;  %v6331_v48 = vsel %vm11813_vm6, %v6326_v18, %v6330_v42  ;;  %v6948_v57 = vrot.slane %v6946_v26, 5  ;;  %v9679_v42 = vrot.slane %v6950_v32, 9  ;;  %v11399_v18 = vld [vmem:[#allocation2 + $0x1c] sm:$0xf] }
 0x436   : > { %v15246_v27 = vpop.f32.mrb[160].mxu1  ;;  %v6341_v4 = vsel %vm11813_vm6, %v6336_v30, %v6340_v8  ;;  %v15254_v35 = vsel %vm11879_vm13, %v9694_v31, %v7121_v12  ;;  %v7123_v11 = vrot.slane %v7121_v12, 4  ;;  %v6943_v55 = vor.u32 %v6942_v15, %v6938_v47 }
 0x437   : > { %v15256_v21 = vpop.f32.mrb[161].mxu1  ;;  %v9774_v45 = vcombine.low %v6331_v48, %v6341_v4  ;;  %v6934_v38 = vrot.slane %v6933_v56, 4  ;;  %v7016_v8 = vrot.slane %v11399_v18, 5  ;;  %v15266_v31 = vadd.f32 %v15061_v9, %v15059_v10  ;;  %v11400_v48 = vld [vmem:[#allocation2 + $0x20] sm:$0x1] }
 0x438   : > { %v15258_v49 = vpop.f32.mrb[162].mxu1  ;;  %v15262_v20 = vsel %vm11879_vm13, %v7123_v11, %v7124_v37  ;;  %v6944_v56 = vrot.slane %v6943_v55, 4  ;;  %v15276_v15 = vadd.f32 %v15105_v33, %v15093_v40  ;;  %v7019_v4 = vrot.slane %v11400_v48, 5  ;;  %v11401_v33 = vld [vmem:[#allocation2 + $0x34] sm:$0xf] }
 0x439   : > { %v15268_v12 = vpop.f32.mrb[163].mxu1  ;;  %v6939_v30 = vsel %vm11813_vm6, %v6934_v38, %v6938_v47  ;;  %v9838_v26 = vcombine.low %v15254_v35, %v15262_v20  ;;  %v7018_v37 = vrot.slane %v7016_v8, 4  ;;  %v15282_v10 = vadd.f32 %v15085_v2, %v15075_v29  ;;  %v6952_v48 = vld [vmem:[#allocation2 + $0x30] sm:$0xe] }
 0x43a   : > { %v15278_v32 = vpop.f32.mrb[196].mxu0  ;;  %v15286_v9 = vadd.f32 %v15119_v61, %v15111_v28  ;;  %v6949_v11 = vsel %vm11813_vm6, %v6944_v56, %v6948_v57  ;;  %v9806_v40 = vcombine.low %v15215_v58, %v15223_v50  ;;  %v7030_v38 = vrot.slane %v11401_v33, 5  ;;  %v11402_v50 = vld [vmem:[#allocation2 + $0x38] sm:$0x1]  ;;  %v11404_v33 = vld [vmem:[#allocation2 + $0x64] sm:$0xf] }
 0x43b   : > { %v10638_v47 = vpop.f32.mrb[197].mxu0  ;;  %v9822_v18 = vcombine.low %v6939_v30, %v6949_v11  ;;  %v7017_v29 = vsel %vm11879_vm13, %v9679_v42, %v7016_v8  ;;  %v7020_v2 = vsel %vm11879_vm13, %v7018_v37, %v7019_v4  ;;  %v15300_v57 = vadd.f32 %v15133_v63, %v15123_v19 }
 0x43c   : > { %v15292_v55 = vpop.f32.mrb[198].mxu0  ;;  %8805 = vmatmul.mubr.bf16.gmra.mrb[252].mxu1 %v9774_v45  ;;  %v9823_v61 = vcombine.low %v7017_v29, %v7020_v2  ;;  %v7032_v6 = vrot.slane %v7030_v38, 4  ;;  %v7033_v56 = vrot.slane %v11402_v50, 5  ;;  %v15304_v45 = vadd.f32 %v15155_v54, %v15151_v52  ;;  %v11403_v54 = vld [vmem:[#allocation2 + $0x4c] sm:$0xf] }
 0x43d   : > { %v10641_v28 = vpop.f32.mrb[199].mxu0  ;;  %8965 = vmatprep.mubr.bf16.mxu0 %v9822_v18  ;;  %v15308_v42 = vadd.f32 %v15141_v17, %v15136_v24  ;;  %v15312_v8 = vadd.f32 %v15173_v60, %v15163_v62  ;;  %v15316_v63 = vadd.f32 %v15186_v5, %v15178_v3  ;;  %v9681_v37 = vrot.slane %v6952_v48, 9 }
 0x43e   : > { %v10525_v58 = vpop.f32.mrb[164].mxu1  ;;  %10991 = vmatprep.mubr.bf16.mxu1 %v9823_v61  ;;  %8966 = vmatmul.mubr.bf16.gmra.mrb[28].mxu0 %v9806_v40  ;;  %v7034_v52 = vsel %vm11879_vm13, %v7032_v6, %v7033_v56  ;;  %v7044_v4 = vrot.slane %v11403_v54, 5  ;;  %v10515_v24 = vadd.f32 %v15217_v13, %v15205_v0  ;;  %v15324_v62 = vadd.f32 %v15203_v14, %v15189_v46 }
 0x43f   : > { %v10526_v30 = vpop.f32.mrb[165].mxu1  ;;  %v15328_v60 = vadd.f32 %v15229_v39, %v15225_v16  ;;  %v7031_v5 = vsel %vm11879_vm13, %v9681_v37, %v7030_v38  ;;  %v7058_v18 = vrot.slane %v11404_v33, 5  ;;  %v15334_v0 = vadd.f32 %v15238_v25, %v15235_v41  ;;  %v16288_v25 = vld [vmem:[#allocation53_spill] sm:$0xff] }
 0x440   : > { %v10528_v19 = vpop.f32.mrb[166].mxu1  ;;  %v9825_v40 = vcombine.low %v7031_v5, %v7034_v52  ;;  %v10521_v46 = vadd.f32 %v15256_v21, %v15246_v27  ;;  %v15340_v13 = vadd.f32 %v14999_v51, %v14935_v7  ;;  %v16287_v16 = vcombine.low %v14557_v22, %v14569_v36  ;;  %v16289_v51 = vld [vmem:[#allocation19_spill] sm:$0xff] }
 0x441   : > { %v10529_v17 = vpop.f32.mrb[167].mxu1  ;;  %v7046_v39 = vrot.slane %v7044_v4, 4  ;;  %v15347_v38 = vadd.f32 %v15244_v34, %v15241_v53  ;;  %v15351_v41 = vadd.f32 %v15019_v59, %v14935_v7  ;;  %v15355_v27 = vadd.f32 %v16288_v25, %v14935_v7  ;;  %v6954_v22 = vld [vmem:[#allocation2 + $0x48] sm:$0xe]  ;;  %v11405_v59 = vld [vmem:[#allocation2 + $0x50] sm:$0x1] }
 0x442   : > { %v10643_v3 = vpop.f32.mrb[200].mxu0  ;;  %v15359_v21 = vadd.f32 %v16289_v51, %v14935_v7  ;;  %v10524_v36 = vadd.f32 %v15268_v12, %v15258_v49  ;;  %v15365_v34 = vadd.f32 %v15149_v43, %v14935_v7  ;;  %v7047_v2 = vrot.slane %v11405_v59, 5  ;;  %v16290_v49 = vld [vmem:[#allocation54_spill] sm:$0xff]  ;;  %v11406_v5 = vld [vmem:[#allocation2 + $0x68] sm:$0x1]  ;;  %v16291_v59 = vld [vmem:[#allocation64_spill] sm:$0xff] }
 0x443   : > { %v10644_v11 = vpop.f32.mrb[201].mxu0  ;;  %v15368_v61 = vadd.f32 %v10638_v47, %v15278_v32  ;;  %v10527_v48 = vadd.f32 %v10526_v30, %v10525_v58  ;;  %v15372_v50 = vadd.f32 %v15169_v1, %v14935_v7  ;;  %v15376_v56 = vadd.f32 %v15197_v23, %v14935_v7  ;;  %v6956_v47 = vld [vmem:[#allocation2 + $0x60] sm:$0xe]  ;;  %v15395_v25 = vld [vmem:[#allocation2 + $0x7c] sm:$0xf] }
 0x444   : > { %v10646_v14 = vpop.f32.mrb[202].mxu0  ;;  %10992 = vmatmul.mubr.bf16.vlgmr.msra.gmra.mrb[0].mxu1 %v16287_v16  ;;  %v15380_v12 = vadd.f32 %v16290_v49, %v14935_v7  ;;  %v7060_v43 = vrot.slane %v7058_v18, 4  ;;  %v9683_v52 = vrot.slane %v6954_v22, 9  ;;  %v7048_v32 = vsel %vm11879_vm13, %v7046_v39, %v7047_v2  ;;  %v16292_v2 = vld [vmem:[#allocation70_spill] sm:$0xff] }
 0x445   : > { %v10647_v29 = vpop.f32.mrb[203].mxu0  ;;  %10995 = vmatprep.mubr.bf16.mxu1 %v9825_v40  ;;  %v15385_v58 = vadd.f32 %v10641_v28, %v15292_v55  ;;  %v10530_v1 = vadd.f32 %v10529_v17, %v10528_v19  ;;  %v8405_v23 = vadd.f32 %v15276_v15, %v14935_v7  ;;  %v8408_v54 = vadd.f32 %v15286_v9, %v14935_v7  ;;  %v6964_v49 = vld [vmem:[#allocation2 + $0xc0] sm:$0xe] }
 0x446   : > { %v10531_v53 = vpop.f32.mrb[168].mxu1  ;;  %v7061_v40 = vrot.slane %v11406_v5, 5  ;;  %v15391_v33 = vadd.f32 %v10644_v11, %v10643_v3  ;;  %v7045_v39 = vsel %vm11879_vm13, %v9683_v52, %v7044_v4  ;;  %v7072_v55 = vrot.slane %v15395_v25, 5  ;;  %v16294_v5 = vld [vmem:[#allocation18_spill] sm:$0xff] }
 0x447   : > { %v10532_v6 = vpop.f32.mrb[169].mxu1  ;;  %v15398_v19 = vadd.f32 %v10647_v29, %v10646_v14  ;;  %v9827_v15 = vcombine.low %v7045_v39, %v7048_v32  ;;  %v9685_v51 = vrot.slane %v6956_v47, 9  ;;  %v8413_v11 = vadd.f32 %v15304_v45, %v14935_v7 }
 0x448   : > { %v10534_v37 = vpop.f32.mrb[170].mxu1  ;;  %v10533_v28 = vadd.f32 %v10532_v6, %v10531_v53  ;;  %v7062_v9 = vsel %vm11879_vm13, %v7060_v43, %v7061_v40  ;;  %v8416_v4 = vadd.f32 %v15312_v8, %v14935_v7  ;;  %v16293_v53 = vcombine.low %v16291_v59, %v16292_v2  ;;  %v16298_v2 = vld [vmem:[#allocation74_spill] sm:$0xff] }
 0x449   : > { %v10535_v30 = vpop.f32.mrb[171].mxu1  ;;  %v8421_v14 = vadd.f32 %v10515_v24, %v14935_v7  ;;  %v8424_v43 = vadd.f32 %v15328_v60, %v14935_v7  ;;  %v7059_v45 = vsel %vm11879_vm13, %v9685_v51, %v7058_v18  ;;  %v8432_v47 = vadd.f32 %v10524_v36, %v14935_v7  ;;  %v16295_v18 = vld [vmem:[#allocation90_spill] sm:$0xff] }
 0x44a   : > { %v10649_v16 = vpop.f32.mrb[204].mxu0  ;;  %v15402_v22 = vadd.f32 %v10535_v30, %v10534_v37  ;;  %v8429_v37 = vadd.f32 %v10521_v46, %v14935_v7  ;;  %v9829_v32 = vcombine.low %v7059_v45, %v7062_v9  ;;  %v7074_v24 = vrot.slane %v7072_v55, 4  ;;  %v16296_v46 = vld [vmem:[#allocation63_spill] sm:$0xff] }
 0x44b   : > { %v10650_v17 = vpop.f32.mrb[205].mxu0  ;;  %v7114_v40 = vrot.slane %v16294_v5, 5  ;;  %v9693_v39 = vrot.slane %v6964_v49, 9  ;;  %v8437_v36 = vadd.f32 %v10527_v48, %v14935_v7  ;;  %v16299_v45 = vld [vmem:[#allocation15_spill] sm:$0xff] }
 0x44c   : > { %v10652_v3 = vpop.f32.mrb[206].mxu0  ;;  %10996 = vmatmul.mubr.bf16.gmra.mrb[4].mxu1 %v16293_v53  ;;  %v15412_v29 = vadd.f32 %v10650_v17, %v10649_v16  ;;  %v15429_v17 = vadd.f32 %v16295_v18, %v15340_v13  ;;  %v15439_v53 = vadd.f32 %v16298_v2, %v15355_v27  ;;  %v15450_v48 = vadd.f32 %v16299_v45, %v15359_v21  ;;  %v16300_v27 = vld [vmem:[#allocation78_spill] sm:$0xff] }
 0x44d   : > { %v10653_v6 = vpop.f32.mrb[207].mxu0  ;;  %10999 = vmatprep.mubr.bf16.mxu1 %v9827_v15  ;;  %v15433_v15 = vadd.f32 %v16296_v46, %v15351_v41  ;;  %v7116_v9 = vrot.slane %v7114_v40, 4  ;;  %v15446_v13 = vsel %vm11879_vm13, %v9693_v39, %v7114_v40  ;;  %v15458_v5 = vadd.f32 %v16300_v27, %v15365_v34  ;;  %v16302_v40 = vld [vmem:[#allocation51_spill] sm:$0xff] }
 0x44e   : > { %v10537_v8 = vpop.f32.mrb[172].mxu1  ;;  %v15419_v52 = vadd.f32 %v10653_v6, %v10652_v3  ;;  %v16297_v3 = vld [vmem:[#allocation22_spill] sm:$0xff]  ;;  %v8440_v6 = vadd.f32 %v10530_v1, %v14935_v7  ;;  %v16301_v1 = vld [vmem:[#allocation75_spill] sm:$0xff]  ;;  %v15466_v39 = vadd.f32 %v16302_v40, %v15376_v56  ;;  %v8445_v21 = vadd.f32 %v10533_v28, %v14935_v7 }
 0x44f   : > { %v10538_v30 = vpop.f32.mrb[173].mxu1  ;;  %v7117_v59 = vrot.slane %v16297_v3, 5  ;;  %v16304_v3 = vld [vmem:[#allocation72_spill] sm:$0xff]  ;;  %v15481_v56 = vadd.f32 %v15266_v31, %v8405_v23  ;;  %v15484_v28 = vadd.f32 %v15282_v10, %v8408_v54  ;;  %v15487_v45 = vadd.f32 %v15300_v57, %v8413_v11  ;;  %v11408_v23 = vld [vmem:[#allocation2 + $0x80] sm:$0x1] }
 0x450   : > { %v15425_v16 = vadd.f32 %v10538_v30, %v10537_v8  ;;  %v10540_v60 = vpop.f32.mrb[174].mxu1  ;;  %v15498_v31 = vadd.f32 %v15324_v62, %v8424_v43  ;;  %v15501_v10 = vadd.f32 %v15334_v0, %v8429_v37  ;;  %v7075_v57 = vrot.slane %v11408_v23, 5 }
 0x451   : > { %v10541_v51 = vpop.f32.mrb[175].mxu1  ;;  %v15454_v8 = vsel %vm11879_vm13, %v7116_v9, %v7117_v59  ;;  %v16303_v9 = vld [vmem:[#allocation76_spill] sm:$0xff]  ;;  %v16305_v59 = vld [vmem:[#allocation73_spill] sm:$0xff]  ;;  %v15507_v11 = vadd.f32 %v15368_v61, %v8437_v36  ;;  %v15515_v0 = vadd.f32 %v15391_v33, %v8445_v21 }
 0x452   : > { %v15442_v49 = vadd.f32 %v10541_v51, %v10540_v60  ;;  %v10655_v41 = vpop.f32.mrb[208].mxu0  ;;  %v15462_v60 = vadd.f32 %v16301_v1, %v15372_v50  ;;  %v9837_v18 = vcombine.low %v15446_v13, %v15454_v8  ;;  %v15475_v34 = vadd.f32 %v16303_v9, %v15380_v12  ;;  %v6958_v12 = vld [vmem:[#allocation2 + $0x78] sm:$0xe] }
 0x453   : > { %v10656_v30 = vpop.f32.mrb[209].mxu0  ;;  %v16306_v50 = vcombine.low %v16304_v3, %v16305_v59  ;;  %v15495_v1 = vadd.f32 %v15316_v63, %v8421_v14  ;;  %v8448_v63 = vadd.f32 %v15402_v22, %v14935_v7  ;;  %v9687_v43 = vrot.slane %v6958_v12, 9 }
 0x454   : > { %v15471_v46 = vadd.f32 %v10656_v30, %v10655_v41  ;;  %v10658_v51 = vpop.f32.mrb[210].mxu0  ;;  %v15490_v41 = vadd.f32 %v15308_v42, %v8416_v4  ;;  %v15504_v42 = vadd.f32 %v15347_v38, %v8432_v47  ;;  %v15510_v4 = vadd.f32 %v15385_v58, %v8440_v6  ;;  %v11409_v38 = vld [vmem:[#allocation2 + $0x94] sm:$0xf] }
 0x455   : > { %11000 = vmatmul.mubr.bf16.gmra.mrb[8].mxu1 %v16306_v50  ;;  %v10659_v2 = vpop.f32.mrb[211].mxu0  ;;  %v7076_v37 = vsel %vm11879_vm13, %v7074_v24, %v7075_v57  ;;  %v7073_v58 = vsel %vm11879_vm13, %v9687_v43, %v7072_v55  ;;  %v15528_v21 = vadd.f32 %v15398_v19, %v8448_v63  ;;  %v16307_v24 = vld [vmem:[#allocation45_spill] sm:$0xff]  ;;  %v6960_v50 = vld [vmem:[#allocation2 + $0x90] sm:$0xe]  ;;  %v16310_v63 = vld [vmem:[#allocation86_spill] sm:$0xff] }
 0x456   : > { %11003 = vmatprep.mubr.bf16.mxu1 %v9829_v32  ;;  %v10543_v30 = vpop.f32.mrb[176].mxu1  ;;  %v15492_v27 = vadd.f32 %v10659_v2, %v10658_v51  ;;  %v7086_v32 = vrot.slane %v11409_v38, 5  ;;  %v9831_v6 = vcombine.low %v7073_v58, %v7076_v37  ;;  %v16308_v51 = vld [vmem:[#allocation77_spill] sm:$0xff]  ;;  %v8453_v37 = vadd.f32 %v15425_v16, %v14935_v7 }
 0x457   : > { %v10544_v54 = vpop.f32.mrb[177].mxu1  ;;  %v16309_v9 = vcombine.low %v16307_v24, %v16308_v51  ;;  %v11410_v55 = vld [vmem:[#allocation2 + $0x98] sm:$0x1]  ;;  %v16312_v51 = vld [vmem:[#allocation52_spill] sm:$0xff]  ;;  %v8456_v16 = vadd.f32 %v15442_v49, %v14935_v7 }
 0x458   : > { %v10545_v62 = vadd.f32 %v10544_v54, %v10543_v30  ;;  %v10546_v14 = vpop.f32.mrb[178].mxu1  ;;  %v7088_v3 = vrot.slane %v7086_v32, 4  ;;  %v7089_v12 = vrot.slane %v11410_v55, 5  ;;  %v9689_v54 = vrot.slane %v6960_v50, 9  ;;  %v16311_v24 = vld [vmem:[#allocation69_spill] sm:$0xff] }
 0x459   : > { %v10547_v47 = vpop.f32.mrb[179].mxu1  ;;  %v6962_v50 = vld [vmem:[#allocation2 + $0xa8] sm:$0xe] }
 0x45a   : > { %v15519_v61 = vadd.f32 %v10547_v47, %v10546_v14  ;;  %v10661_v36 = vpop.f32.mrb[212].mxu0  ;;  %v7090_v19 = vsel %vm11879_vm13, %v7088_v3, %v7089_v12  ;;  %v7100_v14 = vrot.slane %v16310_v63, 5  ;;  %v16314_v12 = vld [vmem:[#allocation88_spill] sm:$0xff]  ;;  %v9691_v63 = vrot.slane %v6962_v50, 9 }
 0x45b   : > { %v10662_v22 = vpop.f32.mrb[213].mxu0 }
 0x45c   : > { %v15525_v40 = vadd.f32 %v10662_v22, %v10661_v36  ;;  %v10664_v33 = vpop.f32.mrb[214].mxu0  ;;  %v7087_v36 = vsel %vm11879_vm13, %v9689_v54, %v7086_v32  ;;  %v7102_v3 = vrot.slane %v7100_v14, 4  ;;  %v15556_v32 = vadd.f32 %v15412_v29, %v8453_v37 }
 0x45d   : > { %11004 = vmatmul.mubr.bf16.gmra.mrb[12].mxu1 %v16309_v9  ;;  %v10665_v59 = vpop.f32.mrb[215].mxu0  ;;  %v9833_v22 = vcombine.low %v7087_v36, %v7090_v19  ;;  %v16313_v9 = vcombine.low %v16311_v24, %v16312_v51  ;;  %v7101_v29 = vsel %vm11879_vm13, %v9691_v63, %v7100_v14 }
 0x45e   : > { %11007 = vmatprep.mubr.bf16.mxu1 %v9831_v6  ;;  %v10549_v25 = vpop.f32.mrb[180].mxu1  ;;  %v15533_v2 = vadd.f32 %v10665_v59, %v10664_v33 }
 0x45f   : > { %v10550_v30 = vpop.f32.mrb[181].mxu1 }
 0x460   : > { %v15535_v23 = vadd.f32 %v10550_v30, %v10549_v25  ;;  %v10552_v57 = vpop.f32.mrb[182].mxu1  ;;  %v7103_v30 = vrot.slane %v16314_v12, 5 }
 0x461   : > { %v10553_v43 = vpop.f32.mrb[183].mxu1 }
 0x462   : > { %v15542_v38 = vadd.f32 %v10553_v43, %v10552_v57  ;;  %v10667_v47 = vpop.f32.mrb[216].mxu0  ;;  %v7104_v43 = vsel %vm11879_vm13, %v7102_v3, %v7103_v30 }
 0x463   : > { %v10668_v58 = vpop.f32.mrb[217].mxu0 }
 0x464   : > { %v15546_v6 = vadd.f32 %v10668_v58, %v10667_v47  ;;  %v10670_v33 = vpop.f32.mrb[218].mxu0  ;;  %v15566_v58 = vadd.f32 %v15419_v52, %v8456_v16 }
 0x465   : > { %11008 = vmatmul.mubr.bf16.gmra.mrb[16].mxu1 %v16313_v9  ;;  %v10671_v59 = vpop.f32.mrb[219].mxu0  ;;  %v16315_v9 = vld [vmem:[#allocation59_spill] sm:$0xff] }
 0x466   : > { %11011 = vmatprep.mubr.bf16.mxu1 %v9833_v22  ;;  %v10555_v25 = vpop.f32.mrb[184].mxu1  ;;  %v15553_v55 = vadd.f32 %v10671_v59, %v10670_v33  ;;  %v9835_v22 = vcombine.low %v7101_v29, %v7104_v43  ;;  %v8461_v33 = vadd.f32 %v10545_v62, %v14935_v7  ;;  %v16316_v59 = vld [vmem:[#allocation56_spill] sm:$0xff]  ;;  %v8464_v7 = vadd.f32 %v15581_v44, %v15519_v61  ;;  %v16318_v29 = vld [vmem:[#allocation81_spill] sm:$0xff] }
 0x467   : > { %v10556_v57 = vpop.f32.mrb[185].mxu1  ;;  %v16317_v3 = vcombine.low %v16315_v9, %v16316_v59 }
 0x468   : > { %v15559_v54 = vadd.f32 %v10556_v57, %v10555_v25  ;;  %v10558_v19 = vpop.f32.mrb[186].mxu1  ;;  %v15586_v16 = vadd.f32 %v15471_v46, %v8461_v33 }
 0x469   : > { %v10559_v47 = vpop.f32.mrb[187].mxu1 }
 0x46a   : > { %v15563_v36 = vadd.f32 %v10559_v47, %v10558_v19  ;;  %v10673_v49 = vpop.f32.mrb[220].mxu0 }
 0x46b   : > { %v10674_v37 = vpop.f32.mrb[221].mxu0 }
 0x46c   : > { %v15571_v24 = vadd.f32 %v10674_v37, %v10673_v49  ;;  %v10676_v51 = vpop.f32.mrb[222].mxu0  ;;  %v15591_v49 = vadd.f32 %v15492_v27, %v8464_v7  ;;  %v16319_v37 = vld [vmem:[#allocation85_spill] sm:$0xff] }
 0x46d   : > { %11012 = vmatmul.mubr.bf16.gmra.mrb[20].mxu1 %v16317_v3  ;;  %v10677_v50 = vpop.f32.mrb[223].mxu0  ;;  %v8469_v3 = vadd.f32 %v15581_v44, %v15535_v23 }
 0x46e   : > { %11015 = vmatprep.mubr.bf16.mxu1 %v9835_v22  ;;  %v10561_v25 = vpop.f32.mrb[188].mxu1  ;;  %v15576_v12 = vadd.f32 %v10677_v50, %v10676_v51  ;;  %v16320_v22 = vcombine.low %v16318_v29, %v16319_v37  ;;  %v16321_v50 = vld [vmem:[#allocation87_spill] sm:$0xff] }
 0x46f   : > { %v10562_v52 = vpop.f32.mrb[189].mxu1 }
 0x470   : > { %v10563_v62 = vadd.f32 %v10562_v52, %v10561_v25  ;;  %v10564_v14 = vpop.f32.mrb[190].mxu1 }
 0x471   : > { %v10565_v30 = vpop.f32.mrb[191].mxu1 }
 0x472   : > { %v10566_v57 = vadd.f32 %v10565_v30, %v10564_v14  ;;  %v10807_v19 = vpop.f32.mrb[224].mxu0  ;;  %v16322_v30 = vld [vmem:[#allocation89_spill] sm:$0xff] }
 0x473   : > { %v10808_v63 = vpop.f32.mrb[225].mxu0 }
 0x474   : > { %v15588_v43 = vadd.f32 %v10808_v63, %v10807_v19  ;;  %v10810_v47 = vpop.f32.mrb[226].mxu0  ;;  %v15615_v63 = vadd.f32 %v15525_v40, %v8469_v3 }
 0x475   : > { %11016 = vmatmul.mubr.bf16.gmra.mrb[24].mxu1 %v16320_v22  ;;  %v10811_v61 = vpop.f32.mrb[227].mxu0 }
 0x476   : > { %11019 = vmatprep.mubr.bf16.mxu1 %v9837_v18  ;;  %v10695_v46 = vpop.f32.mrb[192].mxu1  ;;  %v15599_v33 = vadd.f32 %v10811_v61, %v10810_v47  ;;  %v8472_v18 = vadd.f32 %v15581_v44, %v15542_v38  ;;  %v8477_v38 = vadd.f32 %v15581_v44, %v15559_v54 }
 0x477   : > { %v10696_v51 = vpop.f32.mrb[193].mxu1 }
 0x478   : > { %v10697_v9 = vadd.f32 %v10696_v51, %v10695_v46  ;;  %v10698_v59 = vpop.f32.mrb[194].mxu1  ;;  %v15618_v51 = vadd.f32 %v15533_v2, %v8472_v18 }
 0x479   : > { %v10699_v27 = vpop.f32.mrb[195].mxu1 }
 0x47a   : > { %v15604_v25 = vadd.f32 %v10697_v9, %v16321_v50  ;;  %v10700_v52 = vadd.f32 %v10699_v27, %v10698_v59  ;;  %v10813_v7 = vpop.f32.mrb[228].mxu0 }
 0x47b   : > { %v10814_v14 = vpop.f32.mrb[229].mxu0 }
 0x47c   : > { %v15607_v19 = vadd.f32 %v10700_v52, %v16322_v30  ;;  %v10815_v13 = vadd.f32 %v10814_v14, %v10813_v7  ;;  %v10816_v8 = vpop.f32.mrb[230].mxu0  ;;  %v8480_v7 = vadd.f32 %v15581_v44, %v15563_v36  ;;  %v15627_v14 = vadd.f32 %v15546_v6, %v8477_v38 }
 0x47d   : > { %11020 = vmatmul.mubr.bf16.gmra.mrb[28].mxu1 %v9838_v26  ;;  %v10817_v23 = vpop.f32.mrb[231].mxu0  ;;  %v8488_v6 = vadd.f32 %v15581_v44, %v10566_v57 }
 0x47e   : > { %v10701_v47 = vpop.f32.mrb[196].mxu1  ;;  %v10818_v29 = vadd.f32 %v10817_v23, %v10816_v8 }
 0x47f   : > { %v10702_v37 = vpop.f32.mrb[197].mxu1 }
 0x480   : > { %v10703_v22 = vadd.f32 %v10702_v37, %v10701_v47  ;;  %v10704_v61 = vpop.f32.mrb[198].mxu1  ;;  %v15632_v47 = vadd.f32 %v15553_v55, %v8480_v7 }
 0x481   : > { %v10705_v46 = vpop.f32.mrb[199].mxu1 }
 0x482   : > { %v8695_v9 = vadd.f32 %v10703_v22, %v15429_v17  ;;  %v10706_v20 = vadd.f32 %v10705_v46, %v10704_v61  ;;  %v10819_v35 = vpop.f32.mrb[232].mxu0 }
 0x483   : > { %v10820_v26 = vpop.f32.mrb[233].mxu0 }
 0x484   : > { %v8698_v40 = vadd.f32 %v10706_v20, %v15433_v15  ;;  %v10821_v59 = vadd.f32 %v10820_v26, %v10819_v35  ;;  %v10822_v3 = vpop.f32.mrb[234].mxu0  ;;  %v8485_v15 = vadd.f32 %v15581_v44, %v10563_v62  ;;  %v15640_v62 = vadd.f32 %v15576_v12, %v8488_v6 }
 0x485   : > { %v10823_v27 = vpop.f32.mrb[235].mxu0  ;;  %v15643_v7 = vadd.f32 %v10815_v13, %v8695_v9 }
 0x486   : > { %v10824_v50 = vadd.f32 %v10823_v27, %v10822_v3  ;;  %v10707_v52 = vpop.f32.mrb[200].mxu1  ;;  %v15637_v35 = vadd.f32 %v15571_v24, %v8485_v15 }
 0x487   : > { %v10708_v2 = vpop.f32.mrb[201].mxu1 }
 0x488   : > { %v10709_v17 = vadd.f32 %v10708_v2, %v10707_v52  ;;  %v10710_v30 = vpop.f32.mrb[202].mxu1 }
 0x489   : > { %v10711_v8 = vpop.f32.mrb[203].mxu1 }
 0x48a   : > { %v8703_v18 = vadd.f32 %v10709_v17, %v15439_v53  ;;  %v10712_v54 = vadd.f32 %v10711_v8, %v10710_v30  ;;  %v10825_v23 = vpop.f32.mrb[236].mxu0 }
 0x48b   : > { %v10826_v22 = vpop.f32.mrb[237].mxu0 }
 0x48c   : > { %v8706_v37 = vadd.f32 %v10712_v54, %v15450_v48  ;;  %v10827_v36 = vadd.f32 %v10826_v22, %v10825_v23  ;;  %v10828_v61 = vpop.f32.mrb[238].mxu0  ;;  %v15648_v23 = vadd.f32 %v15588_v43, %v15604_v25  ;;  %v15650_v22 = vadd.f32 %v10818_v29, %v8698_v40 }
 0x48d   : > { %v10829_v46 = vpop.f32.mrb[239].mxu0 }
 0x48e   : > { %v10830_v20 = vadd.f32 %v10829_v46, %v10828_v61  ;;  %v15664_v40 = vadd.f32 %v10824_v50, %v8706_v37 }
 0x490   : > { %v10713_v53 = vpop.f32.mrb[204].mxu1 }
 0x491   : > { %v10714_v26 = vpop.f32.mrb[205].mxu1 }
 0x492   : > { %v10715_v38 = vadd.f32 %v10714_v26, %v10713_v53  ;;  %v10716_v55 = vpop.f32.mrb[206].mxu1 }
 0x493   : > { %v10717_v3 = vpop.f32.mrb[207].mxu1 }
 0x494   : > { %v8711_v48 = vadd.f32 %v10715_v38, %v15458_v5  ;;  %v10718_v27 = vadd.f32 %v10717_v3, %v10716_v55  ;;  %v10831_v52 = vpop.f32.mrb[240].mxu0  ;;  %v15660_v55 = vadd.f32 %v10821_v59, %v8703_v18 }
 0x495   : > { %v10832_v2 = vpop.f32.mrb[241].mxu0 }
 0x496   : > { %v8714_v44 = vadd.f32 %v10718_v27, %v15462_v60  ;;  %v10833_v57 = vadd.f32 %v10832_v2, %v10831_v52  ;;  %v10834_v24 = vpop.f32.mrb[242].mxu0  ;;  %v15655_v60 = vadd.f32 %v15599_v33, %v15607_v19  ;;  %v15657_v61 = vadd.f32 %v10827_v36, %v8711_v48 }
 0x497   : > { %v10835_v17 = vpop.f32.mrb[243].mxu0 }
 0x498   : > { %v10719_v30 = vpop.f32.mrb[208].mxu1  ;;  %v10836_v8 = vadd.f32 %v10835_v17, %v10834_v24  ;;  %v15662_v29 = vadd.f32 %v10830_v20, %v8714_v44 }
 0x499   : > { %v10720_v54 = vpop.f32.mrb[209].mxu1 }
 0x49a   : > { %v10721_v12 = vadd.f32 %v10720_v54, %v10719_v30  ;;  %v10722_v15 = vpop.f32.mrb[210].mxu1 }
 0x49b   : > { %v10723_v5 = vpop.f32.mrb[211].mxu1 }
 0x49c   : > { %v8719_v13 = vadd.f32 %v10721_v12, %v15466_v39  ;;  %v10724_v9 = vadd.f32 %v10723_v5, %v10722_v15 }
 0x49e   : > { %v8722_v46 = vadd.f32 %v10724_v9, %v15475_v34  ;;  %v10837_v6 = vpop.f32.mrb[244].mxu0  ;;  %v15670_v59 = vadd.f32 %v10833_v57, %v8719_v13 }
 0x49f   : > { %v10838_v53 = vpop.f32.mrb[245].mxu0 }
 0x4a0   : > { %v10839_v26 = vadd.f32 %v10838_v53, %v10837_v6  ;;  %v10840_v38 = vpop.f32.mrb[246].mxu0  ;;  %v15674_v17 = vadd.f32 %v10836_v8, %v8722_v46 }
 0x4a1   : > { %v10841_v43 = vpop.f32.mrb[247].mxu0 }
 0x4a2   : > { %v10842_v25 = vadd.f32 %v10841_v43, %v10840_v38 }
 0x4a4   : > { %v10725_v39 = vpop.f32.mrb[212].mxu1 }
 0x4a5   : > { %v10726_v3 = vpop.f32.mrb[213].mxu1 }
 0x4a6   : > { %v10727_v33 = vadd.f32 %v10726_v3, %v10725_v39  ;;  %v10728_v19 = vpop.f32.mrb[214].mxu1 }
 0x4a7   : > { %v10729_v36 = vpop.f32.mrb[215].mxu1 }
 0x4a8   : > { %v8727_v48 = vadd.f32 %v10727_v33, %v15481_v56  ;;  %v10730_v34 = vadd.f32 %v10729_v36, %v10728_v19 }
 0x4a9   : > { %v10843_v27 = vpop.f32.mrb[248].mxu0 }
 0x4aa   : > { %v8730_v52 = vadd.f32 %v10730_v34, %v15484_v28  ;;  %v10844_v2 = vpop.f32.mrb[249].mxu0  ;;  %v15668_v24 = vadd.f32 %v10839_v26, %v8727_v48 }
 0x4ab   : > { %v10845_v18 = vadd.f32 %v10844_v2, %v10843_v27  ;;  %v10846_v20 = vpop.f32.mrb[250].mxu0 }
 0x4ac   : > { %v10847_v50 = vpop.f32.mrb[251].mxu0  ;;  %v15672_v37 = vadd.f32 %v10842_v25, %v8730_v52 }
 0x4ad   : > { %v10731_v44 = vpop.f32.mrb[216].mxu1  ;;  %v10848_v54 = vadd.f32 %v10847_v50, %v10846_v20 }
 0x4ae   : > { %v10732_v30 = vpop.f32.mrb[217].mxu1 }
 0x4af   : > { %v10733_v56 = vadd.f32 %v10732_v30, %v10731_v44  ;;  %v10734_v12 = vpop.f32.mrb[218].mxu1 }
 0x4b0   : > { %v10735_v15 = vpop.f32.mrb[219].mxu1 }
 0x4b1   : > { %v8735_v28 = vadd.f32 %v10733_v56, %v15487_v45  ;;  %v10736_v5 = vadd.f32 %v10735_v15, %v10734_v12  ;;  %v10849_v9 = vpop.f32.mrb[252].mxu0 }
 0x4b2   : > { %v10850_v13 = vpop.f32.mrb[253].mxu0 }
 0x4b3   : > { %v8738_v57 = vadd.f32 %v10736_v5, %v15490_v41  ;;  %v15678_v6 = vadd.f32 %v10845_v18, %v8735_v28  ;;  %v10851_v53 = vadd.f32 %v10850_v13, %v10849_v9  ;;  %v10852_v26 = vpop.f32.mrb[254].mxu0 }
 0x4b4   : > { %v10853_v38 = vpop.f32.mrb[255].mxu0 }
 0x4b5   : > { %v15680_v43 = vadd.f32 %v10848_v54, %v8738_v57  ;;  %v10854_v8 = vadd.f32 %v10853_v38, %v10852_v26 }
 0x4b9   : > { %v10737_v46 = vpop.f32.mrb[220].mxu1 }
 0x4ba   : > { %v10738_v25 = vpop.f32.mrb[221].mxu1 }
 0x4bb   : > { %v10739_v39 = vadd.f32 %v10738_v25, %v10737_v46  ;;  %v10740_v3 = vpop.f32.mrb[222].mxu1 }
 0x4bc   : > { %v10741_v33 = vpop.f32.mrb[223].mxu1 }
 0x4bd   : > { %v8743_v45 = vadd.f32 %v10739_v39, %v15495_v1  ;;  %v10742_v19 = vadd.f32 %v10741_v33, %v10740_v3  ;;  %v10855_v41 = vpop.f32.mrb[0].mxu0 }
 0x4be   : > { %v10856_v34 = vpop.f32.mrb[1].mxu0 }
 0x4bf   : > { %v8746_v36 = vadd.f32 %v10742_v19, %v15498_v31  ;;  %v15684_v48 = vadd.f32 %v10851_v53, %v8743_v45  ;;  %v10857_v27 = vadd.f32 %v10856_v34, %v10855_v41  ;;  %v10858_v52 = vpop.f32.mrb[2].mxu0 }
 0x4c0   : > { %v10859_v18 = vpop.f32.mrb[3].mxu0 }
 0x4c1   : > { %v15686_v2 = vadd.f32 %v10854_v8, %v8746_v36  ;;  %v10860_v44 = vadd.f32 %v10859_v18, %v10858_v52 }
 0x4c2   : > { %v10743_v20 = vpop.f32.mrb[224].mxu1 }
 0x4c3   : > { %v10744_v50 = vpop.f32.mrb[225].mxu1 }
 0x4c4   : > { %v10745_v30 = vadd.f32 %v10744_v50, %v10743_v20  ;;  %v10746_v54 = vpop.f32.mrb[226].mxu1 }
 0x4c5   : > { %v10747_v56 = vpop.f32.mrb[227].mxu1 }
 0x4c6   : > { %v8751_v1 = vadd.f32 %v10745_v30, %v15501_v10  ;;  %v10748_v12 = vadd.f32 %v10747_v56, %v10746_v54 }
 0x4c7   : > { %v10861_v15 = vpop.f32.mrb[4].mxu0 }
 0x4c8   : > { %v8754_v31 = vadd.f32 %v10748_v12, %v15504_v42  ;;  %v15690_v28 = vadd.f32 %v10857_v27, %v8751_v1  ;;  %v10862_v5 = vpop.f32.mrb[5].mxu0 }
 0x4c9   : > { %v10863_v9 = vadd.f32 %v10862_v5, %v10861_v15  ;;  %v10864_v57 = vpop.f32.mrb[6].mxu0 }
 0x4ca   : > { %v15692_v13 = vadd.f32 %v10860_v44, %v8754_v31  ;;  %v10865_v53 = vpop.f32.mrb[7].mxu0 }
 0x4cb   : > { %v10866_v38 = vadd.f32 %v10865_v53, %v10864_v57 }
 0x4cd   : > { %v10749_v26 = vpop.f32.mrb[228].mxu1 }
 0x4ce   : > { %v10750_v8 = vpop.f32.mrb[229].mxu1 }
 0x4cf   : > { %v10751_v46 = vadd.f32 %v10750_v8, %v10749_v26  ;;  %v10752_v25 = vpop.f32.mrb[230].mxu1 }
 0x4d0   : > { %v10753_v39 = vpop.f32.mrb[231].mxu1 }
 0x4d1   : > { %v8759_v10 = vadd.f32 %v10751_v46, %v15507_v11  ;;  %v10754_v3 = vadd.f32 %v10753_v39, %v10752_v25 }
 0x4d2   : > { %v10867_v45 = vpop.f32.mrb[8].mxu0 }
 0x4d3   : > { %v8762_v42 = vadd.f32 %v10754_v3, %v15510_v4  ;;  %v15696_v33 = vadd.f32 %v10863_v9, %v8759_v10  ;;  %v10868_v19 = vpop.f32.mrb[9].mxu0 }
 0x4d4   : > { %v10869_v41 = vadd.f32 %v10868_v19, %v10867_v45  ;;  %v10870_v34 = vpop.f32.mrb[10].mxu0 }
 0x4d5   : > { %v15698_v36 = vadd.f32 %v10866_v38, %v8762_v42  ;;  %v10871_v52 = vpop.f32.mrb[11].mxu0 }
 0x4d6   : > { %v10755_v27 = vpop.f32.mrb[232].mxu1  ;;  %v10872_v20 = vadd.f32 %v10871_v52, %v10870_v34 }
 0x4d7   : > { %v10756_v18 = vpop.f32.mrb[233].mxu1 }
 0x4d8   : > { %v10757_v44 = vadd.f32 %v10756_v18, %v10755_v27  ;;  %v10758_v50 = vpop.f32.mrb[234].mxu1 }
 0x4d9   : > { %v10759_v30 = vpop.f32.mrb[235].mxu1 }
 0x4da   : > { %v8767_v11 = vadd.f32 %v10757_v44, %v15515_v0  ;;  %v10760_v54 = vadd.f32 %v10759_v30, %v10758_v50 }
 0x4db   : > { %v10873_v56 = vpop.f32.mrb[12].mxu0 }
 0x4dc   : > { %v8770_v4 = vadd.f32 %v10760_v54, %v15528_v21  ;;  %v10874_v1 = vpop.f32.mrb[13].mxu0  ;;  %v15702_v12 = vadd.f32 %v10869_v41, %v8767_v11 }
 0x4dd   : > { %v10875_v31 = vadd.f32 %v10874_v1, %v10873_v56  ;;  %v10876_v15 = vpop.f32.mrb[14].mxu0 }
 0x4de   : > { %v10877_v5 = vpop.f32.mrb[15].mxu0  ;;  %v15704_v9 = vadd.f32 %v10872_v20, %v8770_v4 }
 0x4df   : > { %v10878_v57 = vadd.f32 %v10877_v5, %v10876_v15 }
 0x4e4   : > { %v10761_v53 = vpop.f32.mrb[236].mxu1 }
 0x4e5   : > { %v10762_v26 = vpop.f32.mrb[237].mxu1 }
 0x4e6   : > { %v10763_v38 = vadd.f32 %v10762_v26, %v10761_v53  ;;  %v10764_v8 = vpop.f32.mrb[238].mxu1 }
 0x4e7   : > { %v10765_v46 = vpop.f32.mrb[239].mxu1 }
 0x4e8   : > { %v8775_v0 = vadd.f32 %v10763_v38, %v15556_v32  ;;  %v10766_v25 = vadd.f32 %v10765_v46, %v10764_v8  ;;  %v10879_v39 = vpop.f32.mrb[16].mxu0 }
 0x4e9   : > { %v10880_v10 = vpop.f32.mrb[17].mxu0 }
 0x4ea   : > { %v8778_v21 = vadd.f32 %v10766_v25, %v15566_v58  ;;  %v10881_v3 = vadd.f32 %v10880_v10, %v10879_v39  ;;  %v10882_v42 = vpop.f32.mrb[18].mxu0  ;;  %v15708_v45 = vadd.f32 %v10875_v31, %v8775_v0 }
 0x4eb   : > { %v10883_v19 = vpop.f32.mrb[19].mxu0 }
 0x4ec   : > { %v10884_v41 = vadd.f32 %v10883_v19, %v10882_v42  ;;  %v15710_v34 = vadd.f32 %v10878_v57, %v8778_v21 }
 0x4ef   : > { %v10767_v27 = vpop.f32.mrb[240].mxu1 }
 0x4f0   : > { %v10768_v52 = vpop.f32.mrb[241].mxu1 }
 0x4f1   : > { %v10769_v18 = vadd.f32 %v10768_v52, %v10767_v27  ;;  %v10770_v20 = vpop.f32.mrb[242].mxu1 }
 0x4f2   : > { %v10771_v44 = vpop.f32.mrb[243].mxu1 }
 0x4f3   : > { %v8783_v32 = vadd.f32 %v10769_v18, %v15586_v16  ;;  %v10772_v50 = vadd.f32 %v10771_v44, %v10770_v20  ;;  %v10885_v30 = vpop.f32.mrb[20].mxu0 }
 0x4f4   : > { %v10886_v11 = vpop.f32.mrb[21].mxu0 }
 0x4f5   : > { %v8786_v58 = vadd.f32 %v10772_v50, %v15591_v49  ;;  %v10887_v54 = vadd.f32 %v10886_v11, %v10885_v30  ;;  %v10888_v56 = vpop.f32.mrb[22].mxu0  ;;  %v15714_v4 = vadd.f32 %v10881_v3, %v8783_v32 }
 0x4f6   : > { %v10889_v1 = vpop.f32.mrb[23].mxu0 }
 0x4f7   : > { %v10890_v31 = vadd.f32 %v10889_v1, %v10888_v56  ;;  %v15716_v15 = vadd.f32 %v10884_v41, %v8786_v58 }
 0x4fb   : > { %v10773_v5 = vpop.f32.mrb[244].mxu1 }
 0x4fc   : > { %v10774_v57 = vpop.f32.mrb[245].mxu1 }
 0x4fd   : > { %v10775_v53 = vadd.f32 %v10774_v57, %v10773_v5  ;;  %v10776_v26 = vpop.f32.mrb[246].mxu1 }
 0x4fe   : > { %v10777_v38 = vpop.f32.mrb[247].mxu1 }
 0x4ff   : > { %v8791_v16 = vadd.f32 %v10775_v53, %v15615_v63  ;;  %v10778_v8 = vadd.f32 %v10777_v38, %v10776_v26 }
 0x500   : > { %v10891_v46 = vpop.f32.mrb[24].mxu0 }
 0x501   : > { %v8794_v0 = vadd.f32 %v10778_v8, %v15618_v51  ;;  %v10892_v49 = vpop.f32.mrb[25].mxu0  ;;  %v15720_v25 = vadd.f32 %v10887_v54, %v8791_v16 }
 0x502   : > { %v10893_v39 = vadd.f32 %v10892_v49, %v10891_v46  ;;  %v10894_v10 = vpop.f32.mrb[26].mxu0 }
 0x503   : > { %v10895_v21 = vpop.f32.mrb[27].mxu0  ;;  %v15722_v3 = vadd.f32 %v10890_v31, %v8794_v0 }
 0x504   : > { %v10896_v42 = vadd.f32 %v10895_v21, %v10894_v10 }
 0x507   : > { %v10779_v19 = vpop.f32.mrb[248].mxu1 }
 0x508   : > { %v10780_v41 = vpop.f32.mrb[249].mxu1 }
 0x509   : > { %v10781_v27 = vadd.f32 %v10780_v41, %v10779_v19  ;;  %v10782_v52 = vpop.f32.mrb[250].mxu1  ;;  %v16324_v19 = vld [vmem:[#allocation13_spill] sm:$0xff] }
 0x50a   : > { %v10783_v18 = vpop.f32.mrb[251].mxu1 }
 0x50b   : > { %v8799_v63 = vadd.f32 %v10781_v27, %v15627_v14  ;;  %v10784_v20 = vadd.f32 %v10783_v18, %v10782_v52  ;;  %v16326_v27 = vld [vmem:[#allocation14_spill] sm:$0xff] }
 0x50d   : > { %v8802_v44 = vadd.f32 %v10784_v20, %v15632_v47  ;;  %v15726_v51 = vadd.f32 %v10893_v39, %v8799_v63  ;;  %v16323_v39 = vld [vmem:[#allocation16_spill] sm:$0xff] }
 0x50f   : > { %v10785_v32 = vpop.f32.mrb[252].mxu1  ;;  %v15728_v50 = vadd.f32 %v10896_v42, %v8802_v44  ;;  %v16327_v44 = vld [vmem:[#allocation23_spill] sm:$0xff] }
 0x510   : > { %v10786_v30 = vpop.f32.mrb[253].mxu1 }
 0x511   : > { %v10787_v11 = vadd.f32 %v10786_v30, %v10785_v32  ;;  %v10788_v58 = vpop.f32.mrb[254].mxu1  ;;  %v10897_v54 = vpop.f32.mrb[28].mxu0 }
 0x512   : > { %v10789_v56 = vpop.f32.mrb[255].mxu1  ;;  %v10898_v5 = vpop.f32.mrb[29].mxu0 }
 0x513   : > { %v8807_v1 = vadd.f32 %v10787_v11, %v15637_v35  ;;  %v10790_v31 = vadd.f32 %v10789_v56, %v10788_v58  ;;  %v10899_v57 = vadd.f32 %v10898_v5, %v10897_v54  ;;  %v10900_v53 = vpop.f32.mrb[30].mxu0  ;;  %v16328_v58 = vld [vmem:[#allocation20_spill] sm:$0xff]  ;;  %v16330_v5 = vld [vmem:[#allocation21_spill] sm:$0xff] }
 0x514   : > { %v10901_v47 = vpop.f32.mrb[31].mxu0 }
 0x515   : > { %v8810_v14 = vadd.f32 %v10790_v31, %v15640_v62  ;;  %v10902_v26 = vadd.f32 %v10901_v47, %v10900_v53  ;;  %v15732_v38 = vadd.f32 %v10899_v57, %v8807_v1  ;;  %v16329_v1 = vld [vmem:[#allocation24_spill] sm:$0xff] }
 0x517   : > { %v10993_v16 = vpop.f32.mrb[0].mxu1  ;;  %v15735_v0 = vadd.f32 %v10902_v26, %v8810_v14 }
 0x518   : > { %v9017_v8 = vadd.f32 %v10993_v16, %v15643_v7  ;;  %v9008_v46 = vpop.f32.mrb[1].mxu1  ;;  %v16325_v7 = vld [vmem:[#allocation17_spill] sm:$0xff] }
 0x519   : > { %v9009_v49 = vadd.f32 %v9008_v46, %v15648_v23  ;;  %v10994_v35 = vpop.f32.mrb[2].mxu1 }
 0x51a   : > { %v9137_v10 = vadd.f32 %v9017_v8, %v16323_v39  ;;  %v9020_v21 = vadd.f32 %v10994_v35, %v15650_v22  ;;  %v9011_v42 = vpop.f32.mrb[3].mxu1  ;;  %v16332_v8 = vld [vmem:[#allocation25_spill] sm:$0xff]  ;;  %v16333_v35 = vld [vmem:[#allocation28_spill] sm:$0xff] }
 0x51b   : > { %v9135_v62 = vadd.f32 %v9009_v49, %v16324_v19  ;;  %v9012_v41 = vadd.f32 %v9011_v42, %v15655_v60 }
 0x51c   : > { %9169 = vst [vmem:[%s15744_s24 + $0x10] sm:$0xff] %v9137_v10  ;;  %v9138_v23 = vadd.f32 %v9020_v21, %v16325_v7  ;;  %v16334_v10 = vld [vmem:[#allocation26_spill] sm:$0xff] }
 0x51d   : > { %9167 = vst [vmem:[%s15744_s24] sm:$0xff] %v9135_v62  ;;  %v9136_v22 = vadd.f32 %v9012_v41, %v16326_v27 }
 0x51e   : > { %9170 = vst [vmem:[%s15744_s24 + $0x18] sm:$0xff] %v9138_v23  ;;  %v16336_v23 = vld [vmem:[#allocation29_spill] sm:$0xff] }
 0x51f   : > { %9168 = vst [vmem:[%s15744_s24 + $0x8] sm:$0xff] %v9136_v22  ;;  %v10997_v60 = vpop.f32.mrb[4].mxu1 }
 0x520   : > { %v9033_v52 = vadd.f32 %v10997_v60, %v15657_v61  ;;  %v9024_v18 = vpop.f32.mrb[5].mxu1  ;;  %v16337_v60 = vld [vmem:[#allocation32_spill] sm:$0xff] }
 0x521   : > { %v9025_v63 = vadd.f32 %v9024_v18, %v15660_v55  ;;  %v10998_v20 = vpop.f32.mrb[6].mxu1  ;;  %v16338_v18 = vld [vmem:[#allocation30_spill] sm:$0xff] }
 0x522   : > { %v9141_v32 = vadd.f32 %v9033_v52, %v16327_v44  ;;  %v9036_v30 = vadd.f32 %v10998_v20, %v15662_v29  ;;  %v9027_v11 = vpop.f32.mrb[7].mxu1 }
 0x523   : > { %v9139_v54 = vadd.f32 %v9025_v63, %v16328_v58  ;;  %v9028_v56 = vadd.f32 %v9027_v11, %v15664_v40  ;;  %v16331_v40 = vld [vmem:[#allocation27_spill] sm:$0xff]  ;;  %v16340_v58 = vld [vmem:[#allocation33_spill] sm:$0xff] }
 0x524   : > { %9173 = vst [vmem:[%s15744_s24 + $0x30] sm:$0xff] %v9141_v32  ;;  %v9142_v31 = vadd.f32 %v9036_v30, %v16329_v1  ;;  %v16341_v1 = vld [vmem:[#allocation36_spill] sm:$0xff] }
 0x525   : > { %9171 = vst [vmem:[%s15744_s24 + $0x20] sm:$0xff] %v9139_v54  ;;  %v9140_v61 = vadd.f32 %v9028_v56, %v16330_v5  ;;  %v16342_v5 = vld [vmem:[#allocation34_spill] sm:$0xff] }
 0x526   : > { %9174 = vst [vmem:[%s15744_s24 + $0x38] sm:$0xff] %v9142_v31 }
 0x527   : > { %9172 = vst [vmem:[%s15744_s24 + $0x28] sm:$0xff] %v9140_v61 }
 0x528   : > { %v11001_v55 = vpop.f32.mrb[8].mxu1 }
 0x529   : > { %v9049_v29 = vadd.f32 %v11001_v55, %v15668_v24  ;;  %v9040_v57 = vpop.f32.mrb[9].mxu1 }
 0x52a   : > { %v9041_v53 = vadd.f32 %v9040_v57, %v15670_v59  ;;  %v11002_v14 = vpop.f32.mrb[10].mxu1 }
 0x52b   : > { %v9145_v47 = vadd.f32 %v9049_v29, %v16331_v40  ;;  %v9052_v26 = vadd.f32 %v11002_v14, %v15672_v37  ;;  %v9043_v16 = vpop.f32.mrb[11].mxu1  ;;  %v16344_v40 = vld [vmem:[#allocation37_spill] sm:$0xff] }
 0x52c   : > { %v9143_v46 = vadd.f32 %v9041_v53, %v16332_v8  ;;  %v9044_v49 = vadd.f32 %v9043_v16, %v15674_v17  ;;  %v16335_v17 = vld [vmem:[#allocation31_spill] sm:$0xff]  ;;  %v16345_v16 = vld [vmem:[#allocation40_spill] sm:$0xff] }
 0x52d   : > { %9177 = vst [vmem:[%s15744_s24 + $0x50] sm:$0xff] %v9145_v47  ;;  %v9146_v39 = vadd.f32 %v9052_v26, %v16333_v35 }
 0x52e   : > { %9175 = vst [vmem:[%s15744_s24 + $0x40] sm:$0xff] %v9143_v46  ;;  %v9144_v24 = vadd.f32 %v9044_v49, %v16334_v10  ;;  %v16346_v46 = vld [vmem:[#allocation38_spill] sm:$0xff] }
 0x52f   : > { %9178 = vst [vmem:[%s15744_s24 + $0x58] sm:$0xff] %v9146_v39 }
 0x530   : > { %9176 = vst [vmem:[%s15744_s24 + $0x48] sm:$0xff] %v9144_v24  ;;  %v11005_v59 = vpop.f32.mrb[12].mxu1 }
 0x531   : > { %v9065_v37 = vadd.f32 %v11005_v59, %v15684_v48  ;;  %v9056_v21 = vpop.f32.mrb[13].mxu1 }
 0x532   : > { %v9057_v42 = vadd.f32 %v9056_v21, %v15678_v6  ;;  %v11006_v19 = vpop.f32.mrb[14].mxu1 }
 0x533   : > { %v9149_v62 = vadd.f32 %v9065_v37, %v16335_v17  ;;  %v9068_v41 = vadd.f32 %v11006_v19, %v15686_v2  ;;  %v9059_v7 = vpop.f32.mrb[15].mxu1  ;;  %v16348_v37 = vld [vmem:[#allocation41_spill] sm:$0xff]  ;;  %v16349_v19 = vld [vmem:[#allocation44_spill] sm:$0xff] }
 0x534   : > { %v9147_v27 = vadd.f32 %v9057_v42, %v16336_v23  ;;  %v9060_v22 = vadd.f32 %v9059_v7, %v15680_v43  ;;  %v16339_v43 = vld [vmem:[#allocation35_spill] sm:$0xff] }
 0x535   : > { %9181 = vst [vmem:[%s15744_s24 + $0x70] sm:$0xff] %v9149_v62  ;;  %v9150_v52 = vadd.f32 %v9068_v41, %v16337_v60 }
 0x536   : > { %9179 = vst [vmem:[%s15744_s24 + $0x60] sm:$0xff] %v9147_v27  ;;  %v9148_v48 = vadd.f32 %v9060_v22, %v16338_v18 }
 0x537   : > { %9182 = vst [vmem:[%s15744_s24 + $0x78] sm:$0xff] %v9150_v52  ;;  %v16352_v52 = vld [vmem:[#allocation46_spill] sm:$0xff] }
 0x538   : > { %9180 = vst [vmem:[%s15744_s24 + $0x68] sm:$0xff] %v9148_v48  ;;  %v11009_v6 = vpop.f32.mrb[16].mxu1 }
 0x539   : > { %v9081_v2 = vadd.f32 %v11009_v6, %v15696_v33  ;;  %v9072_v63 = vpop.f32.mrb[17].mxu1 }
 0x53a   : > { %v9073_v20 = vadd.f32 %v9072_v63, %v15690_v28  ;;  %v11010_v44 = vpop.f32.mrb[18].mxu1 }
 0x53b   : > { %v9153_v32 = vadd.f32 %v9081_v2, %v16339_v43  ;;  %v9084_v30 = vadd.f32 %v11010_v44, %v15698_v36  ;;  %v9075_v11 = vpop.f32.mrb[19].mxu1 }
 0x53c   : > { %v9151_v54 = vadd.f32 %v9073_v20, %v16340_v58  ;;  %v9076_v56 = vadd.f32 %v9075_v11, %v15692_v13  ;;  %v16343_v13 = vld [vmem:[#allocation39_spill] sm:$0xff] }
 0x53d   : > { %9185 = vst [vmem:[%s15744_s24 + $0x90] sm:$0xff] %v9153_v32  ;;  %v9154_v31 = vadd.f32 %v9084_v30, %v16341_v1 }
 0x53e   : > { %9183 = vst [vmem:[%s15744_s24 + $0x80] sm:$0xff] %v9151_v54  ;;  %v9152_v33 = vadd.f32 %v9076_v56, %v16342_v5 }
 0x53f   : > { %9186 = vst [vmem:[%s15744_s24 + $0x98] sm:$0xff] %v9154_v31 }
 0x540   : > { %9184 = vst [vmem:[%s15744_s24 + $0x88] sm:$0xff] %v9152_v33  ;;  %v11013_v28 = vpop.f32.mrb[20].mxu1 }
 0x541   : > { %v9097_v36 = vadd.f32 %v11013_v28, %v15708_v45  ;;  %v9088_v61 = vpop.f32.mrb[21].mxu1 }
 0x542   : > { %v9089_v55 = vadd.f32 %v9088_v61, %v15702_v12  ;;  %v11014_v29 = vpop.f32.mrb[22].mxu1 }
 0x543   : > { %v9157_v57 = vadd.f32 %v9097_v36, %v16343_v13  ;;  %v9100_v53 = vadd.f32 %v11014_v29, %v15710_v34  ;;  %v9091_v14 = vpop.f32.mrb[23].mxu1 }
 0x544   : > { %v9155_v47 = vadd.f32 %v9089_v55, %v16344_v40  ;;  %v9092_v26 = vadd.f32 %v9091_v14, %v15704_v9  ;;  %v16347_v9 = vld [vmem:[#allocation43_spill] sm:$0xff] }
 0x545   : > { %9189 = vst [vmem:[%s15744_s24 + $0xb0] sm:$0xff] %v9157_v57  ;;  %v9158_v8 = vadd.f32 %v9100_v53, %v16345_v16 }
 0x546   : > { %9187 = vst [vmem:[%s15744_s24 + $0xa0] sm:$0xff] %v9155_v47  ;;  %v9156_v45 = vadd.f32 %v9092_v26, %v16346_v46 }
 0x547   : > { %9190 = vst [vmem:[%s15744_s24 + $0xb8] sm:$0xff] %v9158_v8 }
 0x548   : > { %9188 = vst [vmem:[%s15744_s24 + $0xa8] sm:$0xff] %v9156_v45  ;;  %v11017_v12 = vpop.f32.mrb[24].mxu1 }
 0x549   : > { %v9113_v34 = vadd.f32 %v11017_v12, %v15720_v25  ;;  %v9104_v49 = vpop.f32.mrb[25].mxu1  ;;  %v16350_v25 = vld [vmem:[#allocation42_spill] sm:$0xff] }
 0x54a   : > { %v9105_v35 = vadd.f32 %v9104_v49, %v15714_v4  ;;  %v11018_v39 = vpop.f32.mrb[26].mxu1 }
 0x54b   : > { %v9161_v10 = vadd.f32 %v9113_v34, %v16347_v9  ;;  %v9116_v24 = vadd.f32 %v11018_v39, %v15722_v3  ;;  %v9107_v59 = vpop.f32.mrb[27].mxu1 }
 0x54c   : > { %v9159_v21 = vadd.f32 %v9105_v35, %v16348_v37  ;;  %v9108_v42 = vadd.f32 %v9107_v59, %v15716_v15  ;;  %v16351_v15 = vld [vmem:[#allocation48_spill] sm:$0xff] }
 0x54d   : > { %9193 = vst [vmem:[%s15744_s24 + $0xd0] sm:$0xff] %v9161_v10  ;;  %v9162_v17 = vadd.f32 %v9116_v24, %v16349_v19 }
 0x54e   : > { %9191 = vst [vmem:[%s15744_s24 + $0xc0] sm:$0xff] %v9159_v21  ;;  %v9160_v62 = vadd.f32 %v9108_v42, %v16350_v25 }
 0x54f   : > { %9194 = vst [vmem:[%s15744_s24 + $0xd8] sm:$0xff] %v9162_v17 }
 0x550   : > { %9192 = vst [vmem:[%s15744_s24 + $0xc8] sm:$0xff] %v9160_v62  ;;  %v11021_v4 = vpop.f32.mrb[28].mxu1 }
 0x551   : > { %v9129_v41 = vadd.f32 %v11021_v4, %v15732_v38  ;;  %v9120_v3 = vpop.f32.mrb[29].mxu1  ;;  %v16353_v38 = vld [vmem:[#allocation49_spill] sm:$0xff] }
 0x552   : > { %v9121_v7 = vadd.f32 %v9120_v3, %v15726_v51  ;;  %v11022_v23 = vpop.f32.mrb[30].mxu1  ;;  %v16354_v51 = vld [vmem:[#allocation47_spill] sm:$0xff] }
 0x553   : > { %v9165_v27 = vadd.f32 %v9129_v41, %v16351_v15  ;;  %v9132_v22 = vadd.f32 %v11022_v23, %v15735_v0  ;;  %v9123_v60 = vpop.f32.mrb[31].mxu1 }
 0x554   : > { %v9163_v18 = vadd.f32 %v9121_v7, %v16352_v52  ;;  %v9124_v48 = vadd.f32 %v9123_v60, %v15728_v50 }
 0x555   : > { %9197 = vst [vmem:[%s15744_s24 + $0xf0] sm:$0xff] %v9165_v27  ;;  %v9166_v6 = vadd.f32 %v9132_v22, %v16353_v38 }
 0x556   : > { %9195 = vst [vmem:[%s15744_s24 + $0xe0] sm:$0xff] %v9163_v18  ;;  %v9164_v0 = vadd.f32 %v9124_v48, %v16354_v51 }
 0x557   : > { %9198 = vst [vmem:[%s15744_s24 + $0xf8] sm:$0xff] %v9166_v6 }
 0x558   : > { %9196 = vst [vmem:[%s15744_s24 + $0xe8] sm:$0xff] %v9164_v0 }
 0x559   : > { %11511 = shalt.err (!%p11508_p2)
}
 0x55a   : > { %s11512_s21 = scalar_lea.hbm %s15837_s29, 4096  ;;  %s11516_s30 = scalar_lea.hbm %s15891_s4, 8192 }
 0x55b   : > { %p11513_p13 = scmp.ne.s32.totalorder %s15837_s29, %s11512_s21  ;;  %p11517_p4 = scmp.lt.u32.totalorder %s15837_s29, %s15891_s4 }
 0x55c   : > { %p11518_p5 = scmp.lt.u32.totalorder %s11516_s30, %s11512_s21  ;;  %p11520_p11 = scmp.lt.u32.totalorder %s11512_s21, %s15837_s29 }
 0x55d   : > { %p11514_p6 = pnand %p11513_p13, %p16355_p0 }
 0x55e   : > { %p11519_p8 = por %p11518_p5, %p11517_p4 }
 0x55f   : > { %p11515_p10 = pneg %p11514_p6 }
 0x560   : > { %p11521_p1 = por %p11520_p11, %p11519_p8 }
 0x562   : > { %p11522_p3 = pnand %p11521_p1, %p11515_p10 }
 0x564   : > { %11525 = shalt.err (!%p11522_p3)
}
 0x565   : > { %s11579_s24 = smov 128   ;;  %s11580_s20 = smov 8  }
 0x566   : > { %11033 = dma.vmem_to_hbm [thread:$0]  (%p16355_p0), %s15839_s28, 4096, %s15837_s29, %s9200_s19, %s11579_s24, %s11579_s24, %s11580_s20  }
 0x567 PF: > { %s9228_s11 = sand.u32 1, %s11556_s15   ;;  %p16356_p7 = scmp.ne.s32.totalorder %s15971_s22, 0 }
 0x568   : > { %p16357_p9 = scmp.ge.s32.totalorder %s11568_s18, 2  ;;  %s9229_s12 = scalar_lea.sflag [#allocation5], %s9228_s11 }
 0x56a   : > { %p11047_p12 = pnand %p16357_p9, %p16356_p7 }
 0x56c   : > { %11551 = dma.done.wait (!%p11047_p12), %s9229_s12, 4096  }
 0x56d   : > { %11553 = vsyncadd (!%p11047_p12), %s9229_s12, 4294963200  ;;  %p18_p2 = scmp.ge.s32.totalorder %s11716_s9, 4   ;;  %s16358_s15 = smov %s11560_s16 }
 0x56e   : > { %s16359_s16 = smov %s11564_s17  ;;  %s16360_s17 = smov %s11732_s14 }
 0x56f   : > { %s16361_s18 = smov %s11716_s9  ;;  %20 = sbr.rel (!%p18_p2) target bundleno = 6 (0x6), region = 91 }
 0x576   :  { %9234 = vsyncpa [#allocation4], 1 }
 0x577   :  { %9236 = vsyncpa [#allocation4 + $0x1], 1 }
 0x578   :  { %9237 = vsyncpa [#allocation7], 1 }
 0x579   :  { %9238 = vsyncpa [#allocation5], 1 }
 0x57a   :  { %9240 = vsyncpa [#allocation5 + $0x1], 1 }

</bundles_post_ra>
